<compile_context>
chip_gen: v5e
topology: v5e:2x2
jax: 0.10.0
libtpu: 0.0.40
codegen_flags: <defaults>
</compile_context>

<pallas_src>
import functools

import jax
import jax.numpy as jnp
from jax.experimental import pallas as pl
from jax.experimental.pallas import tpu as pltpu


# Tile configurations.
TM_CONV, TN_CONV, TK_CONV = 128, 128, 256
TM_FC, TN_FC, TK_FC = 16, 512, 512
LANE = 128


def _round_up(x, m):
    return ((x + m - 1) // m) * m


# ---------------------------------------------------------------------------
# Pallas kernel: tiled matmul with fused bias + optional ReLU.
# Operands are bf16, accumulation is f32 in a VMEM scratch; K = grid axis 2.
# ---------------------------------------------------------------------------
def _matmul_bias_act_kernel(a_ref, b_ref, bias_ref, o_ref, acc_ref, *, relu):
    @pl.when(pl.program_id(2) == 0)
    def _():
        acc_ref[...] = jnp.zeros_like(acc_ref)

    acc_ref[...] += jnp.dot(a_ref[...], b_ref[...],
                            preferred_element_type=jnp.float32)

    @pl.when(pl.program_id(2) == pl.num_programs(2) - 1)
    def _():
        out = acc_ref[...] + bias_ref[...]
        if relu:
            out = jnp.maximum(out, 0.0)
        o_ref[...] = out.astype(o_ref.dtype)


def matmul_bias_act(a, b_p, bias_p, n_out, relu, tm, tn, tk):
    """out = act(a @ b + bias).

    a:      (M, K) activation; cast to bf16 and (cheaply) padded to tiles here.
    b_p:    (Kp, Np) bf16 weight, pre-padded at init (Kp % tk == 0, Np % tn == 0).
    bias_p: (1, Np) f32 bias, pre-padded at init.
    Returns (M, n_out) float32.
    """
    M, K = a.shape
    Kp, Np = b_p.shape
    assert Kp % tk == 0 and Np % tn == 0 and Kp >= K and Np >= n_out, \
        (a.shape, b_p.shape, (tm, tn, tk))

    Mp = _round_up(M, tm)
    a = a.astype(jnp.bfloat16)
    if Mp != M or Kp != K:
        a = jnp.pad(a, ((0, Mp - M), (0, Kp - K)))

    out = pl.pallas_call(
        functools.partial(_matmul_bias_act_kernel, relu=relu),
        out_shape=jax.ShapeDtypeStruct((Mp, Np), jnp.float32),
        grid_spec=pltpu.PrefetchScalarGridSpec(
            num_scalar_prefetch=0,
            grid=(Mp // tm, Np // tn, Kp // tk),
            in_specs=[
                pl.BlockSpec((tm, tk), lambda i, j, k: (i, k)),
                pl.BlockSpec((tk, tn), lambda i, j, k: (k, j)),
                pl.BlockSpec((1, tn), lambda i, j, k: (0, j)),
            ],
            out_specs=pl.BlockSpec((tm, tn), lambda i, j, k: (i, j)),
            scratch_shapes=[pltpu.VMEM((tm, tn), jnp.float32)],
        ),
        compiler_params=pltpu.CompilerParams(
            dimension_semantics=("parallel", "parallel", "arbitrary")),
    )(a, b_p, bias_p)

    if Mp == M and Np == n_out:
        return out
    return out[:M, :n_out]


# ---------------------------------------------------------------------------
# Conv / pooling (NHWC, padded channel counts carried through).
# ---------------------------------------------------------------------------
def conv2d_nhwc(x, w_p, bias_p, KH, KW, stride, padding, relu):
    """Conv via NHWC im2col + Pallas matmul. Output keeps the padded Cout."""
    N, H, W, C = x.shape
    coutp = w_p.shape[1]
    assert w_p.shape[0] >= KH * KW * C, (w_p.shape, (KH, KW, C))
    xp = jnp.pad(x, ((0, 0), (padding, padding), (padding, padding), (0, 0)))
    Ho = (H + 2 * padding - KH) // stride + 1
    Wo = (W + 2 * padding - KW) // stride + 1
    views = [
        xp[:, kh:kh + stride * (Ho - 1) + 1:stride,
              kw:kw + stride * (Wo - 1) + 1:stride, :]
        for kh in range(KH) for kw in range(KW)
    ]                                                  # each (N, Ho, Wo, C)
    patches = jnp.stack(views, axis=3)                 # (N, Ho, Wo, KH*KW, C)
    patches = patches.reshape(N * Ho * Wo, KH * KW * C)  # (kh, kw, c) col order
    out = matmul_bias_act(patches, w_p, bias_p, coutp, relu,
                          TM_CONV, TN_CONV, TK_CONV)
    return out.reshape(N, Ho, Wo, coutp)


def maxpool2d_nhwc(x, k=3, s=2):
    """MaxPool2d(kernel_size=3, stride=2); fused maximum tree under jit."""
    N, H, W, C = x.shape
    Ho = (H - k) // s + 1
    Wo = (W - k) // s + 1
    out = None
    for kh in range(k):
        for kw in range(k):
            v = x[:, kh:kh + s * (Ho - 1) + 1:s, kw:kw + s * (Wo - 1) + 1:s, :]
            out = v if out is None else jnp.maximum(out, v)
    return out


def adaptive_avgpool2d_nhwc(x, out_hw=(6, 6)):
    """Matches torch.nn.AdaptiveAvgPool2d bin boundaries (NHWC)."""
    N, H, W, C = x.shape
    OH, OW = out_hw
    rows = []
    for i in range(OH):
        h0 = (i * H) // OH
        h1 = -(-((i + 1) * H) // OH)
        cols = []
        for j in range(OW):
            w0 = (j * W) // OW
            w1 = -(-((j + 1) * W) // OW)
            cols.append(jnp.mean(x[:, h0:h1, w0:w1, :], axis=(1, 2)))  # (N, C)
        rows.append(jnp.stack(cols, axis=1))    # (N, OW, C)
    return jnp.stack(rows, axis=1)              # (N, OH, OW, C)


# ---------------------------------------------------------------------------
# MyNet2 forward (eval mode).
# ---------------------------------------------------------------------------
def mynet2_forward(x, pp, num_classes):
    x = jnp.transpose(x, (0, 2, 3, 1))                         # NCHW -> NHWC
    x = conv2d_nhwc(x, pp["conv1_w"], pp["conv1_b"], 11, 11, 4, 2, relu=True)
    x = maxpool2d_nhwc(x)
    x = conv2d_nhwc(x, pp["conv2_w"], pp["conv2_b"], 5, 5, 1, 2, relu=True)
    x = maxpool2d_nhwc(x)
    x = conv2d_nhwc(x, pp["conv3_w"], pp["conv3_b"], 3, 3, 1, 1, relu=True)
    x = conv2d_nhwc(x, pp["conv4_w"], pp["conv4_b"], 3, 3, 1, 1, relu=True)
    x = conv2d_nhwc(x, pp["conv5_w"], pp["conv5_b"], 3, 3, 1, 1, relu=True)
    x = maxpool2d_nhwc(x)
    x = adaptive_avgpool2d_nhwc(x, (6, 6))                     # (N, 6, 6, 256)
    # PyTorch flattens NCHW order: permute back before reshape (tiny: N x 9216).
    x = jnp.transpose(x, (0, 3, 1, 2)).reshape(x.shape[0], -1)
    # nn.Dropout is identity in eval mode.
    x = matmul_bias_act(x, pp["fc1_w"], pp["fc1_b"], 4096, True,
                        TM_FC, TN_FC, TK_FC)
    x = matmul_bias_act(x, pp["fc2_w"], pp["fc2_b"], 4096, True,
                        TM_FC, TN_FC, TK_FC)
    x = matmul_bias_act(x, pp["fc3_w"], pp["fc3_b"], num_classes, False,
                        TM_FC, LANE, TK_FC)
    return x


# ---------------------------------------------------------------------------
# Parameters: PyTorch-layout init + one-time kernel-layout preparation.
# ---------------------------------------------------------------------------
def init_params(key, num_classes):
    ks = jax.random.split(key, 8)

    def conv(k, cout, cin, kh, kw):
        fan_in = cin * kh * kw
        w = jax.random.normal(k, (cout, cin, kh, kw), jnp.float32) / jnp.sqrt(fan_in)
        return w, jnp.zeros((cout,), jnp.float32)

    def fc(k, out_f, in_f):
        w = jax.random.normal(k, (out_f, in_f), jnp.float32) / jnp.sqrt(in_f)
        return w, jnp.zeros((out_f,), jnp.float32)

    p = {}
    p["conv1_w"], p["conv1_b"] = conv(ks[0], 64, 3, 11, 11)
    p["conv2_w"], p["conv2_b"] = conv(ks[1], 192, 64, 5, 5)
    p["conv3_w"], p["conv3_b"] = conv(ks[2], 384, 192, 3, 3)
    p["conv4_w"], p["conv4_b"] = conv(ks[3], 256, 384, 3, 3)
    p["conv5_w"], p["conv5_b"] = conv(ks[4], 256, 256, 3, 3)
    p["fc1_w"], p["fc1_b"] = fc(ks[5], 4096, 256 * 6 * 6)
    p["fc2_w"], p["fc2_b"] = fc(ks[6], 4096, 4096)
    p["fc3_w"], p["fc3_b"] = fc(ks[7], num_classes, 4096)
    return p


def prepare_params(p):
    """One-time layout work: transpose / pad / cast weights to pre-padded bf16
    (K, N) matrices so the forward pass never relayouts them."""
    pp = {}

    def prep_conv(name, cin_pad):
        w, b = p[name + "_w"], p[name + "_b"]
        cout, cin, KH, KW = w.shape
        coutp = _round_up(cout, LANE)
        wq = jnp.pad(w, ((0, coutp - cout), (0, cin_pad - cin), (0, 0), (0, 0)))
        wmat = jnp.transpose(wq, (2, 3, 1, 0)).reshape(KH * KW * cin_pad, coutp)
        K = KH * KW * cin_pad
        Kp = _round_up(K, TK_CONV)
        pp[name + "_w"] = jnp.pad(wmat, ((0, Kp - K), (0, 0))).astype(jnp.bfloat16)
        pp[name + "_b"] = jnp.pad(b, (0, coutp - cout)).reshape(1, -1).astype(jnp.float32)
        return coutp

    def prep_fc(name, tn):
        w, b = p[name + "_w"], p[name + "_b"]
        out_f, in_f = w.shape
        Kp = _round_up(in_f, TK_FC)
        Np = _round_up(out_f, tn)
        pp[name + "_w"] = jnp.pad(w.T, ((0, Kp - in_f), (0, Np - out_f))).astype(jnp.bfloat16)
        pp[name + "_b"] = jnp.pad(b, (0, Np - out_f)).reshape(1, -1).astype(jnp.float32)

    c1 = prep_conv("conv1", cin_pad=3)     # image channels, no padding needed
    c2 = prep_conv("conv2", cin_pad=c1)    # 128
    c3 = prep_conv("conv3", cin_pad=c2)    # 256
    c4 = prep_conv("conv4", cin_pad=c3)    # 384
    c5 = prep_conv("conv5", cin_pad=c4)    # 256
    assert c5 == 256                        # flatten expects 256 * 6 * 6 = 9216
    prep_fc("fc1", TN_FC)
    prep_fc("fc2", TN_FC)
    prep_fc("fc3", LANE)
    return pp


if __name__ == "__main__":
    num_classes = 16
    key = jax.random.PRNGKey(0)
    k_x, k_p = jax.random.split(key)
    x = jax.random.normal(k_x, (2, 3, 128, 128), jnp.float32)   # NCHW input

    params = init_params(k_p, num_classes)
    pp = prepare_params(params)             # one-time weight relayout (bf16, padded)
    pp = jax.block_until_ready(pp)

    fwd = jax.jit(functools.partial(mynet2_forward, num_classes=num_classes))
    out = fwd(x, pp)
    out = jax.block_until_ready(out)
    assert out.shape == (2, num_classes), out.shape
    assert bool(jnp.all(jnp.isfinite(out)))
    print("KERNEL_OK")
</pallas_src>

<mosaic_0001>
module attributes {stable_mosaic.version = 11 : i64} {
  func.func @_matmul_bias_act_kernel(%arg0: i32, %arg1: i32, %arg2: i32, %arg3: memref<128x256xbf16, #tpu.memory_space<vmem>>, %arg4: memref<256x128xbf16, #tpu.memory_space<vmem>>, %arg5: memref<1x128xf32, #tpu.memory_space<vmem>>, %arg6: memref<128x128xf32, #tpu.memory_space<vmem>>, %arg7: memref<128x128xf32, #tpu.memory_space<vmem>>) attributes {dimension_semantics = [#tpu.dimension_semantics<parallel>, #tpu.dimension_semantics<parallel>, #tpu.dimension_semantics<arbitrary>], iteration_bounds = array<i64: 16, 1, 2>, scalar_prefetch = 0 : i64, scratch_operands = 1 : i64, tpu.core_type = #tpu.core_type<tc>, window_params = [{transform_indices = @transform_0, window_bounds = array<i64: 128, 256>}, {transform_indices = @transform_1, window_bounds = array<i64: 256, 128>}, {transform_indices = @transform_2, window_bounds = array<i64: 1, 128>}, {transform_indices = @transform_3, window_bounds = array<i64: 128, 128>}]} {
    %c0_i32 = arith.constant 0 : i32
    %0 = arith.cmpi eq, %arg2, %c0_i32 : i32
    %1 = arith.extui %0 : i1 to i32
    %c0_i32_0 = arith.constant 0 : i32
    %2 = arith.cmpi ne, %1, %c0_i32_0 : i32
    scf.if %2 {
      %cst_9 = arith.constant 0.000000e+00 : f32
      %12 = vector.broadcast %cst_9 : f32 to vector<128x128xf32>
      %c0_10 = arith.constant 0 : index
      %c0_11 = arith.constant 0 : index
      %13 = vector.load %arg7[%c0_10, %c0_11] : memref<128x128xf32, #tpu.memory_space<vmem>>, vector<128x128xf32>
      tpu.vector_store %arg7[%c0_10, %c0_11], %12 {strides = array<i32>} : memref<128x128xf32, #tpu.memory_space<vmem>>, vector<128x128xf32>,
    } else {
    }
    %c0 = arith.constant 0 : index
    %c0_1 = arith.constant 0 : index
    %3 = vector.load %arg7[%c0, %c0_1] : memref<128x128xf32, #tpu.memory_space<vmem>>, vector<128x128xf32>
    %c0_2 = arith.constant 0 : index
    %c0_3 = arith.constant 0 : index
    %4 = vector.load %arg3[%c0_2, %c0_3] : memref<128x256xbf16, #tpu.memory_space<vmem>>, vector<128x256xbf16>
    %c0_4 = arith.constant 0 : index
    %c0_5 = arith.constant 0 : index
    %5 = vector.load %arg4[%c0_4, %c0_5] : memref<256x128xbf16, #tpu.memory_space<vmem>>, vector<256x128xbf16>
    %cst = arith.constant dense<0.000000e+00> : vector<128x128xf32>
    %6 = tpu.matmul %4, %5, %cst {dimension_numbers = #tpu.dot_dimension_numbers<[1], [0], [0], [1], [0, 0, 1, 1], [], []>} : vector<128x256xbf16>, vector<256x128xbf16>, vector<128x128xf32> -> vector<128x128xf32>
    %7 = arith.addf %3, %6 : vector<128x128xf32>
    %c0_6 = arith.constant 0 : index
    %c0_7 = arith.constant 0 : index
    %8 = vector.load %arg7[%c0_6, %c0_7] : memref<128x128xf32, #tpu.memory_space<vmem>>, vector<128x128xf32>
    tpu.vector_store %arg7[%c0_6, %c0_7], %7 {strides = array<i32>} : memref<128x128xf32, #tpu.memory_space<vmem>>, vector<128x128xf32>,
    %c1_i32 = arith.constant 1 : i32
    %9 = arith.cmpi eq, %arg2, %c1_i32 : i32
    %10 = arith.extui %9 : i1 to i32
    %c0_i32_8 = arith.constant 0 : i32
    %11 = arith.cmpi ne, %10, %c0_i32_8 : i32
    scf.if %11 {
      %c0_9 = arith.constant 0 : index
      %c0_10 = arith.constant 0 : index
      %12 = vector.load %arg7[%c0_9, %c0_10] : memref<128x128xf32, #tpu.memory_space<vmem>>, vector<128x128xf32>
      %c0_11 = arith.constant 0 : index
      %c0_12 = arith.constant 0 : index
      %13 = vector.load %arg5[%c0_11, %c0_12] : memref<1x128xf32, #tpu.memory_space<vmem>>, vector<1x128xf32>
      %14 = vector.broadcast %13 : vector<1x128xf32> to vector<128x128xf32>
      %15 = arith.addf %12, %14 : vector<128x128xf32>
      %cst_13 = arith.constant 0.000000e+00 : f32
      %16 = vector.broadcast %cst_13 : f32 to vector<128x128xf32>
      %17 = arith.maximumf %15, %16 : vector<128x128xf32>
      %c0_14 = arith.constant 0 : index
      %c0_15 = arith.constant 0 : index
      %18 = vector.load %arg6[%c0_14, %c0_15] : memref<128x128xf32, #tpu.memory_space<vmem>>, vector<128x128xf32>
      tpu.vector_store %arg6[%c0_14, %c0_15], %17 {strides = array<i32>} : memref<128x128xf32, #tpu.memory_space<vmem>>, vector<128x128xf32>,
    } else {
    }
    return
  }
  func.func @transform_0(%arg0: i32, %arg1: i32, %arg2: i32) -> (i32, i32) {
    %c0_i32 = arith.constant 0 : i32
    return %arg0, %arg2 : i32, i32
  }
  func.func @transform_1(%arg0: i32, %arg1: i32, %arg2: i32) -> (i32, i32) {
    %c0_i32 = arith.constant 0 : i32
    return %arg2, %arg1 : i32, i32
  }
  func.func @transform_2(%arg0: i32, %arg1: i32, %arg2: i32) -> (i32, i32) {
    %c0_i32 = arith.constant 0 : i32
    %c0_i32_0 = arith.constant 0 : i32
    return %c0_i32, %arg1 : i32, i32
  }
  func.func @transform_3(%arg0: i32, %arg1: i32, %arg2: i32) -> (i32, i32) {
    %c0_i32 = arith.constant 0 : i32
    return %arg0, %arg1 : i32, i32
  }
}

module attributes {stable_mosaic.version = 11 : i64} {
  func.func @_matmul_bias_act_kernel(%arg0: i32, %arg1: i32, %arg2: i32, %arg3: memref<128x256xbf16, #tpu.memory_space<vmem>>, %arg4: memref<256x128xbf16, #tpu.memory_space<vmem>>, %arg5: memref<1x128xf32, #tpu.memory_space<vmem>>, %arg6: memref<128x128xf32, #tpu.memory_space<vmem>>, %arg7: memref<128x128xf32, #tpu.memory_space<vmem>>) attributes {dimension_semantics = [#tpu.dimension_semantics<parallel>, #tpu.dimension_semantics<parallel>, #tpu.dimension_semantics<arbitrary>], iteration_bounds = array<i64: 4, 2, 13>, scalar_prefetch = 0 : i64, scratch_operands = 1 : i64, tpu.core_type = #tpu.core_type<tc>, window_params = [{transform_indices = @transform_0, window_bounds = array<i64: 128, 256>}, {transform_indices = @transform_1, window_bounds = array<i64: 256, 128>}, {transform_indices = @transform_2, window_bounds = array<i64: 1, 128>}, {transform_indices = @transform_3, window_bounds = array<i64: 128, 128>}]} {
    %c0_i32 = arith.constant 0 : i32
    %0 = arith.cmpi eq, %arg2, %c0_i32 : i32
    %1 = arith.extui %0 : i1 to i32
    %c0_i32_0 = arith.constant 0 : i32
    %2 = arith.cmpi ne, %1, %c0_i32_0 : i32
    scf.if %2 {
      %cst_9 = arith.constant 0.000000e+00 : f32
      %12 = vector.broadcast %cst_9 : f32 to vector<128x128xf32>
      %c0_10 = arith.constant 0 : index
      %c0_11 = arith.constant 0 : index
      %13 = vector.load %arg7[%c0_10, %c0_11] : memref<128x128xf32, #tpu.memory_space<vmem>>, vector<128x128xf32>
      tpu.vector_store %arg7[%c0_10, %c0_11], %12 {strides = array<i32>} : memref<128x128xf32, #tpu.memory_space<vmem>>, vector<128x128xf32>,
    } else {
    }
    %c0 = arith.constant 0 : index
    %c0_1 = arith.constant 0 : index
    %3 = vector.load %arg7[%c0, %c0_1] : memref<128x128xf32, #tpu.memory_space<vmem>>, vector<128x128xf32>
    %c0_2 = arith.constant 0 : index
    %c0_3 = arith.constant 0 : index
    %4 = vector.load %arg3[%c0_2, %c0_3] : memref<128x256xbf16, #tpu.memory_space<vmem>>, vector<128x256xbf16>
    %c0_4 = arith.constant 0 : index
    %c0_5 = arith.constant 0 : index
    %5 = vector.load %arg4[%c0_4, %c0_5] : memref<256x128xbf16, #tpu.memory_space<vmem>>, vector<256x128xbf16>
    %cst = arith.constant dense<0.000000e+00> : vector<128x128xf32>
    %6 = tpu.matmul %4, %5, %cst {dimension_numbers = #tpu.dot_dimension_numbers<[1], [0], [0], [1], [0, 0, 1, 1], [], []>} : vector<128x256xbf16>, vector<256x128xbf16>, vector<128x128xf32> -> vector<128x128xf32>
    %7 = arith.addf %3, %6 : vector<128x128xf32>
    %c0_6 = arith.constant 0 : index
    %c0_7 = arith.constant 0 : index
    %8 = vector.load %arg7[%c0_6, %c0_7] : memref<128x128xf32, #tpu.memory_space<vmem>>, vector<128x128xf32>
    tpu.vector_store %arg7[%c0_6, %c0_7], %7 {strides = array<i32>} : memref<128x128xf32, #tpu.memory_space<vmem>>, vector<128x128xf32>,
    %c12_i32 = arith.constant 12 : i32
    %9 = arith.cmpi eq, %arg2, %c12_i32 : i32
    %10 = arith.extui %9 : i1 to i32
    %c0_i32_8 = arith.constant 0 : i32
    %11 = arith.cmpi ne, %10, %c0_i32_8 : i32
    scf.if %11 {
      %c0_9 = arith.constant 0 : index
      %c0_10 = arith.constant 0 : index
      %12 = vector.load %arg7[%c0_9, %c0_10] : memref<128x128xf32, #tpu.memory_space<vmem>>, vector<128x128xf32>
      %c0_11 = arith.constant 0 : index
      %c0_12 = arith.constant 0 : index
      %13 = vector.load %arg5[%c0_11, %c0_12] : memref<1x128xf32, #tpu.memory_space<vmem>>, vector<1x128xf32>
      %14 = vector.broadcast %13 : vector<1x128xf32> to vector<128x128xf32>
      %15 = arith.addf %12, %14 : vector<128x128xf32>
      %cst_13 = arith.constant 0.000000e+00 : f32
      %16 = vector.broadcast %cst_13 : f32 to vector<128x128xf32>
      %17 = arith.maximumf %15, %16 : vector<128x128xf32>
      %c0_14 = arith.constant 0 : index
      %c0_15 = arith.constant 0 : index
      %18 = vector.load %arg6[%c0_14, %c0_15] : memref<128x128xf32, #tpu.memory_space<vmem>>, vector<128x128xf32>
      tpu.vector_store %arg6[%c0_14, %c0_15], %17 {strides = array<i32>} : memref<128x128xf32, #tpu.memory_space<vmem>>, vector<128x128xf32>,
    } else {
    }
    return
  }
  func.func @transform_0(%arg0: i32, %arg1: i32, %arg2: i32) -> (i32, i32) {
    %c0_i32 = arith.constant 0 : i32
    return %arg0, %arg2 : i32, i32
  }
  func.func @transform_1(%arg0: i32, %arg1: i32, %arg2: i32) -> (i32, i32) {
    %c0_i32 = arith.constant 0 : i32
    return %arg2, %arg1 : i32, i32
  }
  func.func @transform_2(%arg0: i32, %arg1: i32, %arg2: i32) -> (i32, i32) {
    %c0_i32 = arith.constant 0 : i32
    %c0_i32_0 = arith.constant 0 : i32
    return %c0_i32, %arg1 : i32, i32
  }
  func.func @transform_3(%arg0: i32, %arg1: i32, %arg2: i32) -> (i32, i32) {
    %c0_i32 = arith.constant 0 : i32
    return %arg0, %arg1 : i32, i32
  }
}

module attributes {stable_mosaic.version = 11 : i64} {
  func.func @_matmul_bias_act_kernel(%arg0: i32, %arg1: i32, %arg2: i32, %arg3: memref<128x256xbf16, #tpu.memory_space<vmem>>, %arg4: memref<256x128xbf16, #tpu.memory_space<vmem>>, %arg5: memref<1x128xf32, #tpu.memory_space<vmem>>, %arg6: memref<128x128xf32, #tpu.memory_space<vmem>>, %arg7: memref<128x128xf32, #tpu.memory_space<vmem>>) attributes {dimension_semantics = [#tpu.dimension_semantics<parallel>, #tpu.dimension_semantics<parallel>, #tpu.dimension_semantics<arbitrary>], iteration_bounds = array<i64: 1, 3, 9>, scalar_prefetch = 0 : i64, scratch_operands = 1 : i64, tpu.core_type = #tpu.core_type<tc>, window_params = [{transform_indices = @transform_0, window_bounds = array<i64: 128, 256>}, {transform_indices = @transform_1, window_bounds = array<i64: 256, 128>}, {transform_indices = @transform_2, window_bounds = array<i64: 1, 128>}, {transform_indices = @transform_3, window_bounds = array<i64: 128, 128>}]} {
    %c0_i32 = arith.constant 0 : i32
    %0 = arith.cmpi eq, %arg2, %c0_i32 : i32
    %1 = arith.extui %0 : i1 to i32
    %c0_i32_0 = arith.constant 0 : i32
    %2 = arith.cmpi ne, %1, %c0_i32_0 : i32
    scf.if %2 {
      %cst_9 = arith.constant 0.000000e+00 : f32
      %12 = vector.broadcast %cst_9 : f32 to vector<128x128xf32>
      %c0_10 = arith.constant 0 : index
      %c0_11 = arith.constant 0 : index
      %13 = vector.load %arg7[%c0_10, %c0_11] : memref<128x128xf32, #tpu.memory_space<vmem>>, vector<128x128xf32>
      tpu.vector_store %arg7[%c0_10, %c0_11], %12 {strides = array<i32>} : memref<128x128xf32, #tpu.memory_space<vmem>>, vector<128x128xf32>,
    } else {
    }
    %c0 = arith.constant 0 : index
    %c0_1 = arith.constant 0 : index
    %3 = vector.load %arg7[%c0, %c0_1] : memref<128x128xf32, #tpu.memory_space<vmem>>, vector<128x128xf32>
    %c0_2 = arith.constant 0 : index
    %c0_3 = arith.constant 0 : index
    %4 = vector.load %arg3[%c0_2, %c0_3] : memref<128x256xbf16, #tpu.memory_space<vmem>>, vector<128x256xbf16>
    %c0_4 = arith.constant 0 : index
    %c0_5 = arith.constant 0 : index
    %5 = vector.load %arg4[%c0_4, %c0_5] : memref<256x128xbf16, #tpu.memory_space<vmem>>, vector<256x128xbf16>
    %cst = arith.constant dense<0.000000e+00> : vector<128x128xf32>
    %6 = tpu.matmul %4, %5, %cst {dimension_numbers = #tpu.dot_dimension_numbers<[1], [0], [0], [1], [0, 0, 1, 1], [], []>} : vector<128x256xbf16>, vector<256x128xbf16>, vector<128x128xf32> -> vector<128x128xf32>
    %7 = arith.addf %3, %6 : vector<128x128xf32>
    %c0_6 = arith.constant 0 : index
    %c0_7 = arith.constant 0 : index
    %8 = vector.load %arg7[%c0_6, %c0_7] : memref<128x128xf32, #tpu.memory_space<vmem>>, vector<128x128xf32>
    tpu.vector_store %arg7[%c0_6, %c0_7], %7 {strides = array<i32>} : memref<128x128xf32, #tpu.memory_space<vmem>>, vector<128x128xf32>,
    %c8_i32 = arith.constant 8 : i32
    %9 = arith.cmpi eq, %arg2, %c8_i32 : i32
    %10 = arith.extui %9 : i1 to i32
    %c0_i32_8 = arith.constant 0 : i32
    %11 = arith.cmpi ne, %10, %c0_i32_8 : i32
    scf.if %11 {
      %c0_9 = arith.constant 0 : index
      %c0_10 = arith.constant 0 : index
      %12 = vector.load %arg7[%c0_9, %c0_10] : memref<128x128xf32, #tpu.memory_space<vmem>>, vector<128x128xf32>
      %c0_11 = arith.constant 0 : index
      %c0_12 = arith.constant 0 : index
      %13 = vector.load %arg5[%c0_11, %c0_12] : memref<1x128xf32, #tpu.memory_space<vmem>>, vector<1x128xf32>
      %14 = vector.broadcast %13 : vector<1x128xf32> to vector<128x128xf32>
      %15 = arith.addf %12, %14 : vector<128x128xf32>
      %cst_13 = arith.constant 0.000000e+00 : f32
      %16 = vector.broadcast %cst_13 : f32 to vector<128x128xf32>
      %17 = arith.maximumf %15, %16 : vector<128x128xf32>
      %c0_14 = arith.constant 0 : index
      %c0_15 = arith.constant 0 : index
      %18 = vector.load %arg6[%c0_14, %c0_15] : memref<128x128xf32, #tpu.memory_space<vmem>>, vector<128x128xf32>
      tpu.vector_store %arg6[%c0_14, %c0_15], %17 {strides = array<i32>} : memref<128x128xf32, #tpu.memory_space<vmem>>, vector<128x128xf32>,
    } else {
    }
    return
  }
  func.func @transform_0(%arg0: i32, %arg1: i32, %arg2: i32) -> (i32, i32) {
    %c0_i32 = arith.constant 0 : i32
    return %arg0, %arg2 : i32, i32
  }
  func.func @transform_1(%arg0: i32, %arg1: i32, %arg2: i32) -> (i32, i32) {
    %c0_i32 = arith.constant 0 : i32
    return %arg2, %arg1 : i32, i32
  }
  func.func @transform_2(%arg0: i32, %arg1: i32, %arg2: i32) -> (i32, i32) {
    %c0_i32 = arith.constant 0 : i32
    %c0_i32_0 = arith.constant 0 : i32
    return %c0_i32, %arg1 : i32, i32
  }
  func.func @transform_3(%arg0: i32, %arg1: i32, %arg2: i32) -> (i32, i32) {
    %c0_i32 = arith.constant 0 : i32
    return %arg0, %arg1 : i32, i32
  }
}

module attributes {stable_mosaic.version = 11 : i64} {
  func.func @_matmul_bias_act_kernel(%arg0: i32, %arg1: i32, %arg2: i32, %arg3: memref<128x256xbf16, #tpu.memory_space<vmem>>, %arg4: memref<256x128xbf16, #tpu.memory_space<vmem>>, %arg5: memref<1x128xf32, #tpu.memory_space<vmem>>, %arg6: memref<128x128xf32, #tpu.memory_space<vmem>>, %arg7: memref<128x128xf32, #tpu.memory_space<vmem>>) attributes {dimension_semantics = [#tpu.dimension_semantics<parallel>, #tpu.dimension_semantics<parallel>, #tpu.dimension_semantics<arbitrary>], iteration_bounds = array<i64: 1, 2, 14>, scalar_prefetch = 0 : i64, scratch_operands = 1 : i64, tpu.core_type = #tpu.core_type<tc>, window_params = [{transform_indices = @transform_0, window_bounds = array<i64: 128, 256>}, {transform_indices = @transform_1, window_bounds = array<i64: 256, 128>}, {transform_indices = @transform_2, window_bounds = array<i64: 1, 128>}, {transform_indices = @transform_3, window_bounds = array<i64: 128, 128>}]} {
    %c0_i32 = arith.constant 0 : i32
    %0 = arith.cmpi eq, %arg2, %c0_i32 : i32
    %1 = arith.extui %0 : i1 to i32
    %c0_i32_0 = arith.constant 0 : i32
    %2 = arith.cmpi ne, %1, %c0_i32_0 : i32
    scf.if %2 {
      %cst_9 = arith.constant 0.000000e+00 : f32
      %12 = vector.broadcast %cst_9 : f32 to vector<128x128xf32>
      %c0_10 = arith.constant 0 : index
      %c0_11 = arith.constant 0 : index
      %13 = vector.load %arg7[%c0_10, %c0_11] : memref<128x128xf32, #tpu.memory_space<vmem>>, vector<128x128xf32>
      tpu.vector_store %arg7[%c0_10, %c0_11], %12 {strides = array<i32>} : memref<128x128xf32, #tpu.memory_space<vmem>>, vector<128x128xf32>,
    } else {
    }
    %c0 = arith.constant 0 : index
    %c0_1 = arith.constant 0 : index
    %3 = vector.load %arg7[%c0, %c0_1] : memref<128x128xf32, #tpu.memory_space<vmem>>, vector<128x128xf32>
    %c0_2 = arith.constant 0 : index
    %c0_3 = arith.constant 0 : index
    %4 = vector.load %arg3[%c0_2, %c0_3] : memref<128x256xbf16, #tpu.memory_space<vmem>>, vector<128x256xbf16>
    %c0_4 = arith.constant 0 : index
    %c0_5 = arith.constant 0 : index
    %5 = vector.load %arg4[%c0_4, %c0_5] : memref<256x128xbf16, #tpu.memory_space<vmem>>, vector<256x128xbf16>
    %cst = arith.constant dense<0.000000e+00> : vector<128x128xf32>
    %6 = tpu.matmul %4, %5, %cst {dimension_numbers = #tpu.dot_dimension_numbers<[1], [0], [0], [1], [0, 0, 1, 1], [], []>} : vector<128x256xbf16>, vector<256x128xbf16>, vector<128x128xf32> -> vector<128x128xf32>
    %7 = arith.addf %3, %6 : vector<128x128xf32>
    %c0_6 = arith.constant 0 : index
    %c0_7 = arith.constant 0 : index
    %8 = vector.load %arg7[%c0_6, %c0_7] : memref<128x128xf32, #tpu.memory_space<vmem>>, vector<128x128xf32>
    tpu.vector_store %arg7[%c0_6, %c0_7], %7 {strides = array<i32>} : memref<128x128xf32, #tpu.memory_space<vmem>>, vector<128x128xf32>,
    %c13_i32 = arith.constant 13 : i32
    %9 = arith.cmpi eq, %arg2, %c13_i32 : i32
    %10 = arith.extui %9 : i1 to i32
    %c0_i32_8 = arith.constant 0 : i32
    %11 = arith.cmpi ne, %10, %c0_i32_8 : i32
    scf.if %11 {
      %c0_9 = arith.constant 0 : index
      %c0_10 = arith.constant 0 : index
      %12 = vector.load %arg7[%c0_9, %c0_10] : memref<128x128xf32, #tpu.memory_space<vmem>>, vector<128x128xf32>
      %c0_11 = arith.constant 0 : index
      %c0_12 = arith.constant 0 : index
      %13 = vector.load %arg5[%c0_11, %c0_12] : memref<1x128xf32, #tpu.memory_space<vmem>>, vector<1x128xf32>
      %14 = vector.broadcast %13 : vector<1x128xf32> to vector<128x128xf32>
      %15 = arith.addf %12, %14 : vector<128x128xf32>
      %cst_13 = arith.constant 0.000000e+00 : f32
      %16 = vector.broadcast %cst_13 : f32 to vector<128x128xf32>
      %17 = arith.maximumf %15, %16 : vector<128x128xf32>
      %c0_14 = arith.constant 0 : index
      %c0_15 = arith.constant 0 : index
      %18 = vector.load %arg6[%c0_14, %c0_15] : memref<128x128xf32, #tpu.memory_space<vmem>>, vector<128x128xf32>
      tpu.vector_store %arg6[%c0_14, %c0_15], %17 {strides = array<i32>} : memref<128x128xf32, #tpu.memory_space<vmem>>, vector<128x128xf32>,
    } else {
    }
    return
  }
  func.func @transform_0(%arg0: i32, %arg1: i32, %arg2: i32) -> (i32, i32) {
    %c0_i32 = arith.constant 0 : i32
    return %arg0, %arg2 : i32, i32
  }
  func.func @transform_1(%arg0: i32, %arg1: i32, %arg2: i32) -> (i32, i32) {
    %c0_i32 = arith.constant 0 : i32
    return %arg2, %arg1 : i32, i32
  }
  func.func @transform_2(%arg0: i32, %arg1: i32, %arg2: i32) -> (i32, i32) {
    %c0_i32 = arith.constant 0 : i32
    %c0_i32_0 = arith.constant 0 : i32
    return %c0_i32, %arg1 : i32, i32
  }
  func.func @transform_3(%arg0: i32, %arg1: i32, %arg2: i32) -> (i32, i32) {
    %c0_i32 = arith.constant 0 : i32
    return %arg0, %arg1 : i32, i32
  }
}

module attributes {stable_mosaic.version = 11 : i64} {
  func.func @_matmul_bias_act_kernel(%arg0: i32, %arg1: i32, %arg2: i32, %arg3: memref<128x256xbf16, #tpu.memory_space<vmem>>, %arg4: memref<256x128xbf16, #tpu.memory_space<vmem>>, %arg5: memref<1x128xf32, #tpu.memory_space<vmem>>, %arg6: memref<128x128xf32, #tpu.memory_space<vmem>>, %arg7: memref<128x128xf32, #tpu.memory_space<vmem>>) attributes {dimension_semantics = [#tpu.dimension_semantics<parallel>, #tpu.dimension_semantics<parallel>, #tpu.dimension_semantics<arbitrary>], iteration_bounds = array<i64: 1, 2, 9>, scalar_prefetch = 0 : i64, scratch_operands = 1 : i64, tpu.core_type = #tpu.core_type<tc>, window_params = [{transform_indices = @transform_0, window_bounds = array<i64: 128, 256>}, {transform_indices = @transform_1, window_bounds = array<i64: 256, 128>}, {transform_indices = @transform_2, window_bounds = array<i64: 1, 128>}, {transform_indices = @transform_3, window_bounds = array<i64: 128, 128>}]} {
    %c0_i32 = arith.constant 0 : i32
    %0 = arith.cmpi eq, %arg2, %c0_i32 : i32
    %1 = arith.extui %0 : i1 to i32
    %c0_i32_0 = arith.constant 0 : i32
    %2 = arith.cmpi ne, %1, %c0_i32_0 : i32
    scf.if %2 {
      %cst_9 = arith.constant 0.000000e+00 : f32
      %12 = vector.broadcast %cst_9 : f32 to vector<128x128xf32>
      %c0_10 = arith.constant 0 : index
      %c0_11 = arith.constant 0 : index
      %13 = vector.load %arg7[%c0_10, %c0_11] : memref<128x128xf32, #tpu.memory_space<vmem>>, vector<128x128xf32>
      tpu.vector_store %arg7[%c0_10, %c0_11], %12 {strides = array<i32>} : memref<128x128xf32, #tpu.memory_space<vmem>>, vector<128x128xf32>,
    } else {
    }
    %c0 = arith.constant 0 : index
    %c0_1 = arith.constant 0 : index
    %3 = vector.load %arg7[%c0, %c0_1] : memref<128x128xf32, #tpu.memory_space<vmem>>, vector<128x128xf32>
    %c0_2 = arith.constant 0 : index
    %c0_3 = arith.constant 0 : index
    %4 = vector.load %arg3[%c0_2, %c0_3] : memref<128x256xbf16, #tpu.memory_space<vmem>>, vector<128x256xbf16>
    %c0_4 = arith.constant 0 : index
    %c0_5 = arith.constant 0 : index
    %5 = vector.load %arg4[%c0_4, %c0_5] : memref<256x128xbf16, #tpu.memory_space<vmem>>, vector<256x128xbf16>
    %cst = arith.constant dense<0.000000e+00> : vector<128x128xf32>
    %6 = tpu.matmul %4, %5, %cst {dimension_numbers = #tpu.dot_dimension_numbers<[1], [0], [0], [1], [0, 0, 1, 1], [], []>} : vector<128x256xbf16>, vector<256x128xbf16>, vector<128x128xf32> -> vector<128x128xf32>
    %7 = arith.addf %3, %6 : vector<128x128xf32>
    %c0_6 = arith.constant 0 : index
    %c0_7 = arith.constant 0 : index
    %8 = vector.load %arg7[%c0_6, %c0_7] : memref<128x128xf32, #tpu.memory_space<vmem>>, vector<128x128xf32>
    tpu.vector_store %arg7[%c0_6, %c0_7], %7 {strides = array<i32>} : memref<128x128xf32, #tpu.memory_space<vmem>>, vector<128x128xf32>,
    %c8_i32 = arith.constant 8 : i32
    %9 = arith.cmpi eq, %arg2, %c8_i32 : i32
    %10 = arith.extui %9 : i1 to i32
    %c0_i32_8 = arith.constant 0 : i32
    %11 = arith.cmpi ne, %10, %c0_i32_8 : i32
    scf.if %11 {
      %c0_9 = arith.constant 0 : index
      %c0_10 = arith.constant 0 : index
      %12 = vector.load %arg7[%c0_9, %c0_10] : memref<128x128xf32, #tpu.memory_space<vmem>>, vector<128x128xf32>
      %c0_11 = arith.constant 0 : index
      %c0_12 = arith.constant 0 : index
      %13 = vector.load %arg5[%c0_11, %c0_12] : memref<1x128xf32, #tpu.memory_space<vmem>>, vector<1x128xf32>
      %14 = vector.broadcast %13 : vector<1x128xf32> to vector<128x128xf32>
      %15 = arith.addf %12, %14 : vector<128x128xf32>
      %cst_13 = arith.constant 0.000000e+00 : f32
      %16 = vector.broadcast %cst_13 : f32 to vector<128x128xf32>
      %17 = arith.maximumf %15, %16 : vector<128x128xf32>
      %c0_14 = arith.constant 0 : index
      %c0_15 = arith.constant 0 : index
      %18 = vector.load %arg6[%c0_14, %c0_15] : memref<128x128xf32, #tpu.memory_space<vmem>>, vector<128x128xf32>
      tpu.vector_store %arg6[%c0_14, %c0_15], %17 {strides = array<i32>} : memref<128x128xf32, #tpu.memory_space<vmem>>, vector<128x128xf32>,
    } else {
    }
    return
  }
  func.func @transform_0(%arg0: i32, %arg1: i32, %arg2: i32) -> (i32, i32) {
    %c0_i32 = arith.constant 0 : i32
    return %arg0, %arg2 : i32, i32
  }
  func.func @transform_1(%arg0: i32, %arg1: i32, %arg2: i32) -> (i32, i32) {
    %c0_i32 = arith.constant 0 : i32
    return %arg2, %arg1 : i32, i32
  }
  func.func @transform_2(%arg0: i32, %arg1: i32, %arg2: i32) -> (i32, i32) {
    %c0_i32 = arith.constant 0 : i32
    %c0_i32_0 = arith.constant 0 : i32
    return %c0_i32, %arg1 : i32, i32
  }
  func.func @transform_3(%arg0: i32, %arg1: i32, %arg2: i32) -> (i32, i32) {
    %c0_i32 = arith.constant 0 : i32
    return %arg0, %arg1 : i32, i32
  }
}

module attributes {stable_mosaic.version = 11 : i64} {
  func.func @_matmul_bias_act_kernel(%arg0: i32, %arg1: i32, %arg2: i32, %arg3: memref<16x512xbf16, #tpu.memory_space<vmem>>, %arg4: memref<512x512xbf16, #tpu.memory_space<vmem>>, %arg5: memref<1x512xf32, #tpu.memory_space<vmem>>, %arg6: memref<16x512xf32, #tpu.memory_space<vmem>>, %arg7: memref<16x512xf32, #tpu.memory_space<vmem>>) attributes {dimension_semantics = [#tpu.dimension_semantics<parallel>, #tpu.dimension_semantics<parallel>, #tpu.dimension_semantics<arbitrary>], iteration_bounds = array<i64: 1, 8, 18>, scalar_prefetch = 0 : i64, scratch_operands = 1 : i64, tpu.core_type = #tpu.core_type<tc>, window_params = [{transform_indices = @transform_0, window_bounds = array<i64: 16, 512>}, {transform_indices = @transform_1, window_bounds = array<i64: 512, 512>}, {transform_indices = @transform_2, window_bounds = array<i64: 1, 512>}, {transform_indices = @transform_3, window_bounds = array<i64: 16, 512>}]} {
    %c0_i32 = arith.constant 0 : i32
    %0 = arith.cmpi eq, %arg2, %c0_i32 : i32
    %1 = arith.extui %0 : i1 to i32
    %c0_i32_0 = arith.constant 0 : i32
    %2 = arith.cmpi ne, %1, %c0_i32_0 : i32
    scf.if %2 {
      %cst_9 = arith.constant 0.000000e+00 : f32
      %12 = vector.broadcast %cst_9 : f32 to vector<16x512xf32>
      %c0_10 = arith.constant 0 : index
      %c0_11 = arith.constant 0 : index
      %13 = vector.load %arg7[%c0_10, %c0_11] : memref<16x512xf32, #tpu.memory_space<vmem>>, vector<16x512xf32>
      tpu.vector_store %arg7[%c0_10, %c0_11], %12 {strides = array<i32>} : memref<16x512xf32, #tpu.memory_space<vmem>>, vector<16x512xf32>,
    } else {
    }
    %c0 = arith.constant 0 : index
    %c0_1 = arith.constant 0 : index
    %3 = vector.load %arg7[%c0, %c0_1] : memref<16x512xf32, #tpu.memory_space<vmem>>, vector<16x512xf32>
    %c0_2 = arith.constant 0 : index
    %c0_3 = arith.constant 0 : index
    %4 = vector.load %arg3[%c0_2, %c0_3] : memref<16x512xbf16, #tpu.memory_space<vmem>>, vector<16x512xbf16>
    %c0_4 = arith.constant 0 : index
    %c0_5 = arith.constant 0 : index
    %5 = vector.load %arg4[%c0_4, %c0_5] : memref<512x512xbf16, #tpu.memory_space<vmem>>, vector<512x512xbf16>
    %cst = arith.constant dense<0.000000e+00> : vector<16x512xf32>
    %6 = tpu.matmul %4, %5, %cst {dimension_numbers = #tpu.dot_dimension_numbers<[1], [0], [0], [1], [0, 0, 1, 1], [], []>} : vector<16x512xbf16>, vector<512x512xbf16>, vector<16x512xf32> -> vector<16x512xf32>
    %7 = arith.addf %3, %6 : vector<16x512xf32>
    %c0_6 = arith.constant 0 : index
    %c0_7 = arith.constant 0 : index
    %8 = vector.load %arg7[%c0_6, %c0_7] : memref<16x512xf32, #tpu.memory_space<vmem>>, vector<16x512xf32>
    tpu.vector_store %arg7[%c0_6, %c0_7], %7 {strides = array<i32>} : memref<16x512xf32, #tpu.memory_space<vmem>>, vector<16x512xf32>,
    %c17_i32 = arith.constant 17 : i32
    %9 = arith.cmpi eq, %arg2, %c17_i32 : i32
    %10 = arith.extui %9 : i1 to i32
    %c0_i32_8 = arith.constant 0 : i32
    %11 = arith.cmpi ne, %10, %c0_i32_8 : i32
    scf.if %11 {
      %c0_9 = arith.constant 0 : index
      %c0_10 = arith.constant 0 : index
      %12 = vector.load %arg7[%c0_9, %c0_10] : memref<16x512xf32, #tpu.memory_space<vmem>>, vector<16x512xf32>
      %c0_11 = arith.constant 0 : index
      %c0_12 = arith.constant 0 : index
      %13 = vector.load %arg5[%c0_11, %c0_12] : memref<1x512xf32, #tpu.memory_space<vmem>>, vector<1x512xf32>
      %14 = vector.broadcast %13 : vector<1x512xf32> to vector<16x512xf32>
      %15 = arith.addf %12, %14 : vector<16x512xf32>
      %cst_13 = arith.constant 0.000000e+00 : f32
      %16 = vector.broadcast %cst_13 : f32 to vector<16x512xf32>
      %17 = arith.maximumf %15, %16 : vector<16x512xf32>
      %c0_14 = arith.constant 0 : index
      %c0_15 = arith.constant 0 : index
      %18 = vector.load %arg6[%c0_14, %c0_15] : memref<16x512xf32, #tpu.memory_space<vmem>>, vector<16x512xf32>
      tpu.vector_store %arg6[%c0_14, %c0_15], %17 {strides = array<i32>} : memref<16x512xf32, #tpu.memory_space<vmem>>, vector<16x512xf32>,
    } else {
    }
    return
  }
  func.func @transform_0(%arg0: i32, %arg1: i32, %arg2: i32) -> (i32, i32) {
    %c0_i32 = arith.constant 0 : i32
    return %arg0, %arg2 : i32, i32
  }
  func.func @transform_1(%arg0: i32, %arg1: i32, %arg2: i32) -> (i32, i32) {
    %c0_i32 = arith.constant 0 : i32
    return %arg2, %arg1 : i32, i32
  }
  func.func @transform_2(%arg0: i32, %arg1: i32, %arg2: i32) -> (i32, i32) {
    %c0_i32 = arith.constant 0 : i32
    %c0_i32_0 = arith.constant 0 : i32
    return %c0_i32, %arg1 : i32, i32
  }
  func.func @transform_3(%arg0: i32, %arg1: i32, %arg2: i32) -> (i32, i32) {
    %c0_i32 = arith.constant 0 : i32
    return %arg0, %arg1 : i32, i32
  }
}

module attributes {stable_mosaic.version = 11 : i64} {
  func.func @_matmul_bias_act_kernel(%arg0: i32, %arg1: i32, %arg2: i32, %arg3: memref<16x512xbf16, #tpu.memory_space<vmem>>, %arg4: memref<512x512xbf16, #tpu.memory_space<vmem>>, %arg5: memref<1x512xf32, #tpu.memory_space<vmem>>, %arg6: memref<16x512xf32, #tpu.memory_space<vmem>>, %arg7: memref<16x512xf32, #tpu.memory_space<vmem>>) attributes {dimension_semantics = [#tpu.dimension_semantics<parallel>, #tpu.dimension_semantics<parallel>, #tpu.dimension_semantics<arbitrary>], iteration_bounds = array<i64: 1, 8, 8>, scalar_prefetch = 0 : i64, scratch_operands = 1 : i64, tpu.core_type = #tpu.core_type<tc>, window_params = [{transform_indices = @transform_0, window_bounds = array<i64: 16, 512>}, {transform_indices = @transform_1, window_bounds = array<i64: 512, 512>}, {transform_indices = @transform_2, window_bounds = array<i64: 1, 512>}, {transform_indices = @transform_3, window_bounds = array<i64: 16, 512>}]} {
    %c0_i32 = arith.constant 0 : i32
    %0 = arith.cmpi eq, %arg2, %c0_i32 : i32
    %1 = arith.extui %0 : i1 to i32
    %c0_i32_0 = arith.constant 0 : i32
    %2 = arith.cmpi ne, %1, %c0_i32_0 : i32
    scf.if %2 {
      %cst_9 = arith.constant 0.000000e+00 : f32
      %12 = vector.broadcast %cst_9 : f32 to vector<16x512xf32>
      %c0_10 = arith.constant 0 : index
      %c0_11 = arith.constant 0 : index
      %13 = vector.load %arg7[%c0_10, %c0_11] : memref<16x512xf32, #tpu.memory_space<vmem>>, vector<16x512xf32>
      tpu.vector_store %arg7[%c0_10, %c0_11], %12 {strides = array<i32>} : memref<16x512xf32, #tpu.memory_space<vmem>>, vector<16x512xf32>,
    } else {
    }
    %c0 = arith.constant 0 : index
    %c0_1 = arith.constant 0 : index
    %3 = vector.load %arg7[%c0, %c0_1] : memref<16x512xf32, #tpu.memory_space<vmem>>, vector<16x512xf32>
    %c0_2 = arith.constant 0 : index
    %c0_3 = arith.constant 0 : index
    %4 = vector.load %arg3[%c0_2, %c0_3] : memref<16x512xbf16, #tpu.memory_space<vmem>>, vector<16x512xbf16>
    %c0_4 = arith.constant 0 : index
    %c0_5 = arith.constant 0 : index
    %5 = vector.load %arg4[%c0_4, %c0_5] : memref<512x512xbf16, #tpu.memory_space<vmem>>, vector<512x512xbf16>
    %cst = arith.constant dense<0.000000e+00> : vector<16x512xf32>
    %6 = tpu.matmul %4, %5, %cst {dimension_numbers = #tpu.dot_dimension_numbers<[1], [0], [0], [1], [0, 0, 1, 1], [], []>} : vector<16x512xbf16>, vector<512x512xbf16>, vector<16x512xf32> -> vector<16x512xf32>
    %7 = arith.addf %3, %6 : vector<16x512xf32>
    %c0_6 = arith.constant 0 : index
    %c0_7 = arith.constant 0 : index
    %8 = vector.load %arg7[%c0_6, %c0_7] : memref<16x512xf32, #tpu.memory_space<vmem>>, vector<16x512xf32>
    tpu.vector_store %arg7[%c0_6, %c0_7], %7 {strides = array<i32>} : memref<16x512xf32, #tpu.memory_space<vmem>>, vector<16x512xf32>,
    %c7_i32 = arith.constant 7 : i32
    %9 = arith.cmpi eq, %arg2, %c7_i32 : i32
    %10 = arith.extui %9 : i1 to i32
    %c0_i32_8 = arith.constant 0 : i32
    %11 = arith.cmpi ne, %10, %c0_i32_8 : i32
    scf.if %11 {
      %c0_9 = arith.constant 0 : index
      %c0_10 = arith.constant 0 : index
      %12 = vector.load %arg7[%c0_9, %c0_10] : memref<16x512xf32, #tpu.memory_space<vmem>>, vector<16x512xf32>
      %c0_11 = arith.constant 0 : index
      %c0_12 = arith.constant 0 : index
      %13 = vector.load %arg5[%c0_11, %c0_12] : memref<1x512xf32, #tpu.memory_space<vmem>>, vector<1x512xf32>
      %14 = vector.broadcast %13 : vector<1x512xf32> to vector<16x512xf32>
      %15 = arith.addf %12, %14 : vector<16x512xf32>
      %cst_13 = arith.constant 0.000000e+00 : f32
      %16 = vector.broadcast %cst_13 : f32 to vector<16x512xf32>
      %17 = arith.maximumf %15, %16 : vector<16x512xf32>
      %c0_14 = arith.constant 0 : index
      %c0_15 = arith.constant 0 : index
      %18 = vector.load %arg6[%c0_14, %c0_15] : memref<16x512xf32, #tpu.memory_space<vmem>>, vector<16x512xf32>
      tpu.vector_store %arg6[%c0_14, %c0_15], %17 {strides = array<i32>} : memref<16x512xf32, #tpu.memory_space<vmem>>, vector<16x512xf32>,
    } else {
    }
    return
  }
  func.func @transform_0(%arg0: i32, %arg1: i32, %arg2: i32) -> (i32, i32) {
    %c0_i32 = arith.constant 0 : i32
    return %arg0, %arg2 : i32, i32
  }
  func.func @transform_1(%arg0: i32, %arg1: i32, %arg2: i32) -> (i32, i32) {
    %c0_i32 = arith.constant 0 : i32
    return %arg2, %arg1 : i32, i32
  }
  func.func @transform_2(%arg0: i32, %arg1: i32, %arg2: i32) -> (i32, i32) {
    %c0_i32 = arith.constant 0 : i32
    %c0_i32_0 = arith.constant 0 : i32
    return %c0_i32, %arg1 : i32, i32
  }
  func.func @transform_3(%arg0: i32, %arg1: i32, %arg2: i32) -> (i32, i32) {
    %c0_i32 = arith.constant 0 : i32
    return %arg0, %arg1 : i32, i32
  }
}

module attributes {stable_mosaic.version = 11 : i64} {
  func.func @_matmul_bias_act_kernel(%arg0: i32, %arg1: i32, %arg2: i32, %arg3: memref<16x512xbf16, #tpu.memory_space<vmem>>, %arg4: memref<512x128xbf16, #tpu.memory_space<vmem>>, %arg5: memref<1x128xf32, #tpu.memory_space<vmem>>, %arg6: memref<16x128xf32, #tpu.memory_space<vmem>>, %arg7: memref<16x128xf32, #tpu.memory_space<vmem>>) attributes {dimension_semantics = [#tpu.dimension_semantics<parallel>, #tpu.dimension_semantics<parallel>, #tpu.dimension_semantics<arbitrary>], iteration_bounds = array<i64: 1, 1, 8>, scalar_prefetch = 0 : i64, scratch_operands = 1 : i64, tpu.core_type = #tpu.core_type<tc>, window_params = [{transform_indices = @transform_0, window_bounds = array<i64: 16, 512>}, {transform_indices = @transform_1, window_bounds = array<i64: 512, 128>}, {transform_indices = @transform_2, window_bounds = array<i64: 1, 128>}, {transform_indices = @transform_3, window_bounds = array<i64: 16, 128>}]} {
    %c0_i32 = arith.constant 0 : i32
    %0 = arith.cmpi eq, %arg2, %c0_i32 : i32
    %1 = arith.extui %0 : i1 to i32
    %c0_i32_0 = arith.constant 0 : i32
    %2 = arith.cmpi ne, %1, %c0_i32_0 : i32
    scf.if %2 {
      %cst_9 = arith.constant 0.000000e+00 : f32
      %12 = vector.broadcast %cst_9 : f32 to vector<16x128xf32>
      %c0_10 = arith.constant 0 : index
      %c0_11 = arith.constant 0 : index
      %13 = vector.load %arg7[%c0_10, %c0_11] : memref<16x128xf32, #tpu.memory_space<vmem>>, vector<16x128xf32>
      tpu.vector_store %arg7[%c0_10, %c0_11], %12 {strides = array<i32>} : memref<16x128xf32, #tpu.memory_space<vmem>>, vector<16x128xf32>,
    } else {
    }
    %c0 = arith.constant 0 : index
    %c0_1 = arith.constant 0 : index
    %3 = vector.load %arg7[%c0, %c0_1] : memref<16x128xf32, #tpu.memory_space<vmem>>, vector<16x128xf32>
    %c0_2 = arith.constant 0 : index
    %c0_3 = arith.constant 0 : index
    %4 = vector.load %arg3[%c0_2, %c0_3] : memref<16x512xbf16, #tpu.memory_space<vmem>>, vector<16x512xbf16>
    %c0_4 = arith.constant 0 : index
    %c0_5 = arith.constant 0 : index
    %5 = vector.load %arg4[%c0_4, %c0_5] : memref<512x128xbf16, #tpu.memory_space<vmem>>, vector<512x128xbf16>
    %cst = arith.constant dense<0.000000e+00> : vector<16x128xf32>
    %6 = tpu.matmul %4, %5, %cst {dimension_numbers = #tpu.dot_dimension_numbers<[1], [0], [0], [1], [0, 0, 1, 1], [], []>} : vector<16x512xbf16>, vector<512x128xbf16>, vector<16x128xf32> -> vector<16x128xf32>
    %7 = arith.addf %3, %6 : vector<16x128xf32>
    %c0_6 = arith.constant 0 : index
    %c0_7 = arith.constant 0 : index
    %8 = vector.load %arg7[%c0_6, %c0_7] : memref<16x128xf32, #tpu.memory_space<vmem>>, vector<16x128xf32>
    tpu.vector_store %arg7[%c0_6, %c0_7], %7 {strides = array<i32>} : memref<16x128xf32, #tpu.memory_space<vmem>>, vector<16x128xf32>,
    %c7_i32 = arith.constant 7 : i32
    %9 = arith.cmpi eq, %arg2, %c7_i32 : i32
    %10 = arith.extui %9 : i1 to i32
    %c0_i32_8 = arith.constant 0 : i32
    %11 = arith.cmpi ne, %10, %c0_i32_8 : i32
    scf.if %11 {
      %c0_9 = arith.constant 0 : index
      %c0_10 = arith.constant 0 : index
      %12 = vector.load %arg7[%c0_9, %c0_10] : memref<16x128xf32, #tpu.memory_space<vmem>>, vector<16x128xf32>
      %c0_11 = arith.constant 0 : index
      %c0_12 = arith.constant 0 : index
      %13 = vector.load %arg5[%c0_11, %c0_12] : memref<1x128xf32, #tpu.memory_space<vmem>>, vector<1x128xf32>
      %14 = vector.broadcast %13 : vector<1x128xf32> to vector<16x128xf32>
      %15 = arith.addf %12, %14 : vector<16x128xf32>
      %c0_13 = arith.constant 0 : index
      %c0_14 = arith.constant 0 : index
      %16 = vector.load %arg6[%c0_13, %c0_14] : memref<16x128xf32, #tpu.memory_space<vmem>>, vector<16x128xf32>
      tpu.vector_store %arg6[%c0_13, %c0_14], %15 {strides = array<i32>} : memref<16x128xf32, #tpu.memory_space<vmem>>, vector<16x128xf32>,
    } else {
    }
    return
  }
  func.func @transform_0(%arg0: i32, %arg1: i32, %arg2: i32) -> (i32, i32) {
    %c0_i32 = arith.constant 0 : i32
    return %arg0, %arg2 : i32, i32
  }
  func.func @transform_1(%arg0: i32, %arg1: i32, %arg2: i32) -> (i32, i32) {
    %c0_i32 = arith.constant 0 : i32
    return %arg2, %arg1 : i32, i32
  }
  func.func @transform_2(%arg0: i32, %arg1: i32, %arg2: i32) -> (i32, i32) {
    %c0_i32 = arith.constant 0 : i32
    %c0_i32_0 = arith.constant 0 : i32
    return %c0_i32, %arg1 : i32, i32
  }
  func.func @transform_3(%arg0: i32, %arg1: i32, %arg2: i32) -> (i32, i32) {
    %c0_i32 = arith.constant 0 : i32
    return %arg0, %arg1 : i32, i32
  }
}

</mosaic_0001>

<bundles_post_ra>
// kernel: mynet2_forward.8
= control target key start
LH: loop header
LB: loop body
LE: loop exit
PB: predicated region body
PF: predicated region fallthrough
CT: control target
= control target key end

     0   :  { %s1260_s12 = smov 0   ;;  %s1262_s13 = smov 0   ;;  %s1445_s0 = inlined_call_operand.vmem [shape: bf16[2048,512], index: 0, kind: input, shape index: {}]   ;;  %s1446_s1 = inlined_call_operand.vmem [shape: bf16[512,128], index: 1, kind: input, shape index: {}]   ;;  %s1447_s2 = inlined_call_operand.vmem [shape: f32[1,128], index: 2, kind: input, shape index: {}]   ;;  %s1448_s3 = inlined_call_operand.vmem [shape: f32[2048,128], index: 3, kind: output, shape index: {}]  }
   0x1   :  { %s1264_s14 = smov 0   ;;  %s1266_s15 = smov 0  }
   0x2   :  { %s1268_s16 = smov 0   ;;  %s1270_s17 = smov 0  }
   0x3   :  { %s1272_s18 = smov 0  }
   0x4 LB: > { %s25_s19 = sadd.s32 1, %s1229_s16  ;;  %s32_s20 = sadd.s32 1, %s1233_s17  ;;  %s1237_s18 = sphi %s1272_s18, %s13_s18   ;;  %s1233_s17 = sphi %s1270_s17, %s1454_s17   ;;  %s1229_s16 = sphi %s1268_s16, %s1453_s16   ;;  %s1225_s15 = sphi %s1266_s15, %s1452_s15   ;;  %s1221_s14 = sphi %s1264_s14, %s1451_s14   ;;  %s1217_s13 = sphi %s1262_s13, %s1450_s13   ;;  %s1213_s12 = sphi %s1260_s12, %s1449_s12  }
   0x5   : > { %p26_p0 = scmp.ge.s32.totalorder %s25_s19, 2  ;;  %p48_p1 = scmp.ne.s32.totalorder %s1217_s13, %s1213_s12 }
   0x6   : > { %p49_p2 = scmp.eq.s32.totalorder %s1237_s18, 0  ;;  %s41_s24 = sadd.s32 1, %s1217_s13 }
   0x7   : > { %s1456_s19 = smov (%p26_p0, %s25_s19), 0  ;;  %s1458_s20 = smov (!%p26_p0, %s32_s20), %s1233_s17 }
   0x8   : > { %p50_p3 = por %p49_p2, %p48_p1  ;;  %p34_p4 = scmp.ge.s32.totalorder %s1458_s20, 16 }
   0x9   : > { %s37_s21 = ssub.s32 %s1229_s16, %s1456_s19  ;;  %p932_p6 = scmp.ge.s32.totalorder %s1237_s18, 32 }
   0xa   : > { %s1460_s20 = smov (%p34_p4, %s1458_s20), 0 }
   0xb   : > { %s36_s22 = ssub.s32 %s1233_s17, %s1460_s20  ;;  %162 = sbr.rel (%p932_p6) target bundleno = 39 (0x27), region = 20 }
   0xc   : > { %s38_s23 = sor.u32 %s37_s21, %s36_s22 }
   0xd   : > { %p39_p5 = scmp.eq.s32.totalorder %s38_s23, 0 }
   0xf   : > { %s1311_s25 = scalar_select %p39_p5, %s1217_s13, %s41_s24  }
  0x10   : > { %165 = sbr.rel (!%p50_p3) target bundleno = 39 (0x27), region = 24  ;;  %s167_s26 = sand.u32 (%p50_p3), 1, %s1217_s13  }
  0x11   : > { %s935_s27 = sshll.u32 (%p50_p3), %s1229_s16, 1  ;;  %s933_s28 = sshll.u32 (%p50_p3), %s167_s26, 7 }
  0x12   : > { %s1076_s29 = sshll.u32 (%p50_p3), %s1233_s17, 6  ;;  %s169_s8 = scalar_lea.vmem (%p50_p3), [#allocation3], %s933_s28 }
  0x13   : > { %s173_s30 = sadd.s32 (%p50_p3), %s1076_s29, %s935_s27 }
  0x14   : > { %s937_s4 = sshll.u32 (%p50_p3), %s173_s30, 2 }
  0x15   : > { %s1320_s7 = scalar_lea.vmem %s1445_s0, %s937_s4 }
  0x16   : > { %v234_v0 = vld [vmem:[%s1320_s7] sm:$0xff]  ;;  %v236_v1 = vld [vmem:[%s1320_s7 + $0x10] sm:$0xff] }
  0x17   : > { %v238_v2 = vld [vmem:[%s1320_s7 + $0x20] sm:$0xff]  ;;  %235 = vst [vmem:[%s169_s8] sm:$0xff] %v234_v0  ;;  %v240_v3 = vld [vmem:[%s1320_s7 + $0x30] sm:$0xff] }
  0x18   : > { %237 = vst [vmem:[%s169_s8 + $0x8] sm:$0xff] %v236_v1  ;;  %v242_v4 = vld [vmem:[%s1320_s7 + $0x40] sm:$0xff]  ;;  %v244_v5 = vld [vmem:[%s1320_s7 + $0x50] sm:$0xff] }
  0x19   : > { %239 = vst [vmem:[%s169_s8 + $0x10] sm:$0xff] %v238_v2  ;;  %v246_v6 = vld [vmem:[%s1320_s7 + $0x60] sm:$0xff]  ;;  %v248_v7 = vld [vmem:[%s1320_s7 + $0x70] sm:$0xff] }
  0x1a   : > { %241 = vst [vmem:[%s169_s8 + $0x18] sm:$0xff] %v240_v3  ;;  %v250_v8 = vld [vmem:[%s1320_s7 + $0x80] sm:$0xff]  ;;  %v252_v9 = vld [vmem:[%s1320_s7 + $0x90] sm:$0xff] }
  0x1b   : > { %243 = vst [vmem:[%s169_s8 + $0x20] sm:$0xff] %v242_v4  ;;  %v254_v10 = vld [vmem:[%s1320_s7 + $0xa0] sm:$0xff]  ;;  %v256_v11 = vld [vmem:[%s1320_s7 + $0xb0] sm:$0xff] }
  0x1c   : > { %245 = vst [vmem:[%s169_s8 + $0x28] sm:$0xff] %v244_v5  ;;  %v258_v12 = vld [vmem:[%s1320_s7 + $0xc0] sm:$0xff]  ;;  %v260_v13 = vld [vmem:[%s1320_s7 + $0xd0] sm:$0xff] }
  0x1d   : > { %247 = vst [vmem:[%s169_s8 + $0x30] sm:$0xff] %v246_v6  ;;  %v262_v14 = vld [vmem:[%s1320_s7 + $0xe0] sm:$0xff]  ;;  %v264_v15 = vld [vmem:[%s1320_s7 + $0xf0] sm:$0xff] }
  0x1e   : > { %249 = vst [vmem:[%s169_s8 + $0x38] sm:$0xff] %v248_v7 }
  0x1f   : > { %251 = vst [vmem:[%s169_s8 + $0x40] sm:$0xff] %v250_v8 }
  0x20   : > { %253 = vst [vmem:[%s169_s8 + $0x48] sm:$0xff] %v252_v9 }
  0x21   : > { %255 = vst [vmem:[%s169_s8 + $0x50] sm:$0xff] %v254_v10 }
  0x22   : > { %257 = vst [vmem:[%s169_s8 + $0x58] sm:$0xff] %v256_v11 }
  0x23   : > { %259 = vst [vmem:[%s169_s8 + $0x60] sm:$0xff] %v258_v12 }
  0x24   : > { %261 = vst [vmem:[%s169_s8 + $0x68] sm:$0xff] %v260_v13 }
  0x25   : > { %263 = vst [vmem:[%s169_s8 + $0x70] sm:$0xff] %v262_v14 }
  0x26   : > { %265 = vst [vmem:[%s169_s8 + $0x78] sm:$0xff] %v264_v15 }
  0x27 PF: > { %p938_p7 = scmp.ge.s32.totalorder %s1237_s18, 1  ;;  %p282_p8 = scmp.lt.s32.totalorder %s1237_s18, 33 }
  0x29   : > { %p283_p9 = pnand %p938_p7, %p282_p8 }
  0x2a   : > { %s289_s9 = sand.u32 (!%p283_p9), 1, %s1213_s12   ;;  %s940_s10 = sshll.u32 (!%p283_p9), %s1221_s14, 5 }
  0x2b   : > { %286 = sbr.rel (%p283_p9) target bundleno = 320 (0x140), region = 66  ;;  %s939_s11 = sshll.u32 (!%p283_p9), %s289_s9, 7 }
  0x2c   : > { %p329_p10 = scmp.lt.s32.totalorder (!%p283_p9), %s940_s10, 63  ;;  %s942_s21 = sshll.u32 (!%p283_p9), %s1225_s15, 4 }
  0x2d   : > { %p341_p11 = scmp.lt.s32.totalorder (!%p283_p9), %s942_s21, 255  ;;  %s1353_s12 = scalar_lea.vmem (!%p283_p9), [#allocation3], %s939_s11 }
  0x2e   : > { %p944_p12 = scmp.ne.s32.totalorder (!%p283_p9), %s1221_s14, 0 }
  0x30   : > { %s1462_s10 = smov (!%p329_p10, %s940_s10), 63  ;;  %s1464_s21 = smov (!%p341_p11, %s942_s21), 255 }
  0x31   : > { %s941_s22 = sshll.u32 %s1462_s10, 2  ;;  %s943_s27 = sshll.u32 %s1464_s21, 3 }
  0x32   : > { %s1346_s26 = scalar_lea.vmem %s1446_s1, %s941_s22  ;;  %s1351_s30 = scalar_lea.vmem %s1448_s3, %s943_s27 }
  0x33   : > { %352 = sbr.rel (%p944_p12) target bundleno = 73 (0x49), region = 74 }
  0x38   : > { %v1239_v16 = vmov 0.0  }
  0x39   : > { %353 = vst [vmem:[#allocation2 + $0x30] sm:$0xff] %v1239_v16 }
  0x3a   : > { %354 = vst [vmem:[#allocation2] sm:$0xff] %v1239_v16 }
  0x3b   : > { %355 = vst [vmem:[#allocation2 + $0x58] sm:$0xff] %v1239_v16 }
  0x3c   : > { %356 = vst [vmem:[#allocation2 + $0x18] sm:$0xff] %v1239_v16 }
  0x3d   : > { %357 = vst [vmem:[#allocation2 + $0x50] sm:$0xff] %v1239_v16 }
  0x3e   : > { %358 = vst [vmem:[#allocation2 + $0x68] sm:$0xff] %v1239_v16 }
  0x3f   : > { %359 = vst [vmem:[#allocation2 + $0x8] sm:$0xff] %v1239_v16 }
  0x40   : > { %360 = vst [vmem:[#allocation2 + $0x48] sm:$0xff] %v1239_v16 }
  0x41   : > { %361 = vst [vmem:[#allocation2 + $0x40] sm:$0xff] %v1239_v16 }
  0x42   : > { %362 = vst [vmem:[#allocation2 + $0x20] sm:$0xff] %v1239_v16 }
  0x43   : > { %363 = vst [vmem:[#allocation2 + $0x10] sm:$0xff] %v1239_v16 }
  0x44   : > { %364 = vst [vmem:[#allocation2 + $0x38] sm:$0xff] %v1239_v16 }
  0x45   : > { %365 = vst [vmem:[#allocation2 + $0x60] sm:$0xff] %v1239_v16 }
  0x46   : > { %366 = vst [vmem:[#allocation2 + $0x70] sm:$0xff] %v1239_v16 }
  0x47   : > { %367 = vst [vmem:[#allocation2 + $0x78] sm:$0xff] %v1239_v16 }
  0x48   : > { %368 = vst [vmem:[#allocation2 + $0x28] sm:$0xff] %v1239_v16 }
  0x49 PF: > { %v1100_v17 = vld [vmem:[%s1346_s26 + $0x38] sm:$0xff]  ;;  %v1099_v19 = vld [vmem:[%s1346_s26 + $0x30] sm:$0xff]  ;;  %v1098_v21 = vld [vmem:[%s1346_s26 + $0x28] sm:$0xff]  ;;  %p1073_p13 = scmp.ne.s32.totalorder %s1221_s14, 1 }
  0x4a   : > { %v1108_v18 = vld [vmem:[%s1346_s26 + $0x78] sm:$0xff]  ;;  %609 = vmatpush.bf16.msra.mxu0 %v1100_v17  ;;  %1109 = vmatpush.bf16.msra.mxu2 %v1100_v17  ;;  %v1107_v20 = vld [vmem:[%s1346_s26 + $0x70] sm:$0xff]  ;;  %v1106_v22 = vld [vmem:[%s1346_s26 + $0x68] sm:$0xff] }
  0x4b   : > { %658 = vmatpush.bf16.msra.mxu1 %v1108_v18  ;;  %1117 = vmatpush.bf16.msra.mxu3 %v1108_v18  ;;  %v1097_v23 = vld [vmem:[%s1346_s26 + $0x20] sm:$0xff]  ;;  %v1096_v25 = vld [vmem:[%s1346_s26 + $0x18] sm:$0xff]  ;;  %v1095_v27 = vld [vmem:[%s1346_s26 + $0x10] sm:$0xff] }
  0x4c   : > { %v1105_v24 = vld [vmem:[%s1346_s26 + $0x60] sm:$0xff]  ;;  %v1104_v26 = vld [vmem:[%s1346_s26 + $0x58] sm:$0xff]  ;;  %v1103_v28 = vld [vmem:[%s1346_s26 + $0x50] sm:$0xff] }
  0x4d   : > { %v1094_v29 = vld [vmem:[%s1346_s26 + $0x8] sm:$0xff]  ;;  %v1093_v31 = vld [vmem:[%s1346_s26] sm:$0xff]  ;;  %v955_v45 = vld [vmem:[%s1353_s12 + $0x10] sm:$0xf] }
  0x4e   : > { %610 = vmatpush.bf16.msra.mxu0 %v1099_v19  ;;  %1110 = vmatpush.bf16.msra.mxu2 %v1099_v19  ;;  %v1102_v30 = vld [vmem:[%s1346_s26 + $0x48] sm:$0xff]  ;;  %v1101_v32 = vld [vmem:[%s1346_s26 + $0x40] sm:$0xff]  ;;  %v1080_v46 = vld [vmem:[%s1353_s12 + $0x14] sm:$0xf0] }
  0x4f   : > { %659 = vmatpush.bf16.msra.mxu1 %v1107_v20  ;;  %1118 = vmatpush.bf16.msra.mxu3 %v1107_v20  ;;  %v947_v33 = vld [vmem:[%s1353_s12] sm:$0xf]  ;;  %v1078_v34 = vld [vmem:[%s1353_s12 + $0x4] sm:$0xf0]  ;;  %v1077_v37 = vld [vmem:[%s1353_s12 + $0x4] sm:$0xf]  ;;  %v956_v53 = vor.u32 %v1080_v46, %v955_v45 }
  0x50   : > { %v979_v35 = vld [vmem:[%s1353_s12 + $0x40] sm:$0xf]  ;;  %v1086_v36 = vld [vmem:[%s1353_s12 + $0x44] sm:$0xf0]  ;;  %v949_v38 = vld [vmem:[%s1353_s12 + $0x8] sm:$0xf0]  ;;  %v948_v41 = vor.u32 %v1078_v34, %v947_v33 }
  0x51   : > { %v1085_v39 = vld [vmem:[%s1353_s12 + $0x44] sm:$0xf]  ;;  %v981_v40 = vld [vmem:[%s1353_s12 + $0x48] sm:$0xf0]  ;;  %v980_v42 = vor.u32 %v1086_v36, %v979_v35  ;;  %v952_v43 = vor.u32 %v1077_v37, %v949_v38  ;;  %v987_v47 = vld [vmem:[%s1353_s12 + $0x50] sm:$0xf] }
  0x52   : > { %611 = vmatpush.bf16.msra.mxu0 %v1098_v21  ;;  %1111 = vmatpush.bf16.msra.mxu2 %v1098_v21  ;;  %v984_v44 = vor.u32 %v1085_v39, %v981_v40  ;;  %v1088_v48 = vld [vmem:[%s1353_s12 + $0x54] sm:$0xf0]  ;;  %v1079_v49 = vld [vmem:[%s1353_s12 + $0x14] sm:$0xf]  ;;  %v957_v50 = vld [vmem:[%s1353_s12 + $0x18] sm:$0xf0] }
  0x53   : > { %660 = vmatpush.bf16.msra.mxu1 %v1106_v22  ;;  %1119 = vmatpush.bf16.msra.mxu3 %v1106_v22  ;;  %v1087_v51 = vld [vmem:[%s1353_s12 + $0x54] sm:$0xf]  ;;  %v989_v52 = vld [vmem:[%s1353_s12 + $0x58] sm:$0xf0]  ;;  %v988_v54 = vor.u32 %v1088_v48, %v987_v47  ;;  %v960_v55 = vor.u32 %v1079_v49, %v957_v50  ;;  %v963_v57 = vld [vmem:[%s1353_s12 + $0x20] sm:$0xf] }
  0x54   : > { %v992_v56 = vor.u32 %v1087_v51, %v989_v52  ;;  %v1082_v58 = vld [vmem:[%s1353_s12 + $0x24] sm:$0xf0]  ;;  %v995_v59 = vld [vmem:[%s1353_s12 + $0x60] sm:$0xf]  ;;  %v1081_v61 = vld [vmem:[%s1353_s12 + $0x24] sm:$0xf] }
  0x55   : > { %v1090_v60 = vld [vmem:[%s1353_s12 + $0x64] sm:$0xf0]  ;;  %v965_v62 = vld [vmem:[%s1353_s12 + $0x28] sm:$0xf0]  ;;  %v1089_v63 = vld [vmem:[%s1353_s12 + $0x64] sm:$0xf]  ;;  %v964_v1 = vor.u32 %v1082_v58, %v963_v57 }
  0x56   : > { %612 = vmatpush.bf16.msra.mxu0 %v1097_v23  ;;  %1112 = vmatpush.bf16.msra.mxu2 %v1097_v23  ;;  %v997_v0 = vld [vmem:[%s1353_s12 + $0x68] sm:$0xf0]  ;;  %v996_v2 = vor.u32 %v1090_v60, %v995_v59  ;;  %v968_v3 = vor.u32 %v1081_v61, %v965_v62  ;;  %v971_v5 = vld [vmem:[%s1353_s12 + $0x30] sm:$0xf]  ;;  %v1084_v6 = vld [vmem:[%s1353_s12 + $0x34] sm:$0xf0] }
  0x57   : > { %661 = vmatpush.bf16.msra.mxu1 %v1105_v24  ;;  %1120 = vmatpush.bf16.msra.mxu3 %v1105_v24  ;;  %v1000_v4 = vor.u32 %v1089_v63, %v997_v0  ;;  %v1003_v7 = vld [vmem:[%s1353_s12 + $0x70] sm:$0xf]  ;;  %v1092_v8 = vld [vmem:[%s1353_s12 + $0x74] sm:$0xf0]  ;;  %v1083_v9 = vld [vmem:[%s1353_s12 + $0x34] sm:$0xf]  ;;  %v972_v13 = vor.u32 %v1084_v6, %v971_v5 }
  0x58   : > { %v973_v10 = vld [vmem:[%s1353_s12 + $0x38] sm:$0xf0]  ;;  %v1091_v11 = vld [vmem:[%s1353_s12 + $0x74] sm:$0xf]  ;;  %v1004_v14 = vor.u32 %v1092_v8, %v1003_v7  ;;  %v377_v23 = vld [vmem:[#allocation2 + $0x40] sm:$0xff] }
  0x59   : > { %v1005_v12 = vld [vmem:[%s1353_s12 + $0x78] sm:$0xf0]  ;;  %v976_v15 = vor.u32 %v1083_v9, %v973_v10  ;;  %v369_v18 = vld [vmem:[#allocation2 + $0x30] sm:$0xff]  ;;  %v378_v33 = vld [vmem:[#allocation2 + $0x20] sm:$0xff] }
  0x5a   : > { %613 = vmatpush.bf16.msra.mxu0 %v1096_v25  ;;  %1113 = vmatpush.bf16.msra.mxu2 %v1096_v25  ;;  %v1008_v16 = vor.u32 %v1091_v11, %v1005_v12  ;;  %v371_v37 = vld [vmem:[#allocation2 + $0x58] sm:$0xff]  ;;  %v373_v57 = vld [vmem:[#allocation2 + $0x50] sm:$0xff]  ;;  %v381_v63 = vld [vmem:[#allocation2 + $0x60] sm:$0xff] }
  0x5b   : > { %662 = vmatpush.bf16.msra.mxu1 %v1104_v26  ;;  %1121 = vmatpush.bf16.msra.mxu3 %v1104_v26  ;;  %v372_v47 = vld [vmem:[#allocation2 + $0x18] sm:$0xff]  ;;  %v382_v9 = vld [vmem:[#allocation2 + $0x70] sm:$0xff] }
  0x5e   : > { %614 = vmatpush.bf16.msra.mxu0 %v1095_v27  ;;  %1114 = vmatpush.bf16.msra.mxu2 %v1095_v27  ;;  %v370_v27 = vld [vmem:[#allocation2] sm:$0xff] }
  0x5f   : > { %663 = vmatpush.bf16.msra.mxu1 %v1103_v28  ;;  %1122 = vmatpush.bf16.msra.mxu3 %v1103_v28 }
  0x62   : > { %615 = vmatpush.bf16.msra.mxu0 %v1094_v29  ;;  %1115 = vmatpush.bf16.msra.mxu2 %v1094_v29 }
  0x63   : > { %664 = vmatpush.bf16.msra.mxu1 %v1102_v30  ;;  %1123 = vmatpush.bf16.msra.mxu3 %v1102_v30 }
  0x66   : > { %616 = vmatpush.bf16.msra.mxu0 %v1093_v31  ;;  %1116 = vmatpush.bf16.msra.mxu2 %v1093_v31 }
  0x67   : > { %665 = vmatpush.bf16.msra.mxu1 %v1101_v32  ;;  %1124 = vmatpush.bf16.msra.mxu3 %v1101_v32 }
  0x69   : > { %617 = vmatmul.bf16.vlgmr.msra.gmra.mxu0 %v948_v41  ;;  %637 = vmatmul.bf16.vlgmr.msra.gmra.mxu2 %v980_v42 }
  0x6a   : > { %666 = vmatmul.bf16.vlgmr.msra.gmra.mxu1 %v952_v43  ;;  %686 = vmatmul.bf16.vlgmr.msra.gmra.mxu3 %v984_v44  ;;  %v379_v43 = vld [vmem:[#allocation2 + $0x10] sm:$0xff] }
  0x79   : > { %622 = vmatmul.bf16.gmra.mxu0 %v956_v53  ;;  %642 = vmatmul.bf16.gmra.mxu2 %v988_v54  ;;  %v380_v53 = vld [vmem:[#allocation2 + $0x38] sm:$0xff] }
  0x7a   : > { %671 = vmatmul.bf16.gmra.mxu1 %v960_v55  ;;  %691 = vmatmul.bf16.gmra.mxu3 %v992_v56 }
  0x89   : > { %627 = vmatmul.bf16.gmra.mxu0 %v964_v1  ;;  %647 = vmatmul.bf16.gmra.mxu2 %v996_v2 }
  0x8a   : > { %676 = vmatmul.bf16.gmra.mxu1 %v968_v3  ;;  %696 = vmatmul.bf16.gmra.mxu3 %v1000_v4  ;;  %v374_v3 = vld [vmem:[#allocation2 + $0x68] sm:$0xff] }
  0x99   : > { %632 = vmatmul.bf16.gmra.mxu0 %v972_v13  ;;  %652 = vmatmul.bf16.gmra.mxu2 %v1004_v14  ;;  %v375_v13 = vld [vmem:[#allocation2 + $0x8] sm:$0xff] }
  0x9a   : > { %681 = vmatmul.bf16.gmra.mxu1 %v976_v15  ;;  %701 = vmatmul.bf16.gmra.mxu3 %v1008_v16 }
  0xe6   : > { %v618_v17 = vpop.f32.mrf.mxu0 }
  0xe7   : > { %v667_v19 = vpop.f32.mrf.mxu1 }
  0xe8   : > { %v668_v20 = vadd.f32 %v667_v19, %v618_v17  ;;  %v383_v19 = vld [vmem:[#allocation2 + $0x78] sm:$0xff] }
  0xea   : > { %v707_v21 = vadd.f32 %v668_v20, %v369_v18 }
  0xec   : > { %723 = vst [vmem:[#allocation2 + $0x30] sm:$0xff] %v707_v21  ;;  %v638_v22 = vpop.f32.mrf.mxu2 }
  0xed   : > { %v687_v24 = vpop.f32.mrf.mxu3 }
  0xee   : > { %v688_v25 = vadd.f32 %v687_v24, %v638_v22  ;;  %v620_v26 = vpop.f32.mrf.mxu0 }
  0xef   : > { %v669_v28 = vpop.f32.mrf.mxu1 }
  0xf0   : > { %v715_v29 = vadd.f32 %v688_v25, %v377_v23  ;;  %v670_v30 = vadd.f32 %v669_v28, %v620_v26  ;;  %v376_v23 = vld [vmem:[#allocation2 + $0x48] sm:$0xff] }
  0xf2   : > { %731 = vst [vmem:[#allocation2 + $0x40] sm:$0xff] %v715_v29  ;;  %v708_v31 = vadd.f32 %v670_v30, %v370_v27  ;;  %v384_v29 = vld [vmem:[#allocation2 + $0x28] sm:$0xff] }
  0xf4   : > { %724 = vst [vmem:[#allocation2] sm:$0xff] %v708_v31  ;;  %v640_v32 = vpop.f32.mrf.mxu2 }
  0xf5   : > { %v689_v34 = vpop.f32.mrf.mxu3 }
  0xf6   : > { %v690_v35 = vadd.f32 %v689_v34, %v640_v32  ;;  %v623_v36 = vpop.f32.mrf.mxu0 }
  0xf7   : > { %v672_v38 = vpop.f32.mrf.mxu1 }
  0xf8   : > { %v716_v39 = vadd.f32 %v690_v35, %v378_v33  ;;  %v673_v40 = vadd.f32 %v672_v38, %v623_v36 }
  0xfa   : > { %732 = vst [vmem:[#allocation2 + $0x20] sm:$0xff] %v716_v39  ;;  %v709_v41 = vadd.f32 %v673_v40, %v371_v37 }
  0xfc   : > { %725 = vst [vmem:[#allocation2 + $0x58] sm:$0xff] %v709_v41  ;;  %v643_v42 = vpop.f32.mrf.mxu2 }
  0xfd   : > { %v692_v44 = vpop.f32.mrf.mxu3 }
  0xfe   : > { %v693_v45 = vadd.f32 %v692_v44, %v643_v42  ;;  %v625_v46 = vpop.f32.mrf.mxu0 }
  0xff   : > { %v674_v48 = vpop.f32.mrf.mxu1 }
 0x100   : > { %v717_v49 = vadd.f32 %v693_v45, %v379_v43  ;;  %v675_v50 = vadd.f32 %v674_v48, %v625_v46 }
 0x102   : > { %733 = vst [vmem:[#allocation2 + $0x10] sm:$0xff] %v717_v49  ;;  %v710_v51 = vadd.f32 %v675_v50, %v372_v47 }
 0x104   : > { %726 = vst [vmem:[#allocation2 + $0x18] sm:$0xff] %v710_v51  ;;  %v645_v52 = vpop.f32.mrf.mxu2 }
 0x105   : > { %v694_v54 = vpop.f32.mrf.mxu3 }
 0x106   : > { %v695_v55 = vadd.f32 %v694_v54, %v645_v52  ;;  %v628_v56 = vpop.f32.mrf.mxu0 }
 0x107   : > { %v677_v58 = vpop.f32.mrf.mxu1 }
 0x108   : > { %v718_v59 = vadd.f32 %v695_v55, %v380_v53  ;;  %v678_v60 = vadd.f32 %v677_v58, %v628_v56 }
 0x10a   : > { %734 = vst [vmem:[#allocation2 + $0x38] sm:$0xff] %v718_v59  ;;  %v711_v61 = vadd.f32 %v678_v60, %v373_v57 }
 0x10c   : > { %727 = vst [vmem:[#allocation2 + $0x50] sm:$0xff] %v711_v61  ;;  %v648_v62 = vpop.f32.mrf.mxu2 }
 0x10d   : > { %v697_v0 = vpop.f32.mrf.mxu3 }
 0x10e   : > { %v698_v1 = vadd.f32 %v697_v0, %v648_v62  ;;  %v630_v2 = vpop.f32.mrf.mxu0 }
 0x10f   : > { %v679_v4 = vpop.f32.mrf.mxu1 }
 0x110   : > { %v719_v5 = vadd.f32 %v698_v1, %v381_v63  ;;  %v680_v6 = vadd.f32 %v679_v4, %v630_v2 }
 0x112   : > { %735 = vst [vmem:[#allocation2 + $0x60] sm:$0xff] %v719_v5  ;;  %v712_v7 = vadd.f32 %v680_v6, %v374_v3 }
 0x114   : > { %728 = vst [vmem:[#allocation2 + $0x68] sm:$0xff] %v712_v7  ;;  %v650_v8 = vpop.f32.mrf.mxu2 }
 0x115   : > { %v699_v10 = vpop.f32.mrf.mxu3 }
 0x116   : > { %v700_v11 = vadd.f32 %v699_v10, %v650_v8  ;;  %v633_v12 = vpop.f32.mrf.mxu0 }
 0x117   : > { %v682_v14 = vpop.f32.mrf.mxu1 }
 0x118   : > { %v720_v15 = vadd.f32 %v700_v11, %v382_v9  ;;  %v683_v16 = vadd.f32 %v682_v14, %v633_v12 }
 0x11a   : > { %736 = vst [vmem:[#allocation2 + $0x70] sm:$0xff] %v720_v15  ;;  %v713_v17 = vadd.f32 %v683_v16, %v375_v13 }
 0x11c   : > { %729 = vst [vmem:[#allocation2 + $0x8] sm:$0xff] %v713_v17  ;;  %v653_v18 = vpop.f32.mrf.mxu2 }
 0x11d   : > { %v702_v20 = vpop.f32.mrf.mxu3 }
 0x11e   : > { %v703_v21 = vadd.f32 %v702_v20, %v653_v18  ;;  %v635_v22 = vpop.f32.mrf.mxu0 }
 0x11f   : > { %v684_v24 = vpop.f32.mrf.mxu1 }
 0x120   : > { %v721_v25 = vadd.f32 %v703_v21, %v383_v19  ;;  %v685_v26 = vadd.f32 %v684_v24, %v635_v22 }
 0x122   : > { %737 = vst [vmem:[#allocation2 + $0x78] sm:$0xff] %v721_v25  ;;  %v714_v27 = vadd.f32 %v685_v26, %v376_v23 }
 0x124   : > { %730 = vst [vmem:[#allocation2 + $0x48] sm:$0xff] %v714_v27  ;;  %v655_v28 = vpop.f32.mrf.mxu2 }
 0x125   : > { %v704_v30 = vpop.f32.mrf.mxu3 }
 0x126   : > { %v705_v31 = vadd.f32 %v704_v30, %v655_v28  ;;  %742 = sbr.rel (%p1073_p13) target bundleno = 320 (0x140), region = 78 }
 0x128   : > { %v722_v32 = vadd.f32 %v705_v31, %v384_v29 }
 0x12a   : > { %738 = vst [vmem:[#allocation2 + $0x28] sm:$0xff] %v722_v32 }
 0x12b   : > { %v743_v33 = vld [vmem:[#allocation2 + $0x30] sm:$0xff]  ;;  %v1182_v34 = vld [vmem:[%s1447_s2] ss:$0 sm:$0xff]  ;;  %v745_v36 = vld [vmem:[#allocation2 + $0x58] sm:$0xff] }
 0x12c   : > { %v744_v35 = vld [vmem:[#allocation2] sm:$0xff]  ;;  %v746_v37 = vld [vmem:[#allocation2 + $0x18] sm:$0xff]  ;;  %v763_v38 = vadd.f32 %v1182_v34, %v743_v33  ;;  %v765_v40 = vadd.f32 %v1182_v34, %v745_v36  ;;  %v747_v42 = vld [vmem:[#allocation2 + $0x50] sm:$0xff] }
 0x12d   : > { %v764_v39 = vadd.f32 %v1182_v34, %v744_v35  ;;  %v766_v41 = vadd.f32 %v1182_v34, %v746_v37  ;;  %v748_v43 = vld [vmem:[#allocation2 + $0x68] sm:$0xff]  ;;  %v767_v45 = vadd.f32 %v1182_v34, %v747_v42  ;;  %v751_v48 = vld [vmem:[#allocation2 + $0x40] sm:$0xff]  ;;  %v753_v56 = vld [vmem:[#allocation2 + $0x10] sm:$0xff] }
 0x12e   : > { %v749_v44 = vld [vmem:[#allocation2 + $0x8] sm:$0xff]  ;;  %v768_v46 = vadd.f32 %v1182_v34, %v748_v43  ;;  %v779_v49 = vmax.f32 %v763_v38, 0.0  ;;  %v781_v51 = vmax.f32 %v765_v40, 0.0  ;;  %v752_v53 = vld [vmem:[#allocation2 + $0x20] sm:$0xff]  ;;  %v771_v58 = vadd.f32 %v1182_v34, %v751_v48  ;;  %v754_v59 = vld [vmem:[#allocation2 + $0x38] sm:$0xff] }
 0x12f   : > { %v750_v47 = vld [vmem:[#allocation2 + $0x48] sm:$0xff]  ;;  %v780_v50 = vmax.f32 %v764_v39, 0.0  ;;  %v769_v52 = vadd.f32 %v1182_v34, %v749_v44  ;;  %v782_v54 = vmax.f32 %v766_v41, 0.0  ;;  %v783_v57 = vmax.f32 %v767_v45, 0.0  ;;  %v755_v62 = vld [vmem:[#allocation2 + $0x60] sm:$0xff]  ;;  %v756_v1 = vld [vmem:[#allocation2 + $0x70] sm:$0xff] }
 0x130   : > { %v770_v55 = vadd.f32 %v1182_v34, %v750_v47  ;;  %795 = vst [vmem:[%s1351_s30] sm:$0xff] %v779_v49  ;;  %v784_v60 = vmax.f32 %v768_v46, 0.0  ;;  %v772_v61 = vadd.f32 %v1182_v34, %v752_v53  ;;  %v773_v0 = vadd.f32 %v1182_v34, %v753_v56  ;;  %v757_v4 = vld [vmem:[#allocation2 + $0x78] sm:$0xff] }
 0x131   : > { %796 = vst [vmem:[%s1351_s30 + $0x8] sm:$0xff] %v780_v50  ;;  %v785_v63 = vmax.f32 %v769_v52, 0.0  ;;  %v774_v3 = vadd.f32 %v1182_v34, %v754_v59  ;;  %v787_v5 = vmax.f32 %v771_v58, 0.0  ;;  %v775_v6 = vadd.f32 %v1182_v34, %v755_v62  ;;  %v758_v7 = vld [vmem:[#allocation2 + $0x28] sm:$0xff] }
 0x132   : > { %797 = vst [vmem:[%s1351_s30 + $0x10] sm:$0xff] %v781_v51  ;;  %v786_v2 = vmax.f32 %v770_v55, 0.0  ;;  %v788_v8 = vmax.f32 %v772_v61, 0.0  ;;  %v776_v9 = vadd.f32 %v1182_v34, %v756_v1  ;;  %v789_v10 = vmax.f32 %v773_v0, 0.0 }
 0x133   : > { %798 = vst [vmem:[%s1351_s30 + $0x18] sm:$0xff] %v782_v54  ;;  %v777_v11 = vadd.f32 %v1182_v34, %v757_v4  ;;  %v790_v12 = vmax.f32 %v774_v3, 0.0  ;;  %v778_v13 = vadd.f32 %v1182_v34, %v758_v7  ;;  %v791_v14 = vmax.f32 %v775_v6, 0.0 }
 0x134   : > { %799 = vst [vmem:[%s1351_s30 + $0x20] sm:$0xff] %v783_v57  ;;  %v792_v15 = vmax.f32 %v776_v9, 0.0 }
 0x135   : > { %800 = vst [vmem:[%s1351_s30 + $0x28] sm:$0xff] %v784_v60  ;;  %v793_v16 = vmax.f32 %v777_v11, 0.0  ;;  %v794_v17 = vmax.f32 %v778_v13, 0.0 }
 0x136   : > { %801 = vst [vmem:[%s1351_s30 + $0x30] sm:$0xff] %v785_v63 }
 0x137   : > { %802 = vst [vmem:[%s1351_s30 + $0x38] sm:$0xff] %v786_v2 }
 0x138   : > { %803 = vst [vmem:[%s1351_s30 + $0x40] sm:$0xff] %v787_v5 }
 0x139   : > { %804 = vst [vmem:[%s1351_s30 + $0x48] sm:$0xff] %v788_v8 }
 0x13a   : > { %805 = vst [vmem:[%s1351_s30 + $0x50] sm:$0xff] %v789_v10 }
 0x13b   : > { %806 = vst [vmem:[%s1351_s30 + $0x58] sm:$0xff] %v790_v12 }
 0x13c   : > { %807 = vst [vmem:[%s1351_s30 + $0x60] sm:$0xff] %v791_v14 }
 0x13d   : > { %808 = vst [vmem:[%s1351_s30 + $0x68] sm:$0xff] %v792_v15 }
 0x13e   : > { %809 = vst [vmem:[%s1351_s30 + $0x70] sm:$0xff] %v793_v16 }
 0x13f   : > { %810 = vst [vmem:[%s1351_s30 + $0x78] sm:$0xff] %v794_v17 }
 0x140 PF: > { %s13_s18 = sadd.s32 1, %s1237_s18   ;;  %s1449_s12 = smov %s1217_s13 }
 0x141   : > { %p10_p0 = scmp.ge.s32.totalorder %s13_s18, 34   ;;  %s1450_s13 = smov %s1311_s25 }
 0x142   : > { %s1451_s14 = smov %s1229_s16  ;;  %s1452_s15 = smov %s1233_s17 }
 0x143   : > { %s1453_s16 = smov %s1456_s19  ;;  %s1454_s17 = smov %s1460_s20 }
 0x144   :  { %12 = sbr.rel (!%p10_p0) target bundleno = 4 (0x4), region = 119 }

// kernel: mynet2_forward.9
= control target key start
LH: loop header
LB: loop body
LE: loop exit
PB: predicated region body
PF: predicated region fallthrough
CT: control target
= control target key end

     0   :  { %s1851_s0 = inlined_call_operand.vmem [shape: bf16[512,3328], index: 0, kind: input, shape index: {}]   ;;  %s1852_s1 = inlined_call_operand.hbm [shape: bf16[3328,256], index: 1, kind: input, shape index: {}]   ;;  %s1853_s2 = inlined_call_operand.vmem [shape: f32[1,256], index: 2, kind: input, shape index: {}]   ;;  %s1854_s3 = inlined_call_operand.vmem [shape: f32[512,256], index: 3, kind: output, shape index: {}]  }
   0x1   :  { %1860 = sst [smem:[#allocation16_spill]] %s1851_s0 }
   0x2   :  { %1861 = sst [smem:[#allocation17_spill]] %s1854_s3 }
   0x3   :  { %8 = vsyncpa [#allocation5], 0 }
   0x4   :  { %10 = vsyncpa [#allocation5 + $0x1], 0  ;;  %s1522_s12 = smov 0   ;;  %s1524_s13 = smov 0  }
   0x5   :  { %s1526_s14 = smov 0   ;;  %s1528_s15 = smov 0  }
   0x6   :  { %s1530_s16 = smov 0   ;;  %s1532_s17 = smov 0  }
   0x7   :  { %s1534_s18 = smov 0   ;;  %s1536_s19 = smov 0  }
   0x8   :  { %s1538_s20 = smov 0   ;;  %s1540_s21 = smov 0  }
   0x9   :  { %s1542_s22 = smov 0   ;;  %s1544_s23 = smov 0  }
   0xa   :  { %s1546_s24 = smov 0   ;;  %s1548_s25 = smov 0  }
   0xb LB: > { %1862 = sst [smem:[#allocation8_spill]] %s1468_s18  ;;  %s28_s27 = sadd.s32 1, %s1484_s22  ;;  %s1496_s25 = sphi %s1548_s25, %s16_s25   ;;  %s1492_s24 = sphi %s1546_s24, %s1898_s24   ;;  %s1488_s23 = sphi %s1544_s23, %s1897_s23   ;;  %s1484_s22 = sphi %s1542_s22, %s1896_s22   ;;  %s1480_s21 = sphi %s1540_s21, %s1884_s21   ;;  %s1476_s20 = sphi %s1538_s20, %s1895_s20   ;;  %s1472_s19 = sphi %s1536_s19, %s1894_s19   ;;  %s1468_s18 = sphi %s1534_s18, %s1883_s18   ;;  %s1464_s17 = sphi %s1532_s17, %s1882_s17   ;;  %s1460_s16 = sphi %s1530_s16, %s1893_s16   ;;  %s1456_s15 = sphi %s1528_s15, %s1892_s15   ;;  %s1452_s14 = sphi %s1526_s14, %s1891_s14   ;;  %s1448_s13 = sphi %s1524_s13, %s1890_s13   ;;  %s1444_s12 = sphi %s1522_s12, %s1889_s12  }
   0xc   : > { %1863 = sst [smem:[#allocation9_spill]] %s1472_s19  ;;  %p29_p0 = scmp.ge.s32.totalorder %s28_s27, 13 }
   0xd   : > { %1864 = sst [smem:[#allocation10_spill]] %s1480_s21  ;;  %s31_s28 = sadd.s32 1, %s1488_s23 }
   0xe   : > { %1865 = sst [smem:[#allocation11_spill]] %s1492_s24  ;;  %s35_s29 = sadd.s32 1, %s1492_s24 }
   0xf   : > { %s44_s30 = sadd.s32 1, %s1468_s18  ;;  %s1900_s27 = smov (%p29_p0, %s28_s27), 0 }
  0x10   : > { %1866 = sst [smem:[#allocation12_spill]] %s1900_s27  ;;  %s1902_s28 = smov (!%p29_p0, %s31_s28), %s1488_s23 }
  0x11   : > { %s40_s4 = ssub.s32 %s1484_s22, %s1900_s27  ;;  %p51_p1 = scmp.ne.s32.totalorder %s1468_s18, %s1464_s17 }
  0x12   : > { %p33_p2 = scmp.ge.s32.totalorder %s1902_s28, 2  ;;  %p52_p3 = scmp.eq.s32.totalorder %s1496_s25, 0 }
  0x13   : > { %s72_s5 = sadd.s32 1, %s1460_s16  ;;  %p79_p4 = scmp.ne.s32.totalorder %s1460_s16, %s1456_s15 }
  0x14   : > { %s1904_s28 = smov (%p33_p2, %s1902_s28), 0  ;;  %s1906_s29 = smov (!%p33_p2, %s35_s29), %s1492_s24 }
  0x15   : > { %1867 = sst [smem:[#allocation13_spill]] %s1904_s28  ;;  %p1611_p5 = por %p52_p3, %p51_p1 }
  0x16   : > { %s68_s7 = ssub.s32 %s1488_s23, %s1904_s28  ;;  %p37_p6 = scmp.ge.s32.totalorder %s1906_s29, 4 }
  0x17   : > { %s69_s8 = sor.u32 %s68_s7, %s40_s4  ;;  %p1617_p8 = por %p79_p4, %p52_p3 }
  0x18   : > { %p70_p7 = scmp.eq.s32.totalorder %s69_s8, 0  ;;  %s1908_s29 = smov (%p37_p6, %s1906_s29), 0 }
  0x19   : > { %1870 = sst [smem:[#allocation14_spill]] %s1908_s29  ;;  %s39_s11 = ssub.s32 %s1492_s24, %s1908_s29 }
  0x1a   : > { %s1624_s10 = scalar_select %p70_p7, %s1460_s16, %s72_s5  }
  0x1b   : > { %p85_p9 = scmp.ne.s32.totalorder %s1456_s15, %s1452_s14  ;;  %s41_s26 = sor.u32 %s40_s4, %s39_s11 }
  0x1c   : > { %s1871_s28 = sadd.s32 4294967295, %s1496_s25   ;;  %p42_p11 = scmp.eq.s32.totalorder %s41_s26, 0 }
  0x1d   : > { %p86_p10 = scmp.eq.s32.totalorder %s1871_s28, 0  ;;  %s123_s27 = sor.u32 %s68_s7, %s39_s11 }
  0x1e   : > { %p124_p13 = scmp.eq.s32.totalorder %s123_s27, 0  ;;  %s126_s21 = sadd.s32 1, %s1448_s13 }
  0x1f   : > { %p1632_p12 = por %p86_p10, %p85_p9  ;;  %p136_p0 = scmp.ne.s32.totalorder %s1448_s13, %s1444_s12 }
  0x20   : > { %s1637_s8 = scalar_select %p42_p11, %s1468_s18, %s44_s30  }
  0x21   : > { %s1643_s19 = scalar_select %p124_p13, %s1448_s13, %s126_s21  }
  0x22   : > { %1873 = sst [smem:[#allocation15_spill]] %s1637_s8  ;;  %s1874_s5 = smov %s1871_s28 }
  0x23   : > { %p137_p1 = scmp.eq.s32.totalorder %s1874_s5, 103  ;;  %p1034_p3 = scmp.ge.s32.totalorder %s1496_s25, 104 }
  0x25   : > { %p1647_p2 = por %p137_p1, %p136_p0  ;;  %159 = sbr.rel (%p1034_p3) target bundleno = 76 (0x4c), region = 16 }
  0x2a   : > { %162 = sbr.rel (!%p1611_p5) target bundleno = 68 (0x44), region = 20  ;;  %s164_s26 = sand.u32 (%p1611_p5), 1, %s1468_s18  }
  0x2b   : > { %s1037_s27 = sshll.u32 (%p1611_p5), %s1484_s22, 1  ;;  %s1035_s28 = sshll.u32 (%p1611_p5), %s164_s26, 7 }
  0x2c   : > { %s1234_s21 = smul.u32 (%p1611_p5), 416, %s1492_s24  ;;  %s1876_s0 = sld [smem:[#allocation16_spill]] (%p1611_p5) }
  0x2d   : > { %s166_s6 = scalar_lea.vmem (%p1611_p5), [#allocation3], %s1035_s28 }
  0x2e   : > { %s170_s30 = sadd.s32 (%p1611_p5), %s1234_s21, %s1037_s27 }
  0x2f   : > { %s1039_s4 = sshll.u32 %s170_s30, 2 }
  0x32   : > { %s1660_s5 = scalar_lea.vmem %s1876_s0, %s1039_s4 }
  0x33   : > { %v231_v0 = vld [vmem:[%s1660_s5] sm:$0xff]  ;;  %v233_v1 = vld [vmem:[%s1660_s5 + $0x68] sm:$0xff]  ;;  %v235_v2 = vld [vmem:[%s1660_s5 + $0xd0] sm:$0xff] }
  0x34   : > { %232 = vst [vmem:[%s166_s6] sm:$0xff] %v231_v0  ;;  %v237_v3 = vld [vmem:[%s1660_s5 + $0x138] sm:$0xff]  ;;  %v239_v4 = vld [vmem:[%s1660_s5 + $0x1a0] sm:$0xff]  ;;  %v241_v5 = vld [vmem:[%s1660_s5 + $0x208] sm:$0xff] }
  0x35   : > { %234 = vst [vmem:[%s166_s6 + $0x8] sm:$0xff] %v233_v1  ;;  %v243_v6 = vld [vmem:[%s1660_s5 + $0x270] sm:$0xff]  ;;  %v245_v7 = vld [vmem:[%s1660_s5 + $0x2d8] sm:$0xff]  ;;  %v247_v8 = vld [vmem:[%s1660_s5 + $0x340] sm:$0xff] }
  0x36   : > { %236 = vst [vmem:[%s166_s6 + $0x10] sm:$0xff] %v235_v2  ;;  %v249_v9 = vld [vmem:[%s1660_s5 + $0x3a8] sm:$0xff]  ;;  %v251_v10 = vld [vmem:[%s1660_s5 + $0x410] sm:$0xff]  ;;  %v253_v11 = vld [vmem:[%s1660_s5 + $0x478] sm:$0xff] }
  0x37   : > { %238 = vst [vmem:[%s166_s6 + $0x18] sm:$0xff] %v237_v3  ;;  %v255_v12 = vld [vmem:[%s1660_s5 + $0x4e0] sm:$0xff]  ;;  %v257_v13 = vld [vmem:[%s1660_s5 + $0x548] sm:$0xff]  ;;  %v259_v14 = vld [vmem:[%s1660_s5 + $0x5b0] sm:$0xff] }
  0x38   : > { %240 = vst [vmem:[%s166_s6 + $0x20] sm:$0xff] %v239_v4  ;;  %v261_v15 = vld [vmem:[%s1660_s5 + $0x618] sm:$0xff] }
  0x39   : > { %242 = vst [vmem:[%s166_s6 + $0x28] sm:$0xff] %v241_v5 }
  0x3a   : > { %244 = vst [vmem:[%s166_s6 + $0x30] sm:$0xff] %v243_v6 }
  0x3b   : > { %246 = vst [vmem:[%s166_s6 + $0x38] sm:$0xff] %v245_v7 }
  0x3c   : > { %248 = vst [vmem:[%s166_s6 + $0x40] sm:$0xff] %v247_v8 }
  0x3d   : > { %250 = vst [vmem:[%s166_s6 + $0x48] sm:$0xff] %v249_v9 }
  0x3e   : > { %252 = vst [vmem:[%s166_s6 + $0x50] sm:$0xff] %v251_v10 }
  0x3f   : > { %254 = vst [vmem:[%s166_s6 + $0x58] sm:$0xff] %v253_v11 }
  0x40   : > { %256 = vst [vmem:[%s166_s6 + $0x60] sm:$0xff] %v255_v12 }
  0x41   : > { %258 = vst [vmem:[%s166_s6 + $0x68] sm:$0xff] %v257_v13 }
  0x42   : > { %260 = vst [vmem:[%s166_s6 + $0x70] sm:$0xff] %v259_v14 }
  0x43   : > { %262 = vst [vmem:[%s166_s6 + $0x78] sm:$0xff] %v261_v15 }
  0x44 PF: > { %s269_s26 = sand.u32 1, %s1460_s16   ;;  %s1184_s27 = sshll.u32 %s1484_s22, 6 }
  0x45   : > { %s1040_s28 = sshll.u32 %s269_s26, 7  ;;  %s278_s21 = sadd.s32 %s1488_s23, %s1184_s27 }
  0x46   : > { %s1043_s30 = sshll.u32 %s278_s21, 2  ;;  %s273_s4 = scalar_lea.vmem [#allocation4], %s1040_s28 }
  0x47   : > { %s283_s7 = sshll.u32 %s273_s4, 4  ;;  %s280_s29 = scalar_lea.hbm %s1852_s1, %s1043_s30  ;;  %s284_s7 = int_to_ptr.vmem [resolvable:$true] %s283_s7 }
  0x48   : > { %s281_s5 = sshll.u32 %s280_s29, 4  ;;  %s270_s6 = scalar_lea.sflag [#allocation5], %s269_s26  ;;  %s282_s5 = int_to_ptr.hbm [resolvable:$true] %s281_s5 }
  0x49   : > { %s1498_s24 = smov 128   ;;  %s1499_s8 = smov 64  }
  0x4a   : > { %s1500_s18 = smov 4  }
  0x4b   : > { %1235 = dma.hbm_to_vmem [thread:$0]  (%p1617_p8), %s282_s5, 2048, %s284_s7, %s270_s6, %s1498_s24, %s1499_s8, %s1500_s18  }
  0x4c PF: > { %p1044_p4 = scmp.ge.s32.totalorder %s1496_s25, 1  ;;  %p297_p5 = scmp.lt.s32.totalorder %s1496_s25, 105 }
  0x4e   : > { %p298_p6 = pnand %p1044_p4, %p297_p5 }
  0x4f   : > { %s304_s0 = sand.u32 (!%p298_p6), 1, %s1464_s17   ;;  %s310_s27 = sand.u32 (!%p298_p6), 1, %s1456_s15  }
  0x50   : > { %301 = sbr.rel (%p298_p6) target bundleno = 390 (0x186), region = 66  ;;  %s1045_s29 = sshll.u32 (!%p298_p6), %s304_s0, 7 }
  0x51   : > { %s1046_s28 = sshll.u32 (!%p298_p6), %s310_s27, 7  ;;  %s1690_s26 = scalar_lea.vmem (!%p298_p6), [#allocation3], %s1045_s29 }
  0x52   : > { %s311_s21 = scalar_lea.sflag (!%p298_p6), [#allocation5], %s310_s27  ;;  %s1692_s30 = scalar_lea.vmem (!%p298_p6), [#allocation4], %s1046_s28 }
  0x55   : > { %1439 = dma.done.wait (%p1632_p12), %s311_s21, 2048  }
  0x56   : > { %1441 = vsyncadd (%p1632_p12), %s311_s21, 4294965248  ;;  %s341_s18 = sand.u32 1, %s1444_s12   ;;  %p347_p7 = scmp.lt.s32.totalorder %s1476_s20, 1 }
  0x57   : > { %s1047_s24 = sshll.u32 %s341_s18, 7  ;;  %s1877_s11 = sld [smem:[#allocation9_spill]] }
  0x58   : > { %s1701_s17 = scalar_select %p347_p7, %s1476_s20, 1 }
  0x59   : > { %s1707_s7 = scalar_lea.vmem [#allocation6], %s1047_s24 }
  0x5a   : > { %s349_s4 = scalar_lea.vmem %s1853_s2, %s1701_s17 }
  0x5d   : > { %p1048_p8 = scmp.ne.s32.totalorder %s1877_s11, 0 }
  0x5f   : > { %354 = sbr.rel (%p1048_p8) target bundleno = 117 (0x75), region = 78 }
  0x64   : > { %v1501_v16 = vmov 0.0  }
  0x65   : > { %355 = vst [vmem:[#allocation2 + $0x30] sm:$0xff] %v1501_v16 }
  0x66   : > { %356 = vst [vmem:[#allocation2] sm:$0xff] %v1501_v16 }
  0x67   : > { %357 = vst [vmem:[#allocation2 + $0x58] sm:$0xff] %v1501_v16 }
  0x68   : > { %358 = vst [vmem:[#allocation2 + $0x18] sm:$0xff] %v1501_v16 }
  0x69   : > { %359 = vst [vmem:[#allocation2 + $0x50] sm:$0xff] %v1501_v16 }
  0x6a   : > { %360 = vst [vmem:[#allocation2 + $0x68] sm:$0xff] %v1501_v16 }
  0x6b   : > { %361 = vst [vmem:[#allocation2 + $0x8] sm:$0xff] %v1501_v16 }
  0x6c   : > { %362 = vst [vmem:[#allocation2 + $0x48] sm:$0xff] %v1501_v16 }
  0x6d   : > { %363 = vst [vmem:[#allocation2 + $0x40] sm:$0xff] %v1501_v16 }
  0x6e   : > { %364 = vst [vmem:[#allocation2 + $0x20] sm:$0xff] %v1501_v16 }
  0x6f   : > { %365 = vst [vmem:[#allocation2 + $0x10] sm:$0xff] %v1501_v16 }
  0x70   : > { %366 = vst [vmem:[#allocation2 + $0x38] sm:$0xff] %v1501_v16 }
  0x71   : > { %367 = vst [vmem:[#allocation2 + $0x60] sm:$0xff] %v1501_v16 }
  0x72   : > { %368 = vst [vmem:[#allocation2 + $0x70] sm:$0xff] %v1501_v16 }
  0x73   : > { %369 = vst [vmem:[#allocation2 + $0x78] sm:$0xff] %v1501_v16 }
  0x74   : > { %370 = vst [vmem:[#allocation2 + $0x28] sm:$0xff] %v1501_v16 }
  0x75 PF: > { %v1208_v17 = vld [vmem:[%s1692_s30 + $0x38] sm:$0xff]  ;;  %v1207_v19 = vld [vmem:[%s1692_s30 + $0x30] sm:$0xff]  ;;  %v1206_v21 = vld [vmem:[%s1692_s30 + $0x28] sm:$0xff]  ;;  %s1878_s3 = sld [smem:[#allocation9_spill]] }
  0x76   : > { %v1216_v18 = vld [vmem:[%s1692_s30 + $0x78] sm:$0xff]  ;;  %611 = vmatpush.bf16.msra.mxu0 %v1208_v17  ;;  %1218 = vmatpush.bf16.msra.mxu2 %v1208_v17  ;;  %v1215_v20 = vld [vmem:[%s1692_s30 + $0x70] sm:$0xff]  ;;  %v1214_v22 = vld [vmem:[%s1692_s30 + $0x68] sm:$0xff] }
  0x77   : > { %660 = vmatpush.bf16.msra.mxu1 %v1216_v18  ;;  %1226 = vmatpush.bf16.msra.mxu3 %v1216_v18  ;;  %v1205_v23 = vld [vmem:[%s1692_s30 + $0x20] sm:$0xff]  ;;  %v1204_v25 = vld [vmem:[%s1692_s30 + $0x18] sm:$0xff]  ;;  %v1203_v27 = vld [vmem:[%s1692_s30 + $0x10] sm:$0xff] }
  0x78   : > { %v1213_v24 = vld [vmem:[%s1692_s30 + $0x60] sm:$0xff]  ;;  %v1212_v26 = vld [vmem:[%s1692_s30 + $0x58] sm:$0xff]  ;;  %v1211_v28 = vld [vmem:[%s1692_s30 + $0x50] sm:$0xff] }
  0x79   : > { %v1202_v29 = vld [vmem:[%s1692_s30 + $0x8] sm:$0xff]  ;;  %v1201_v31 = vld [vmem:[%s1692_s30] sm:$0xff]  ;;  %v1059_v45 = vld [vmem:[%s1690_s26 + $0x10] sm:$0xf] }
  0x7a   : > { %612 = vmatpush.bf16.msra.mxu0 %v1207_v19  ;;  %1219 = vmatpush.bf16.msra.mxu2 %v1207_v19  ;;  %v1210_v30 = vld [vmem:[%s1692_s30 + $0x48] sm:$0xff]  ;;  %v1209_v32 = vld [vmem:[%s1692_s30 + $0x40] sm:$0xff]  ;;  %v1188_v46 = vld [vmem:[%s1690_s26 + $0x14] sm:$0xf0] }
  0x7b   : > { %661 = vmatpush.bf16.msra.mxu1 %v1215_v20  ;;  %1227 = vmatpush.bf16.msra.mxu3 %v1215_v20  ;;  %v1051_v33 = vld [vmem:[%s1690_s26] sm:$0xf]  ;;  %v1186_v34 = vld [vmem:[%s1690_s26 + $0x4] sm:$0xf0]  ;;  %v1185_v37 = vld [vmem:[%s1690_s26 + $0x4] sm:$0xf]  ;;  %v1060_v53 = vor.u32 %v1188_v46, %v1059_v45 }
  0x7c   : > { %v1083_v35 = vld [vmem:[%s1690_s26 + $0x40] sm:$0xf]  ;;  %v1194_v36 = vld [vmem:[%s1690_s26 + $0x44] sm:$0xf0]  ;;  %v1053_v38 = vld [vmem:[%s1690_s26 + $0x8] sm:$0xf0]  ;;  %v1052_v41 = vor.u32 %v1186_v34, %v1051_v33 }
  0x7d   : > { %v1193_v39 = vld [vmem:[%s1690_s26 + $0x44] sm:$0xf]  ;;  %v1085_v40 = vld [vmem:[%s1690_s26 + $0x48] sm:$0xf0]  ;;  %v1084_v42 = vor.u32 %v1194_v36, %v1083_v35  ;;  %v1056_v43 = vor.u32 %v1185_v37, %v1053_v38  ;;  %v1091_v47 = vld [vmem:[%s1690_s26 + $0x50] sm:$0xf] }
  0x7e   : > { %613 = vmatpush.bf16.msra.mxu0 %v1206_v21  ;;  %1220 = vmatpush.bf16.msra.mxu2 %v1206_v21  ;;  %v1088_v44 = vor.u32 %v1193_v39, %v1085_v40  ;;  %v1196_v48 = vld [vmem:[%s1690_s26 + $0x54] sm:$0xf0]  ;;  %v1187_v49 = vld [vmem:[%s1690_s26 + $0x14] sm:$0xf]  ;;  %v1061_v50 = vld [vmem:[%s1690_s26 + $0x18] sm:$0xf0] }
  0x7f   : > { %662 = vmatpush.bf16.msra.mxu1 %v1214_v22  ;;  %1228 = vmatpush.bf16.msra.mxu3 %v1214_v22  ;;  %v1195_v51 = vld [vmem:[%s1690_s26 + $0x54] sm:$0xf]  ;;  %v1093_v52 = vld [vmem:[%s1690_s26 + $0x58] sm:$0xf0]  ;;  %v1092_v54 = vor.u32 %v1196_v48, %v1091_v47  ;;  %v1064_v55 = vor.u32 %v1187_v49, %v1061_v50  ;;  %v1067_v57 = vld [vmem:[%s1690_s26 + $0x20] sm:$0xf] }
  0x80   : > { %v1096_v56 = vor.u32 %v1195_v51, %v1093_v52  ;;  %v1190_v58 = vld [vmem:[%s1690_s26 + $0x24] sm:$0xf0]  ;;  %v1099_v59 = vld [vmem:[%s1690_s26 + $0x60] sm:$0xf]  ;;  %v1189_v61 = vld [vmem:[%s1690_s26 + $0x24] sm:$0xf] }
  0x81   : > { %v1198_v60 = vld [vmem:[%s1690_s26 + $0x64] sm:$0xf0]  ;;  %v1069_v62 = vld [vmem:[%s1690_s26 + $0x28] sm:$0xf0]  ;;  %v1197_v63 = vld [vmem:[%s1690_s26 + $0x64] sm:$0xf]  ;;  %v1068_v1 = vor.u32 %v1190_v58, %v1067_v57 }
  0x82   : > { %614 = vmatpush.bf16.msra.mxu0 %v1205_v23  ;;  %1221 = vmatpush.bf16.msra.mxu2 %v1205_v23  ;;  %v1101_v0 = vld [vmem:[%s1690_s26 + $0x68] sm:$0xf0]  ;;  %v1100_v2 = vor.u32 %v1198_v60, %v1099_v59  ;;  %v1072_v3 = vor.u32 %v1189_v61, %v1069_v62  ;;  %v1075_v5 = vld [vmem:[%s1690_s26 + $0x30] sm:$0xf]  ;;  %v1192_v6 = vld [vmem:[%s1690_s26 + $0x34] sm:$0xf0] }
  0x83   : > { %663 = vmatpush.bf16.msra.mxu1 %v1213_v24  ;;  %1229 = vmatpush.bf16.msra.mxu3 %v1213_v24  ;;  %v1104_v4 = vor.u32 %v1197_v63, %v1101_v0  ;;  %v1107_v7 = vld [vmem:[%s1690_s26 + $0x70] sm:$0xf]  ;;  %v1200_v8 = vld [vmem:[%s1690_s26 + $0x74] sm:$0xf0]  ;;  %v1191_v9 = vld [vmem:[%s1690_s26 + $0x34] sm:$0xf]  ;;  %v1076_v13 = vor.u32 %v1192_v6, %v1075_v5 }
  0x84   : > { %v1077_v10 = vld [vmem:[%s1690_s26 + $0x38] sm:$0xf0]  ;;  %v1199_v11 = vld [vmem:[%s1690_s26 + $0x74] sm:$0xf]  ;;  %v1108_v14 = vor.u32 %v1200_v8, %v1107_v7  ;;  %v379_v23 = vld [vmem:[#allocation2 + $0x40] sm:$0xff]  ;;  %p1177_p9 = scmp.ne.s32.totalorder %s1878_s3, 12 }
  0x85   : > { %v1109_v12 = vld [vmem:[%s1690_s26 + $0x78] sm:$0xf0]  ;;  %v1080_v15 = vor.u32 %v1191_v9, %v1077_v10  ;;  %v371_v18 = vld [vmem:[#allocation2 + $0x30] sm:$0xff]  ;;  %v380_v33 = vld [vmem:[#allocation2 + $0x20] sm:$0xff] }
  0x86   : > { %615 = vmatpush.bf16.msra.mxu0 %v1204_v25  ;;  %1222 = vmatpush.bf16.msra.mxu2 %v1204_v25  ;;  %v1112_v16 = vor.u32 %v1199_v11, %v1109_v12  ;;  %v373_v37 = vld [vmem:[#allocation2 + $0x58] sm:$0xff]  ;;  %v375_v57 = vld [vmem:[#allocation2 + $0x50] sm:$0xff]  ;;  %v383_v63 = vld [vmem:[#allocation2 + $0x60] sm:$0xff] }
  0x87   : > { %664 = vmatpush.bf16.msra.mxu1 %v1212_v26  ;;  %1230 = vmatpush.bf16.msra.mxu3 %v1212_v26  ;;  %v374_v47 = vld [vmem:[#allocation2 + $0x18] sm:$0xff]  ;;  %v384_v9 = vld [vmem:[#allocation2 + $0x70] sm:$0xff] }
  0x8a   : > { %616 = vmatpush.bf16.msra.mxu0 %v1203_v27  ;;  %1223 = vmatpush.bf16.msra.mxu2 %v1203_v27  ;;  %v372_v27 = vld [vmem:[#allocation2] sm:$0xff] }
  0x8b   : > { %665 = vmatpush.bf16.msra.mxu1 %v1211_v28  ;;  %1231 = vmatpush.bf16.msra.mxu3 %v1211_v28 }
  0x8e   : > { %617 = vmatpush.bf16.msra.mxu0 %v1202_v29  ;;  %1224 = vmatpush.bf16.msra.mxu2 %v1202_v29 }
  0x8f   : > { %666 = vmatpush.bf16.msra.mxu1 %v1210_v30  ;;  %1232 = vmatpush.bf16.msra.mxu3 %v1210_v30 }
  0x92   : > { %618 = vmatpush.bf16.msra.mxu0 %v1201_v31  ;;  %1225 = vmatpush.bf16.msra.mxu2 %v1201_v31 }
  0x93   : > { %667 = vmatpush.bf16.msra.mxu1 %v1209_v32  ;;  %1233 = vmatpush.bf16.msra.mxu3 %v1209_v32 }
  0x95   : > { %619 = vmatmul.bf16.vlgmr.msra.gmra.mxu0 %v1052_v41  ;;  %639 = vmatmul.bf16.vlgmr.msra.gmra.mxu2 %v1084_v42 }
  0x96   : > { %668 = vmatmul.bf16.vlgmr.msra.gmra.mxu1 %v1056_v43  ;;  %688 = vmatmul.bf16.vlgmr.msra.gmra.mxu3 %v1088_v44  ;;  %v381_v43 = vld [vmem:[#allocation2 + $0x10] sm:$0xff] }
  0xa5   : > { %624 = vmatmul.bf16.gmra.mxu0 %v1060_v53  ;;  %644 = vmatmul.bf16.gmra.mxu2 %v1092_v54  ;;  %v382_v53 = vld [vmem:[#allocation2 + $0x38] sm:$0xff] }
  0xa6   : > { %673 = vmatmul.bf16.gmra.mxu1 %v1064_v55  ;;  %693 = vmatmul.bf16.gmra.mxu3 %v1096_v56 }
  0xb5   : > { %629 = vmatmul.bf16.gmra.mxu0 %v1068_v1  ;;  %649 = vmatmul.bf16.gmra.mxu2 %v1100_v2 }
  0xb6   : > { %678 = vmatmul.bf16.gmra.mxu1 %v1072_v3  ;;  %698 = vmatmul.bf16.gmra.mxu3 %v1104_v4  ;;  %v376_v3 = vld [vmem:[#allocation2 + $0x68] sm:$0xff] }
  0xc5   : > { %634 = vmatmul.bf16.gmra.mxu0 %v1076_v13  ;;  %654 = vmatmul.bf16.gmra.mxu2 %v1108_v14  ;;  %v377_v13 = vld [vmem:[#allocation2 + $0x8] sm:$0xff] }
  0xc6   : > { %683 = vmatmul.bf16.gmra.mxu1 %v1080_v15  ;;  %703 = vmatmul.bf16.gmra.mxu3 %v1112_v16 }
 0x112   : > { %v620_v17 = vpop.f32.mrf.mxu0 }
 0x113   : > { %v669_v19 = vpop.f32.mrf.mxu1 }
 0x114   : > { %v670_v20 = vadd.f32 %v669_v19, %v620_v17  ;;  %v385_v19 = vld [vmem:[#allocation2 + $0x78] sm:$0xff] }
 0x116   : > { %v709_v21 = vadd.f32 %v670_v20, %v371_v18 }
 0x118   : > { %725 = vst [vmem:[#allocation2 + $0x30] sm:$0xff] %v709_v21  ;;  %v640_v22 = vpop.f32.mrf.mxu2 }
 0x119   : > { %v689_v24 = vpop.f32.mrf.mxu3 }
 0x11a   : > { %v690_v25 = vadd.f32 %v689_v24, %v640_v22  ;;  %v622_v26 = vpop.f32.mrf.mxu0 }
 0x11b   : > { %v671_v28 = vpop.f32.mrf.mxu1 }
 0x11c   : > { %v717_v29 = vadd.f32 %v690_v25, %v379_v23  ;;  %v672_v30 = vadd.f32 %v671_v28, %v622_v26  ;;  %v378_v23 = vld [vmem:[#allocation2 + $0x48] sm:$0xff] }
 0x11e   : > { %733 = vst [vmem:[#allocation2 + $0x40] sm:$0xff] %v717_v29  ;;  %v710_v31 = vadd.f32 %v672_v30, %v372_v27  ;;  %v386_v29 = vld [vmem:[#allocation2 + $0x28] sm:$0xff] }
 0x120   : > { %726 = vst [vmem:[#allocation2] sm:$0xff] %v710_v31  ;;  %v642_v32 = vpop.f32.mrf.mxu2 }
 0x121   : > { %v691_v34 = vpop.f32.mrf.mxu3 }
 0x122   : > { %v692_v35 = vadd.f32 %v691_v34, %v642_v32  ;;  %v625_v36 = vpop.f32.mrf.mxu0 }
 0x123   : > { %v674_v38 = vpop.f32.mrf.mxu1 }
 0x124   : > { %v718_v39 = vadd.f32 %v692_v35, %v380_v33  ;;  %v675_v40 = vadd.f32 %v674_v38, %v625_v36 }
 0x126   : > { %734 = vst [vmem:[#allocation2 + $0x20] sm:$0xff] %v718_v39  ;;  %v711_v41 = vadd.f32 %v675_v40, %v373_v37 }
 0x128   : > { %727 = vst [vmem:[#allocation2 + $0x58] sm:$0xff] %v711_v41  ;;  %v645_v42 = vpop.f32.mrf.mxu2 }
 0x129   : > { %v694_v44 = vpop.f32.mrf.mxu3 }
 0x12a   : > { %v695_v45 = vadd.f32 %v694_v44, %v645_v42  ;;  %v627_v46 = vpop.f32.mrf.mxu0 }
 0x12b   : > { %v676_v48 = vpop.f32.mrf.mxu1 }
 0x12c   : > { %v719_v49 = vadd.f32 %v695_v45, %v381_v43  ;;  %v677_v50 = vadd.f32 %v676_v48, %v627_v46 }
 0x12e   : > { %735 = vst [vmem:[#allocation2 + $0x10] sm:$0xff] %v719_v49  ;;  %v712_v51 = vadd.f32 %v677_v50, %v374_v47 }
 0x130   : > { %728 = vst [vmem:[#allocation2 + $0x18] sm:$0xff] %v712_v51  ;;  %v647_v52 = vpop.f32.mrf.mxu2 }
 0x131   : > { %v696_v54 = vpop.f32.mrf.mxu3 }
 0x132   : > { %v697_v55 = vadd.f32 %v696_v54, %v647_v52  ;;  %v630_v56 = vpop.f32.mrf.mxu0 }
 0x133   : > { %v679_v58 = vpop.f32.mrf.mxu1 }
 0x134   : > { %v720_v59 = vadd.f32 %v697_v55, %v382_v53  ;;  %v680_v60 = vadd.f32 %v679_v58, %v630_v56 }
 0x136   : > { %736 = vst [vmem:[#allocation2 + $0x38] sm:$0xff] %v720_v59  ;;  %v713_v61 = vadd.f32 %v680_v60, %v375_v57 }
 0x138   : > { %729 = vst [vmem:[#allocation2 + $0x50] sm:$0xff] %v713_v61  ;;  %v650_v62 = vpop.f32.mrf.mxu2 }
 0x139   : > { %v699_v0 = vpop.f32.mrf.mxu3 }
 0x13a   : > { %v700_v1 = vadd.f32 %v699_v0, %v650_v62  ;;  %v632_v2 = vpop.f32.mrf.mxu0 }
 0x13b   : > { %v681_v4 = vpop.f32.mrf.mxu1 }
 0x13c   : > { %v721_v5 = vadd.f32 %v700_v1, %v383_v63  ;;  %v682_v6 = vadd.f32 %v681_v4, %v632_v2 }
 0x13e   : > { %737 = vst [vmem:[#allocation2 + $0x60] sm:$0xff] %v721_v5  ;;  %v714_v7 = vadd.f32 %v682_v6, %v376_v3 }
 0x140   : > { %730 = vst [vmem:[#allocation2 + $0x68] sm:$0xff] %v714_v7  ;;  %v652_v8 = vpop.f32.mrf.mxu2 }
 0x141   : > { %v701_v10 = vpop.f32.mrf.mxu3 }
 0x142   : > { %v702_v11 = vadd.f32 %v701_v10, %v652_v8  ;;  %v635_v12 = vpop.f32.mrf.mxu0 }
 0x143   : > { %v684_v14 = vpop.f32.mrf.mxu1 }
 0x144   : > { %v722_v15 = vadd.f32 %v702_v11, %v384_v9  ;;  %v685_v16 = vadd.f32 %v684_v14, %v635_v12 }
 0x146   : > { %738 = vst [vmem:[#allocation2 + $0x70] sm:$0xff] %v722_v15  ;;  %v715_v17 = vadd.f32 %v685_v16, %v377_v13 }
 0x148   : > { %731 = vst [vmem:[#allocation2 + $0x8] sm:$0xff] %v715_v17  ;;  %v655_v18 = vpop.f32.mrf.mxu2 }
 0x149   : > { %v704_v20 = vpop.f32.mrf.mxu3 }
 0x14a   : > { %v705_v21 = vadd.f32 %v704_v20, %v655_v18  ;;  %v637_v22 = vpop.f32.mrf.mxu0 }
 0x14b   : > { %v686_v24 = vpop.f32.mrf.mxu1 }
 0x14c   : > { %v723_v25 = vadd.f32 %v705_v21, %v385_v19  ;;  %v687_v26 = vadd.f32 %v686_v24, %v637_v22 }
 0x14e   : > { %739 = vst [vmem:[#allocation2 + $0x78] sm:$0xff] %v723_v25  ;;  %v716_v27 = vadd.f32 %v687_v26, %v378_v23 }
 0x150   : > { %732 = vst [vmem:[#allocation2 + $0x48] sm:$0xff] %v716_v27  ;;  %v657_v28 = vpop.f32.mrf.mxu2 }
 0x151   : > { %v706_v30 = vpop.f32.mrf.mxu3 }
 0x152   : > { %v707_v31 = vadd.f32 %v706_v30, %v657_v28  ;;  %744 = sbr.rel (%p1177_p9) target bundleno = 364 (0x16c), region = 82 }
 0x154   : > { %v724_v32 = vadd.f32 %v707_v31, %v386_v29 }
 0x156   : > { %740 = vst [vmem:[#allocation2 + $0x28] sm:$0xff] %v724_v32 }
 0x157   : > { %v745_v33 = vld [vmem:[#allocation2 + $0x30] sm:$0xff]  ;;  %v1353_v34 = vld [vmem:[%s349_s4] ss:$0 sm:$0xff]  ;;  %v747_v36 = vld [vmem:[#allocation2 + $0x58] sm:$0xff] }
 0x158   : > { %v746_v35 = vld [vmem:[#allocation2] sm:$0xff]  ;;  %v748_v37 = vld [vmem:[#allocation2 + $0x18] sm:$0xff]  ;;  %v765_v38 = vadd.f32 %v1353_v34, %v745_v33  ;;  %v767_v40 = vadd.f32 %v1353_v34, %v747_v36  ;;  %v749_v42 = vld [vmem:[#allocation2 + $0x50] sm:$0xff] }
 0x159   : > { %v766_v39 = vadd.f32 %v1353_v34, %v746_v35  ;;  %v768_v41 = vadd.f32 %v1353_v34, %v748_v37  ;;  %v750_v43 = vld [vmem:[#allocation2 + $0x68] sm:$0xff]  ;;  %v769_v45 = vadd.f32 %v1353_v34, %v749_v42  ;;  %v753_v48 = vld [vmem:[#allocation2 + $0x40] sm:$0xff]  ;;  %v755_v56 = vld [vmem:[#allocation2 + $0x10] sm:$0xff] }
 0x15a   : > { %v751_v44 = vld [vmem:[#allocation2 + $0x8] sm:$0xff]  ;;  %v770_v46 = vadd.f32 %v1353_v34, %v750_v43  ;;  %v781_v49 = vmax.f32 %v765_v38, 0.0  ;;  %v783_v51 = vmax.f32 %v767_v40, 0.0  ;;  %v754_v53 = vld [vmem:[#allocation2 + $0x20] sm:$0xff]  ;;  %v773_v58 = vadd.f32 %v1353_v34, %v753_v48  ;;  %v756_v59 = vld [vmem:[#allocation2 + $0x38] sm:$0xff] }
 0x15b   : > { %v752_v47 = vld [vmem:[#allocation2 + $0x48] sm:$0xff]  ;;  %v782_v50 = vmax.f32 %v766_v39, 0.0  ;;  %v771_v52 = vadd.f32 %v1353_v34, %v751_v44  ;;  %v784_v54 = vmax.f32 %v768_v41, 0.0  ;;  %v785_v57 = vmax.f32 %v769_v45, 0.0  ;;  %v757_v62 = vld [vmem:[#allocation2 + $0x60] sm:$0xff]  ;;  %v758_v1 = vld [vmem:[#allocation2 + $0x70] sm:$0xff] }
 0x15c   : > { %v772_v55 = vadd.f32 %v1353_v34, %v752_v47  ;;  %797 = vst [vmem:[%s1707_s7] sm:$0xff] %v781_v49  ;;  %v786_v60 = vmax.f32 %v770_v46, 0.0  ;;  %v774_v61 = vadd.f32 %v1353_v34, %v754_v53  ;;  %v775_v0 = vadd.f32 %v1353_v34, %v755_v56  ;;  %v759_v4 = vld [vmem:[#allocation2 + $0x78] sm:$0xff] }
 0x15d   : > { %798 = vst [vmem:[%s1707_s7 + $0x8] sm:$0xff] %v782_v50  ;;  %v787_v63 = vmax.f32 %v771_v52, 0.0  ;;  %v776_v3 = vadd.f32 %v1353_v34, %v756_v59  ;;  %v789_v5 = vmax.f32 %v773_v58, 0.0  ;;  %v777_v6 = vadd.f32 %v1353_v34, %v757_v62  ;;  %v760_v7 = vld [vmem:[#allocation2 + $0x28] sm:$0xff] }
 0x15e   : > { %799 = vst [vmem:[%s1707_s7 + $0x10] sm:$0xff] %v783_v51  ;;  %v788_v2 = vmax.f32 %v772_v55, 0.0  ;;  %v790_v8 = vmax.f32 %v774_v61, 0.0  ;;  %v778_v9 = vadd.f32 %v1353_v34, %v758_v1  ;;  %v791_v10 = vmax.f32 %v775_v0, 0.0 }
 0x15f   : > { %800 = vst [vmem:[%s1707_s7 + $0x18] sm:$0xff] %v784_v54  ;;  %v779_v11 = vadd.f32 %v1353_v34, %v759_v4  ;;  %v792_v12 = vmax.f32 %v776_v3, 0.0  ;;  %v780_v13 = vadd.f32 %v1353_v34, %v760_v7  ;;  %v793_v14 = vmax.f32 %v777_v6, 0.0 }
 0x160   : > { %801 = vst [vmem:[%s1707_s7 + $0x20] sm:$0xff] %v785_v57  ;;  %v794_v15 = vmax.f32 %v778_v9, 0.0 }
 0x161   : > { %802 = vst [vmem:[%s1707_s7 + $0x28] sm:$0xff] %v786_v60  ;;  %v795_v16 = vmax.f32 %v779_v11, 0.0  ;;  %v796_v17 = vmax.f32 %v780_v13, 0.0 }
 0x162   : > { %803 = vst [vmem:[%s1707_s7 + $0x30] sm:$0xff] %v787_v63 }
 0x163   : > { %804 = vst [vmem:[%s1707_s7 + $0x38] sm:$0xff] %v788_v2 }
 0x164   : > { %805 = vst [vmem:[%s1707_s7 + $0x40] sm:$0xff] %v789_v5 }
 0x165   : > { %806 = vst [vmem:[%s1707_s7 + $0x48] sm:$0xff] %v790_v8 }
 0x166   : > { %807 = vst [vmem:[%s1707_s7 + $0x50] sm:$0xff] %v791_v10 }
 0x167   : > { %808 = vst [vmem:[%s1707_s7 + $0x58] sm:$0xff] %v792_v12 }
 0x168   : > { %809 = vst [vmem:[%s1707_s7 + $0x60] sm:$0xff] %v793_v14 }
 0x169   : > { %810 = vst [vmem:[%s1707_s7 + $0x68] sm:$0xff] %v794_v15 }
 0x16a   : > { %811 = vst [vmem:[%s1707_s7 + $0x70] sm:$0xff] %v795_v16 }
 0x16b   : > { %812 = vst [vmem:[%s1707_s7 + $0x78] sm:$0xff] %v796_v17 }
 0x16c PF: > { %819 = sbr.rel (!%p1647_p2) target bundleno = 390 (0x186), region = 86  ;;  %s1879_s6 = sld [smem:[#allocation10_spill]] (%p1647_p2)  ;;  %v883_v18 = vld [vmem:[%s1707_s7] sm:$0xff] (%p1647_p2)  ;;  %v885_v19 = vld [vmem:[%s1707_s7 + $0x8] sm:$0xff] (%p1647_p2)  ;;  %v887_v20 = vld [vmem:[%s1707_s7 + $0x10] sm:$0xff] (%p1647_p2) }
 0x16d   : > { %s1880_s14 = sld [smem:[#allocation17_spill]] (%p1647_p2)  ;;  %v889_v21 = vld [vmem:[%s1707_s7 + $0x18] sm:$0xff] (%p1647_p2)  ;;  %v891_v22 = vld [vmem:[%s1707_s7 + $0x20] sm:$0xff] (%p1647_p2)  ;;  %v893_v23 = vld [vmem:[%s1707_s7 + $0x28] sm:$0xff] (%p1647_p2) }
 0x16e   : > { %v895_v24 = vld [vmem:[%s1707_s7 + $0x30] sm:$0xff] (%p1647_p2)  ;;  %v897_v25 = vld [vmem:[%s1707_s7 + $0x38] sm:$0xff] (%p1647_p2)  ;;  %v899_v26 = vld [vmem:[%s1707_s7 + $0x40] sm:$0xff] (%p1647_p2) }
 0x16f   : > { %v901_v27 = vld [vmem:[%s1707_s7 + $0x48] sm:$0xff] (%p1647_p2)  ;;  %v903_v28 = vld [vmem:[%s1707_s7 + $0x50] sm:$0xff] (%p1647_p2)  ;;  %v905_v29 = vld [vmem:[%s1707_s7 + $0x58] sm:$0xff] (%p1647_p2) }
 0x170   : > { %v907_v30 = vld [vmem:[%s1707_s7 + $0x60] sm:$0xff] (%p1647_p2)  ;;  %v909_v31 = vld [vmem:[%s1707_s7 + $0x68] sm:$0xff] (%p1647_p2) }
 0x171   : > { %v911_v32 = vld [vmem:[%s1707_s7 + $0x70] sm:$0xff] }
 0x172   : > { %s1217_s0 = sshll.u32 %s1879_s6, 5  ;;  %v913_v33 = vld [vmem:[%s1707_s7 + $0x78] sm:$0xff] }
 0x173   : > { %s822_s27 = sadd.s32 %s1476_s20, %s1217_s0 }
 0x174   : > { %s1181_s29 = sshll.u32 %s822_s27, 3 }
 0x175   : > { %s824_s21 = scalar_lea.vmem %s1880_s14, %s1181_s29 }
 0x176   : > { %884 = vst [vmem:[%s824_s21] sm:$0xff] %v883_v18 }
 0x177   : > { %886 = vst [vmem:[%s824_s21 + $0x10] sm:$0xff] %v885_v19 }
 0x178   : > { %888 = vst [vmem:[%s824_s21 + $0x20] sm:$0xff] %v887_v20 }
 0x179   : > { %890 = vst [vmem:[%s824_s21 + $0x30] sm:$0xff] %v889_v21 }
 0x17a   : > { %892 = vst [vmem:[%s824_s21 + $0x40] sm:$0xff] %v891_v22 }
 0x17b   : > { %894 = vst [vmem:[%s824_s21 + $0x50] sm:$0xff] %v893_v23 }
 0x17c   : > { %896 = vst [vmem:[%s824_s21 + $0x60] sm:$0xff] %v895_v24 }
 0x17d   : > { %898 = vst [vmem:[%s824_s21 + $0x70] sm:$0xff] %v897_v25 }
 0x17e   : > { %900 = vst [vmem:[%s824_s21 + $0x80] sm:$0xff] %v899_v26 }
 0x17f   : > { %902 = vst [vmem:[%s824_s21 + $0x90] sm:$0xff] %v901_v27 }
 0x180   : > { %904 = vst [vmem:[%s824_s21 + $0xa0] sm:$0xff] %v903_v28 }
 0x181   : > { %906 = vst [vmem:[%s824_s21 + $0xb0] sm:$0xff] %v905_v29 }
 0x182   : > { %908 = vst [vmem:[%s824_s21 + $0xc0] sm:$0xff] %v907_v30 }
 0x183   : > { %910 = vst [vmem:[%s824_s21 + $0xd0] sm:$0xff] %v909_v31 }
 0x184   : > { %912 = vst [vmem:[%s824_s21 + $0xe0] sm:$0xff] %v911_v32 }
 0x185   : > { %914 = vst [vmem:[%s824_s21 + $0xf0] sm:$0xff] %v913_v33 }
 0x186 PF: > { %s16_s25 = sadd.s32 1, %s1496_s25   ;;  %s1882_s17 = sld [smem:[#allocation8_spill]] }
 0x187   : > { %p1804_p10 = scmp.ge.s32.totalorder %s16_s25, 106   ;;  %s1883_s18 = sld [smem:[#allocation15_spill]] }
 0x188   : > { %s1884_s21 = sld [smem:[#allocation11_spill]]  ;;  %s1889_s12 = smov %s1448_s13 }
 0x189   : > { %s1885_s30 = sld [smem:[#allocation12_spill]]  ;;  %s1890_s13 = smov %s1643_s19 }
 0x18a   : > { %s1886_s24 = sld [smem:[#allocation13_spill]]  ;;  %s1891_s14 = smov %s1456_s15 }
 0x18b   : > { %s1887_s9 = sld [smem:[#allocation14_spill]]  ;;  %s1892_s15 = smov %s1460_s16 }
 0x18c   : > { %s1893_s16 = smov %s1624_s10  ;;  %s1894_s19 = smov %s1484_s22 }
 0x18d   : > { %s1895_s20 = smov %s1488_s23  ;;  %15 = sbr.rel (!%p1804_p10) target bundleno = 11 (0xb), region = 167 }
 0x18f   : > { %s1896_s22 = smov %s1885_s30 }
 0x190   : > { %s1897_s23 = smov %s1886_s24 }
 0x191   : > { %s1898_s24 = smov %s1887_s9 }
 0x192   :  { %930 = vsyncpa [#allocation5], 1 }
 0x193   :  { %932 = vsyncpa [#allocation5 + $0x1], 1 }

// kernel: mynet2_forward.10
= control target key start
LH: loop header
LB: loop body
LE: loop exit
PB: predicated region body
PF: predicated region fallthrough
CT: control target
= control target key end

     0   :  { %s1781_s0 = inlined_call_operand.vmem [shape: bf16[128,2304], index: 0, kind: input, shape index: {}]   ;;  %s1782_s1 = inlined_call_operand.hbm [shape: bf16[2304,384], index: 1, kind: input, shape index: {}]   ;;  %s1783_s2 = inlined_call_operand.vmem [shape: f32[1,384], index: 2, kind: input, shape index: {}]   ;;  %s1784_s3 = inlined_call_operand.vmem [shape: f32[128,384], index: 3, kind: output, shape index: {}]  }
   0x1   :  { %1788 = sst [smem:[#allocation14_spill]] %s1781_s0 }
   0x2   :  { %8 = vsyncpa [#allocation5], 0 }
   0x3   :  { %10 = vsyncpa [#allocation5 + $0x1], 0  ;;  %s1482_s12 = smov 0   ;;  %s1484_s13 = smov 0  }
   0x4   :  { %s1486_s14 = smov 0   ;;  %s1488_s15 = smov 0  }
   0x5   :  { %s1490_s16 = smov 0   ;;  %s1492_s17 = smov 0  }
   0x6   :  { %s1494_s18 = smov 0   ;;  %s1496_s19 = smov 0  }
   0x7   :  { %s1498_s20 = smov 0   ;;  %s1500_s21 = smov 0  }
   0x8   :  { %s1502_s22 = smov 0   ;;  %s1504_s23 = smov 0  }
   0x9 LB: > { %1789 = sst [smem:[#allocation8_spill]] %s1436_s18  ;;  %s1028_s24 = sadd.s32 4294967295, %s1456_s23   ;;  %s1456_s23 = sphi %s1504_s23, %s16_s23   ;;  %s1452_s22 = sphi %s1502_s22, %s1814_s22   ;;  %s1448_s21 = sphi %s1500_s21, %s1813_s21   ;;  %s1444_s20 = sphi %s1498_s20, %s1812_s20   ;;  %s1440_s19 = sphi %s1496_s19, %s1811_s19   ;;  %s1436_s18 = sphi %s1494_s18, %s1803_s18   ;;  %s1432_s17 = sphi %s1492_s17, %s1802_s17   ;;  %s1428_s16 = sphi %s1490_s16, %s1810_s16   ;;  %s1424_s15 = sphi %s1488_s15, %s1809_s15   ;;  %s1420_s14 = sphi %s1486_s14, %s1808_s14   ;;  %s1416_s13 = sphi %s1484_s13, %s1807_s13   ;;  %s1412_s12 = sphi %s1482_s12, %s1806_s12  }
   0xa   : > { %s28_s25 = sadd.s32 1, %s1448_s21  ;;  %s31_s26 = sadd.s32 1, %s1452_s22 }
   0xb   : > { %p29_p0 = scmp.ge.s32.totalorder %s28_s25, 9  ;;  %s44_s27 = sadd.s32 1, %s1436_s18 }
   0xc   : > { %p51_p1 = scmp.ne.s32.totalorder %s1436_s18, %s1432_s17  ;;  %p52_p2 = scmp.eq.s32.totalorder %s1456_s23, 0 }
   0xd   : > { %s1816_s25 = smov (%p29_p0, %s28_s25), 0  ;;  %s1818_s26 = smov (!%p29_p0, %s31_s26), %s1452_s22 }
   0xe   : > { %1790 = sst [smem:[#allocation9_spill]] %s1816_s25  ;;  %s40_s28 = ssub.s32 %s1448_s21, %s1816_s25 }
   0xf   : > { %p33_p3 = scmp.ge.s32.totalorder %s1818_s26, 3  ;;  %p42_p4 = scmp.eq.s32.totalorder %s40_s28, 0 }
  0x10   : > { %p1554_p5 = por %p52_p2, %p51_p1  ;;  %s72_s30 = sadd.s32 1, %s1428_s16 }
  0x11   : > { %s1820_s26 = smov (%p33_p3, %s1818_s26), 0  ;;  %p79_p6 = scmp.ne.s32.totalorder %s1428_s16, %s1424_s15 }
  0x12   : > { %1792 = sst [smem:[#allocation10_spill]] %s1820_s26  ;;  %s68_s5 = ssub.s32 %s1452_s22, %s1820_s26 }
  0x13   : > { %s1562_s4 = scalar_select %p42_p4, %s1436_s18, %s44_s27  }
  0x14   : > { %s69_s6 = sor.u32 %s68_s5, %s40_s28  ;;  %p85_p7 = scmp.ne.s32.totalorder %s1424_s15, %s1420_s14 }
  0x15   : > { %1793 = sst [smem:[#allocation11_spill]] %s1562_s4  ;;  %p70_p8 = scmp.eq.s32.totalorder %s69_s6, 0 }
  0x16   : > { %p1570_p9 = por %p79_p6, %p52_p2  ;;  %p86_p10 = scmp.eq.s32.totalorder %s1028_s24, 0 }
  0x17   : > { %p124_p11 = scmp.eq.s32.totalorder %s68_s5, 0  ;;  %s126_s10 = sadd.s32 1, %s1416_s13 }
  0x18   : > { %s1577_s8 = scalar_select %p70_p8, %s1428_s16, %s72_s30  }
  0x19   : > { %p1579_p12 = por %p86_p10, %p85_p7  ;;  %p136_p13 = scmp.ne.s32.totalorder %s1416_s13, %s1412_s12 }
  0x1a   : > { %1795 = sst [smem:[#allocation12_spill]] %s1577_s8  ;;  %p137_p0 = scmp.eq.s32.totalorder %s1028_s24, 26 }
  0x1b   : > { %s1585_s11 = scalar_select %p124_p11, %s1416_s13, %s126_s10  }
  0x1c   : > { %p1591_p1 = por %p137_p0, %p136_p13  ;;  %p1031_p2 = scmp.ge.s32.totalorder %s1456_s23, 27 }
  0x1d   : > { %1797 = sst [smem:[#allocation13_spill]] %s1585_s11 }
  0x1e   : > { %159 = sbr.rel (%p1031_p2) target bundleno = 69 (0x45), region = 16 }
  0x23   : > { %162 = sbr.rel (!%p1554_p5) target bundleno = 61 (0x3d), region = 20  ;;  %s164_s27 = sand.u32 (%p1554_p5), 1, %s1436_s18  }
  0x24   : > { %s1177_s28 = sshll.u32 (%p1554_p5), %s1448_s21, 3  ;;  %s1032_s30 = sshll.u32 (%p1554_p5), %s164_s27, 7 }
  0x25   : > { %s1799_s0 = sld [smem:[#allocation14_spill]] (%p1554_p5)  ;;  %s166_s24 = scalar_lea.vmem (%p1554_p5), [#allocation3], %s1032_s30 }
  0x2b   : > { %s1603_s10 = scalar_lea.vmem %s1799_s0, %s1177_s28 }
  0x2c   : > { %v231_v0 = vld [vmem:[%s1603_s10] sm:$0xff]  ;;  %v233_v1 = vld [vmem:[%s1603_s10 + $0x48] sm:$0xff]  ;;  %v235_v2 = vld [vmem:[%s1603_s10 + $0x90] sm:$0xff] }
  0x2d   : > { %232 = vst [vmem:[%s166_s24] sm:$0xff] %v231_v0  ;;  %v237_v3 = vld [vmem:[%s1603_s10 + $0xd8] sm:$0xff]  ;;  %v239_v4 = vld [vmem:[%s1603_s10 + $0x120] sm:$0xff]  ;;  %v241_v5 = vld [vmem:[%s1603_s10 + $0x168] sm:$0xff] }
  0x2e   : > { %234 = vst [vmem:[%s166_s24 + $0x8] sm:$0xff] %v233_v1  ;;  %v243_v6 = vld [vmem:[%s1603_s10 + $0x1b0] sm:$0xff]  ;;  %v245_v7 = vld [vmem:[%s1603_s10 + $0x1f8] sm:$0xff]  ;;  %v247_v8 = vld [vmem:[%s1603_s10 + $0x240] sm:$0xff] }
  0x2f   : > { %236 = vst [vmem:[%s166_s24 + $0x10] sm:$0xff] %v235_v2  ;;  %v249_v9 = vld [vmem:[%s1603_s10 + $0x288] sm:$0xff]  ;;  %v251_v10 = vld [vmem:[%s1603_s10 + $0x2d0] sm:$0xff]  ;;  %v253_v11 = vld [vmem:[%s1603_s10 + $0x318] sm:$0xff] }
  0x30   : > { %238 = vst [vmem:[%s166_s24 + $0x18] sm:$0xff] %v237_v3  ;;  %v255_v12 = vld [vmem:[%s1603_s10 + $0x360] sm:$0xff]  ;;  %v257_v13 = vld [vmem:[%s1603_s10 + $0x3a8] sm:$0xff]  ;;  %v259_v14 = vld [vmem:[%s1603_s10 + $0x3f0] sm:$0xff] }
  0x31   : > { %240 = vst [vmem:[%s166_s24 + $0x20] sm:$0xff] %v239_v4  ;;  %v261_v15 = vld [vmem:[%s1603_s10 + $0x438] sm:$0xff] }
  0x32   : > { %242 = vst [vmem:[%s166_s24 + $0x28] sm:$0xff] %v241_v5 }
  0x33   : > { %244 = vst [vmem:[%s166_s24 + $0x30] sm:$0xff] %v243_v6 }
  0x34   : > { %246 = vst [vmem:[%s166_s24 + $0x38] sm:$0xff] %v245_v7 }
  0x35   : > { %248 = vst [vmem:[%s166_s24 + $0x40] sm:$0xff] %v247_v8 }
  0x36   : > { %250 = vst [vmem:[%s166_s24 + $0x48] sm:$0xff] %v249_v9 }
  0x37   : > { %252 = vst [vmem:[%s166_s24 + $0x50] sm:$0xff] %v251_v10 }
  0x38   : > { %254 = vst [vmem:[%s166_s24 + $0x58] sm:$0xff] %v253_v11 }
  0x39   : > { %256 = vst [vmem:[%s166_s24 + $0x60] sm:$0xff] %v255_v12 }
  0x3a   : > { %258 = vst [vmem:[%s166_s24 + $0x68] sm:$0xff] %v257_v13 }
  0x3b   : > { %260 = vst [vmem:[%s166_s24 + $0x70] sm:$0xff] %v259_v14 }
  0x3c   : > { %262 = vst [vmem:[%s166_s24 + $0x78] sm:$0xff] %v261_v15 }
  0x3d PF: > { %s269_s29 = sand.u32 1, %s1428_s16   ;;  %s1226_s27 = smul.u32 96, %s1448_s21 }
  0x3e   : > { %s1035_s28 = sshll.u32 %s269_s29, 7  ;;  %s270_s24 = scalar_lea.sflag [#allocation5], %s269_s29 }
  0x3f   : > { %s278_s30 = sadd.s32 %s1452_s22, %s1226_s27  ;;  %s273_s6 = scalar_lea.vmem [#allocation4], %s1035_s28 }
  0x40   : > { %s1038_s5 = sshll.u32 %s278_s30, 2  ;;  %s283_s0 = sshll.u32 %s273_s6, 4  ;;  %s284_s0 = int_to_ptr.vmem [resolvable:$true] %s283_s0 }
  0x41   : > { %s280_s4 = scalar_lea.hbm %s1782_s1, %s1038_s5  ;;  %s1458_s18 = smov 192  }
  0x42   : > { %s281_s10 = sshll.u32 %s280_s4, 4  ;;  %s1459_s8 = smov 64   ;;  %s282_s10 = int_to_ptr.hbm [resolvable:$true] %s281_s10 }
  0x43   : > { %s1460_s11 = smov 4  }
  0x44   : > { %1227 = dma.hbm_to_vmem [thread:$0]  (%p1570_p9), %s282_s10, 2048, %s284_s0, %s270_s24, %s1458_s18, %s1459_s8, %s1460_s11  }
  0x45 PF: > { %p1039_p3 = scmp.ge.s32.totalorder %s1456_s23, 1  ;;  %p297_p4 = scmp.lt.s32.totalorder %s1456_s23, 28 }
  0x47   : > { %p298_p5 = pnand %p1039_p3, %p297_p4 }
  0x48   : > { %s304_s25 = sand.u32 (!%p298_p5), 1, %s1432_s17   ;;  %s310_s26 = sand.u32 (!%p298_p5), 1, %s1424_s15  }
  0x49   : > { %301 = sbr.rel (%p298_p5) target bundleno = 369 (0x171), region = 66  ;;  %s1040_s4 = sshll.u32 (!%p298_p5), %s304_s25, 7 }
  0x4a   : > { %s1041_s27 = sshll.u32 (!%p298_p5), %s310_s26, 7  ;;  %s1633_s29 = scalar_lea.vmem (!%p298_p5), [#allocation3], %s1040_s4 }
  0x4b   : > { %s311_s28 = scalar_lea.sflag (!%p298_p5), [#allocation5], %s310_s26  ;;  %s1635_s30 = scalar_lea.vmem (!%p298_p5), [#allocation4], %s1041_s27 }
  0x4e   : > { %1407 = dma.done.wait (%p1579_p12), %s311_s28, 2048  }
  0x4f   : > { %1409 = vsyncadd (%p1579_p12), %s311_s28, 4294965248  ;;  %s341_s0 = sand.u32 1, %s1412_s12   ;;  %p347_p6 = scmp.lt.s32.totalorder %s1444_s20, 2 }
  0x50   : > { %s1042_s18 = sshll.u32 %s341_s0, 7  ;;  %p1043_p7 = scmp.ne.s32.totalorder %s1440_s19, 0 }
  0x51   : > { %s1644_s17 = scalar_select %p347_p6, %s1444_s20, 2 }
  0x52   : > { %s1650_s5 = scalar_lea.vmem [#allocation6], %s1042_s18  ;;  %354 = sbr.rel (%p1043_p7) target bundleno = 104 (0x68), region = 78 }
  0x53   : > { %s349_s11 = scalar_lea.vmem %s1783_s2, %s1644_s17 }
  0x57   : > { %v1461_v16 = vmov 0.0  }
  0x58   : > { %355 = vst [vmem:[#allocation2 + $0x30] sm:$0xff] %v1461_v16 }
  0x59   : > { %356 = vst [vmem:[#allocation2] sm:$0xff] %v1461_v16 }
  0x5a   : > { %357 = vst [vmem:[#allocation2 + $0x58] sm:$0xff] %v1461_v16 }
  0x5b   : > { %358 = vst [vmem:[#allocation2 + $0x18] sm:$0xff] %v1461_v16 }
  0x5c   : > { %359 = vst [vmem:[#allocation2 + $0x50] sm:$0xff] %v1461_v16 }
  0x5d   : > { %360 = vst [vmem:[#allocation2 + $0x68] sm:$0xff] %v1461_v16 }
  0x5e   : > { %361 = vst [vmem:[#allocation2 + $0x8] sm:$0xff] %v1461_v16 }
  0x5f   : > { %362 = vst [vmem:[#allocation2 + $0x48] sm:$0xff] %v1461_v16 }
  0x60   : > { %363 = vst [vmem:[#allocation2 + $0x40] sm:$0xff] %v1461_v16 }
  0x61   : > { %364 = vst [vmem:[#allocation2 + $0x20] sm:$0xff] %v1461_v16 }
  0x62   : > { %365 = vst [vmem:[#allocation2 + $0x10] sm:$0xff] %v1461_v16 }
  0x63   : > { %366 = vst [vmem:[#allocation2 + $0x38] sm:$0xff] %v1461_v16 }
  0x64   : > { %367 = vst [vmem:[#allocation2 + $0x60] sm:$0xff] %v1461_v16 }
  0x65   : > { %368 = vst [vmem:[#allocation2 + $0x70] sm:$0xff] %v1461_v16 }
  0x66   : > { %369 = vst [vmem:[#allocation2 + $0x78] sm:$0xff] %v1461_v16 }
  0x67   : > { %370 = vst [vmem:[#allocation2 + $0x28] sm:$0xff] %v1461_v16 }
  0x68 PF: > { %v1201_v17 = vld [vmem:[%s1635_s30 + $0x38] sm:$0xff]  ;;  %v1200_v19 = vld [vmem:[%s1635_s30 + $0x30] sm:$0xff]  ;;  %v1199_v21 = vld [vmem:[%s1635_s30 + $0x28] sm:$0xff]  ;;  %p1172_p8 = scmp.ne.s32.totalorder %s1440_s19, 8 }
  0x69   : > { %v1209_v18 = vld [vmem:[%s1635_s30 + $0x78] sm:$0xff]  ;;  %611 = vmatpush.bf16.msra.mxu0 %v1201_v17  ;;  %1210 = vmatpush.bf16.msra.mxu2 %v1201_v17  ;;  %v1208_v20 = vld [vmem:[%s1635_s30 + $0x70] sm:$0xff]  ;;  %v1207_v22 = vld [vmem:[%s1635_s30 + $0x68] sm:$0xff] }
  0x6a   : > { %660 = vmatpush.bf16.msra.mxu1 %v1209_v18  ;;  %1218 = vmatpush.bf16.msra.mxu3 %v1209_v18  ;;  %v1198_v23 = vld [vmem:[%s1635_s30 + $0x20] sm:$0xff]  ;;  %v1197_v25 = vld [vmem:[%s1635_s30 + $0x18] sm:$0xff]  ;;  %v1196_v27 = vld [vmem:[%s1635_s30 + $0x10] sm:$0xff] }
  0x6b   : > { %v1206_v24 = vld [vmem:[%s1635_s30 + $0x60] sm:$0xff]  ;;  %v1205_v26 = vld [vmem:[%s1635_s30 + $0x58] sm:$0xff]  ;;  %v1204_v28 = vld [vmem:[%s1635_s30 + $0x50] sm:$0xff] }
  0x6c   : > { %v1195_v29 = vld [vmem:[%s1635_s30 + $0x8] sm:$0xff]  ;;  %v1194_v31 = vld [vmem:[%s1635_s30] sm:$0xff]  ;;  %v1054_v45 = vld [vmem:[%s1633_s29 + $0x10] sm:$0xf] }
  0x6d   : > { %612 = vmatpush.bf16.msra.mxu0 %v1200_v19  ;;  %1211 = vmatpush.bf16.msra.mxu2 %v1200_v19  ;;  %v1203_v30 = vld [vmem:[%s1635_s30 + $0x48] sm:$0xff]  ;;  %v1202_v32 = vld [vmem:[%s1635_s30 + $0x40] sm:$0xff]  ;;  %v1181_v46 = vld [vmem:[%s1633_s29 + $0x14] sm:$0xf0] }
  0x6e   : > { %661 = vmatpush.bf16.msra.mxu1 %v1208_v20  ;;  %1219 = vmatpush.bf16.msra.mxu3 %v1208_v20  ;;  %v1046_v33 = vld [vmem:[%s1633_s29] sm:$0xf]  ;;  %v1179_v34 = vld [vmem:[%s1633_s29 + $0x4] sm:$0xf0]  ;;  %v1178_v37 = vld [vmem:[%s1633_s29 + $0x4] sm:$0xf]  ;;  %v1055_v53 = vor.u32 %v1181_v46, %v1054_v45 }
  0x6f   : > { %v1078_v35 = vld [vmem:[%s1633_s29 + $0x40] sm:$0xf]  ;;  %v1187_v36 = vld [vmem:[%s1633_s29 + $0x44] sm:$0xf0]  ;;  %v1048_v38 = vld [vmem:[%s1633_s29 + $0x8] sm:$0xf0]  ;;  %v1047_v41 = vor.u32 %v1179_v34, %v1046_v33 }
  0x70   : > { %v1186_v39 = vld [vmem:[%s1633_s29 + $0x44] sm:$0xf]  ;;  %v1080_v40 = vld [vmem:[%s1633_s29 + $0x48] sm:$0xf0]  ;;  %v1079_v42 = vor.u32 %v1187_v36, %v1078_v35  ;;  %v1051_v43 = vor.u32 %v1178_v37, %v1048_v38  ;;  %v1086_v47 = vld [vmem:[%s1633_s29 + $0x50] sm:$0xf] }
  0x71   : > { %613 = vmatpush.bf16.msra.mxu0 %v1199_v21  ;;  %1212 = vmatpush.bf16.msra.mxu2 %v1199_v21  ;;  %v1083_v44 = vor.u32 %v1186_v39, %v1080_v40  ;;  %v1189_v48 = vld [vmem:[%s1633_s29 + $0x54] sm:$0xf0]  ;;  %v1180_v49 = vld [vmem:[%s1633_s29 + $0x14] sm:$0xf]  ;;  %v1056_v50 = vld [vmem:[%s1633_s29 + $0x18] sm:$0xf0] }
  0x72   : > { %662 = vmatpush.bf16.msra.mxu1 %v1207_v22  ;;  %1220 = vmatpush.bf16.msra.mxu3 %v1207_v22  ;;  %v1188_v51 = vld [vmem:[%s1633_s29 + $0x54] sm:$0xf]  ;;  %v1088_v52 = vld [vmem:[%s1633_s29 + $0x58] sm:$0xf0]  ;;  %v1087_v54 = vor.u32 %v1189_v48, %v1086_v47  ;;  %v1059_v55 = vor.u32 %v1180_v49, %v1056_v50  ;;  %v1062_v57 = vld [vmem:[%s1633_s29 + $0x20] sm:$0xf] }
  0x73   : > { %v1091_v56 = vor.u32 %v1188_v51, %v1088_v52  ;;  %v1183_v58 = vld [vmem:[%s1633_s29 + $0x24] sm:$0xf0]  ;;  %v1094_v59 = vld [vmem:[%s1633_s29 + $0x60] sm:$0xf]  ;;  %v1182_v61 = vld [vmem:[%s1633_s29 + $0x24] sm:$0xf] }
  0x74   : > { %v1191_v60 = vld [vmem:[%s1633_s29 + $0x64] sm:$0xf0]  ;;  %v1064_v62 = vld [vmem:[%s1633_s29 + $0x28] sm:$0xf0]  ;;  %v1190_v63 = vld [vmem:[%s1633_s29 + $0x64] sm:$0xf]  ;;  %v1063_v1 = vor.u32 %v1183_v58, %v1062_v57 }
  0x75   : > { %614 = vmatpush.bf16.msra.mxu0 %v1198_v23  ;;  %1213 = vmatpush.bf16.msra.mxu2 %v1198_v23  ;;  %v1096_v0 = vld [vmem:[%s1633_s29 + $0x68] sm:$0xf0]  ;;  %v1095_v2 = vor.u32 %v1191_v60, %v1094_v59  ;;  %v1067_v3 = vor.u32 %v1182_v61, %v1064_v62  ;;  %v1070_v5 = vld [vmem:[%s1633_s29 + $0x30] sm:$0xf]  ;;  %v1185_v6 = vld [vmem:[%s1633_s29 + $0x34] sm:$0xf0] }
  0x76   : > { %663 = vmatpush.bf16.msra.mxu1 %v1206_v24  ;;  %1221 = vmatpush.bf16.msra.mxu3 %v1206_v24  ;;  %v1099_v4 = vor.u32 %v1190_v63, %v1096_v0  ;;  %v1102_v7 = vld [vmem:[%s1633_s29 + $0x70] sm:$0xf]  ;;  %v1193_v8 = vld [vmem:[%s1633_s29 + $0x74] sm:$0xf0]  ;;  %v1184_v9 = vld [vmem:[%s1633_s29 + $0x34] sm:$0xf]  ;;  %v1071_v13 = vor.u32 %v1185_v6, %v1070_v5 }
  0x77   : > { %v1072_v10 = vld [vmem:[%s1633_s29 + $0x38] sm:$0xf0]  ;;  %v1192_v11 = vld [vmem:[%s1633_s29 + $0x74] sm:$0xf]  ;;  %v1103_v14 = vor.u32 %v1193_v8, %v1102_v7  ;;  %v379_v23 = vld [vmem:[#allocation2 + $0x40] sm:$0xff] }
  0x78   : > { %v1104_v12 = vld [vmem:[%s1633_s29 + $0x78] sm:$0xf0]  ;;  %v1075_v15 = vor.u32 %v1184_v9, %v1072_v10  ;;  %v371_v18 = vld [vmem:[#allocation2 + $0x30] sm:$0xff]  ;;  %v380_v33 = vld [vmem:[#allocation2 + $0x20] sm:$0xff] }
  0x79   : > { %615 = vmatpush.bf16.msra.mxu0 %v1197_v25  ;;  %1214 = vmatpush.bf16.msra.mxu2 %v1197_v25  ;;  %v1107_v16 = vor.u32 %v1192_v11, %v1104_v12  ;;  %v373_v37 = vld [vmem:[#allocation2 + $0x58] sm:$0xff]  ;;  %v375_v57 = vld [vmem:[#allocation2 + $0x50] sm:$0xff]  ;;  %v383_v63 = vld [vmem:[#allocation2 + $0x60] sm:$0xff] }
  0x7a   : > { %664 = vmatpush.bf16.msra.mxu1 %v1205_v26  ;;  %1222 = vmatpush.bf16.msra.mxu3 %v1205_v26  ;;  %v374_v47 = vld [vmem:[#allocation2 + $0x18] sm:$0xff]  ;;  %v384_v9 = vld [vmem:[#allocation2 + $0x70] sm:$0xff] }
  0x7d   : > { %616 = vmatpush.bf16.msra.mxu0 %v1196_v27  ;;  %1215 = vmatpush.bf16.msra.mxu2 %v1196_v27  ;;  %v372_v27 = vld [vmem:[#allocation2] sm:$0xff] }
  0x7e   : > { %665 = vmatpush.bf16.msra.mxu1 %v1204_v28  ;;  %1223 = vmatpush.bf16.msra.mxu3 %v1204_v28 }
  0x81   : > { %617 = vmatpush.bf16.msra.mxu0 %v1195_v29  ;;  %1216 = vmatpush.bf16.msra.mxu2 %v1195_v29 }
  0x82   : > { %666 = vmatpush.bf16.msra.mxu1 %v1203_v30  ;;  %1224 = vmatpush.bf16.msra.mxu3 %v1203_v30 }
  0x85   : > { %618 = vmatpush.bf16.msra.mxu0 %v1194_v31  ;;  %1217 = vmatpush.bf16.msra.mxu2 %v1194_v31 }
  0x86   : > { %667 = vmatpush.bf16.msra.mxu1 %v1202_v32  ;;  %1225 = vmatpush.bf16.msra.mxu3 %v1202_v32 }
  0x88   : > { %619 = vmatmul.bf16.vlgmr.msra.gmra.mxu0 %v1047_v41  ;;  %639 = vmatmul.bf16.vlgmr.msra.gmra.mxu2 %v1079_v42 }
  0x89   : > { %668 = vmatmul.bf16.vlgmr.msra.gmra.mxu1 %v1051_v43  ;;  %688 = vmatmul.bf16.vlgmr.msra.gmra.mxu3 %v1083_v44  ;;  %v381_v43 = vld [vmem:[#allocation2 + $0x10] sm:$0xff] }
  0x98   : > { %624 = vmatmul.bf16.gmra.mxu0 %v1055_v53  ;;  %644 = vmatmul.bf16.gmra.mxu2 %v1087_v54  ;;  %v382_v53 = vld [vmem:[#allocation2 + $0x38] sm:$0xff] }
  0x99   : > { %673 = vmatmul.bf16.gmra.mxu1 %v1059_v55  ;;  %693 = vmatmul.bf16.gmra.mxu3 %v1091_v56 }
  0xa8   : > { %629 = vmatmul.bf16.gmra.mxu0 %v1063_v1  ;;  %649 = vmatmul.bf16.gmra.mxu2 %v1095_v2 }
  0xa9   : > { %678 = vmatmul.bf16.gmra.mxu1 %v1067_v3  ;;  %698 = vmatmul.bf16.gmra.mxu3 %v1099_v4  ;;  %v376_v3 = vld [vmem:[#allocation2 + $0x68] sm:$0xff] }
  0xb8   : > { %634 = vmatmul.bf16.gmra.mxu0 %v1071_v13  ;;  %654 = vmatmul.bf16.gmra.mxu2 %v1103_v14  ;;  %v377_v13 = vld [vmem:[#allocation2 + $0x8] sm:$0xff] }
  0xb9   : > { %683 = vmatmul.bf16.gmra.mxu1 %v1075_v15  ;;  %703 = vmatmul.bf16.gmra.mxu3 %v1107_v16 }
 0x105   : > { %v620_v17 = vpop.f32.mrf.mxu0 }
 0x106   : > { %v669_v19 = vpop.f32.mrf.mxu1 }
 0x107   : > { %v670_v20 = vadd.f32 %v669_v19, %v620_v17  ;;  %v385_v19 = vld [vmem:[#allocation2 + $0x78] sm:$0xff] }
 0x109   : > { %v709_v21 = vadd.f32 %v670_v20, %v371_v18 }
 0x10b   : > { %725 = vst [vmem:[#allocation2 + $0x30] sm:$0xff] %v709_v21  ;;  %v640_v22 = vpop.f32.mrf.mxu2 }
 0x10c   : > { %v689_v24 = vpop.f32.mrf.mxu3 }
 0x10d   : > { %v690_v25 = vadd.f32 %v689_v24, %v640_v22  ;;  %v622_v26 = vpop.f32.mrf.mxu0 }
 0x10e   : > { %v671_v28 = vpop.f32.mrf.mxu1 }
 0x10f   : > { %v717_v29 = vadd.f32 %v690_v25, %v379_v23  ;;  %v672_v30 = vadd.f32 %v671_v28, %v622_v26  ;;  %v378_v23 = vld [vmem:[#allocation2 + $0x48] sm:$0xff] }
 0x111   : > { %733 = vst [vmem:[#allocation2 + $0x40] sm:$0xff] %v717_v29  ;;  %v710_v31 = vadd.f32 %v672_v30, %v372_v27  ;;  %v386_v29 = vld [vmem:[#allocation2 + $0x28] sm:$0xff] }
 0x113   : > { %726 = vst [vmem:[#allocation2] sm:$0xff] %v710_v31  ;;  %v642_v32 = vpop.f32.mrf.mxu2 }
 0x114   : > { %v691_v34 = vpop.f32.mrf.mxu3 }
 0x115   : > { %v692_v35 = vadd.f32 %v691_v34, %v642_v32  ;;  %v625_v36 = vpop.f32.mrf.mxu0 }
 0x116   : > { %v674_v38 = vpop.f32.mrf.mxu1 }
 0x117   : > { %v718_v39 = vadd.f32 %v692_v35, %v380_v33  ;;  %v675_v40 = vadd.f32 %v674_v38, %v625_v36 }
 0x119   : > { %734 = vst [vmem:[#allocation2 + $0x20] sm:$0xff] %v718_v39  ;;  %v711_v41 = vadd.f32 %v675_v40, %v373_v37 }
 0x11b   : > { %727 = vst [vmem:[#allocation2 + $0x58] sm:$0xff] %v711_v41  ;;  %v645_v42 = vpop.f32.mrf.mxu2 }
 0x11c   : > { %v694_v44 = vpop.f32.mrf.mxu3 }
 0x11d   : > { %v695_v45 = vadd.f32 %v694_v44, %v645_v42  ;;  %v627_v46 = vpop.f32.mrf.mxu0 }
 0x11e   : > { %v676_v48 = vpop.f32.mrf.mxu1 }
 0x11f   : > { %v719_v49 = vadd.f32 %v695_v45, %v381_v43  ;;  %v677_v50 = vadd.f32 %v676_v48, %v627_v46 }
 0x121   : > { %735 = vst [vmem:[#allocation2 + $0x10] sm:$0xff] %v719_v49  ;;  %v712_v51 = vadd.f32 %v677_v50, %v374_v47 }
 0x123   : > { %728 = vst [vmem:[#allocation2 + $0x18] sm:$0xff] %v712_v51  ;;  %v647_v52 = vpop.f32.mrf.mxu2 }
 0x124   : > { %v696_v54 = vpop.f32.mrf.mxu3 }
 0x125   : > { %v697_v55 = vadd.f32 %v696_v54, %v647_v52  ;;  %v630_v56 = vpop.f32.mrf.mxu0 }
 0x126   : > { %v679_v58 = vpop.f32.mrf.mxu1 }
 0x127   : > { %v720_v59 = vadd.f32 %v697_v55, %v382_v53  ;;  %v680_v60 = vadd.f32 %v679_v58, %v630_v56 }
 0x129   : > { %736 = vst [vmem:[#allocation2 + $0x38] sm:$0xff] %v720_v59  ;;  %v713_v61 = vadd.f32 %v680_v60, %v375_v57 }
 0x12b   : > { %729 = vst [vmem:[#allocation2 + $0x50] sm:$0xff] %v713_v61  ;;  %v650_v62 = vpop.f32.mrf.mxu2 }
 0x12c   : > { %v699_v0 = vpop.f32.mrf.mxu3 }
 0x12d   : > { %v700_v1 = vadd.f32 %v699_v0, %v650_v62  ;;  %v632_v2 = vpop.f32.mrf.mxu0 }
 0x12e   : > { %v681_v4 = vpop.f32.mrf.mxu1 }
 0x12f   : > { %v721_v5 = vadd.f32 %v700_v1, %v383_v63  ;;  %v682_v6 = vadd.f32 %v681_v4, %v632_v2 }
 0x131   : > { %737 = vst [vmem:[#allocation2 + $0x60] sm:$0xff] %v721_v5  ;;  %v714_v7 = vadd.f32 %v682_v6, %v376_v3 }
 0x133   : > { %730 = vst [vmem:[#allocation2 + $0x68] sm:$0xff] %v714_v7  ;;  %v652_v8 = vpop.f32.mrf.mxu2 }
 0x134   : > { %v701_v10 = vpop.f32.mrf.mxu3 }
 0x135   : > { %v702_v11 = vadd.f32 %v701_v10, %v652_v8  ;;  %v635_v12 = vpop.f32.mrf.mxu0 }
 0x136   : > { %v684_v14 = vpop.f32.mrf.mxu1 }
 0x137   : > { %v722_v15 = vadd.f32 %v702_v11, %v384_v9  ;;  %v685_v16 = vadd.f32 %v684_v14, %v635_v12 }
 0x139   : > { %738 = vst [vmem:[#allocation2 + $0x70] sm:$0xff] %v722_v15  ;;  %v715_v17 = vadd.f32 %v685_v16, %v377_v13 }
 0x13b   : > { %731 = vst [vmem:[#allocation2 + $0x8] sm:$0xff] %v715_v17  ;;  %v655_v18 = vpop.f32.mrf.mxu2 }
 0x13c   : > { %v704_v20 = vpop.f32.mrf.mxu3 }
 0x13d   : > { %v705_v21 = vadd.f32 %v704_v20, %v655_v18  ;;  %v637_v22 = vpop.f32.mrf.mxu0 }
 0x13e   : > { %v686_v24 = vpop.f32.mrf.mxu1 }
 0x13f   : > { %v723_v25 = vadd.f32 %v705_v21, %v385_v19  ;;  %v687_v26 = vadd.f32 %v686_v24, %v637_v22 }
 0x141   : > { %739 = vst [vmem:[#allocation2 + $0x78] sm:$0xff] %v723_v25  ;;  %v716_v27 = vadd.f32 %v687_v26, %v378_v23 }
 0x143   : > { %732 = vst [vmem:[#allocation2 + $0x48] sm:$0xff] %v716_v27  ;;  %v657_v28 = vpop.f32.mrf.mxu2 }
 0x144   : > { %v706_v30 = vpop.f32.mrf.mxu3 }
 0x145   : > { %v707_v31 = vadd.f32 %v706_v30, %v657_v28  ;;  %744 = sbr.rel (%p1172_p8) target bundleno = 351 (0x15f), region = 82 }
 0x147   : > { %v724_v32 = vadd.f32 %v707_v31, %v386_v29 }
 0x149   : > { %740 = vst [vmem:[#allocation2 + $0x28] sm:$0xff] %v724_v32 }
 0x14a   : > { %v745_v33 = vld [vmem:[#allocation2 + $0x30] sm:$0xff]  ;;  %v1329_v34 = vld [vmem:[%s349_s11] ss:$0 sm:$0xff]  ;;  %v747_v36 = vld [vmem:[#allocation2 + $0x58] sm:$0xff] }
 0x14b   : > { %v746_v35 = vld [vmem:[#allocation2] sm:$0xff]  ;;  %v748_v37 = vld [vmem:[#allocation2 + $0x18] sm:$0xff]  ;;  %v765_v38 = vadd.f32 %v1329_v34, %v745_v33  ;;  %v767_v40 = vadd.f32 %v1329_v34, %v747_v36  ;;  %v749_v42 = vld [vmem:[#allocation2 + $0x50] sm:$0xff] }
 0x14c   : > { %v766_v39 = vadd.f32 %v1329_v34, %v746_v35  ;;  %v768_v41 = vadd.f32 %v1329_v34, %v748_v37  ;;  %v750_v43 = vld [vmem:[#allocation2 + $0x68] sm:$0xff]  ;;  %v769_v45 = vadd.f32 %v1329_v34, %v749_v42  ;;  %v753_v48 = vld [vmem:[#allocation2 + $0x40] sm:$0xff]  ;;  %v755_v56 = vld [vmem:[#allocation2 + $0x10] sm:$0xff] }
 0x14d   : > { %v751_v44 = vld [vmem:[#allocation2 + $0x8] sm:$0xff]  ;;  %v770_v46 = vadd.f32 %v1329_v34, %v750_v43  ;;  %v781_v49 = vmax.f32 %v765_v38, 0.0  ;;  %v783_v51 = vmax.f32 %v767_v40, 0.0  ;;  %v754_v53 = vld [vmem:[#allocation2 + $0x20] sm:$0xff]  ;;  %v773_v58 = vadd.f32 %v1329_v34, %v753_v48  ;;  %v756_v59 = vld [vmem:[#allocation2 + $0x38] sm:$0xff] }
 0x14e   : > { %v752_v47 = vld [vmem:[#allocation2 + $0x48] sm:$0xff]  ;;  %v782_v50 = vmax.f32 %v766_v39, 0.0  ;;  %v771_v52 = vadd.f32 %v1329_v34, %v751_v44  ;;  %v784_v54 = vmax.f32 %v768_v41, 0.0  ;;  %v785_v57 = vmax.f32 %v769_v45, 0.0  ;;  %v757_v62 = vld [vmem:[#allocation2 + $0x60] sm:$0xff]  ;;  %v758_v1 = vld [vmem:[#allocation2 + $0x70] sm:$0xff] }
 0x14f   : > { %v772_v55 = vadd.f32 %v1329_v34, %v752_v47  ;;  %797 = vst [vmem:[%s1650_s5] sm:$0xff] %v781_v49  ;;  %v786_v60 = vmax.f32 %v770_v46, 0.0  ;;  %v774_v61 = vadd.f32 %v1329_v34, %v754_v53  ;;  %v775_v0 = vadd.f32 %v1329_v34, %v755_v56  ;;  %v759_v4 = vld [vmem:[#allocation2 + $0x78] sm:$0xff] }
 0x150   : > { %798 = vst [vmem:[%s1650_s5 + $0x8] sm:$0xff] %v782_v50  ;;  %v787_v63 = vmax.f32 %v771_v52, 0.0  ;;  %v776_v3 = vadd.f32 %v1329_v34, %v756_v59  ;;  %v789_v5 = vmax.f32 %v773_v58, 0.0  ;;  %v777_v6 = vadd.f32 %v1329_v34, %v757_v62  ;;  %v760_v7 = vld [vmem:[#allocation2 + $0x28] sm:$0xff] }
 0x151   : > { %799 = vst [vmem:[%s1650_s5 + $0x10] sm:$0xff] %v783_v51  ;;  %v788_v2 = vmax.f32 %v772_v55, 0.0  ;;  %v790_v8 = vmax.f32 %v774_v61, 0.0  ;;  %v778_v9 = vadd.f32 %v1329_v34, %v758_v1  ;;  %v791_v10 = vmax.f32 %v775_v0, 0.0 }
 0x152   : > { %800 = vst [vmem:[%s1650_s5 + $0x18] sm:$0xff] %v784_v54  ;;  %v779_v11 = vadd.f32 %v1329_v34, %v759_v4  ;;  %v792_v12 = vmax.f32 %v776_v3, 0.0  ;;  %v780_v13 = vadd.f32 %v1329_v34, %v760_v7  ;;  %v793_v14 = vmax.f32 %v777_v6, 0.0 }
 0x153   : > { %801 = vst [vmem:[%s1650_s5 + $0x20] sm:$0xff] %v785_v57  ;;  %v794_v15 = vmax.f32 %v778_v9, 0.0 }
 0x154   : > { %802 = vst [vmem:[%s1650_s5 + $0x28] sm:$0xff] %v786_v60  ;;  %v795_v16 = vmax.f32 %v779_v11, 0.0  ;;  %v796_v17 = vmax.f32 %v780_v13, 0.0 }
 0x155   : > { %803 = vst [vmem:[%s1650_s5 + $0x30] sm:$0xff] %v787_v63 }
 0x156   : > { %804 = vst [vmem:[%s1650_s5 + $0x38] sm:$0xff] %v788_v2 }
 0x157   : > { %805 = vst [vmem:[%s1650_s5 + $0x40] sm:$0xff] %v789_v5 }
 0x158   : > { %806 = vst [vmem:[%s1650_s5 + $0x48] sm:$0xff] %v790_v8 }
 0x159   : > { %807 = vst [vmem:[%s1650_s5 + $0x50] sm:$0xff] %v791_v10 }
 0x15a   : > { %808 = vst [vmem:[%s1650_s5 + $0x58] sm:$0xff] %v792_v12 }
 0x15b   : > { %809 = vst [vmem:[%s1650_s5 + $0x60] sm:$0xff] %v793_v14 }
 0x15c   : > { %810 = vst [vmem:[%s1650_s5 + $0x68] sm:$0xff] %v794_v15 }
 0x15d   : > { %811 = vst [vmem:[%s1650_s5 + $0x70] sm:$0xff] %v795_v16 }
 0x15e   : > { %812 = vst [vmem:[%s1650_s5 + $0x78] sm:$0xff] %v796_v17 }
 0x15f PF: > { %819 = sbr.rel (!%p1591_p1) target bundleno = 369 (0x171), region = 86  ;;  %s1174_s19 = sshll.u32 (%p1591_p1), %s1444_s20, 3  ;;  %v883_v18 = vld [vmem:[%s1650_s5] sm:$0xff] (%p1591_p1)  ;;  %v885_v19 = vld [vmem:[%s1650_s5 + $0x8] sm:$0xff] (%p1591_p1)  ;;  %v887_v20 = vld [vmem:[%s1650_s5 + $0x10] sm:$0xff] (%p1591_p1) }
 0x160   : > { %s824_s24 = scalar_lea.vmem (%p1591_p1), %s1784_s3, %s1174_s19  ;;  %v889_v21 = vld [vmem:[%s1650_s5 + $0x18] sm:$0xff] (%p1591_p1)  ;;  %v891_v22 = vld [vmem:[%s1650_s5 + $0x20] sm:$0xff] (%p1591_p1)  ;;  %v893_v23 = vld [vmem:[%s1650_s5 + $0x28] sm:$0xff] (%p1591_p1) }
 0x161   : > { %884 = vst [vmem:[%s824_s24] sm:$0xff] (%p1591_p1), %v883_v18  ;;  %v895_v24 = vld [vmem:[%s1650_s5 + $0x30] sm:$0xff] (%p1591_p1)  ;;  %v897_v25 = vld [vmem:[%s1650_s5 + $0x38] sm:$0xff] (%p1591_p1)  ;;  %v899_v26 = vld [vmem:[%s1650_s5 + $0x40] sm:$0xff] (%p1591_p1) }
 0x162   : > { %886 = vst [vmem:[%s824_s24 + $0x18] sm:$0xff] (%p1591_p1), %v885_v19  ;;  %v901_v27 = vld [vmem:[%s1650_s5 + $0x48] sm:$0xff] (%p1591_p1)  ;;  %v903_v28 = vld [vmem:[%s1650_s5 + $0x50] sm:$0xff] (%p1591_p1)  ;;  %v905_v29 = vld [vmem:[%s1650_s5 + $0x58] sm:$0xff] (%p1591_p1) }
 0x163   : > { %888 = vst [vmem:[%s824_s24 + $0x30] sm:$0xff] (%p1591_p1), %v887_v20  ;;  %v907_v30 = vld [vmem:[%s1650_s5 + $0x60] sm:$0xff] (%p1591_p1)  ;;  %v909_v31 = vld [vmem:[%s1650_s5 + $0x68] sm:$0xff] (%p1591_p1) }
 0x164   : > { %890 = vst [vmem:[%s824_s24 + $0x48] sm:$0xff] %v889_v21  ;;  %v911_v32 = vld [vmem:[%s1650_s5 + $0x70] sm:$0xff] }
 0x165   : > { %892 = vst [vmem:[%s824_s24 + $0x60] sm:$0xff] %v891_v22  ;;  %v913_v33 = vld [vmem:[%s1650_s5 + $0x78] sm:$0xff] }
 0x166   : > { %894 = vst [vmem:[%s824_s24 + $0x78] sm:$0xff] %v893_v23 }
 0x167   : > { %896 = vst [vmem:[%s824_s24 + $0x90] sm:$0xff] %v895_v24 }
 0x168   : > { %898 = vst [vmem:[%s824_s24 + $0xa8] sm:$0xff] %v897_v25 }
 0x169   : > { %900 = vst [vmem:[%s824_s24 + $0xc0] sm:$0xff] %v899_v26 }
 0x16a   : > { %902 = vst [vmem:[%s824_s24 + $0xd8] sm:$0xff] %v901_v27 }
 0x16b   : > { %904 = vst [vmem:[%s824_s24 + $0xf0] sm:$0xff] %v903_v28 }
 0x16c   : > { %906 = vst [vmem:[%s824_s24 + $0x108] sm:$0xff] %v905_v29 }
 0x16d   : > { %908 = vst [vmem:[%s824_s24 + $0x120] sm:$0xff] %v907_v30 }
 0x16e   : > { %910 = vst [vmem:[%s824_s24 + $0x138] sm:$0xff] %v909_v31 }
 0x16f   : > { %912 = vst [vmem:[%s824_s24 + $0x150] sm:$0xff] %v911_v32 }
 0x170   : > { %914 = vst [vmem:[%s824_s24 + $0x168] sm:$0xff] %v913_v33 }
 0x171 PF: > { %s16_s23 = sadd.s32 1, %s1456_s23   ;;  %s1800_s20 = sld [smem:[#allocation13_spill]] }
 0x172   : > { %p13_p9 = scmp.ge.s32.totalorder %s16_s23, 29   ;;  %s1801_s25 = sld [smem:[#allocation12_spill]] }
 0x173   : > { %s1802_s17 = sld [smem:[#allocation8_spill]]  ;;  %s1806_s12 = smov %s1416_s13 }
 0x174   : > { %s1803_s18 = sld [smem:[#allocation11_spill]]  ;;  %s1808_s14 = smov %s1424_s15 }
 0x175   : > { %s1804_s26 = sld [smem:[#allocation9_spill]]  ;;  %s1809_s15 = smov %s1428_s16 }
 0x176   : > { %s1805_s4 = sld [smem:[#allocation10_spill]]  ;;  %s1811_s19 = smov %s1448_s21 }
 0x177   : > { %s1807_s13 = smov %s1800_s20  ;;  %s1812_s20 = smov %s1452_s22 }
 0x178   : > { %s1810_s16 = smov %s1801_s25  ;;  %15 = sbr.rel (!%p13_p9) target bundleno = 9 (0x9), region = 167 }
 0x17b   : > { %s1813_s21 = smov %s1804_s26 }
 0x17c   : > { %s1814_s22 = smov %s1805_s4 }
 0x17d   :  { %930 = vsyncpa [#allocation5], 1 }
 0x17e   :  { %932 = vsyncpa [#allocation5 + $0x1], 1 }

// kernel: mynet2_forward.11
= control target key start
LH: loop header
LB: loop body
LE: loop exit
PB: predicated region body
PF: predicated region fallthrough
CT: control target
= control target key end

     0   :  { %s1781_s0 = inlined_call_operand.vmem [shape: bf16[128,3584], index: 0, kind: input, shape index: {}]   ;;  %s1782_s1 = inlined_call_operand.hbm [shape: bf16[3584,256], index: 1, kind: input, shape index: {}]   ;;  %s1783_s2 = inlined_call_operand.vmem [shape: f32[1,256], index: 2, kind: input, shape index: {}]   ;;  %s1784_s3 = inlined_call_operand.vmem [shape: f32[128,256], index: 3, kind: output, shape index: {}]  }
   0x1   :  { %1788 = sst [smem:[#allocation14_spill]] %s1781_s0 }
   0x2   :  { %8 = vsyncpa [#allocation5], 0 }
   0x3   :  { %10 = vsyncpa [#allocation5 + $0x1], 0  ;;  %s1482_s12 = smov 0   ;;  %s1484_s13 = smov 0  }
   0x4   :  { %s1486_s14 = smov 0   ;;  %s1488_s15 = smov 0  }
   0x5   :  { %s1490_s16 = smov 0   ;;  %s1492_s17 = smov 0  }
   0x6   :  { %s1494_s18 = smov 0   ;;  %s1496_s19 = smov 0  }
   0x7   :  { %s1498_s20 = smov 0   ;;  %s1500_s21 = smov 0  }
   0x8   :  { %s1502_s22 = smov 0   ;;  %s1504_s23 = smov 0  }
   0x9 LB: > { %1789 = sst [smem:[#allocation8_spill]] %s1436_s18  ;;  %s1028_s24 = sadd.s32 4294967295, %s1456_s23   ;;  %s1456_s23 = sphi %s1504_s23, %s16_s23   ;;  %s1452_s22 = sphi %s1502_s22, %s1814_s22   ;;  %s1448_s21 = sphi %s1500_s21, %s1813_s21   ;;  %s1444_s20 = sphi %s1498_s20, %s1812_s20   ;;  %s1440_s19 = sphi %s1496_s19, %s1811_s19   ;;  %s1436_s18 = sphi %s1494_s18, %s1803_s18   ;;  %s1432_s17 = sphi %s1492_s17, %s1802_s17   ;;  %s1428_s16 = sphi %s1490_s16, %s1810_s16   ;;  %s1424_s15 = sphi %s1488_s15, %s1809_s15   ;;  %s1420_s14 = sphi %s1486_s14, %s1808_s14   ;;  %s1416_s13 = sphi %s1484_s13, %s1807_s13   ;;  %s1412_s12 = sphi %s1482_s12, %s1806_s12  }
   0xa   : > { %s28_s25 = sadd.s32 1, %s1448_s21  ;;  %s31_s26 = sadd.s32 1, %s1452_s22 }
   0xb   : > { %p29_p0 = scmp.ge.s32.totalorder %s28_s25, 14  ;;  %s44_s27 = sadd.s32 1, %s1436_s18 }
   0xc   : > { %p51_p1 = scmp.ne.s32.totalorder %s1436_s18, %s1432_s17  ;;  %p52_p2 = scmp.eq.s32.totalorder %s1456_s23, 0 }
   0xd   : > { %s1816_s25 = smov (%p29_p0, %s28_s25), 0  ;;  %s1818_s26 = smov (!%p29_p0, %s31_s26), %s1452_s22 }
   0xe   : > { %1790 = sst [smem:[#allocation9_spill]] %s1816_s25  ;;  %s40_s28 = ssub.s32 %s1448_s21, %s1816_s25 }
   0xf   : > { %p33_p3 = scmp.ge.s32.totalorder %s1818_s26, 2  ;;  %p42_p4 = scmp.eq.s32.totalorder %s40_s28, 0 }
  0x10   : > { %p1554_p5 = por %p52_p2, %p51_p1  ;;  %s72_s30 = sadd.s32 1, %s1428_s16 }
  0x11   : > { %s1820_s26 = smov (%p33_p3, %s1818_s26), 0  ;;  %p79_p6 = scmp.ne.s32.totalorder %s1428_s16, %s1424_s15 }
  0x12   : > { %1792 = sst [smem:[#allocation10_spill]] %s1820_s26  ;;  %s68_s5 = ssub.s32 %s1452_s22, %s1820_s26 }
  0x13   : > { %s1562_s4 = scalar_select %p42_p4, %s1436_s18, %s44_s27  }
  0x14   : > { %s69_s6 = sor.u32 %s68_s5, %s40_s28  ;;  %p85_p7 = scmp.ne.s32.totalorder %s1424_s15, %s1420_s14 }
  0x15   : > { %1793 = sst [smem:[#allocation11_spill]] %s1562_s4  ;;  %p70_p8 = scmp.eq.s32.totalorder %s69_s6, 0 }
  0x16   : > { %p1570_p9 = por %p79_p6, %p52_p2  ;;  %p86_p10 = scmp.eq.s32.totalorder %s1028_s24, 0 }
  0x17   : > { %p124_p11 = scmp.eq.s32.totalorder %s68_s5, 0  ;;  %s126_s10 = sadd.s32 1, %s1416_s13 }
  0x18   : > { %s1577_s8 = scalar_select %p70_p8, %s1428_s16, %s72_s30  }
  0x19   : > { %p1579_p12 = por %p86_p10, %p85_p7  ;;  %p136_p13 = scmp.ne.s32.totalorder %s1416_s13, %s1412_s12 }
  0x1a   : > { %1795 = sst [smem:[#allocation12_spill]] %s1577_s8  ;;  %p137_p0 = scmp.eq.s32.totalorder %s1028_s24, 27 }
  0x1b   : > { %s1585_s11 = scalar_select %p124_p11, %s1416_s13, %s126_s10  }
  0x1c   : > { %p1591_p1 = por %p137_p0, %p136_p13  ;;  %p1031_p2 = scmp.ge.s32.totalorder %s1456_s23, 28 }
  0x1d   : > { %1797 = sst [smem:[#allocation13_spill]] %s1585_s11 }
  0x1e   : > { %159 = sbr.rel (%p1031_p2) target bundleno = 69 (0x45), region = 16 }
  0x23   : > { %162 = sbr.rel (!%p1554_p5) target bundleno = 61 (0x3d), region = 20  ;;  %s164_s27 = sand.u32 (%p1554_p5), 1, %s1436_s18  }
  0x24   : > { %s1177_s28 = sshll.u32 (%p1554_p5), %s1448_s21, 3  ;;  %s1032_s30 = sshll.u32 (%p1554_p5), %s164_s27, 7 }
  0x25   : > { %s1799_s0 = sld [smem:[#allocation14_spill]] (%p1554_p5)  ;;  %s166_s24 = scalar_lea.vmem (%p1554_p5), [#allocation3], %s1032_s30 }
  0x2b   : > { %s1603_s10 = scalar_lea.vmem %s1799_s0, %s1177_s28 }
  0x2c   : > { %v231_v0 = vld [vmem:[%s1603_s10] sm:$0xff]  ;;  %v233_v1 = vld [vmem:[%s1603_s10 + $0x70] sm:$0xff] }
  0x2d   : > { %v235_v2 = vld [vmem:[%s1603_s10 + $0xe0] sm:$0xff]  ;;  %232 = vst [vmem:[%s166_s24] sm:$0xff] %v231_v0  ;;  %v237_v3 = vld [vmem:[%s1603_s10 + $0x150] sm:$0xff] }
  0x2e   : > { %234 = vst [vmem:[%s166_s24 + $0x8] sm:$0xff] %v233_v1  ;;  %v239_v4 = vld [vmem:[%s1603_s10 + $0x1c0] sm:$0xff]  ;;  %v241_v5 = vld [vmem:[%s1603_s10 + $0x230] sm:$0xff] }
  0x2f   : > { %236 = vst [vmem:[%s166_s24 + $0x10] sm:$0xff] %v235_v2  ;;  %v243_v6 = vld [vmem:[%s1603_s10 + $0x2a0] sm:$0xff]  ;;  %v245_v7 = vld [vmem:[%s1603_s10 + $0x310] sm:$0xff] }
  0x30   : > { %238 = vst [vmem:[%s166_s24 + $0x18] sm:$0xff] %v237_v3  ;;  %v247_v8 = vld [vmem:[%s1603_s10 + $0x380] sm:$0xff]  ;;  %v249_v9 = vld [vmem:[%s1603_s10 + $0x3f0] sm:$0xff] }
  0x31   : > { %240 = vst [vmem:[%s166_s24 + $0x20] sm:$0xff] %v239_v4  ;;  %v251_v10 = vld [vmem:[%s1603_s10 + $0x460] sm:$0xff]  ;;  %v253_v11 = vld [vmem:[%s1603_s10 + $0x4d0] sm:$0xff] }
  0x32   : > { %242 = vst [vmem:[%s166_s24 + $0x28] sm:$0xff] %v241_v5  ;;  %v255_v12 = vld [vmem:[%s1603_s10 + $0x540] sm:$0xff]  ;;  %v257_v13 = vld [vmem:[%s1603_s10 + $0x5b0] sm:$0xff] }
  0x33   : > { %244 = vst [vmem:[%s166_s24 + $0x30] sm:$0xff] %v243_v6  ;;  %v259_v14 = vld [vmem:[%s1603_s10 + $0x620] sm:$0xff]  ;;  %v261_v15 = vld [vmem:[%s1603_s10 + $0x690] sm:$0xff] }
  0x34   : > { %246 = vst [vmem:[%s166_s24 + $0x38] sm:$0xff] %v245_v7 }
  0x35   : > { %248 = vst [vmem:[%s166_s24 + $0x40] sm:$0xff] %v247_v8 }
  0x36   : > { %250 = vst [vmem:[%s166_s24 + $0x48] sm:$0xff] %v249_v9 }
  0x37   : > { %252 = vst [vmem:[%s166_s24 + $0x50] sm:$0xff] %v251_v10 }
  0x38   : > { %254 = vst [vmem:[%s166_s24 + $0x58] sm:$0xff] %v253_v11 }
  0x39   : > { %256 = vst [vmem:[%s166_s24 + $0x60] sm:$0xff] %v255_v12 }
  0x3a   : > { %258 = vst [vmem:[%s166_s24 + $0x68] sm:$0xff] %v257_v13 }
  0x3b   : > { %260 = vst [vmem:[%s166_s24 + $0x70] sm:$0xff] %v259_v14 }
  0x3c   : > { %262 = vst [vmem:[%s166_s24 + $0x78] sm:$0xff] %v261_v15 }
  0x3d PF: > { %s269_s29 = sand.u32 1, %s1428_s16   ;;  %s1178_s27 = sshll.u32 %s1448_s21, 6 }
  0x3e   : > { %s1035_s28 = sshll.u32 %s269_s29, 7  ;;  %s278_s30 = sadd.s32 %s1452_s22, %s1178_s27 }
  0x3f   : > { %s1038_s5 = sshll.u32 %s278_s30, 2  ;;  %s273_s6 = scalar_lea.vmem [#allocation4], %s1035_s28 }
  0x40   : > { %s283_s0 = sshll.u32 %s273_s6, 4  ;;  %s280_s4 = scalar_lea.hbm %s1782_s1, %s1038_s5  ;;  %s284_s0 = int_to_ptr.vmem [resolvable:$true] %s283_s0 }
  0x41   : > { %s281_s10 = sshll.u32 %s280_s4, 4  ;;  %s270_s24 = scalar_lea.sflag [#allocation5], %s269_s29  ;;  %s282_s10 = int_to_ptr.hbm [resolvable:$true] %s281_s10 }
  0x42   : > { %s1458_s18 = smov 128   ;;  %s1459_s8 = smov 64  }
  0x43   : > { %s1460_s11 = smov 4  }
  0x44   : > { %1227 = dma.hbm_to_vmem [thread:$0]  (%p1570_p9), %s282_s10, 2048, %s284_s0, %s270_s24, %s1458_s18, %s1459_s8, %s1460_s11  }
  0x45 PF: > { %p1039_p3 = scmp.ge.s32.totalorder %s1456_s23, 1  ;;  %p297_p4 = scmp.lt.s32.totalorder %s1456_s23, 29 }
  0x47   : > { %p298_p5 = pnand %p1039_p3, %p297_p4 }
  0x48   : > { %s304_s25 = sand.u32 (!%p298_p5), 1, %s1432_s17   ;;  %s310_s26 = sand.u32 (!%p298_p5), 1, %s1424_s15  }
  0x49   : > { %301 = sbr.rel (%p298_p5) target bundleno = 369 (0x171), region = 66  ;;  %s1040_s4 = sshll.u32 (!%p298_p5), %s304_s25, 7 }
  0x4a   : > { %s1041_s27 = sshll.u32 (!%p298_p5), %s310_s26, 7  ;;  %s1633_s29 = scalar_lea.vmem (!%p298_p5), [#allocation3], %s1040_s4 }
  0x4b   : > { %s311_s28 = scalar_lea.sflag (!%p298_p5), [#allocation5], %s310_s26  ;;  %s1635_s30 = scalar_lea.vmem (!%p298_p5), [#allocation4], %s1041_s27 }
  0x4e   : > { %1407 = dma.done.wait (%p1579_p12), %s311_s28, 2048  }
  0x4f   : > { %1409 = vsyncadd (%p1579_p12), %s311_s28, 4294965248  ;;  %s341_s0 = sand.u32 1, %s1412_s12   ;;  %p347_p6 = scmp.lt.s32.totalorder %s1444_s20, 1 }
  0x50   : > { %s1042_s18 = sshll.u32 %s341_s0, 7  ;;  %p1043_p7 = scmp.ne.s32.totalorder %s1440_s19, 0 }
  0x51   : > { %s1644_s17 = scalar_select %p347_p6, %s1444_s20, 1 }
  0x52   : > { %s1650_s5 = scalar_lea.vmem [#allocation6], %s1042_s18  ;;  %354 = sbr.rel (%p1043_p7) target bundleno = 104 (0x68), region = 78 }
  0x53   : > { %s349_s11 = scalar_lea.vmem %s1783_s2, %s1644_s17 }
  0x57   : > { %v1461_v16 = vmov 0.0  }
  0x58   : > { %355 = vst [vmem:[#allocation2 + $0x30] sm:$0xff] %v1461_v16 }
  0x59   : > { %356 = vst [vmem:[#allocation2] sm:$0xff] %v1461_v16 }
  0x5a   : > { %357 = vst [vmem:[#allocation2 + $0x58] sm:$0xff] %v1461_v16 }
  0x5b   : > { %358 = vst [vmem:[#allocation2 + $0x18] sm:$0xff] %v1461_v16 }
  0x5c   : > { %359 = vst [vmem:[#allocation2 + $0x50] sm:$0xff] %v1461_v16 }
  0x5d   : > { %360 = vst [vmem:[#allocation2 + $0x68] sm:$0xff] %v1461_v16 }
  0x5e   : > { %361 = vst [vmem:[#allocation2 + $0x8] sm:$0xff] %v1461_v16 }
  0x5f   : > { %362 = vst [vmem:[#allocation2 + $0x48] sm:$0xff] %v1461_v16 }
  0x60   : > { %363 = vst [vmem:[#allocation2 + $0x40] sm:$0xff] %v1461_v16 }
  0x61   : > { %364 = vst [vmem:[#allocation2 + $0x20] sm:$0xff] %v1461_v16 }
  0x62   : > { %365 = vst [vmem:[#allocation2 + $0x10] sm:$0xff] %v1461_v16 }
  0x63   : > { %366 = vst [vmem:[#allocation2 + $0x38] sm:$0xff] %v1461_v16 }
  0x64   : > { %367 = vst [vmem:[#allocation2 + $0x60] sm:$0xff] %v1461_v16 }
  0x65   : > { %368 = vst [vmem:[#allocation2 + $0x70] sm:$0xff] %v1461_v16 }
  0x66   : > { %369 = vst [vmem:[#allocation2 + $0x78] sm:$0xff] %v1461_v16 }
  0x67   : > { %370 = vst [vmem:[#allocation2 + $0x28] sm:$0xff] %v1461_v16 }
  0x68 PF: > { %v1202_v17 = vld [vmem:[%s1635_s30 + $0x38] sm:$0xff]  ;;  %v1201_v19 = vld [vmem:[%s1635_s30 + $0x30] sm:$0xff]  ;;  %v1200_v21 = vld [vmem:[%s1635_s30 + $0x28] sm:$0xff]  ;;  %p1172_p8 = scmp.ne.s32.totalorder %s1440_s19, 13 }
  0x69   : > { %v1210_v18 = vld [vmem:[%s1635_s30 + $0x78] sm:$0xff]  ;;  %611 = vmatpush.bf16.msra.mxu0 %v1202_v17  ;;  %1211 = vmatpush.bf16.msra.mxu2 %v1202_v17  ;;  %v1209_v20 = vld [vmem:[%s1635_s30 + $0x70] sm:$0xff]  ;;  %v1208_v22 = vld [vmem:[%s1635_s30 + $0x68] sm:$0xff] }
  0x6a   : > { %660 = vmatpush.bf16.msra.mxu1 %v1210_v18  ;;  %1219 = vmatpush.bf16.msra.mxu3 %v1210_v18  ;;  %v1199_v23 = vld [vmem:[%s1635_s30 + $0x20] sm:$0xff]  ;;  %v1198_v25 = vld [vmem:[%s1635_s30 + $0x18] sm:$0xff]  ;;  %v1197_v27 = vld [vmem:[%s1635_s30 + $0x10] sm:$0xff] }
  0x6b   : > { %v1207_v24 = vld [vmem:[%s1635_s30 + $0x60] sm:$0xff]  ;;  %v1206_v26 = vld [vmem:[%s1635_s30 + $0x58] sm:$0xff]  ;;  %v1205_v28 = vld [vmem:[%s1635_s30 + $0x50] sm:$0xff] }
  0x6c   : > { %v1196_v29 = vld [vmem:[%s1635_s30 + $0x8] sm:$0xff]  ;;  %v1195_v31 = vld [vmem:[%s1635_s30] sm:$0xff]  ;;  %v1054_v45 = vld [vmem:[%s1633_s29 + $0x10] sm:$0xf] }
  0x6d   : > { %612 = vmatpush.bf16.msra.mxu0 %v1201_v19  ;;  %1212 = vmatpush.bf16.msra.mxu2 %v1201_v19  ;;  %v1204_v30 = vld [vmem:[%s1635_s30 + $0x48] sm:$0xff]  ;;  %v1203_v32 = vld [vmem:[%s1635_s30 + $0x40] sm:$0xff]  ;;  %v1182_v46 = vld [vmem:[%s1633_s29 + $0x14] sm:$0xf0] }
  0x6e   : > { %661 = vmatpush.bf16.msra.mxu1 %v1209_v20  ;;  %1220 = vmatpush.bf16.msra.mxu3 %v1209_v20  ;;  %v1046_v33 = vld [vmem:[%s1633_s29] sm:$0xf]  ;;  %v1180_v34 = vld [vmem:[%s1633_s29 + $0x4] sm:$0xf0]  ;;  %v1179_v37 = vld [vmem:[%s1633_s29 + $0x4] sm:$0xf]  ;;  %v1055_v53 = vor.u32 %v1182_v46, %v1054_v45 }
  0x6f   : > { %v1078_v35 = vld [vmem:[%s1633_s29 + $0x40] sm:$0xf]  ;;  %v1188_v36 = vld [vmem:[%s1633_s29 + $0x44] sm:$0xf0]  ;;  %v1048_v38 = vld [vmem:[%s1633_s29 + $0x8] sm:$0xf0]  ;;  %v1047_v41 = vor.u32 %v1180_v34, %v1046_v33 }
  0x70   : > { %v1187_v39 = vld [vmem:[%s1633_s29 + $0x44] sm:$0xf]  ;;  %v1080_v40 = vld [vmem:[%s1633_s29 + $0x48] sm:$0xf0]  ;;  %v1079_v42 = vor.u32 %v1188_v36, %v1078_v35  ;;  %v1051_v43 = vor.u32 %v1179_v37, %v1048_v38  ;;  %v1086_v47 = vld [vmem:[%s1633_s29 + $0x50] sm:$0xf] }
  0x71   : > { %613 = vmatpush.bf16.msra.mxu0 %v1200_v21  ;;  %1213 = vmatpush.bf16.msra.mxu2 %v1200_v21  ;;  %v1083_v44 = vor.u32 %v1187_v39, %v1080_v40  ;;  %v1190_v48 = vld [vmem:[%s1633_s29 + $0x54] sm:$0xf0]  ;;  %v1181_v49 = vld [vmem:[%s1633_s29 + $0x14] sm:$0xf]  ;;  %v1056_v50 = vld [vmem:[%s1633_s29 + $0x18] sm:$0xf0] }
  0x72   : > { %662 = vmatpush.bf16.msra.mxu1 %v1208_v22  ;;  %1221 = vmatpush.bf16.msra.mxu3 %v1208_v22  ;;  %v1189_v51 = vld [vmem:[%s1633_s29 + $0x54] sm:$0xf]  ;;  %v1088_v52 = vld [vmem:[%s1633_s29 + $0x58] sm:$0xf0]  ;;  %v1087_v54 = vor.u32 %v1190_v48, %v1086_v47  ;;  %v1059_v55 = vor.u32 %v1181_v49, %v1056_v50  ;;  %v1062_v57 = vld [vmem:[%s1633_s29 + $0x20] sm:$0xf] }
  0x73   : > { %v1091_v56 = vor.u32 %v1189_v51, %v1088_v52  ;;  %v1184_v58 = vld [vmem:[%s1633_s29 + $0x24] sm:$0xf0]  ;;  %v1094_v59 = vld [vmem:[%s1633_s29 + $0x60] sm:$0xf]  ;;  %v1183_v61 = vld [vmem:[%s1633_s29 + $0x24] sm:$0xf] }
  0x74   : > { %v1192_v60 = vld [vmem:[%s1633_s29 + $0x64] sm:$0xf0]  ;;  %v1064_v62 = vld [vmem:[%s1633_s29 + $0x28] sm:$0xf0]  ;;  %v1191_v63 = vld [vmem:[%s1633_s29 + $0x64] sm:$0xf]  ;;  %v1063_v1 = vor.u32 %v1184_v58, %v1062_v57 }
  0x75   : > { %614 = vmatpush.bf16.msra.mxu0 %v1199_v23  ;;  %1214 = vmatpush.bf16.msra.mxu2 %v1199_v23  ;;  %v1096_v0 = vld [vmem:[%s1633_s29 + $0x68] sm:$0xf0]  ;;  %v1095_v2 = vor.u32 %v1192_v60, %v1094_v59  ;;  %v1067_v3 = vor.u32 %v1183_v61, %v1064_v62  ;;  %v1070_v5 = vld [vmem:[%s1633_s29 + $0x30] sm:$0xf]  ;;  %v1186_v6 = vld [vmem:[%s1633_s29 + $0x34] sm:$0xf0] }
  0x76   : > { %663 = vmatpush.bf16.msra.mxu1 %v1207_v24  ;;  %1222 = vmatpush.bf16.msra.mxu3 %v1207_v24  ;;  %v1099_v4 = vor.u32 %v1191_v63, %v1096_v0  ;;  %v1102_v7 = vld [vmem:[%s1633_s29 + $0x70] sm:$0xf]  ;;  %v1194_v8 = vld [vmem:[%s1633_s29 + $0x74] sm:$0xf0]  ;;  %v1185_v9 = vld [vmem:[%s1633_s29 + $0x34] sm:$0xf]  ;;  %v1071_v13 = vor.u32 %v1186_v6, %v1070_v5 }
  0x77   : > { %v1072_v10 = vld [vmem:[%s1633_s29 + $0x38] sm:$0xf0]  ;;  %v1193_v11 = vld [vmem:[%s1633_s29 + $0x74] sm:$0xf]  ;;  %v1103_v14 = vor.u32 %v1194_v8, %v1102_v7  ;;  %v379_v23 = vld [vmem:[#allocation2 + $0x40] sm:$0xff] }
  0x78   : > { %v1104_v12 = vld [vmem:[%s1633_s29 + $0x78] sm:$0xf0]  ;;  %v1075_v15 = vor.u32 %v1185_v9, %v1072_v10  ;;  %v371_v18 = vld [vmem:[#allocation2 + $0x30] sm:$0xff]  ;;  %v380_v33 = vld [vmem:[#allocation2 + $0x20] sm:$0xff] }
  0x79   : > { %615 = vmatpush.bf16.msra.mxu0 %v1198_v25  ;;  %1215 = vmatpush.bf16.msra.mxu2 %v1198_v25  ;;  %v1107_v16 = vor.u32 %v1193_v11, %v1104_v12  ;;  %v373_v37 = vld [vmem:[#allocation2 + $0x58] sm:$0xff]  ;;  %v375_v57 = vld [vmem:[#allocation2 + $0x50] sm:$0xff]  ;;  %v383_v63 = vld [vmem:[#allocation2 + $0x60] sm:$0xff] }
  0x7a   : > { %664 = vmatpush.bf16.msra.mxu1 %v1206_v26  ;;  %1223 = vmatpush.bf16.msra.mxu3 %v1206_v26  ;;  %v374_v47 = vld [vmem:[#allocation2 + $0x18] sm:$0xff]  ;;  %v384_v9 = vld [vmem:[#allocation2 + $0x70] sm:$0xff] }
  0x7d   : > { %616 = vmatpush.bf16.msra.mxu0 %v1197_v27  ;;  %1216 = vmatpush.bf16.msra.mxu2 %v1197_v27  ;;  %v372_v27 = vld [vmem:[#allocation2] sm:$0xff] }
  0x7e   : > { %665 = vmatpush.bf16.msra.mxu1 %v1205_v28  ;;  %1224 = vmatpush.bf16.msra.mxu3 %v1205_v28 }
  0x81   : > { %617 = vmatpush.bf16.msra.mxu0 %v1196_v29  ;;  %1217 = vmatpush.bf16.msra.mxu2 %v1196_v29 }
  0x82   : > { %666 = vmatpush.bf16.msra.mxu1 %v1204_v30  ;;  %1225 = vmatpush.bf16.msra.mxu3 %v1204_v30 }
  0x85   : > { %618 = vmatpush.bf16.msra.mxu0 %v1195_v31  ;;  %1218 = vmatpush.bf16.msra.mxu2 %v1195_v31 }
  0x86   : > { %667 = vmatpush.bf16.msra.mxu1 %v1203_v32  ;;  %1226 = vmatpush.bf16.msra.mxu3 %v1203_v32 }
  0x88   : > { %619 = vmatmul.bf16.vlgmr.msra.gmra.mxu0 %v1047_v41  ;;  %639 = vmatmul.bf16.vlgmr.msra.gmra.mxu2 %v1079_v42 }
  0x89   : > { %668 = vmatmul.bf16.vlgmr.msra.gmra.mxu1 %v1051_v43  ;;  %688 = vmatmul.bf16.vlgmr.msra.gmra.mxu3 %v1083_v44  ;;  %v381_v43 = vld [vmem:[#allocation2 + $0x10] sm:$0xff] }
  0x98   : > { %624 = vmatmul.bf16.gmra.mxu0 %v1055_v53  ;;  %644 = vmatmul.bf16.gmra.mxu2 %v1087_v54  ;;  %v382_v53 = vld [vmem:[#allocation2 + $0x38] sm:$0xff] }
  0x99   : > { %673 = vmatmul.bf16.gmra.mxu1 %v1059_v55  ;;  %693 = vmatmul.bf16.gmra.mxu3 %v1091_v56 }
  0xa8   : > { %629 = vmatmul.bf16.gmra.mxu0 %v1063_v1  ;;  %649 = vmatmul.bf16.gmra.mxu2 %v1095_v2 }
  0xa9   : > { %678 = vmatmul.bf16.gmra.mxu1 %v1067_v3  ;;  %698 = vmatmul.bf16.gmra.mxu3 %v1099_v4  ;;  %v376_v3 = vld [vmem:[#allocation2 + $0x68] sm:$0xff] }
  0xb8   : > { %634 = vmatmul.bf16.gmra.mxu0 %v1071_v13  ;;  %654 = vmatmul.bf16.gmra.mxu2 %v1103_v14  ;;  %v377_v13 = vld [vmem:[#allocation2 + $0x8] sm:$0xff] }
  0xb9   : > { %683 = vmatmul.bf16.gmra.mxu1 %v1075_v15  ;;  %703 = vmatmul.bf16.gmra.mxu3 %v1107_v16 }
 0x105   : > { %v620_v17 = vpop.f32.mrf.mxu0 }
 0x106   : > { %v669_v19 = vpop.f32.mrf.mxu1 }
 0x107   : > { %v670_v20 = vadd.f32 %v669_v19, %v620_v17  ;;  %v385_v19 = vld [vmem:[#allocation2 + $0x78] sm:$0xff] }
 0x109   : > { %v709_v21 = vadd.f32 %v670_v20, %v371_v18 }
 0x10b   : > { %725 = vst [vmem:[#allocation2 + $0x30] sm:$0xff] %v709_v21  ;;  %v640_v22 = vpop.f32.mrf.mxu2 }
 0x10c   : > { %v689_v24 = vpop.f32.mrf.mxu3 }
 0x10d   : > { %v690_v25 = vadd.f32 %v689_v24, %v640_v22  ;;  %v622_v26 = vpop.f32.mrf.mxu0 }
 0x10e   : > { %v671_v28 = vpop.f32.mrf.mxu1 }
 0x10f   : > { %v717_v29 = vadd.f32 %v690_v25, %v379_v23  ;;  %v672_v30 = vadd.f32 %v671_v28, %v622_v26  ;;  %v378_v23 = vld [vmem:[#allocation2 + $0x48] sm:$0xff] }
 0x111   : > { %733 = vst [vmem:[#allocation2 + $0x40] sm:$0xff] %v717_v29  ;;  %v710_v31 = vadd.f32 %v672_v30, %v372_v27  ;;  %v386_v29 = vld [vmem:[#allocation2 + $0x28] sm:$0xff] }
 0x113   : > { %726 = vst [vmem:[#allocation2] sm:$0xff] %v710_v31  ;;  %v642_v32 = vpop.f32.mrf.mxu2 }
 0x114   : > { %v691_v34 = vpop.f32.mrf.mxu3 }
 0x115   : > { %v692_v35 = vadd.f32 %v691_v34, %v642_v32  ;;  %v625_v36 = vpop.f32.mrf.mxu0 }
 0x116   : > { %v674_v38 = vpop.f32.mrf.mxu1 }
 0x117   : > { %v718_v39 = vadd.f32 %v692_v35, %v380_v33  ;;  %v675_v40 = vadd.f32 %v674_v38, %v625_v36 }
 0x119   : > { %734 = vst [vmem:[#allocation2 + $0x20] sm:$0xff] %v718_v39  ;;  %v711_v41 = vadd.f32 %v675_v40, %v373_v37 }
 0x11b   : > { %727 = vst [vmem:[#allocation2 + $0x58] sm:$0xff] %v711_v41  ;;  %v645_v42 = vpop.f32.mrf.mxu2 }
 0x11c   : > { %v694_v44 = vpop.f32.mrf.mxu3 }
 0x11d   : > { %v695_v45 = vadd.f32 %v694_v44, %v645_v42  ;;  %v627_v46 = vpop.f32.mrf.mxu0 }
 0x11e   : > { %v676_v48 = vpop.f32.mrf.mxu1 }
 0x11f   : > { %v719_v49 = vadd.f32 %v695_v45, %v381_v43  ;;  %v677_v50 = vadd.f32 %v676_v48, %v627_v46 }
 0x121   : > { %735 = vst [vmem:[#allocation2 + $0x10] sm:$0xff] %v719_v49  ;;  %v712_v51 = vadd.f32 %v677_v50, %v374_v47 }
 0x123   : > { %728 = vst [vmem:[#allocation2 + $0x18] sm:$0xff] %v712_v51  ;;  %v647_v52 = vpop.f32.mrf.mxu2 }
 0x124   : > { %v696_v54 = vpop.f32.mrf.mxu3 }
 0x125   : > { %v697_v55 = vadd.f32 %v696_v54, %v647_v52  ;;  %v630_v56 = vpop.f32.mrf.mxu0 }
 0x126   : > { %v679_v58 = vpop.f32.mrf.mxu1 }
 0x127   : > { %v720_v59 = vadd.f32 %v697_v55, %v382_v53  ;;  %v680_v60 = vadd.f32 %v679_v58, %v630_v56 }
 0x129   : > { %736 = vst [vmem:[#allocation2 + $0x38] sm:$0xff] %v720_v59  ;;  %v713_v61 = vadd.f32 %v680_v60, %v375_v57 }
 0x12b   : > { %729 = vst [vmem:[#allocation2 + $0x50] sm:$0xff] %v713_v61  ;;  %v650_v62 = vpop.f32.mrf.mxu2 }
 0x12c   : > { %v699_v0 = vpop.f32.mrf.mxu3 }
 0x12d   : > { %v700_v1 = vadd.f32 %v699_v0, %v650_v62  ;;  %v632_v2 = vpop.f32.mrf.mxu0 }
 0x12e   : > { %v681_v4 = vpop.f32.mrf.mxu1 }
 0x12f   : > { %v721_v5 = vadd.f32 %v700_v1, %v383_v63  ;;  %v682_v6 = vadd.f32 %v681_v4, %v632_v2 }
 0x131   : > { %737 = vst [vmem:[#allocation2 + $0x60] sm:$0xff] %v721_v5  ;;  %v714_v7 = vadd.f32 %v682_v6, %v376_v3 }
 0x133   : > { %730 = vst [vmem:[#allocation2 + $0x68] sm:$0xff] %v714_v7  ;;  %v652_v8 = vpop.f32.mrf.mxu2 }
 0x134   : > { %v701_v10 = vpop.f32.mrf.mxu3 }
 0x135   : > { %v702_v11 = vadd.f32 %v701_v10, %v652_v8  ;;  %v635_v12 = vpop.f32.mrf.mxu0 }
 0x136   : > { %v684_v14 = vpop.f32.mrf.mxu1 }
 0x137   : > { %v722_v15 = vadd.f32 %v702_v11, %v384_v9  ;;  %v685_v16 = vadd.f32 %v684_v14, %v635_v12 }
 0x139   : > { %738 = vst [vmem:[#allocation2 + $0x70] sm:$0xff] %v722_v15  ;;  %v715_v17 = vadd.f32 %v685_v16, %v377_v13 }
 0x13b   : > { %731 = vst [vmem:[#allocation2 + $0x8] sm:$0xff] %v715_v17  ;;  %v655_v18 = vpop.f32.mrf.mxu2 }
 0x13c   : > { %v704_v20 = vpop.f32.mrf.mxu3 }
 0x13d   : > { %v705_v21 = vadd.f32 %v704_v20, %v655_v18  ;;  %v637_v22 = vpop.f32.mrf.mxu0 }
 0x13e   : > { %v686_v24 = vpop.f32.mrf.mxu1 }
 0x13f   : > { %v723_v25 = vadd.f32 %v705_v21, %v385_v19  ;;  %v687_v26 = vadd.f32 %v686_v24, %v637_v22 }
 0x141   : > { %739 = vst [vmem:[#allocation2 + $0x78] sm:$0xff] %v723_v25  ;;  %v716_v27 = vadd.f32 %v687_v26, %v378_v23 }
 0x143   : > { %732 = vst [vmem:[#allocation2 + $0x48] sm:$0xff] %v716_v27  ;;  %v657_v28 = vpop.f32.mrf.mxu2 }
 0x144   : > { %v706_v30 = vpop.f32.mrf.mxu3 }
 0x145   : > { %v707_v31 = vadd.f32 %v706_v30, %v657_v28  ;;  %744 = sbr.rel (%p1172_p8) target bundleno = 351 (0x15f), region = 82 }
 0x147   : > { %v724_v32 = vadd.f32 %v707_v31, %v386_v29 }
 0x149   : > { %740 = vst [vmem:[#allocation2 + $0x28] sm:$0xff] %v724_v32 }
 0x14a   : > { %v745_v33 = vld [vmem:[#allocation2 + $0x30] sm:$0xff]  ;;  %v1329_v34 = vld [vmem:[%s349_s11] ss:$0 sm:$0xff]  ;;  %v747_v36 = vld [vmem:[#allocation2 + $0x58] sm:$0xff] }
 0x14b   : > { %v746_v35 = vld [vmem:[#allocation2] sm:$0xff]  ;;  %v748_v37 = vld [vmem:[#allocation2 + $0x18] sm:$0xff]  ;;  %v765_v38 = vadd.f32 %v1329_v34, %v745_v33  ;;  %v767_v40 = vadd.f32 %v1329_v34, %v747_v36  ;;  %v749_v42 = vld [vmem:[#allocation2 + $0x50] sm:$0xff] }
 0x14c   : > { %v766_v39 = vadd.f32 %v1329_v34, %v746_v35  ;;  %v768_v41 = vadd.f32 %v1329_v34, %v748_v37  ;;  %v750_v43 = vld [vmem:[#allocation2 + $0x68] sm:$0xff]  ;;  %v769_v45 = vadd.f32 %v1329_v34, %v749_v42  ;;  %v753_v48 = vld [vmem:[#allocation2 + $0x40] sm:$0xff]  ;;  %v755_v56 = vld [vmem:[#allocation2 + $0x10] sm:$0xff] }
 0x14d   : > { %v751_v44 = vld [vmem:[#allocation2 + $0x8] sm:$0xff]  ;;  %v770_v46 = vadd.f32 %v1329_v34, %v750_v43  ;;  %v781_v49 = vmax.f32 %v765_v38, 0.0  ;;  %v783_v51 = vmax.f32 %v767_v40, 0.0  ;;  %v754_v53 = vld [vmem:[#allocation2 + $0x20] sm:$0xff]  ;;  %v773_v58 = vadd.f32 %v1329_v34, %v753_v48  ;;  %v756_v59 = vld [vmem:[#allocation2 + $0x38] sm:$0xff] }
 0x14e   : > { %v752_v47 = vld [vmem:[#allocation2 + $0x48] sm:$0xff]  ;;  %v782_v50 = vmax.f32 %v766_v39, 0.0  ;;  %v771_v52 = vadd.f32 %v1329_v34, %v751_v44  ;;  %v784_v54 = vmax.f32 %v768_v41, 0.0  ;;  %v785_v57 = vmax.f32 %v769_v45, 0.0  ;;  %v757_v62 = vld [vmem:[#allocation2 + $0x60] sm:$0xff]  ;;  %v758_v1 = vld [vmem:[#allocation2 + $0x70] sm:$0xff] }
 0x14f   : > { %v772_v55 = vadd.f32 %v1329_v34, %v752_v47  ;;  %797 = vst [vmem:[%s1650_s5] sm:$0xff] %v781_v49  ;;  %v786_v60 = vmax.f32 %v770_v46, 0.0  ;;  %v774_v61 = vadd.f32 %v1329_v34, %v754_v53  ;;  %v775_v0 = vadd.f32 %v1329_v34, %v755_v56  ;;  %v759_v4 = vld [vmem:[#allocation2 + $0x78] sm:$0xff] }
 0x150   : > { %798 = vst [vmem:[%s1650_s5 + $0x8] sm:$0xff] %v782_v50  ;;  %v787_v63 = vmax.f32 %v771_v52, 0.0  ;;  %v776_v3 = vadd.f32 %v1329_v34, %v756_v59  ;;  %v789_v5 = vmax.f32 %v773_v58, 0.0  ;;  %v777_v6 = vadd.f32 %v1329_v34, %v757_v62  ;;  %v760_v7 = vld [vmem:[#allocation2 + $0x28] sm:$0xff] }
 0x151   : > { %799 = vst [vmem:[%s1650_s5 + $0x10] sm:$0xff] %v783_v51  ;;  %v788_v2 = vmax.f32 %v772_v55, 0.0  ;;  %v790_v8 = vmax.f32 %v774_v61, 0.0  ;;  %v778_v9 = vadd.f32 %v1329_v34, %v758_v1  ;;  %v791_v10 = vmax.f32 %v775_v0, 0.0 }
 0x152   : > { %800 = vst [vmem:[%s1650_s5 + $0x18] sm:$0xff] %v784_v54  ;;  %v779_v11 = vadd.f32 %v1329_v34, %v759_v4  ;;  %v792_v12 = vmax.f32 %v776_v3, 0.0  ;;  %v780_v13 = vadd.f32 %v1329_v34, %v760_v7  ;;  %v793_v14 = vmax.f32 %v777_v6, 0.0 }
 0x153   : > { %801 = vst [vmem:[%s1650_s5 + $0x20] sm:$0xff] %v785_v57  ;;  %v794_v15 = vmax.f32 %v778_v9, 0.0 }
 0x154   : > { %802 = vst [vmem:[%s1650_s5 + $0x28] sm:$0xff] %v786_v60  ;;  %v795_v16 = vmax.f32 %v779_v11, 0.0  ;;  %v796_v17 = vmax.f32 %v780_v13, 0.0 }
 0x155   : > { %803 = vst [vmem:[%s1650_s5 + $0x30] sm:$0xff] %v787_v63 }
 0x156   : > { %804 = vst [vmem:[%s1650_s5 + $0x38] sm:$0xff] %v788_v2 }
 0x157   : > { %805 = vst [vmem:[%s1650_s5 + $0x40] sm:$0xff] %v789_v5 }
 0x158   : > { %806 = vst [vmem:[%s1650_s5 + $0x48] sm:$0xff] %v790_v8 }
 0x159   : > { %807 = vst [vmem:[%s1650_s5 + $0x50] sm:$0xff] %v791_v10 }
 0x15a   : > { %808 = vst [vmem:[%s1650_s5 + $0x58] sm:$0xff] %v792_v12 }
 0x15b   : > { %809 = vst [vmem:[%s1650_s5 + $0x60] sm:$0xff] %v793_v14 }
 0x15c   : > { %810 = vst [vmem:[%s1650_s5 + $0x68] sm:$0xff] %v794_v15 }
 0x15d   : > { %811 = vst [vmem:[%s1650_s5 + $0x70] sm:$0xff] %v795_v16 }
 0x15e   : > { %812 = vst [vmem:[%s1650_s5 + $0x78] sm:$0xff] %v796_v17 }
 0x15f PF: > { %819 = sbr.rel (!%p1591_p1) target bundleno = 369 (0x171), region = 86  ;;  %s1174_s19 = sshll.u32 (%p1591_p1), %s1444_s20, 3  ;;  %v883_v18 = vld [vmem:[%s1650_s5] sm:$0xff] (%p1591_p1)  ;;  %v885_v19 = vld [vmem:[%s1650_s5 + $0x8] sm:$0xff] (%p1591_p1)  ;;  %v887_v20 = vld [vmem:[%s1650_s5 + $0x10] sm:$0xff] (%p1591_p1) }
 0x160   : > { %s824_s24 = scalar_lea.vmem (%p1591_p1), %s1784_s3, %s1174_s19  ;;  %v889_v21 = vld [vmem:[%s1650_s5 + $0x18] sm:$0xff] (%p1591_p1)  ;;  %v891_v22 = vld [vmem:[%s1650_s5 + $0x20] sm:$0xff] (%p1591_p1)  ;;  %v893_v23 = vld [vmem:[%s1650_s5 + $0x28] sm:$0xff] (%p1591_p1) }
 0x161   : > { %884 = vst [vmem:[%s824_s24] sm:$0xff] (%p1591_p1), %v883_v18  ;;  %v895_v24 = vld [vmem:[%s1650_s5 + $0x30] sm:$0xff] (%p1591_p1)  ;;  %v897_v25 = vld [vmem:[%s1650_s5 + $0x38] sm:$0xff] (%p1591_p1)  ;;  %v899_v26 = vld [vmem:[%s1650_s5 + $0x40] sm:$0xff] (%p1591_p1) }
 0x162   : > { %886 = vst [vmem:[%s824_s24 + $0x10] sm:$0xff] (%p1591_p1), %v885_v19  ;;  %v901_v27 = vld [vmem:[%s1650_s5 + $0x48] sm:$0xff] (%p1591_p1)  ;;  %v903_v28 = vld [vmem:[%s1650_s5 + $0x50] sm:$0xff] (%p1591_p1)  ;;  %v905_v29 = vld [vmem:[%s1650_s5 + $0x58] sm:$0xff] (%p1591_p1) }
 0x163   : > { %888 = vst [vmem:[%s824_s24 + $0x20] sm:$0xff] (%p1591_p1), %v887_v20  ;;  %v907_v30 = vld [vmem:[%s1650_s5 + $0x60] sm:$0xff] (%p1591_p1)  ;;  %v909_v31 = vld [vmem:[%s1650_s5 + $0x68] sm:$0xff] (%p1591_p1) }
 0x164   : > { %890 = vst [vmem:[%s824_s24 + $0x30] sm:$0xff] %v889_v21  ;;  %v911_v32 = vld [vmem:[%s1650_s5 + $0x70] sm:$0xff] }
 0x165   : > { %892 = vst [vmem:[%s824_s24 + $0x40] sm:$0xff] %v891_v22  ;;  %v913_v33 = vld [vmem:[%s1650_s5 + $0x78] sm:$0xff] }
 0x166   : > { %894 = vst [vmem:[%s824_s24 + $0x50] sm:$0xff] %v893_v23 }
 0x167   : > { %896 = vst [vmem:[%s824_s24 + $0x60] sm:$0xff] %v895_v24 }
 0x168   : > { %898 = vst [vmem:[%s824_s24 + $0x70] sm:$0xff] %v897_v25 }
 0x169   : > { %900 = vst [vmem:[%s824_s24 + $0x80] sm:$0xff] %v899_v26 }
 0x16a   : > { %902 = vst [vmem:[%s824_s24 + $0x90] sm:$0xff] %v901_v27 }
 0x16b   : > { %904 = vst [vmem:[%s824_s24 + $0xa0] sm:$0xff] %v903_v28 }
 0x16c   : > { %906 = vst [vmem:[%s824_s24 + $0xb0] sm:$0xff] %v905_v29 }
 0x16d   : > { %908 = vst [vmem:[%s824_s24 + $0xc0] sm:$0xff] %v907_v30 }
 0x16e   : > { %910 = vst [vmem:[%s824_s24 + $0xd0] sm:$0xff] %v909_v31 }
 0x16f   : > { %912 = vst [vmem:[%s824_s24 + $0xe0] sm:$0xff] %v911_v32 }
 0x170   : > { %914 = vst [vmem:[%s824_s24 + $0xf0] sm:$0xff] %v913_v33 }
 0x171 PF: > { %s16_s23 = sadd.s32 1, %s1456_s23   ;;  %s1800_s20 = sld [smem:[#allocation13_spill]] }
 0x172   : > { %p13_p9 = scmp.ge.s32.totalorder %s16_s23, 30   ;;  %s1801_s25 = sld [smem:[#allocation12_spill]] }
 0x173   : > { %s1802_s17 = sld [smem:[#allocation8_spill]]  ;;  %s1806_s12 = smov %s1416_s13 }
 0x174   : > { %s1803_s18 = sld [smem:[#allocation11_spill]]  ;;  %s1808_s14 = smov %s1424_s15 }
 0x175   : > { %s1804_s26 = sld [smem:[#allocation9_spill]]  ;;  %s1809_s15 = smov %s1428_s16 }
 0x176   : > { %s1805_s4 = sld [smem:[#allocation10_spill]]  ;;  %s1811_s19 = smov %s1448_s21 }
 0x177   : > { %s1807_s13 = smov %s1800_s20  ;;  %s1812_s20 = smov %s1452_s22 }
 0x178   : > { %s1810_s16 = smov %s1801_s25  ;;  %15 = sbr.rel (!%p13_p9) target bundleno = 9 (0x9), region = 167 }
 0x17b   : > { %s1813_s21 = smov %s1804_s26 }
 0x17c   : > { %s1814_s22 = smov %s1805_s4 }
 0x17d   :  { %930 = vsyncpa [#allocation5], 1 }
 0x17e   :  { %932 = vsyncpa [#allocation5 + $0x1], 1 }

// kernel: mynet2_forward.12
= control target key start
LH: loop header
LB: loop body
LE: loop exit
PB: predicated region body
PF: predicated region fallthrough
CT: control target
= control target key end

     0   :  { %s1781_s0 = inlined_call_operand.vmem [shape: bf16[128,2304], index: 0, kind: input, shape index: {}]   ;;  %s1782_s1 = inlined_call_operand.hbm [shape: bf16[2304,256], index: 1, kind: input, shape index: {}]   ;;  %s1783_s2 = inlined_call_operand.vmem [shape: f32[1,256], index: 2, kind: input, shape index: {}]   ;;  %s1784_s3 = inlined_call_operand.vmem [shape: f32[128,256], index: 3, kind: output, shape index: {}]  }
   0x1   :  { %1788 = sst [smem:[#allocation14_spill]] %s1781_s0 }
   0x2   :  { %8 = vsyncpa [#allocation5], 0 }
   0x3   :  { %10 = vsyncpa [#allocation5 + $0x1], 0  ;;  %s1482_s12 = smov 0   ;;  %s1484_s13 = smov 0  }
   0x4   :  { %s1486_s14 = smov 0   ;;  %s1488_s15 = smov 0  }
   0x5   :  { %s1490_s16 = smov 0   ;;  %s1492_s17 = smov 0  }
   0x6   :  { %s1494_s18 = smov 0   ;;  %s1496_s19 = smov 0  }
   0x7   :  { %s1498_s20 = smov 0   ;;  %s1500_s21 = smov 0  }
   0x8   :  { %s1502_s22 = smov 0   ;;  %s1504_s23 = smov 0  }
   0x9 LB: > { %1789 = sst [smem:[#allocation8_spill]] %s1436_s18  ;;  %s1028_s24 = sadd.s32 4294967295, %s1456_s23   ;;  %s1456_s23 = sphi %s1504_s23, %s16_s23   ;;  %s1452_s22 = sphi %s1502_s22, %s1814_s22   ;;  %s1448_s21 = sphi %s1500_s21, %s1813_s21   ;;  %s1444_s20 = sphi %s1498_s20, %s1812_s20   ;;  %s1440_s19 = sphi %s1496_s19, %s1811_s19   ;;  %s1436_s18 = sphi %s1494_s18, %s1803_s18   ;;  %s1432_s17 = sphi %s1492_s17, %s1802_s17   ;;  %s1428_s16 = sphi %s1490_s16, %s1810_s16   ;;  %s1424_s15 = sphi %s1488_s15, %s1809_s15   ;;  %s1420_s14 = sphi %s1486_s14, %s1808_s14   ;;  %s1416_s13 = sphi %s1484_s13, %s1807_s13   ;;  %s1412_s12 = sphi %s1482_s12, %s1806_s12  }
   0xa   : > { %s28_s25 = sadd.s32 1, %s1448_s21  ;;  %s31_s26 = sadd.s32 1, %s1452_s22 }
   0xb   : > { %p29_p0 = scmp.ge.s32.totalorder %s28_s25, 9  ;;  %s44_s27 = sadd.s32 1, %s1436_s18 }
   0xc   : > { %p51_p1 = scmp.ne.s32.totalorder %s1436_s18, %s1432_s17  ;;  %p52_p2 = scmp.eq.s32.totalorder %s1456_s23, 0 }
   0xd   : > { %s1816_s25 = smov (%p29_p0, %s28_s25), 0  ;;  %s1818_s26 = smov (!%p29_p0, %s31_s26), %s1452_s22 }
   0xe   : > { %1790 = sst [smem:[#allocation9_spill]] %s1816_s25  ;;  %s40_s28 = ssub.s32 %s1448_s21, %s1816_s25 }
   0xf   : > { %p33_p3 = scmp.ge.s32.totalorder %s1818_s26, 2  ;;  %p42_p4 = scmp.eq.s32.totalorder %s40_s28, 0 }
  0x10   : > { %p1554_p5 = por %p52_p2, %p51_p1  ;;  %s72_s30 = sadd.s32 1, %s1428_s16 }
  0x11   : > { %s1820_s26 = smov (%p33_p3, %s1818_s26), 0  ;;  %p79_p6 = scmp.ne.s32.totalorder %s1428_s16, %s1424_s15 }
  0x12   : > { %1792 = sst [smem:[#allocation10_spill]] %s1820_s26  ;;  %s68_s5 = ssub.s32 %s1452_s22, %s1820_s26 }
  0x13   : > { %s1562_s4 = scalar_select %p42_p4, %s1436_s18, %s44_s27  }
  0x14   : > { %s69_s6 = sor.u32 %s68_s5, %s40_s28  ;;  %p85_p7 = scmp.ne.s32.totalorder %s1424_s15, %s1420_s14 }
  0x15   : > { %1793 = sst [smem:[#allocation11_spill]] %s1562_s4  ;;  %p70_p8 = scmp.eq.s32.totalorder %s69_s6, 0 }
  0x16   : > { %p1570_p9 = por %p79_p6, %p52_p2  ;;  %p86_p10 = scmp.eq.s32.totalorder %s1028_s24, 0 }
  0x17   : > { %p124_p11 = scmp.eq.s32.totalorder %s68_s5, 0  ;;  %s126_s10 = sadd.s32 1, %s1416_s13 }
  0x18   : > { %s1577_s8 = scalar_select %p70_p8, %s1428_s16, %s72_s30  }
  0x19   : > { %p1579_p12 = por %p86_p10, %p85_p7  ;;  %p136_p13 = scmp.ne.s32.totalorder %s1416_s13, %s1412_s12 }
  0x1a   : > { %1795 = sst [smem:[#allocation12_spill]] %s1577_s8  ;;  %p137_p0 = scmp.eq.s32.totalorder %s1028_s24, 17 }
  0x1b   : > { %s1585_s11 = scalar_select %p124_p11, %s1416_s13, %s126_s10  }
  0x1c   : > { %p1591_p1 = por %p137_p0, %p136_p13  ;;  %p1031_p2 = scmp.ge.s32.totalorder %s1456_s23, 18 }
  0x1d   : > { %1797 = sst [smem:[#allocation13_spill]] %s1585_s11 }
  0x1e   : > { %159 = sbr.rel (%p1031_p2) target bundleno = 69 (0x45), region = 16 }
  0x23   : > { %162 = sbr.rel (!%p1554_p5) target bundleno = 61 (0x3d), region = 20  ;;  %s164_s27 = sand.u32 (%p1554_p5), 1, %s1436_s18  }
  0x24   : > { %s1177_s28 = sshll.u32 (%p1554_p5), %s1448_s21, 3  ;;  %s1032_s30 = sshll.u32 (%p1554_p5), %s164_s27, 7 }
  0x25   : > { %s1799_s0 = sld [smem:[#allocation14_spill]] (%p1554_p5)  ;;  %s166_s24 = scalar_lea.vmem (%p1554_p5), [#allocation3], %s1032_s30 }
  0x2b   : > { %s1603_s10 = scalar_lea.vmem %s1799_s0, %s1177_s28 }
  0x2c   : > { %v231_v0 = vld [vmem:[%s1603_s10] sm:$0xff]  ;;  %v233_v1 = vld [vmem:[%s1603_s10 + $0x48] sm:$0xff]  ;;  %v235_v2 = vld [vmem:[%s1603_s10 + $0x90] sm:$0xff] }
  0x2d   : > { %232 = vst [vmem:[%s166_s24] sm:$0xff] %v231_v0  ;;  %v237_v3 = vld [vmem:[%s1603_s10 + $0xd8] sm:$0xff]  ;;  %v239_v4 = vld [vmem:[%s1603_s10 + $0x120] sm:$0xff]  ;;  %v241_v5 = vld [vmem:[%s1603_s10 + $0x168] sm:$0xff] }
  0x2e   : > { %234 = vst [vmem:[%s166_s24 + $0x8] sm:$0xff] %v233_v1  ;;  %v243_v6 = vld [vmem:[%s1603_s10 + $0x1b0] sm:$0xff]  ;;  %v245_v7 = vld [vmem:[%s1603_s10 + $0x1f8] sm:$0xff]  ;;  %v247_v8 = vld [vmem:[%s1603_s10 + $0x240] sm:$0xff] }
  0x2f   : > { %236 = vst [vmem:[%s166_s24 + $0x10] sm:$0xff] %v235_v2  ;;  %v249_v9 = vld [vmem:[%s1603_s10 + $0x288] sm:$0xff]  ;;  %v251_v10 = vld [vmem:[%s1603_s10 + $0x2d0] sm:$0xff]  ;;  %v253_v11 = vld [vmem:[%s1603_s10 + $0x318] sm:$0xff] }
  0x30   : > { %238 = vst [vmem:[%s166_s24 + $0x18] sm:$0xff] %v237_v3  ;;  %v255_v12 = vld [vmem:[%s1603_s10 + $0x360] sm:$0xff]  ;;  %v257_v13 = vld [vmem:[%s1603_s10 + $0x3a8] sm:$0xff]  ;;  %v259_v14 = vld [vmem:[%s1603_s10 + $0x3f0] sm:$0xff] }
  0x31   : > { %240 = vst [vmem:[%s166_s24 + $0x20] sm:$0xff] %v239_v4  ;;  %v261_v15 = vld [vmem:[%s1603_s10 + $0x438] sm:$0xff] }
  0x32   : > { %242 = vst [vmem:[%s166_s24 + $0x28] sm:$0xff] %v241_v5 }
  0x33   : > { %244 = vst [vmem:[%s166_s24 + $0x30] sm:$0xff] %v243_v6 }
  0x34   : > { %246 = vst [vmem:[%s166_s24 + $0x38] sm:$0xff] %v245_v7 }
  0x35   : > { %248 = vst [vmem:[%s166_s24 + $0x40] sm:$0xff] %v247_v8 }
  0x36   : > { %250 = vst [vmem:[%s166_s24 + $0x48] sm:$0xff] %v249_v9 }
  0x37   : > { %252 = vst [vmem:[%s166_s24 + $0x50] sm:$0xff] %v251_v10 }
  0x38   : > { %254 = vst [vmem:[%s166_s24 + $0x58] sm:$0xff] %v253_v11 }
  0x39   : > { %256 = vst [vmem:[%s166_s24 + $0x60] sm:$0xff] %v255_v12 }
  0x3a   : > { %258 = vst [vmem:[%s166_s24 + $0x68] sm:$0xff] %v257_v13 }
  0x3b   : > { %260 = vst [vmem:[%s166_s24 + $0x70] sm:$0xff] %v259_v14 }
  0x3c   : > { %262 = vst [vmem:[%s166_s24 + $0x78] sm:$0xff] %v261_v15 }
  0x3d PF: > { %s269_s29 = sand.u32 1, %s1428_s16   ;;  %s1178_s27 = sshll.u32 %s1448_s21, 6 }
  0x3e   : > { %s1035_s28 = sshll.u32 %s269_s29, 7  ;;  %s278_s30 = sadd.s32 %s1452_s22, %s1178_s27 }
  0x3f   : > { %s1038_s5 = sshll.u32 %s278_s30, 2  ;;  %s273_s6 = scalar_lea.vmem [#allocation4], %s1035_s28 }
  0x40   : > { %s283_s0 = sshll.u32 %s273_s6, 4  ;;  %s280_s4 = scalar_lea.hbm %s1782_s1, %s1038_s5  ;;  %s284_s0 = int_to_ptr.vmem [resolvable:$true] %s283_s0 }
  0x41   : > { %s281_s10 = sshll.u32 %s280_s4, 4  ;;  %s270_s24 = scalar_lea.sflag [#allocation5], %s269_s29  ;;  %s282_s10 = int_to_ptr.hbm [resolvable:$true] %s281_s10 }
  0x42   : > { %s1458_s18 = smov 128   ;;  %s1459_s8 = smov 64  }
  0x43   : > { %s1460_s11 = smov 4  }
  0x44   : > { %1227 = dma.hbm_to_vmem [thread:$0]  (%p1570_p9), %s282_s10, 2048, %s284_s0, %s270_s24, %s1458_s18, %s1459_s8, %s1460_s11  }
  0x45 PF: > { %p1039_p3 = scmp.ge.s32.totalorder %s1456_s23, 1  ;;  %p297_p4 = scmp.lt.s32.totalorder %s1456_s23, 19 }
  0x47   : > { %p298_p5 = pnand %p1039_p3, %p297_p4 }
  0x48   : > { %s304_s25 = sand.u32 (!%p298_p5), 1, %s1432_s17   ;;  %s310_s26 = sand.u32 (!%p298_p5), 1, %s1424_s15  }
  0x49   : > { %301 = sbr.rel (%p298_p5) target bundleno = 369 (0x171), region = 66  ;;  %s1040_s4 = sshll.u32 (!%p298_p5), %s304_s25, 7 }
  0x4a   : > { %s1041_s27 = sshll.u32 (!%p298_p5), %s310_s26, 7  ;;  %s1633_s29 = scalar_lea.vmem (!%p298_p5), [#allocation3], %s1040_s4 }
  0x4b   : > { %s311_s28 = scalar_lea.sflag (!%p298_p5), [#allocation5], %s310_s26  ;;  %s1635_s30 = scalar_lea.vmem (!%p298_p5), [#allocation4], %s1041_s27 }
  0x4e   : > { %1407 = dma.done.wait (%p1579_p12), %s311_s28, 2048  }
  0x4f   : > { %1409 = vsyncadd (%p1579_p12), %s311_s28, 4294965248  ;;  %s341_s0 = sand.u32 1, %s1412_s12   ;;  %p347_p6 = scmp.lt.s32.totalorder %s1444_s20, 1 }
  0x50   : > { %s1042_s18 = sshll.u32 %s341_s0, 7  ;;  %p1043_p7 = scmp.ne.s32.totalorder %s1440_s19, 0 }
  0x51   : > { %s1644_s17 = scalar_select %p347_p6, %s1444_s20, 1 }
  0x52   : > { %s1650_s5 = scalar_lea.vmem [#allocation6], %s1042_s18  ;;  %354 = sbr.rel (%p1043_p7) target bundleno = 104 (0x68), region = 78 }
  0x53   : > { %s349_s11 = scalar_lea.vmem %s1783_s2, %s1644_s17 }
  0x57   : > { %v1461_v16 = vmov 0.0  }
  0x58   : > { %355 = vst [vmem:[#allocation2 + $0x30] sm:$0xff] %v1461_v16 }
  0x59   : > { %356 = vst [vmem:[#allocation2] sm:$0xff] %v1461_v16 }
  0x5a   : > { %357 = vst [vmem:[#allocation2 + $0x58] sm:$0xff] %v1461_v16 }
  0x5b   : > { %358 = vst [vmem:[#allocation2 + $0x18] sm:$0xff] %v1461_v16 }
  0x5c   : > { %359 = vst [vmem:[#allocation2 + $0x50] sm:$0xff] %v1461_v16 }
  0x5d   : > { %360 = vst [vmem:[#allocation2 + $0x68] sm:$0xff] %v1461_v16 }
  0x5e   : > { %361 = vst [vmem:[#allocation2 + $0x8] sm:$0xff] %v1461_v16 }
  0x5f   : > { %362 = vst [vmem:[#allocation2 + $0x48] sm:$0xff] %v1461_v16 }
  0x60   : > { %363 = vst [vmem:[#allocation2 + $0x40] sm:$0xff] %v1461_v16 }
  0x61   : > { %364 = vst [vmem:[#allocation2 + $0x20] sm:$0xff] %v1461_v16 }
  0x62   : > { %365 = vst [vmem:[#allocation2 + $0x10] sm:$0xff] %v1461_v16 }
  0x63   : > { %366 = vst [vmem:[#allocation2 + $0x38] sm:$0xff] %v1461_v16 }
  0x64   : > { %367 = vst [vmem:[#allocation2 + $0x60] sm:$0xff] %v1461_v16 }
  0x65   : > { %368 = vst [vmem:[#allocation2 + $0x70] sm:$0xff] %v1461_v16 }
  0x66   : > { %369 = vst [vmem:[#allocation2 + $0x78] sm:$0xff] %v1461_v16 }
  0x67   : > { %370 = vst [vmem:[#allocation2 + $0x28] sm:$0xff] %v1461_v16 }
  0x68 PF: > { %v1202_v17 = vld [vmem:[%s1635_s30 + $0x38] sm:$0xff]  ;;  %v1201_v19 = vld [vmem:[%s1635_s30 + $0x30] sm:$0xff]  ;;  %v1200_v21 = vld [vmem:[%s1635_s30 + $0x28] sm:$0xff]  ;;  %p1172_p8 = scmp.ne.s32.totalorder %s1440_s19, 8 }
  0x69   : > { %v1210_v18 = vld [vmem:[%s1635_s30 + $0x78] sm:$0xff]  ;;  %611 = vmatpush.bf16.msra.mxu0 %v1202_v17  ;;  %1211 = vmatpush.bf16.msra.mxu2 %v1202_v17  ;;  %v1209_v20 = vld [vmem:[%s1635_s30 + $0x70] sm:$0xff]  ;;  %v1208_v22 = vld [vmem:[%s1635_s30 + $0x68] sm:$0xff] }
  0x6a   : > { %660 = vmatpush.bf16.msra.mxu1 %v1210_v18  ;;  %1219 = vmatpush.bf16.msra.mxu3 %v1210_v18  ;;  %v1199_v23 = vld [vmem:[%s1635_s30 + $0x20] sm:$0xff]  ;;  %v1198_v25 = vld [vmem:[%s1635_s30 + $0x18] sm:$0xff]  ;;  %v1197_v27 = vld [vmem:[%s1635_s30 + $0x10] sm:$0xff] }
  0x6b   : > { %v1207_v24 = vld [vmem:[%s1635_s30 + $0x60] sm:$0xff]  ;;  %v1206_v26 = vld [vmem:[%s1635_s30 + $0x58] sm:$0xff]  ;;  %v1205_v28 = vld [vmem:[%s1635_s30 + $0x50] sm:$0xff] }
  0x6c   : > { %v1196_v29 = vld [vmem:[%s1635_s30 + $0x8] sm:$0xff]  ;;  %v1195_v31 = vld [vmem:[%s1635_s30] sm:$0xff]  ;;  %v1054_v45 = vld [vmem:[%s1633_s29 + $0x10] sm:$0xf] }
  0x6d   : > { %612 = vmatpush.bf16.msra.mxu0 %v1201_v19  ;;  %1212 = vmatpush.bf16.msra.mxu2 %v1201_v19  ;;  %v1204_v30 = vld [vmem:[%s1635_s30 + $0x48] sm:$0xff]  ;;  %v1203_v32 = vld [vmem:[%s1635_s30 + $0x40] sm:$0xff]  ;;  %v1182_v46 = vld [vmem:[%s1633_s29 + $0x14] sm:$0xf0] }
  0x6e   : > { %661 = vmatpush.bf16.msra.mxu1 %v1209_v20  ;;  %1220 = vmatpush.bf16.msra.mxu3 %v1209_v20  ;;  %v1046_v33 = vld [vmem:[%s1633_s29] sm:$0xf]  ;;  %v1180_v34 = vld [vmem:[%s1633_s29 + $0x4] sm:$0xf0]  ;;  %v1179_v37 = vld [vmem:[%s1633_s29 + $0x4] sm:$0xf]  ;;  %v1055_v53 = vor.u32 %v1182_v46, %v1054_v45 }
  0x6f   : > { %v1078_v35 = vld [vmem:[%s1633_s29 + $0x40] sm:$0xf]  ;;  %v1188_v36 = vld [vmem:[%s1633_s29 + $0x44] sm:$0xf0]  ;;  %v1048_v38 = vld [vmem:[%s1633_s29 + $0x8] sm:$0xf0]  ;;  %v1047_v41 = vor.u32 %v1180_v34, %v1046_v33 }
  0x70   : > { %v1187_v39 = vld [vmem:[%s1633_s29 + $0x44] sm:$0xf]  ;;  %v1080_v40 = vld [vmem:[%s1633_s29 + $0x48] sm:$0xf0]  ;;  %v1079_v42 = vor.u32 %v1188_v36, %v1078_v35  ;;  %v1051_v43 = vor.u32 %v1179_v37, %v1048_v38  ;;  %v1086_v47 = vld [vmem:[%s1633_s29 + $0x50] sm:$0xf] }
  0x71   : > { %613 = vmatpush.bf16.msra.mxu0 %v1200_v21  ;;  %1213 = vmatpush.bf16.msra.mxu2 %v1200_v21  ;;  %v1083_v44 = vor.u32 %v1187_v39, %v1080_v40  ;;  %v1190_v48 = vld [vmem:[%s1633_s29 + $0x54] sm:$0xf0]  ;;  %v1181_v49 = vld [vmem:[%s1633_s29 + $0x14] sm:$0xf]  ;;  %v1056_v50 = vld [vmem:[%s1633_s29 + $0x18] sm:$0xf0] }
  0x72   : > { %662 = vmatpush.bf16.msra.mxu1 %v1208_v22  ;;  %1221 = vmatpush.bf16.msra.mxu3 %v1208_v22  ;;  %v1189_v51 = vld [vmem:[%s1633_s29 + $0x54] sm:$0xf]  ;;  %v1088_v52 = vld [vmem:[%s1633_s29 + $0x58] sm:$0xf0]  ;;  %v1087_v54 = vor.u32 %v1190_v48, %v1086_v47  ;;  %v1059_v55 = vor.u32 %v1181_v49, %v1056_v50  ;;  %v1062_v57 = vld [vmem:[%s1633_s29 + $0x20] sm:$0xf] }
  0x73   : > { %v1091_v56 = vor.u32 %v1189_v51, %v1088_v52  ;;  %v1184_v58 = vld [vmem:[%s1633_s29 + $0x24] sm:$0xf0]  ;;  %v1094_v59 = vld [vmem:[%s1633_s29 + $0x60] sm:$0xf]  ;;  %v1183_v61 = vld [vmem:[%s1633_s29 + $0x24] sm:$0xf] }
  0x74   : > { %v1192_v60 = vld [vmem:[%s1633_s29 + $0x64] sm:$0xf0]  ;;  %v1064_v62 = vld [vmem:[%s1633_s29 + $0x28] sm:$0xf0]  ;;  %v1191_v63 = vld [vmem:[%s1633_s29 + $0x64] sm:$0xf]  ;;  %v1063_v1 = vor.u32 %v1184_v58, %v1062_v57 }
  0x75   : > { %614 = vmatpush.bf16.msra.mxu0 %v1199_v23  ;;  %1214 = vmatpush.bf16.msra.mxu2 %v1199_v23  ;;  %v1096_v0 = vld [vmem:[%s1633_s29 + $0x68] sm:$0xf0]  ;;  %v1095_v2 = vor.u32 %v1192_v60, %v1094_v59  ;;  %v1067_v3 = vor.u32 %v1183_v61, %v1064_v62  ;;  %v1070_v5 = vld [vmem:[%s1633_s29 + $0x30] sm:$0xf]  ;;  %v1186_v6 = vld [vmem:[%s1633_s29 + $0x34] sm:$0xf0] }
  0x76   : > { %663 = vmatpush.bf16.msra.mxu1 %v1207_v24  ;;  %1222 = vmatpush.bf16.msra.mxu3 %v1207_v24  ;;  %v1099_v4 = vor.u32 %v1191_v63, %v1096_v0  ;;  %v1102_v7 = vld [vmem:[%s1633_s29 + $0x70] sm:$0xf]  ;;  %v1194_v8 = vld [vmem:[%s1633_s29 + $0x74] sm:$0xf0]  ;;  %v1185_v9 = vld [vmem:[%s1633_s29 + $0x34] sm:$0xf]  ;;  %v1071_v13 = vor.u32 %v1186_v6, %v1070_v5 }
  0x77   : > { %v1072_v10 = vld [vmem:[%s1633_s29 + $0x38] sm:$0xf0]  ;;  %v1193_v11 = vld [vmem:[%s1633_s29 + $0x74] sm:$0xf]  ;;  %v1103_v14 = vor.u32 %v1194_v8, %v1102_v7  ;;  %v379_v23 = vld [vmem:[#allocation2 + $0x40] sm:$0xff] }
  0x78   : > { %v1104_v12 = vld [vmem:[%s1633_s29 + $0x78] sm:$0xf0]  ;;  %v1075_v15 = vor.u32 %v1185_v9, %v1072_v10  ;;  %v371_v18 = vld [vmem:[#allocation2 + $0x30] sm:$0xff]  ;;  %v380_v33 = vld [vmem:[#allocation2 + $0x20] sm:$0xff] }
  0x79   : > { %615 = vmatpush.bf16.msra.mxu0 %v1198_v25  ;;  %1215 = vmatpush.bf16.msra.mxu2 %v1198_v25  ;;  %v1107_v16 = vor.u32 %v1193_v11, %v1104_v12  ;;  %v373_v37 = vld [vmem:[#allocation2 + $0x58] sm:$0xff]  ;;  %v375_v57 = vld [vmem:[#allocation2 + $0x50] sm:$0xff]  ;;  %v383_v63 = vld [vmem:[#allocation2 + $0x60] sm:$0xff] }
  0x7a   : > { %664 = vmatpush.bf16.msra.mxu1 %v1206_v26  ;;  %1223 = vmatpush.bf16.msra.mxu3 %v1206_v26  ;;  %v374_v47 = vld [vmem:[#allocation2 + $0x18] sm:$0xff]  ;;  %v384_v9 = vld [vmem:[#allocation2 + $0x70] sm:$0xff] }
  0x7d   : > { %616 = vmatpush.bf16.msra.mxu0 %v1197_v27  ;;  %1216 = vmatpush.bf16.msra.mxu2 %v1197_v27  ;;  %v372_v27 = vld [vmem:[#allocation2] sm:$0xff] }
  0x7e   : > { %665 = vmatpush.bf16.msra.mxu1 %v1205_v28  ;;  %1224 = vmatpush.bf16.msra.mxu3 %v1205_v28 }
  0x81   : > { %617 = vmatpush.bf16.msra.mxu0 %v1196_v29  ;;  %1217 = vmatpush.bf16.msra.mxu2 %v1196_v29 }
  0x82   : > { %666 = vmatpush.bf16.msra.mxu1 %v1204_v30  ;;  %1225 = vmatpush.bf16.msra.mxu3 %v1204_v30 }
  0x85   : > { %618 = vmatpush.bf16.msra.mxu0 %v1195_v31  ;;  %1218 = vmatpush.bf16.msra.mxu2 %v1195_v31 }
  0x86   : > { %667 = vmatpush.bf16.msra.mxu1 %v1203_v32  ;;  %1226 = vmatpush.bf16.msra.mxu3 %v1203_v32 }
  0x88   : > { %619 = vmatmul.bf16.vlgmr.msra.gmra.mxu0 %v1047_v41  ;;  %639 = vmatmul.bf16.vlgmr.msra.gmra.mxu2 %v1079_v42 }
  0x89   : > { %668 = vmatmul.bf16.vlgmr.msra.gmra.mxu1 %v1051_v43  ;;  %688 = vmatmul.bf16.vlgmr.msra.gmra.mxu3 %v1083_v44  ;;  %v381_v43 = vld [vmem:[#allocation2 + $0x10] sm:$0xff] }
  0x98   : > { %624 = vmatmul.bf16.gmra.mxu0 %v1055_v53  ;;  %644 = vmatmul.bf16.gmra.mxu2 %v1087_v54  ;;  %v382_v53 = vld [vmem:[#allocation2 + $0x38] sm:$0xff] }
  0x99   : > { %673 = vmatmul.bf16.gmra.mxu1 %v1059_v55  ;;  %693 = vmatmul.bf16.gmra.mxu3 %v1091_v56 }
  0xa8   : > { %629 = vmatmul.bf16.gmra.mxu0 %v1063_v1  ;;  %649 = vmatmul.bf16.gmra.mxu2 %v1095_v2 }
  0xa9   : > { %678 = vmatmul.bf16.gmra.mxu1 %v1067_v3  ;;  %698 = vmatmul.bf16.gmra.mxu3 %v1099_v4  ;;  %v376_v3 = vld [vmem:[#allocation2 + $0x68] sm:$0xff] }
  0xb8   : > { %634 = vmatmul.bf16.gmra.mxu0 %v1071_v13  ;;  %654 = vmatmul.bf16.gmra.mxu2 %v1103_v14  ;;  %v377_v13 = vld [vmem:[#allocation2 + $0x8] sm:$0xff] }
  0xb9   : > { %683 = vmatmul.bf16.gmra.mxu1 %v1075_v15  ;;  %703 = vmatmul.bf16.gmra.mxu3 %v1107_v16 }
 0x105   : > { %v620_v17 = vpop.f32.mrf.mxu0 }
 0x106   : > { %v669_v19 = vpop.f32.mrf.mxu1 }
 0x107   : > { %v670_v20 = vadd.f32 %v669_v19, %v620_v17  ;;  %v385_v19 = vld [vmem:[#allocation2 + $0x78] sm:$0xff] }
 0x109   : > { %v709_v21 = vadd.f32 %v670_v20, %v371_v18 }
 0x10b   : > { %725 = vst [vmem:[#allocation2 + $0x30] sm:$0xff] %v709_v21  ;;  %v640_v22 = vpop.f32.mrf.mxu2 }
 0x10c   : > { %v689_v24 = vpop.f32.mrf.mxu3 }
 0x10d   : > { %v690_v25 = vadd.f32 %v689_v24, %v640_v22  ;;  %v622_v26 = vpop.f32.mrf.mxu0 }
 0x10e   : > { %v671_v28 = vpop.f32.mrf.mxu1 }
 0x10f   : > { %v717_v29 = vadd.f32 %v690_v25, %v379_v23  ;;  %v672_v30 = vadd.f32 %v671_v28, %v622_v26  ;;  %v378_v23 = vld [vmem:[#allocation2 + $0x48] sm:$0xff] }
 0x111   : > { %733 = vst [vmem:[#allocation2 + $0x40] sm:$0xff] %v717_v29  ;;  %v710_v31 = vadd.f32 %v672_v30, %v372_v27  ;;  %v386_v29 = vld [vmem:[#allocation2 + $0x28] sm:$0xff] }
 0x113   : > { %726 = vst [vmem:[#allocation2] sm:$0xff] %v710_v31  ;;  %v642_v32 = vpop.f32.mrf.mxu2 }
 0x114   : > { %v691_v34 = vpop.f32.mrf.mxu3 }
 0x115   : > { %v692_v35 = vadd.f32 %v691_v34, %v642_v32  ;;  %v625_v36 = vpop.f32.mrf.mxu0 }
 0x116   : > { %v674_v38 = vpop.f32.mrf.mxu1 }
 0x117   : > { %v718_v39 = vadd.f32 %v692_v35, %v380_v33  ;;  %v675_v40 = vadd.f32 %v674_v38, %v625_v36 }
 0x119   : > { %734 = vst [vmem:[#allocation2 + $0x20] sm:$0xff] %v718_v39  ;;  %v711_v41 = vadd.f32 %v675_v40, %v373_v37 }
 0x11b   : > { %727 = vst [vmem:[#allocation2 + $0x58] sm:$0xff] %v711_v41  ;;  %v645_v42 = vpop.f32.mrf.mxu2 }
 0x11c   : > { %v694_v44 = vpop.f32.mrf.mxu3 }
 0x11d   : > { %v695_v45 = vadd.f32 %v694_v44, %v645_v42  ;;  %v627_v46 = vpop.f32.mrf.mxu0 }
 0x11e   : > { %v676_v48 = vpop.f32.mrf.mxu1 }
 0x11f   : > { %v719_v49 = vadd.f32 %v695_v45, %v381_v43  ;;  %v677_v50 = vadd.f32 %v676_v48, %v627_v46 }
 0x121   : > { %735 = vst [vmem:[#allocation2 + $0x10] sm:$0xff] %v719_v49  ;;  %v712_v51 = vadd.f32 %v677_v50, %v374_v47 }
 0x123   : > { %728 = vst [vmem:[#allocation2 + $0x18] sm:$0xff] %v712_v51  ;;  %v647_v52 = vpop.f32.mrf.mxu2 }
 0x124   : > { %v696_v54 = vpop.f32.mrf.mxu3 }
 0x125   : > { %v697_v55 = vadd.f32 %v696_v54, %v647_v52  ;;  %v630_v56 = vpop.f32.mrf.mxu0 }
 0x126   : > { %v679_v58 = vpop.f32.mrf.mxu1 }
 0x127   : > { %v720_v59 = vadd.f32 %v697_v55, %v382_v53  ;;  %v680_v60 = vadd.f32 %v679_v58, %v630_v56 }
 0x129   : > { %736 = vst [vmem:[#allocation2 + $0x38] sm:$0xff] %v720_v59  ;;  %v713_v61 = vadd.f32 %v680_v60, %v375_v57 }
 0x12b   : > { %729 = vst [vmem:[#allocation2 + $0x50] sm:$0xff] %v713_v61  ;;  %v650_v62 = vpop.f32.mrf.mxu2 }
 0x12c   : > { %v699_v0 = vpop.f32.mrf.mxu3 }
 0x12d   : > { %v700_v1 = vadd.f32 %v699_v0, %v650_v62  ;;  %v632_v2 = vpop.f32.mrf.mxu0 }
 0x12e   : > { %v681_v4 = vpop.f32.mrf.mxu1 }
 0x12f   : > { %v721_v5 = vadd.f32 %v700_v1, %v383_v63  ;;  %v682_v6 = vadd.f32 %v681_v4, %v632_v2 }
 0x131   : > { %737 = vst [vmem:[#allocation2 + $0x60] sm:$0xff] %v721_v5  ;;  %v714_v7 = vadd.f32 %v682_v6, %v376_v3 }
 0x133   : > { %730 = vst [vmem:[#allocation2 + $0x68] sm:$0xff] %v714_v7  ;;  %v652_v8 = vpop.f32.mrf.mxu2 }
 0x134   : > { %v701_v10 = vpop.f32.mrf.mxu3 }
 0x135   : > { %v702_v11 = vadd.f32 %v701_v10, %v652_v8  ;;  %v635_v12 = vpop.f32.mrf.mxu0 }
 0x136   : > { %v684_v14 = vpop.f32.mrf.mxu1 }
 0x137   : > { %v722_v15 = vadd.f32 %v702_v11, %v384_v9  ;;  %v685_v16 = vadd.f32 %v684_v14, %v635_v12 }
 0x139   : > { %738 = vst [vmem:[#allocation2 + $0x70] sm:$0xff] %v722_v15  ;;  %v715_v17 = vadd.f32 %v685_v16, %v377_v13 }
 0x13b   : > { %731 = vst [vmem:[#allocation2 + $0x8] sm:$0xff] %v715_v17  ;;  %v655_v18 = vpop.f32.mrf.mxu2 }
 0x13c   : > { %v704_v20 = vpop.f32.mrf.mxu3 }
 0x13d   : > { %v705_v21 = vadd.f32 %v704_v20, %v655_v18  ;;  %v637_v22 = vpop.f32.mrf.mxu0 }
 0x13e   : > { %v686_v24 = vpop.f32.mrf.mxu1 }
 0x13f   : > { %v723_v25 = vadd.f32 %v705_v21, %v385_v19  ;;  %v687_v26 = vadd.f32 %v686_v24, %v637_v22 }
 0x141   : > { %739 = vst [vmem:[#allocation2 + $0x78] sm:$0xff] %v723_v25  ;;  %v716_v27 = vadd.f32 %v687_v26, %v378_v23 }
 0x143   : > { %732 = vst [vmem:[#allocation2 + $0x48] sm:$0xff] %v716_v27  ;;  %v657_v28 = vpop.f32.mrf.mxu2 }
 0x144   : > { %v706_v30 = vpop.f32.mrf.mxu3 }
 0x145   : > { %v707_v31 = vadd.f32 %v706_v30, %v657_v28  ;;  %744 = sbr.rel (%p1172_p8) target bundleno = 351 (0x15f), region = 82 }
 0x147   : > { %v724_v32 = vadd.f32 %v707_v31, %v386_v29 }
 0x149   : > { %740 = vst [vmem:[#allocation2 + $0x28] sm:$0xff] %v724_v32 }
 0x14a   : > { %v745_v33 = vld [vmem:[#allocation2 + $0x30] sm:$0xff]  ;;  %v1329_v34 = vld [vmem:[%s349_s11] ss:$0 sm:$0xff]  ;;  %v747_v36 = vld [vmem:[#allocation2 + $0x58] sm:$0xff] }
 0x14b   : > { %v746_v35 = vld [vmem:[#allocation2] sm:$0xff]  ;;  %v748_v37 = vld [vmem:[#allocation2 + $0x18] sm:$0xff]  ;;  %v765_v38 = vadd.f32 %v1329_v34, %v745_v33  ;;  %v767_v40 = vadd.f32 %v1329_v34, %v747_v36  ;;  %v749_v42 = vld [vmem:[#allocation2 + $0x50] sm:$0xff] }
 0x14c   : > { %v766_v39 = vadd.f32 %v1329_v34, %v746_v35  ;;  %v768_v41 = vadd.f32 %v1329_v34, %v748_v37  ;;  %v750_v43 = vld [vmem:[#allocation2 + $0x68] sm:$0xff]  ;;  %v769_v45 = vadd.f32 %v1329_v34, %v749_v42  ;;  %v753_v48 = vld [vmem:[#allocation2 + $0x40] sm:$0xff]  ;;  %v755_v56 = vld [vmem:[#allocation2 + $0x10] sm:$0xff] }
 0x14d   : > { %v751_v44 = vld [vmem:[#allocation2 + $0x8] sm:$0xff]  ;;  %v770_v46 = vadd.f32 %v1329_v34, %v750_v43  ;;  %v781_v49 = vmax.f32 %v765_v38, 0.0  ;;  %v783_v51 = vmax.f32 %v767_v40, 0.0  ;;  %v754_v53 = vld [vmem:[#allocation2 + $0x20] sm:$0xff]  ;;  %v773_v58 = vadd.f32 %v1329_v34, %v753_v48  ;;  %v756_v59 = vld [vmem:[#allocation2 + $0x38] sm:$0xff] }
 0x14e   : > { %v752_v47 = vld [vmem:[#allocation2 + $0x48] sm:$0xff]  ;;  %v782_v50 = vmax.f32 %v766_v39, 0.0  ;;  %v771_v52 = vadd.f32 %v1329_v34, %v751_v44  ;;  %v784_v54 = vmax.f32 %v768_v41, 0.0  ;;  %v785_v57 = vmax.f32 %v769_v45, 0.0  ;;  %v757_v62 = vld [vmem:[#allocation2 + $0x60] sm:$0xff]  ;;  %v758_v1 = vld [vmem:[#allocation2 + $0x70] sm:$0xff] }
 0x14f   : > { %v772_v55 = vadd.f32 %v1329_v34, %v752_v47  ;;  %797 = vst [vmem:[%s1650_s5] sm:$0xff] %v781_v49  ;;  %v786_v60 = vmax.f32 %v770_v46, 0.0  ;;  %v774_v61 = vadd.f32 %v1329_v34, %v754_v53  ;;  %v775_v0 = vadd.f32 %v1329_v34, %v755_v56  ;;  %v759_v4 = vld [vmem:[#allocation2 + $0x78] sm:$0xff] }
 0x150   : > { %798 = vst [vmem:[%s1650_s5 + $0x8] sm:$0xff] %v782_v50  ;;  %v787_v63 = vmax.f32 %v771_v52, 0.0  ;;  %v776_v3 = vadd.f32 %v1329_v34, %v756_v59  ;;  %v789_v5 = vmax.f32 %v773_v58, 0.0  ;;  %v777_v6 = vadd.f32 %v1329_v34, %v757_v62  ;;  %v760_v7 = vld [vmem:[#allocation2 + $0x28] sm:$0xff] }
 0x151   : > { %799 = vst [vmem:[%s1650_s5 + $0x10] sm:$0xff] %v783_v51  ;;  %v788_v2 = vmax.f32 %v772_v55, 0.0  ;;  %v790_v8 = vmax.f32 %v774_v61, 0.0  ;;  %v778_v9 = vadd.f32 %v1329_v34, %v758_v1  ;;  %v791_v10 = vmax.f32 %v775_v0, 0.0 }
 0x152   : > { %800 = vst [vmem:[%s1650_s5 + $0x18] sm:$0xff] %v784_v54  ;;  %v779_v11 = vadd.f32 %v1329_v34, %v759_v4  ;;  %v792_v12 = vmax.f32 %v776_v3, 0.0  ;;  %v780_v13 = vadd.f32 %v1329_v34, %v760_v7  ;;  %v793_v14 = vmax.f32 %v777_v6, 0.0 }
 0x153   : > { %801 = vst [vmem:[%s1650_s5 + $0x20] sm:$0xff] %v785_v57  ;;  %v794_v15 = vmax.f32 %v778_v9, 0.0 }
 0x154   : > { %802 = vst [vmem:[%s1650_s5 + $0x28] sm:$0xff] %v786_v60  ;;  %v795_v16 = vmax.f32 %v779_v11, 0.0  ;;  %v796_v17 = vmax.f32 %v780_v13, 0.0 }
 0x155   : > { %803 = vst [vmem:[%s1650_s5 + $0x30] sm:$0xff] %v787_v63 }
 0x156   : > { %804 = vst [vmem:[%s1650_s5 + $0x38] sm:$0xff] %v788_v2 }
 0x157   : > { %805 = vst [vmem:[%s1650_s5 + $0x40] sm:$0xff] %v789_v5 }
 0x158   : > { %806 = vst [vmem:[%s1650_s5 + $0x48] sm:$0xff] %v790_v8 }
 0x159   : > { %807 = vst [vmem:[%s1650_s5 + $0x50] sm:$0xff] %v791_v10 }
 0x15a   : > { %808 = vst [vmem:[%s1650_s5 + $0x58] sm:$0xff] %v792_v12 }
 0x15b   : > { %809 = vst [vmem:[%s1650_s5 + $0x60] sm:$0xff] %v793_v14 }
 0x15c   : > { %810 = vst [vmem:[%s1650_s5 + $0x68] sm:$0xff] %v794_v15 }
 0x15d   : > { %811 = vst [vmem:[%s1650_s5 + $0x70] sm:$0xff] %v795_v16 }
 0x15e   : > { %812 = vst [vmem:[%s1650_s5 + $0x78] sm:$0xff] %v796_v17 }
 0x15f PF: > { %819 = sbr.rel (!%p1591_p1) target bundleno = 369 (0x171), region = 86  ;;  %s1174_s19 = sshll.u32 (%p1591_p1), %s1444_s20, 3  ;;  %v883_v18 = vld [vmem:[%s1650_s5] sm:$0xff] (%p1591_p1)  ;;  %v885_v19 = vld [vmem:[%s1650_s5 + $0x8] sm:$0xff] (%p1591_p1)  ;;  %v887_v20 = vld [vmem:[%s1650_s5 + $0x10] sm:$0xff] (%p1591_p1) }
 0x160   : > { %s824_s24 = scalar_lea.vmem (%p1591_p1), %s1784_s3, %s1174_s19  ;;  %v889_v21 = vld [vmem:[%s1650_s5 + $0x18] sm:$0xff] (%p1591_p1)  ;;  %v891_v22 = vld [vmem:[%s1650_s5 + $0x20] sm:$0xff] (%p1591_p1)  ;;  %v893_v23 = vld [vmem:[%s1650_s5 + $0x28] sm:$0xff] (%p1591_p1) }
 0x161   : > { %884 = vst [vmem:[%s824_s24] sm:$0xff] (%p1591_p1), %v883_v18  ;;  %v895_v24 = vld [vmem:[%s1650_s5 + $0x30] sm:$0xff] (%p1591_p1)  ;;  %v897_v25 = vld [vmem:[%s1650_s5 + $0x38] sm:$0xff] (%p1591_p1)  ;;  %v899_v26 = vld [vmem:[%s1650_s5 + $0x40] sm:$0xff] (%p1591_p1) }
 0x162   : > { %886 = vst [vmem:[%s824_s24 + $0x10] sm:$0xff] (%p1591_p1), %v885_v19  ;;  %v901_v27 = vld [vmem:[%s1650_s5 + $0x48] sm:$0xff] (%p1591_p1)  ;;  %v903_v28 = vld [vmem:[%s1650_s5 + $0x50] sm:$0xff] (%p1591_p1)  ;;  %v905_v29 = vld [vmem:[%s1650_s5 + $0x58] sm:$0xff] (%p1591_p1) }
 0x163   : > { %888 = vst [vmem:[%s824_s24 + $0x20] sm:$0xff] (%p1591_p1), %v887_v20  ;;  %v907_v30 = vld [vmem:[%s1650_s5 + $0x60] sm:$0xff] (%p1591_p1)  ;;  %v909_v31 = vld [vmem:[%s1650_s5 + $0x68] sm:$0xff] (%p1591_p1) }
 0x164   : > { %890 = vst [vmem:[%s824_s24 + $0x30] sm:$0xff] %v889_v21  ;;  %v911_v32 = vld [vmem:[%s1650_s5 + $0x70] sm:$0xff] }
 0x165   : > { %892 = vst [vmem:[%s824_s24 + $0x40] sm:$0xff] %v891_v22  ;;  %v913_v33 = vld [vmem:[%s1650_s5 + $0x78] sm:$0xff] }
 0x166   : > { %894 = vst [vmem:[%s824_s24 + $0x50] sm:$0xff] %v893_v23 }
 0x167   : > { %896 = vst [vmem:[%s824_s24 + $0x60] sm:$0xff] %v895_v24 }
 0x168   : > { %898 = vst [vmem:[%s824_s24 + $0x70] sm:$0xff] %v897_v25 }
 0x169   : > { %900 = vst [vmem:[%s824_s24 + $0x80] sm:$0xff] %v899_v26 }
 0x16a   : > { %902 = vst [vmem:[%s824_s24 + $0x90] sm:$0xff] %v901_v27 }
 0x16b   : > { %904 = vst [vmem:[%s824_s24 + $0xa0] sm:$0xff] %v903_v28 }
 0x16c   : > { %906 = vst [vmem:[%s824_s24 + $0xb0] sm:$0xff] %v905_v29 }
 0x16d   : > { %908 = vst [vmem:[%s824_s24 + $0xc0] sm:$0xff] %v907_v30 }
 0x16e   : > { %910 = vst [vmem:[%s824_s24 + $0xd0] sm:$0xff] %v909_v31 }
 0x16f   : > { %912 = vst [vmem:[%s824_s24 + $0xe0] sm:$0xff] %v911_v32 }
 0x170   : > { %914 = vst [vmem:[%s824_s24 + $0xf0] sm:$0xff] %v913_v33 }
 0x171 PF: > { %s16_s23 = sadd.s32 1, %s1456_s23   ;;  %s1800_s20 = sld [smem:[#allocation13_spill]] }
 0x172   : > { %p13_p9 = scmp.ge.s32.totalorder %s16_s23, 20   ;;  %s1801_s25 = sld [smem:[#allocation12_spill]] }
 0x173   : > { %s1802_s17 = sld [smem:[#allocation8_spill]]  ;;  %s1806_s12 = smov %s1416_s13 }
 0x174   : > { %s1803_s18 = sld [smem:[#allocation11_spill]]  ;;  %s1808_s14 = smov %s1424_s15 }
 0x175   : > { %s1804_s26 = sld [smem:[#allocation9_spill]]  ;;  %s1809_s15 = smov %s1428_s16 }
 0x176   : > { %s1805_s4 = sld [smem:[#allocation10_spill]]  ;;  %s1811_s19 = smov %s1448_s21 }
 0x177   : > { %s1807_s13 = smov %s1800_s20  ;;  %s1812_s20 = smov %s1452_s22 }
 0x178   : > { %s1810_s16 = smov %s1801_s25  ;;  %15 = sbr.rel (!%p13_p9) target bundleno = 9 (0x9), region = 167 }
 0x17b   : > { %s1813_s21 = smov %s1804_s26 }
 0x17c   : > { %s1814_s22 = smov %s1805_s4 }
 0x17d   :  { %930 = vsyncpa [#allocation5], 1 }
 0x17e   :  { %932 = vsyncpa [#allocation5 + $0x1], 1 }

// kernel: mynet2_forward.13
= control target key start
LH: loop header
LB: loop body
LE: loop exit
PB: predicated region body
PF: predicated region fallthrough
CT: control target
= control target key end

     0   :  { %s3417_s0 = inlined_call_operand.vmem [shape: bf16[16,9216], index: 0, kind: input, shape index: {}]   ;;  %s3418_s1 = inlined_call_operand.vmem [shape: bf16[9216,4096], index: 1, kind: input, shape index: {}]   ;;  %s3419_s2 = inlined_call_operand.vmem [shape: f32[1,4096], index: 2, kind: input, shape index: {}]   ;;  %s3420_s3 = inlined_call_operand.vmem [shape: f32[16,4096], index: 3, kind: output, shape index: {}]  }
   0x1   :  { %3422 = sst [smem:[#allocation7_spill]] %s3417_s0 }
   0x2   :  { %3423 = sst [smem:[#allocation8_spill]] %s3418_s1 }
   0x3   :  { %s2675_s12 = smov 0   ;;  %s2677_s13 = smov 0  }
   0x4   :  { %s2679_s14 = smov 0   ;;  %s2681_s15 = smov 0  }
   0x5   :  { %s2683_s16 = smov 0   ;;  %s2685_s17 = smov 0  }
   0x6   :  { %s2687_s18 = smov 0   ;;  %s2689_s19 = smov 0  }
   0x7   :  { %s2691_s20 = smov 0   ;;  %s2693_s21 = smov 0  }
   0x8   :  { %s2695_s22 = smov 0  }
   0x9 LB: > { %s1790_s23 = sadd.s32 4294967295, %s2652_s22   ;;  %s25_s24 = sadd.s32 1, %s2644_s20  ;;  %s2652_s22 = sphi %s2695_s22, %s13_s22   ;;  %s2648_s21 = sphi %s2693_s21, %s3440_s21   ;;  %s2644_s20 = sphi %s2691_s20, %s3439_s20   ;;  %s2640_s19 = sphi %s2689_s19, %s3438_s19   ;;  %s2636_s18 = sphi %s2687_s18, %s3437_s18   ;;  %s2632_s17 = sphi %s2685_s17, %s3436_s17   ;;  %s2628_s16 = sphi %s2683_s16, %s3435_s16   ;;  %s2624_s15 = sphi %s2681_s15, %s3434_s15   ;;  %s2620_s14 = sphi %s2679_s14, %s3433_s14   ;;  %s2616_s13 = sphi %s2677_s13, %s3432_s13   ;;  %s2612_s12 = sphi %s2675_s12, %s3431_s12  }
   0xa   : > { %p26_p0 = scmp.ge.s32.totalorder %s25_s24, 18  ;;  %s28_s25 = sadd.s32 1, %s2648_s21 }
   0xb   : > { %s41_s26 = sadd.s32 1, %s2632_s17  ;;  %p48_p1 = scmp.ne.s32.totalorder %s2632_s17, %s2628_s16 }
   0xc   : > { %s3442_s24 = smov (%p26_p0, %s25_s24), 0  ;;  %s3444_s25 = smov (!%p26_p0, %s28_s25), %s2648_s21 }
   0xd   : > { %s37_s27 = ssub.s32 %s2644_s20, %s3442_s24  ;;  %p49_p2 = scmp.eq.s32.totalorder %s2652_s22, 0 }
   0xe   : > { %p30_p3 = scmp.ge.s32.totalorder %s3444_s25, 8  ;;  %p39_p4 = scmp.eq.s32.totalorder %s37_s27, 0 }
   0xf   : > { %p2742_p5 = por %p49_p2, %p48_p1  ;;  %s69_s29 = sadd.s32 1, %s2624_s15 }
  0x10   : > { %s3446_s25 = smov (%p30_p3, %s3444_s25), 0  ;;  %p76_p6 = scmp.ne.s32.totalorder %s2624_s15, %s2620_s14 }
  0x11   : > { %3425 = sst [smem:[#allocation6_spill]] %s3446_s25  ;;  %s65_s4 = ssub.s32 %s2648_s21, %s3446_s25 }
  0x12   : > { %s2750_s30 = scalar_select %p39_p4, %s2632_s17, %s41_s26  }
  0x13   : > { %s66_s5 = sor.u32 %s65_s4, %s37_s27  ;;  %p121_p7 = scmp.eq.s32.totalorder %s65_s4, 0 }
  0x14   : > { %p67_p8 = scmp.eq.s32.totalorder %s66_s5, 0  ;;  %p2756_p9 = por %p76_p6, %p49_p2 }
  0x15   : > { %s123_s7 = sadd.s32 1, %s2616_s13  ;;  %p133_p10 = scmp.ne.s32.totalorder %s2616_s13, %s2612_s12 }
  0x16   : > { %s2764_s8 = scalar_select %p67_p8, %s2624_s15, %s69_s29  }
  0x17   : > { %s2767_s9 = scalar_select %p121_p7, %s2616_s13, %s123_s7  }
  0x18   : > { %p134_p11 = scmp.eq.s32.totalorder %s1790_s23, 143  ;;  %p1793_p13 = scmp.ge.s32.totalorder %s2652_s22, 144 }
  0x1a   : > { %p2769_p12 = por %p134_p11, %p133_p10  ;;  %156 = sbr.rel (%p1793_p13) target bundleno = 183 (0xb7), region = 16 }
  0x1f   : > { %159 = sbr.rel (!%p2742_p5) target bundleno = 45 (0x2d), region = 20  ;;  %s161_s11 = sand.u32 (%p2742_p5), 1, %s2632_s17  }
  0x20   : > { %s2342_s26 = sshll.u32 (%p2742_p5), %s2644_s20, 4  ;;  %s1794_s27 = sshll.u32 (%p2742_p5), %s161_s11, 5 }
  0x21   : > { %s3428_s0 = sld [smem:[#allocation7_spill]] (%p2742_p5)  ;;  %s163_s23 = scalar_lea.vmem (%p2742_p5), [#allocation3], %s1794_s27 }
  0x27   : > { %s169_s5 = scalar_lea.vmem %s3428_s0, %s2342_s26 }
  0x28   : > { %v182_v0 = vld [vmem:[%s169_s5] sm:$0xff]  ;;  %v184_v1 = vld [vmem:[%s169_s5 + $0x8] sm:$0xff] }
  0x29   : > { %v186_v2 = vld [vmem:[%s169_s5 + $0x120] sm:$0xff]  ;;  %183 = vst [vmem:[%s163_s23] sm:$0xff] %v182_v0  ;;  %v188_v3 = vld [vmem:[%s169_s5 + $0x128] sm:$0xff] }
  0x2a   : > { %185 = vst [vmem:[%s163_s23 + $0x8] sm:$0xff] %v184_v1 }
  0x2b   : > { %187 = vst [vmem:[%s163_s23 + $0x10] sm:$0xff] %v186_v2 }
  0x2c   : > { %189 = vst [vmem:[%s163_s23 + $0x18] sm:$0xff] %v188_v3 }
  0x2d PF: > { %195 = sbr.rel (!%p2756_p9) target bundleno = 183 (0xb7), region = 43  ;;  %s197_s28 = sand.u32 (%p2756_p9), 1, %s2624_s15  }
  0x2e   : > { %s1799_s7 = sshll.u32 (%p2756_p9), %s2648_s21, 2  ;;  %s1797_s11 = sshll.u32 (%p2756_p9), %s197_s28, 10 }
  0x2f   : > { %s2343_s26 = sshll.u32 (%p2756_p9), %s2644_s20, 11  ;;  %s3429_s1 = sld [smem:[#allocation8_spill]] (%p2756_p9) }
  0x30   : > { %s203_s29 = sadd.s32 (%p2756_p9), %s2343_s26, %s1799_s7  ;;  %s2794_s6 = scalar_lea.vmem (%p2756_p9), [#allocation4], %s1797_s11 }
  0x31   : > { %s1801_s4 = sshll.u32 (%p2756_p9), %s203_s29, 2 }
  0x35   : > { %s2789_s5 = scalar_lea.vmem %s3429_s1, %s1801_s4 }
  0x36   : > { %v218_v4 = vld [vmem:[%s2789_s5] sm:$0xff]  ;;  %v220_v5 = vld [vmem:[%s2789_s5 + $0x8] sm:$0xff] }
  0x37   : > { %v222_v6 = vld [vmem:[%s2789_s5 + $0x80] sm:$0xff]  ;;  %219 = vst [vmem:[%s2794_s6] sm:$0xff] %v218_v4  ;;  %v224_v7 = vld [vmem:[%s2789_s5 + $0x88] sm:$0xff] }
  0x38   : > { %221 = vst [vmem:[%s2794_s6 + $0x8] sm:$0xff] %v220_v5  ;;  %v226_v8 = vld [vmem:[%s2789_s5 + $0x100] sm:$0xff]  ;;  %v228_v9 = vld [vmem:[%s2789_s5 + $0x108] sm:$0xff] }
  0x39   : > { %223 = vst [vmem:[%s2794_s6 + $0x10] sm:$0xff] %v222_v6  ;;  %v230_v10 = vld [vmem:[%s2789_s5 + $0x180] sm:$0xff]  ;;  %v232_v11 = vld [vmem:[%s2789_s5 + $0x188] sm:$0xff] }
  0x3a   : > { %225 = vst [vmem:[%s2794_s6 + $0x18] sm:$0xff] %v224_v7  ;;  %v234_v12 = vld [vmem:[%s2789_s5 + $0x200] sm:$0xff]  ;;  %v236_v13 = vld [vmem:[%s2789_s5 + $0x208] sm:$0xff] }
  0x3b   : > { %227 = vst [vmem:[%s2794_s6 + $0x20] sm:$0xff] %v226_v8  ;;  %v238_v14 = vld [vmem:[%s2789_s5 + $0x280] sm:$0xff]  ;;  %v240_v15 = vld [vmem:[%s2789_s5 + $0x288] sm:$0xff] }
  0x3c   : > { %229 = vst [vmem:[%s2794_s6 + $0x28] sm:$0xff] %v228_v9  ;;  %v242_v16 = vld [vmem:[%s2789_s5 + $0x300] sm:$0xff]  ;;  %v244_v17 = vld [vmem:[%s2789_s5 + $0x308] sm:$0xff] }
  0x3d   : > { %231 = vst [vmem:[%s2794_s6 + $0x30] sm:$0xff] %v230_v10  ;;  %v246_v18 = vld [vmem:[%s2789_s5 + $0x380] sm:$0xff]  ;;  %v248_v19 = vld [vmem:[%s2789_s5 + $0x388] sm:$0xff] }
  0x3e   : > { %233 = vst [vmem:[%s2794_s6 + $0x38] sm:$0xff] %v232_v11  ;;  %v250_v20 = vld [vmem:[%s2789_s5 + $0x400] sm:$0xff]  ;;  %v252_v21 = vld [vmem:[%s2789_s5 + $0x408] sm:$0xff] }
  0x3f   : > { %235 = vst [vmem:[%s2794_s6 + $0x40] sm:$0xff] %v234_v12  ;;  %v254_v22 = vld [vmem:[%s2789_s5 + $0x480] sm:$0xff]  ;;  %v256_v23 = vld [vmem:[%s2789_s5 + $0x488] sm:$0xff] }
  0x40   : > { %237 = vst [vmem:[%s2794_s6 + $0x48] sm:$0xff] %v236_v13  ;;  %v258_v24 = vld [vmem:[%s2789_s5 + $0x500] sm:$0xff]  ;;  %v260_v25 = vld [vmem:[%s2789_s5 + $0x508] sm:$0xff] }
  0x41   : > { %239 = vst [vmem:[%s2794_s6 + $0x50] sm:$0xff] %v238_v14  ;;  %v262_v26 = vld [vmem:[%s2789_s5 + $0x580] sm:$0xff]  ;;  %v264_v27 = vld [vmem:[%s2789_s5 + $0x588] sm:$0xff] }
  0x42   : > { %241 = vst [vmem:[%s2794_s6 + $0x58] sm:$0xff] %v240_v15  ;;  %v266_v28 = vld [vmem:[%s2789_s5 + $0x600] sm:$0xff]  ;;  %v268_v29 = vld [vmem:[%s2789_s5 + $0x608] sm:$0xff] }
  0x43   : > { %243 = vst [vmem:[%s2794_s6 + $0x60] sm:$0xff] %v242_v16  ;;  %v270_v30 = vld [vmem:[%s2789_s5 + $0x680] sm:$0xff]  ;;  %v272_v31 = vld [vmem:[%s2789_s5 + $0x688] sm:$0xff] }
  0x44   : > { %245 = vst [vmem:[%s2794_s6 + $0x68] sm:$0xff] %v244_v17  ;;  %v274_v32 = vld [vmem:[%s2789_s5 + $0x700] sm:$0xff]  ;;  %v276_v33 = vld [vmem:[%s2789_s5 + $0x708] sm:$0xff] }
  0x45   : > { %247 = vst [vmem:[%s2794_s6 + $0x70] sm:$0xff] %v246_v18  ;;  %v278_v34 = vld [vmem:[%s2789_s5 + $0x780] sm:$0xff]  ;;  %v280_v35 = vld [vmem:[%s2789_s5 + $0x788] sm:$0xff] }
  0x46   : > { %249 = vst [vmem:[%s2794_s6 + $0x78] sm:$0xff] %v248_v19  ;;  %v282_v36 = vld [vmem:[%s2789_s5 + $0x800] sm:$0xff]  ;;  %v284_v37 = vld [vmem:[%s2789_s5 + $0x808] sm:$0xff] }
  0x47   : > { %251 = vst [vmem:[%s2794_s6 + $0x80] sm:$0xff] %v250_v20  ;;  %v286_v38 = vld [vmem:[%s2789_s5 + $0x880] sm:$0xff]  ;;  %v288_v39 = vld [vmem:[%s2789_s5 + $0x888] sm:$0xff] }
  0x48   : > { %253 = vst [vmem:[%s2794_s6 + $0x88] sm:$0xff] %v252_v21  ;;  %v290_v40 = vld [vmem:[%s2789_s5 + $0x900] sm:$0xff]  ;;  %v292_v41 = vld [vmem:[%s2789_s5 + $0x908] sm:$0xff] }
  0x49   : > { %255 = vst [vmem:[%s2794_s6 + $0x90] sm:$0xff] %v254_v22  ;;  %v294_v42 = vld [vmem:[%s2789_s5 + $0x980] sm:$0xff]  ;;  %v296_v43 = vld [vmem:[%s2789_s5 + $0x988] sm:$0xff] }
  0x4a   : > { %257 = vst [vmem:[%s2794_s6 + $0x98] sm:$0xff] %v256_v23  ;;  %v298_v44 = vld [vmem:[%s2789_s5 + $0xa00] sm:$0xff]  ;;  %v300_v45 = vld [vmem:[%s2789_s5 + $0xa08] sm:$0xff] }
  0x4b   : > { %259 = vst [vmem:[%s2794_s6 + $0xa0] sm:$0xff] %v258_v24  ;;  %v302_v46 = vld [vmem:[%s2789_s5 + $0xa80] sm:$0xff]  ;;  %v304_v47 = vld [vmem:[%s2789_s5 + $0xa88] sm:$0xff] }
  0x4c   : > { %261 = vst [vmem:[%s2794_s6 + $0xa8] sm:$0xff] %v260_v25  ;;  %v306_v48 = vld [vmem:[%s2789_s5 + $0xb00] sm:$0xff]  ;;  %v308_v49 = vld [vmem:[%s2789_s5 + $0xb08] sm:$0xff] }
  0x4d   : > { %263 = vst [vmem:[%s2794_s6 + $0xb0] sm:$0xff] %v262_v26  ;;  %v310_v50 = vld [vmem:[%s2789_s5 + $0xb80] sm:$0xff]  ;;  %v312_v51 = vld [vmem:[%s2789_s5 + $0xb88] sm:$0xff] }
  0x4e   : > { %265 = vst [vmem:[%s2794_s6 + $0xb8] sm:$0xff] %v264_v27  ;;  %v314_v52 = vld [vmem:[%s2789_s5 + $0xc00] sm:$0xff]  ;;  %v316_v53 = vld [vmem:[%s2789_s5 + $0xc08] sm:$0xff] }
  0x4f   : > { %267 = vst [vmem:[%s2794_s6 + $0xc0] sm:$0xff] %v266_v28  ;;  %v318_v54 = vld [vmem:[%s2789_s5 + $0xc80] sm:$0xff]  ;;  %v320_v55 = vld [vmem:[%s2789_s5 + $0xc88] sm:$0xff] }
  0x50   : > { %269 = vst [vmem:[%s2794_s6 + $0xc8] sm:$0xff] %v268_v29  ;;  %v322_v56 = vld [vmem:[%s2789_s5 + $0xd00] sm:$0xff]  ;;  %v324_v57 = vld [vmem:[%s2789_s5 + $0xd08] sm:$0xff] }
  0x51   : > { %271 = vst [vmem:[%s2794_s6 + $0xd0] sm:$0xff] %v270_v30  ;;  %v326_v58 = vld [vmem:[%s2789_s5 + $0xd80] sm:$0xff]  ;;  %v328_v59 = vld [vmem:[%s2789_s5 + $0xd88] sm:$0xff] }
  0x52   : > { %273 = vst [vmem:[%s2794_s6 + $0xd8] sm:$0xff] %v272_v31  ;;  %v330_v60 = vld [vmem:[%s2789_s5 + $0xe00] sm:$0xff]  ;;  %v332_v61 = vld [vmem:[%s2789_s5 + $0xe08] sm:$0xff] }
  0x53   : > { %275 = vst [vmem:[%s2794_s6 + $0xe0] sm:$0xff] %v274_v32  ;;  %v334_v62 = vld [vmem:[%s2789_s5 + $0xe80] sm:$0xff]  ;;  %v336_v63 = vld [vmem:[%s2789_s5 + $0xe88] sm:$0xff] }
  0x54   : > { %277 = vst [vmem:[%s2794_s6 + $0xe8] sm:$0xff] %v276_v33  ;;  %v338_v0 = vld [vmem:[%s2789_s5 + $0xf00] sm:$0xff]  ;;  %v340_v1 = vld [vmem:[%s2789_s5 + $0xf08] sm:$0xff] }
  0x55   : > { %279 = vst [vmem:[%s2794_s6 + $0xf0] sm:$0xff] %v278_v34  ;;  %v342_v2 = vld [vmem:[%s2789_s5 + $0xf80] sm:$0xff]  ;;  %v344_v3 = vld [vmem:[%s2789_s5 + $0xf88] sm:$0xff] }
  0x56   : > { %281 = vst [vmem:[%s2794_s6 + $0xf8] sm:$0xff] %v280_v35  ;;  %v346_v4 = vld [vmem:[%s2789_s5 + $0x1000] sm:$0xff]  ;;  %v348_v5 = vld [vmem:[%s2789_s5 + $0x1008] sm:$0xff] }
  0x57   : > { %283 = vst [vmem:[%s2794_s6 + $0x100] sm:$0xff] %v282_v36  ;;  %v350_v6 = vld [vmem:[%s2789_s5 + $0x1080] sm:$0xff]  ;;  %v352_v7 = vld [vmem:[%s2789_s5 + $0x1088] sm:$0xff] }
  0x58   : > { %285 = vst [vmem:[%s2794_s6 + $0x108] sm:$0xff] %v284_v37  ;;  %v354_v8 = vld [vmem:[%s2789_s5 + $0x1100] sm:$0xff]  ;;  %v356_v9 = vld [vmem:[%s2789_s5 + $0x1108] sm:$0xff] }
  0x59   : > { %287 = vst [vmem:[%s2794_s6 + $0x110] sm:$0xff] %v286_v38  ;;  %v358_v10 = vld [vmem:[%s2789_s5 + $0x1180] sm:$0xff]  ;;  %v360_v11 = vld [vmem:[%s2789_s5 + $0x1188] sm:$0xff] }
  0x5a   : > { %289 = vst [vmem:[%s2794_s6 + $0x118] sm:$0xff] %v288_v39  ;;  %v362_v12 = vld [vmem:[%s2789_s5 + $0x1200] sm:$0xff]  ;;  %v364_v13 = vld [vmem:[%s2789_s5 + $0x1208] sm:$0xff] }
  0x5b   : > { %291 = vst [vmem:[%s2794_s6 + $0x120] sm:$0xff] %v290_v40  ;;  %v366_v14 = vld [vmem:[%s2789_s5 + $0x1280] sm:$0xff]  ;;  %v368_v15 = vld [vmem:[%s2789_s5 + $0x1288] sm:$0xff] }
  0x5c   : > { %293 = vst [vmem:[%s2794_s6 + $0x128] sm:$0xff] %v292_v41  ;;  %v370_v16 = vld [vmem:[%s2789_s5 + $0x1300] sm:$0xff]  ;;  %v372_v17 = vld [vmem:[%s2789_s5 + $0x1308] sm:$0xff] }
  0x5d   : > { %295 = vst [vmem:[%s2794_s6 + $0x130] sm:$0xff] %v294_v42  ;;  %v374_v18 = vld [vmem:[%s2789_s5 + $0x1380] sm:$0xff]  ;;  %v376_v19 = vld [vmem:[%s2789_s5 + $0x1388] sm:$0xff] }
  0x5e   : > { %297 = vst [vmem:[%s2794_s6 + $0x138] sm:$0xff] %v296_v43  ;;  %v378_v20 = vld [vmem:[%s2789_s5 + $0x1400] sm:$0xff]  ;;  %v380_v21 = vld [vmem:[%s2789_s5 + $0x1408] sm:$0xff] }
  0x5f   : > { %299 = vst [vmem:[%s2794_s6 + $0x140] sm:$0xff] %v298_v44  ;;  %v382_v22 = vld [vmem:[%s2789_s5 + $0x1480] sm:$0xff]  ;;  %v384_v23 = vld [vmem:[%s2789_s5 + $0x1488] sm:$0xff] }
  0x60   : > { %301 = vst [vmem:[%s2794_s6 + $0x148] sm:$0xff] %v300_v45  ;;  %v386_v24 = vld [vmem:[%s2789_s5 + $0x1500] sm:$0xff]  ;;  %v388_v25 = vld [vmem:[%s2789_s5 + $0x1508] sm:$0xff] }
  0x61   : > { %303 = vst [vmem:[%s2794_s6 + $0x150] sm:$0xff] %v302_v46  ;;  %v390_v26 = vld [vmem:[%s2789_s5 + $0x1580] sm:$0xff]  ;;  %v392_v27 = vld [vmem:[%s2789_s5 + $0x1588] sm:$0xff] }
  0x62   : > { %305 = vst [vmem:[%s2794_s6 + $0x158] sm:$0xff] %v304_v47  ;;  %v394_v28 = vld [vmem:[%s2789_s5 + $0x1600] sm:$0xff]  ;;  %v396_v29 = vld [vmem:[%s2789_s5 + $0x1608] sm:$0xff] }
  0x63   : > { %307 = vst [vmem:[%s2794_s6 + $0x160] sm:$0xff] %v306_v48  ;;  %v398_v30 = vld [vmem:[%s2789_s5 + $0x1680] sm:$0xff]  ;;  %v400_v31 = vld [vmem:[%s2789_s5 + $0x1688] sm:$0xff] }
  0x64   : > { %309 = vst [vmem:[%s2794_s6 + $0x168] sm:$0xff] %v308_v49  ;;  %v402_v32 = vld [vmem:[%s2789_s5 + $0x1700] sm:$0xff]  ;;  %v404_v33 = vld [vmem:[%s2789_s5 + $0x1708] sm:$0xff] }
  0x65   : > { %311 = vst [vmem:[%s2794_s6 + $0x170] sm:$0xff] %v310_v50  ;;  %v406_v34 = vld [vmem:[%s2789_s5 + $0x1780] sm:$0xff]  ;;  %v408_v35 = vld [vmem:[%s2789_s5 + $0x1788] sm:$0xff] }
  0x66   : > { %313 = vst [vmem:[%s2794_s6 + $0x178] sm:$0xff] %v312_v51  ;;  %v410_v36 = vld [vmem:[%s2789_s5 + $0x1800] sm:$0xff]  ;;  %v412_v37 = vld [vmem:[%s2789_s5 + $0x1808] sm:$0xff] }
  0x67   : > { %315 = vst [vmem:[%s2794_s6 + $0x180] sm:$0xff] %v314_v52  ;;  %v414_v38 = vld [vmem:[%s2789_s5 + $0x1880] sm:$0xff]  ;;  %v416_v39 = vld [vmem:[%s2789_s5 + $0x1888] sm:$0xff] }
  0x68   : > { %317 = vst [vmem:[%s2794_s6 + $0x188] sm:$0xff] %v316_v53  ;;  %v418_v40 = vld [vmem:[%s2789_s5 + $0x1900] sm:$0xff]  ;;  %v420_v41 = vld [vmem:[%s2789_s5 + $0x1908] sm:$0xff] }
  0x69   : > { %319 = vst [vmem:[%s2794_s6 + $0x190] sm:$0xff] %v318_v54  ;;  %v422_v42 = vld [vmem:[%s2789_s5 + $0x1980] sm:$0xff]  ;;  %v424_v43 = vld [vmem:[%s2789_s5 + $0x1988] sm:$0xff] }
  0x6a   : > { %321 = vst [vmem:[%s2794_s6 + $0x198] sm:$0xff] %v320_v55  ;;  %v426_v44 = vld [vmem:[%s2789_s5 + $0x1a00] sm:$0xff]  ;;  %v428_v45 = vld [vmem:[%s2789_s5 + $0x1a08] sm:$0xff] }
  0x6b   : > { %323 = vst [vmem:[%s2794_s6 + $0x1a0] sm:$0xff] %v322_v56  ;;  %v430_v46 = vld [vmem:[%s2789_s5 + $0x1a80] sm:$0xff]  ;;  %v432_v47 = vld [vmem:[%s2789_s5 + $0x1a88] sm:$0xff] }
  0x6c   : > { %325 = vst [vmem:[%s2794_s6 + $0x1a8] sm:$0xff] %v324_v57  ;;  %v434_v48 = vld [vmem:[%s2789_s5 + $0x1b00] sm:$0xff]  ;;  %v436_v49 = vld [vmem:[%s2789_s5 + $0x1b08] sm:$0xff] }
  0x6d   : > { %327 = vst [vmem:[%s2794_s6 + $0x1b0] sm:$0xff] %v326_v58  ;;  %v438_v50 = vld [vmem:[%s2789_s5 + $0x1b80] sm:$0xff]  ;;  %v440_v51 = vld [vmem:[%s2789_s5 + $0x1b88] sm:$0xff] }
  0x6e   : > { %329 = vst [vmem:[%s2794_s6 + $0x1b8] sm:$0xff] %v328_v59  ;;  %v442_v52 = vld [vmem:[%s2789_s5 + $0x1c00] sm:$0xff]  ;;  %v444_v53 = vld [vmem:[%s2789_s5 + $0x1c08] sm:$0xff] }
  0x6f   : > { %331 = vst [vmem:[%s2794_s6 + $0x1c0] sm:$0xff] %v330_v60  ;;  %v446_v54 = vld [vmem:[%s2789_s5 + $0x1c80] sm:$0xff]  ;;  %v448_v55 = vld [vmem:[%s2789_s5 + $0x1c88] sm:$0xff] }
  0x70   : > { %333 = vst [vmem:[%s2794_s6 + $0x1c8] sm:$0xff] %v332_v61  ;;  %v450_v56 = vld [vmem:[%s2789_s5 + $0x1d00] sm:$0xff]  ;;  %v452_v57 = vld [vmem:[%s2789_s5 + $0x1d08] sm:$0xff] }
  0x71   : > { %335 = vst [vmem:[%s2794_s6 + $0x1d0] sm:$0xff] %v334_v62  ;;  %v454_v58 = vld [vmem:[%s2789_s5 + $0x1d80] sm:$0xff]  ;;  %v456_v59 = vld [vmem:[%s2789_s5 + $0x1d88] sm:$0xff] }
  0x72   : > { %337 = vst [vmem:[%s2794_s6 + $0x1d8] sm:$0xff] %v336_v63  ;;  %v458_v60 = vld [vmem:[%s2789_s5 + $0x1e00] sm:$0xff]  ;;  %v460_v61 = vld [vmem:[%s2789_s5 + $0x1e08] sm:$0xff] }
  0x73   : > { %339 = vst [vmem:[%s2794_s6 + $0x1e0] sm:$0xff] %v338_v0  ;;  %v462_v62 = vld [vmem:[%s2789_s5 + $0x1e80] sm:$0xff]  ;;  %v464_v63 = vld [vmem:[%s2789_s5 + $0x1e88] sm:$0xff] }
  0x74   : > { %341 = vst [vmem:[%s2794_s6 + $0x1e8] sm:$0xff] %v340_v1  ;;  %v466_v0 = vld [vmem:[%s2789_s5 + $0x1f00] sm:$0xff]  ;;  %v468_v1 = vld [vmem:[%s2789_s5 + $0x1f08] sm:$0xff] }
  0x75   : > { %343 = vst [vmem:[%s2794_s6 + $0x1f0] sm:$0xff] %v342_v2  ;;  %v470_v2 = vld [vmem:[%s2789_s5 + $0x1f80] sm:$0xff] }
  0x76   : > { %345 = vst [vmem:[%s2794_s6 + $0x1f8] sm:$0xff] %v344_v3  ;;  %v472_v3 = vld [vmem:[%s2789_s5 + $0x1f88] sm:$0xff] }
  0x77   : > { %347 = vst [vmem:[%s2794_s6 + $0x200] sm:$0xff] %v346_v4 }
  0x78   : > { %349 = vst [vmem:[%s2794_s6 + $0x208] sm:$0xff] %v348_v5 }
  0x79   : > { %351 = vst [vmem:[%s2794_s6 + $0x210] sm:$0xff] %v350_v6 }
  0x7a   : > { %353 = vst [vmem:[%s2794_s6 + $0x218] sm:$0xff] %v352_v7 }
  0x7b   : > { %355 = vst [vmem:[%s2794_s6 + $0x220] sm:$0xff] %v354_v8 }
  0x7c   : > { %357 = vst [vmem:[%s2794_s6 + $0x228] sm:$0xff] %v356_v9 }
  0x7d   : > { %359 = vst [vmem:[%s2794_s6 + $0x230] sm:$0xff] %v358_v10 }
  0x7e   : > { %361 = vst [vmem:[%s2794_s6 + $0x238] sm:$0xff] %v360_v11 }
  0x7f   : > { %363 = vst [vmem:[%s2794_s6 + $0x240] sm:$0xff] %v362_v12 }
  0x80   : > { %365 = vst [vmem:[%s2794_s6 + $0x248] sm:$0xff] %v364_v13 }
  0x81   : > { %367 = vst [vmem:[%s2794_s6 + $0x250] sm:$0xff] %v366_v14 }
  0x82   : > { %369 = vst [vmem:[%s2794_s6 + $0x258] sm:$0xff] %v368_v15 }
  0x83   : > { %371 = vst [vmem:[%s2794_s6 + $0x260] sm:$0xff] %v370_v16 }
  0x84   : > { %373 = vst [vmem:[%s2794_s6 + $0x268] sm:$0xff] %v372_v17 }
  0x85   : > { %375 = vst [vmem:[%s2794_s6 + $0x270] sm:$0xff] %v374_v18 }
  0x86   : > { %377 = vst [vmem:[%s2794_s6 + $0x278] sm:$0xff] %v376_v19 }
  0x87   : > { %379 = vst [vmem:[%s2794_s6 + $0x280] sm:$0xff] %v378_v20 }
  0x88   : > { %381 = vst [vmem:[%s2794_s6 + $0x288] sm:$0xff] %v380_v21 }
  0x89   : > { %383 = vst [vmem:[%s2794_s6 + $0x290] sm:$0xff] %v382_v22 }
  0x8a   : > { %385 = vst [vmem:[%s2794_s6 + $0x298] sm:$0xff] %v384_v23 }
  0x8b   : > { %387 = vst [vmem:[%s2794_s6 + $0x2a0] sm:$0xff] %v386_v24 }
  0x8c   : > { %389 = vst [vmem:[%s2794_s6 + $0x2a8] sm:$0xff] %v388_v25 }
  0x8d   : > { %391 = vst [vmem:[%s2794_s6 + $0x2b0] sm:$0xff] %v390_v26 }
  0x8e   : > { %393 = vst [vmem:[%s2794_s6 + $0x2b8] sm:$0xff] %v392_v27 }
  0x8f   : > { %395 = vst [vmem:[%s2794_s6 + $0x2c0] sm:$0xff] %v394_v28 }
  0x90   : > { %397 = vst [vmem:[%s2794_s6 + $0x2c8] sm:$0xff] %v396_v29 }
  0x91   : > { %399 = vst [vmem:[%s2794_s6 + $0x2d0] sm:$0xff] %v398_v30 }
  0x92   : > { %401 = vst [vmem:[%s2794_s6 + $0x2d8] sm:$0xff] %v400_v31 }
  0x93   : > { %403 = vst [vmem:[%s2794_s6 + $0x2e0] sm:$0xff] %v402_v32 }
  0x94   : > { %405 = vst [vmem:[%s2794_s6 + $0x2e8] sm:$0xff] %v404_v33 }
  0x95   : > { %407 = vst [vmem:[%s2794_s6 + $0x2f0] sm:$0xff] %v406_v34 }
  0x96   : > { %409 = vst [vmem:[%s2794_s6 + $0x2f8] sm:$0xff] %v408_v35 }
  0x97   : > { %411 = vst [vmem:[%s2794_s6 + $0x300] sm:$0xff] %v410_v36 }
  0x98   : > { %413 = vst [vmem:[%s2794_s6 + $0x308] sm:$0xff] %v412_v37 }
  0x99   : > { %415 = vst [vmem:[%s2794_s6 + $0x310] sm:$0xff] %v414_v38 }
  0x9a   : > { %417 = vst [vmem:[%s2794_s6 + $0x318] sm:$0xff] %v416_v39 }
  0x9b   : > { %419 = vst [vmem:[%s2794_s6 + $0x320] sm:$0xff] %v418_v40 }
  0x9c   : > { %421 = vst [vmem:[%s2794_s6 + $0x328] sm:$0xff] %v420_v41 }
  0x9d   : > { %423 = vst [vmem:[%s2794_s6 + $0x330] sm:$0xff] %v422_v42 }
  0x9e   : > { %425 = vst [vmem:[%s2794_s6 + $0x338] sm:$0xff] %v424_v43 }
  0x9f   : > { %427 = vst [vmem:[%s2794_s6 + $0x340] sm:$0xff] %v426_v44 }
  0xa0   : > { %429 = vst [vmem:[%s2794_s6 + $0x348] sm:$0xff] %v428_v45 }
  0xa1   : > { %431 = vst [vmem:[%s2794_s6 + $0x350] sm:$0xff] %v430_v46 }
  0xa2   : > { %433 = vst [vmem:[%s2794_s6 + $0x358] sm:$0xff] %v432_v47 }
  0xa3   : > { %435 = vst [vmem:[%s2794_s6 + $0x360] sm:$0xff] %v434_v48 }
  0xa4   : > { %437 = vst [vmem:[%s2794_s6 + $0x368] sm:$0xff] %v436_v49 }
  0xa5   : > { %439 = vst [vmem:[%s2794_s6 + $0x370] sm:$0xff] %v438_v50 }
  0xa6   : > { %441 = vst [vmem:[%s2794_s6 + $0x378] sm:$0xff] %v440_v51 }
  0xa7   : > { %443 = vst [vmem:[%s2794_s6 + $0x380] sm:$0xff] %v442_v52 }
  0xa8   : > { %445 = vst [vmem:[%s2794_s6 + $0x388] sm:$0xff] %v444_v53 }
  0xa9   : > { %447 = vst [vmem:[%s2794_s6 + $0x390] sm:$0xff] %v446_v54 }
  0xaa   : > { %449 = vst [vmem:[%s2794_s6 + $0x398] sm:$0xff] %v448_v55 }
  0xab   : > { %451 = vst [vmem:[%s2794_s6 + $0x3a0] sm:$0xff] %v450_v56 }
  0xac   : > { %453 = vst [vmem:[%s2794_s6 + $0x3a8] sm:$0xff] %v452_v57 }
  0xad   : > { %455 = vst [vmem:[%s2794_s6 + $0x3b0] sm:$0xff] %v454_v58 }
  0xae   : > { %457 = vst [vmem:[%s2794_s6 + $0x3b8] sm:$0xff] %v456_v59 }
  0xaf   : > { %459 = vst [vmem:[%s2794_s6 + $0x3c0] sm:$0xff] %v458_v60 }
  0xb0   : > { %461 = vst [vmem:[%s2794_s6 + $0x3c8] sm:$0xff] %v460_v61 }
  0xb1   : > { %463 = vst [vmem:[%s2794_s6 + $0x3d0] sm:$0xff] %v462_v62 }
  0xb2   : > { %465 = vst [vmem:[%s2794_s6 + $0x3d8] sm:$0xff] %v464_v63 }
  0xb3   : > { %467 = vst [vmem:[%s2794_s6 + $0x3e0] sm:$0xff] %v466_v0 }
  0xb4   : > { %469 = vst [vmem:[%s2794_s6 + $0x3e8] sm:$0xff] %v468_v1 }
  0xb5   : > { %471 = vst [vmem:[%s2794_s6 + $0x3f0] sm:$0xff] %v470_v2 }
  0xb6   : > { %473 = vst [vmem:[%s2794_s6 + $0x3f8] sm:$0xff] %v472_v3 }
  0xb7 PF: > { %p1802_p0 = scmp.ge.s32.totalorder %s2652_s22, 1  ;;  %p486_p1 = scmp.lt.s32.totalorder %s2652_s22, 145 }
  0xb9   : > { %p487_p2 = pnand %p1802_p0, %p486_p1 }
  0xba   : > { %s493_s0 = sand.u32 (!%p487_p2), 1, %s2628_s16   ;;  %s500_s23 = sand.u32 (!%p487_p2), 1, %s2620_s14  }
  0xbb   : > { %490 = sbr.rel (%p487_p2) target bundleno = 512 (0x200), region = 70  ;;  %s1803_s28 = sshll.u32 (!%p487_p2), %s493_s0, 5 }
  0xbc   : > { %s1804_s7 = sshll.u32 (!%p487_p2), %s500_s23, 10  ;;  %s527_s11 = sand.u32 (!%p487_p2), 1, %s2612_s12  }
  0xbd   : > { %s1806_s26 = sshll.u32 (!%p487_p2), %s2640_s19, 2  ;;  %s1805_s29 = sshll.u32 (!%p487_p2), %s527_s11, 6 }
  0xbe   : > { %p535_p3 = scmp.lt.s32.totalorder (!%p487_p2), %s1806_s26, 31  ;;  %s3061_s6 = scalar_lea.vmem (!%p487_p2), [#allocation3], %s1803_s28 }
  0xbf   : > { %s3063_s1 = scalar_lea.vmem (!%p487_p2), [#allocation4], %s1804_s7  ;;  %s3065_s25 = scalar_lea.vmem (!%p487_p2), [#allocation5], %s1805_s29 }
  0xc0   : > { %s3448_s26 = smov (!%p535_p3, %s1806_s26), 31  ;;  %p1807_p4 = scmp.ne.s32.totalorder %s2636_s18, 0 }
  0xc1   : > { %s537_s5 = scalar_lea.vmem %s3419_s2, %s3448_s26 }
  0xc2   : > { %544 = sbr.rel (%p1807_p4) target bundleno = 208 (0xd0), region = 82 }
  0xc7   : > { %v2654_v4 = vmov 0.0  }
  0xc8   : > { %545 = vst [vmem:[#allocation2 + $0x30] sm:$0xff] %v2654_v4 }
  0xc9   : > { %546 = vst [vmem:[#allocation2] sm:$0xff] %v2654_v4 }
  0xca   : > { %547 = vst [vmem:[#allocation2 + $0x18] sm:$0xff] %v2654_v4 }
  0xcb   : > { %548 = vst [vmem:[#allocation2 + $0x10] sm:$0xff] %v2654_v4 }
  0xcc   : > { %549 = vst [vmem:[#allocation2 + $0x8] sm:$0xff] %v2654_v4 }
  0xcd   : > { %550 = vst [vmem:[#allocation2 + $0x20] sm:$0xff] %v2654_v4 }
  0xce   : > { %551 = vst [vmem:[#allocation2 + $0x28] sm:$0xff] %v2654_v4 }
  0xcf   : > { %552 = vst [vmem:[#allocation2 + $0x38] sm:$0xff] %v2654_v4 }
  0xd0 PF: > { %v1938_v5 = vld [vmem:[%s3063_s1 + $0xe0] sm:$0xf]  ;;  %v2378_v6 = vld [vmem:[%s3063_s1 + $0xec] sm:$0xf0]  ;;  %p2336_p5 = scmp.ne.s32.totalorder %s2636_s18, 17 }
  0xd1   : > { %v2066_v7 = vld [vmem:[%s3063_s1 + $0x1e0] sm:$0xf]  ;;  %v1939_v8 = vor.u32 %v2378_v6, %v1938_v5  ;;  %v2410_v9 = vld [vmem:[%s3063_s1 + $0x1ec] sm:$0xf0] }
  0xd2   : > { %v2194_v10 = vld [vmem:[%s3063_s1 + $0x2e0] sm:$0xf]  ;;  %v2442_v11 = vld [vmem:[%s3063_s1 + $0x2ec] sm:$0xf0]  ;;  %v2067_v12 = vor.u32 %v2410_v9, %v2066_v7 }
  0xd3   : > { %v2195_v13 = vor.u32 %v2442_v11, %v2194_v10  ;;  %v2322_v14 = vld [vmem:[%s3063_s1 + $0x3e0] sm:$0xf]  ;;  %v2474_v15 = vld [vmem:[%s3063_s1 + $0x3ec] sm:$0xf0]  ;;  %1353 = vmatpush.bf16.msra.mxu0 %v1939_v8 }
  0xd4   : > { %v1922_v16 = vld [vmem:[%s3063_s1 + $0xc0] sm:$0xf]  ;;  %v2323_v17 = vor.u32 %v2474_v15, %v2322_v14  ;;  %v2374_v18 = vld [vmem:[%s3063_s1 + $0xcc] sm:$0xf0]  ;;  %1367 = vmatpush.bf16.msra.mxu1 %v2067_v12 }
  0xd5   : > { %v2050_v19 = vld [vmem:[%s3063_s1 + $0x1c0] sm:$0xf]  ;;  %v2406_v20 = vld [vmem:[%s3063_s1 + $0x1cc] sm:$0xf0]  ;;  %1381 = vmatpush.bf16.msra.mxu2 %v2195_v13  ;;  %v1923_v21 = vor.u32 %v2374_v18, %v1922_v16 }
  0xd6   : > { %v2051_v22 = vor.u32 %v2406_v20, %v2050_v19  ;;  %v2178_v23 = vld [vmem:[%s3063_s1 + $0x2c0] sm:$0xf]  ;;  %v2438_v24 = vld [vmem:[%s3063_s1 + $0x2cc] sm:$0xf0]  ;;  %1395 = vmatpush.bf16.msra.mxu3 %v2323_v17 }
  0xd7   : > { %v2306_v25 = vld [vmem:[%s3063_s1 + $0x3c0] sm:$0xf]  ;;  %v2179_v26 = vor.u32 %v2438_v24, %v2178_v23  ;;  %v2470_v27 = vld [vmem:[%s3063_s1 + $0x3cc] sm:$0xf0]  ;;  %1354 = vmatpush.bf16.msra.mxu0 %v1923_v21 }
  0xd8   : > { %v1906_v28 = vld [vmem:[%s3063_s1 + $0xa0] sm:$0xf]  ;;  %v2370_v29 = vld [vmem:[%s3063_s1 + $0xac] sm:$0xf0]  ;;  %v2307_v30 = vor.u32 %v2470_v27, %v2306_v25  ;;  %1368 = vmatpush.bf16.msra.mxu1 %v2051_v22 }
  0xd9   : > { %v2034_v31 = vld [vmem:[%s3063_s1 + $0x1a0] sm:$0xf]  ;;  %v2402_v32 = vld [vmem:[%s3063_s1 + $0x1ac] sm:$0xf0]  ;;  %v1907_v34 = vor.u32 %v2370_v29, %v1906_v28  ;;  %1382 = vmatpush.bf16.msra.mxu2 %v2179_v26 }
  0xda   : > { %v2162_v33 = vld [vmem:[%s3063_s1 + $0x2a0] sm:$0xf]  ;;  %v2434_v35 = vld [vmem:[%s3063_s1 + $0x2ac] sm:$0xf0]  ;;  %v2035_v38 = vor.u32 %v2402_v32, %v2034_v31  ;;  %1396 = vmatpush.bf16.msra.mxu3 %v2307_v30 }
  0xdb   : > { %v2290_v36 = vld [vmem:[%s3063_s1 + $0x3a0] sm:$0xf]  ;;  %v2466_v37 = vld [vmem:[%s3063_s1 + $0x3ac] sm:$0xf0]  ;;  %v2163_v39 = vor.u32 %v2434_v35, %v2162_v33  ;;  %1355 = vmatpush.bf16.msra.mxu0 %v1907_v34  ;;  %v2376_v33 = vld [vmem:[%s3063_s1 + $0xe4] sm:$0xf] }
  0xdc   : > { %v1890_v40 = vld [vmem:[%s3063_s1 + $0x80] sm:$0xf]  ;;  %v2366_v41 = vld [vmem:[%s3063_s1 + $0x8c] sm:$0xf0]  ;;  %v2291_v43 = vor.u32 %v2466_v37, %v2290_v36  ;;  %1369 = vmatpush.bf16.msra.mxu1 %v2035_v38  ;;  %v1940_v34 = vld [vmem:[%s3063_s1 + $0xf0] sm:$0xf0] }
  0xdd   : > { %v2018_v42 = vld [vmem:[%s3063_s1 + $0x180] sm:$0xf]  ;;  %v2398_v44 = vld [vmem:[%s3063_s1 + $0x18c] sm:$0xf0]  ;;  %v1891_v49 = vor.u32 %v2366_v41, %v1890_v40  ;;  %1383 = vmatpush.bf16.msra.mxu2 %v2163_v39  ;;  %v2408_v35 = vld [vmem:[%s3063_s1 + $0x1e4] sm:$0xf] }
  0xde   : > { %v2146_v45 = vld [vmem:[%s3063_s1 + $0x280] sm:$0xf]  ;;  %v2430_v46 = vld [vmem:[%s3063_s1 + $0x28c] sm:$0xf0]  ;;  %v2019_v50 = vor.u32 %v2398_v44, %v2018_v42  ;;  %1397 = vmatpush.bf16.msra.mxu3 %v2291_v43  ;;  %v2068_v37 = vld [vmem:[%s3063_s1 + $0x1f0] sm:$0xf0] }
  0xdf   : > { %v2274_v47 = vld [vmem:[%s3063_s1 + $0x380] sm:$0xf]  ;;  %v2462_v48 = vld [vmem:[%s3063_s1 + $0x38c] sm:$0xf0]  ;;  %v2147_v51 = vor.u32 %v2430_v46, %v2146_v45  ;;  %1356 = vmatpush.bf16.msra.mxu0 %v1891_v49  ;;  %v2440_v38 = vld [vmem:[%s3063_s1 + $0x2e4] sm:$0xf]  ;;  %v1943_v45 = vor.u32 %v2376_v33, %v1940_v34  ;;  %v2071_v46 = vor.u32 %v2408_v35, %v2068_v37 }
  0xe0   : > { %v1874_v52 = vld [vmem:[%s3063_s1 + $0x60] sm:$0xf]  ;;  %v2362_v53 = vld [vmem:[%s3063_s1 + $0x6c] sm:$0xf0]  ;;  %v2275_v55 = vor.u32 %v2462_v48, %v2274_v47  ;;  %1370 = vmatpush.bf16.msra.mxu1 %v2019_v50  ;;  %v2196_v39 = vld [vmem:[%s3063_s1 + $0x2f0] sm:$0xf0] }
  0xe1   : > { %v2002_v54 = vld [vmem:[%s3063_s1 + $0x160] sm:$0xf]  ;;  %v2394_v56 = vld [vmem:[%s3063_s1 + $0x16c] sm:$0xf0]  ;;  %v1875_v61 = vor.u32 %v2362_v53, %v1874_v52  ;;  %1384 = vmatpush.bf16.msra.mxu2 %v2147_v51  ;;  %v2472_v42 = vld [vmem:[%s3063_s1 + $0x3e4] sm:$0xf]  ;;  %v2199_v47 = vor.u32 %v2440_v38, %v2196_v39 }
  0xe2   : > { %v2130_v57 = vld [vmem:[%s3063_s1 + $0x260] sm:$0xf]  ;;  %v2426_v58 = vld [vmem:[%s3063_s1 + $0x26c] sm:$0xf0]  ;;  %v2003_v62 = vor.u32 %v2394_v56, %v2002_v54  ;;  %1398 = vmatpush.bf16.msra.mxu3 %v2275_v55  ;;  %v2324_v43 = vld [vmem:[%s3063_s1 + $0x3f0] sm:$0xf0] }
  0xe3   : > { %v2258_v59 = vld [vmem:[%s3063_s1 + $0x360] sm:$0xf]  ;;  %v2458_v60 = vld [vmem:[%s3063_s1 + $0x36c] sm:$0xf0]  ;;  %v2131_v63 = vor.u32 %v2426_v58, %v2130_v57  ;;  %1357 = vmatpush.bf16.msra.mxu0 %v1875_v61  ;;  %v2372_v48 = vld [vmem:[%s3063_s1 + $0xc4] sm:$0xf]  ;;  %v2327_v51 = vor.u32 %v2472_v42, %v2324_v43 }
  0xe4   : > { %v1858_v0 = vld [vmem:[%s3063_s1 + $0x40] sm:$0xf]  ;;  %v2358_v1 = vld [vmem:[%s3063_s1 + $0x4c] sm:$0xf0]  ;;  %v2259_v3 = vor.u32 %v2458_v60, %v2258_v59  ;;  %1371 = vmatpush.bf16.msra.mxu1 %v2003_v62  ;;  %v1924_v49 = vld [vmem:[%s3063_s1 + $0xd0] sm:$0xf0] }
  0xe5   : > { %v1986_v2 = vld [vmem:[%s3063_s1 + $0x140] sm:$0xf]  ;;  %v2390_v4 = vld [vmem:[%s3063_s1 + $0x14c] sm:$0xf0]  ;;  %v1859_v9 = vor.u32 %v2358_v1, %v1858_v0  ;;  %1385 = vmatpush.bf16.msra.mxu2 %v2131_v63  ;;  %v2404_v50 = vld [vmem:[%s3063_s1 + $0x1c4] sm:$0xf]  ;;  %v1927_v57 = vor.u32 %v2372_v48, %v1924_v49 }
  0xe6   : > { %v2114_v5 = vld [vmem:[%s3063_s1 + $0x240] sm:$0xf]  ;;  %v2422_v6 = vld [vmem:[%s3063_s1 + $0x24c] sm:$0xf0]  ;;  %v1987_v10 = vor.u32 %v2390_v4, %v1986_v2  ;;  %1399 = vmatpush.bf16.msra.mxu3 %v2259_v3  ;;  %v2052_v52 = vld [vmem:[%s3063_s1 + $0x1d0] sm:$0xf0] }
  0xe7   : > { %v2242_v7 = vld [vmem:[%s3063_s1 + $0x340] sm:$0xf]  ;;  %v2454_v8 = vld [vmem:[%s3063_s1 + $0x34c] sm:$0xf0]  ;;  %v2115_v11 = vor.u32 %v2422_v6, %v2114_v5  ;;  %1358 = vmatpush.bf16.msra.mxu0 %v1859_v9  ;;  %v2436_v53 = vld [vmem:[%s3063_s1 + $0x2c4] sm:$0xf]  ;;  %v2055_v58 = vor.u32 %v2404_v50, %v2052_v52 }
  0xe8   : > { %v1842_v12 = vld [vmem:[%s3063_s1 + $0x20] sm:$0xf]  ;;  %v2354_v13 = vld [vmem:[%s3063_s1 + $0x2c] sm:$0xf0]  ;;  %v2243_v15 = vor.u32 %v2454_v8, %v2242_v7  ;;  %1372 = vmatpush.bf16.msra.mxu1 %v1987_v10  ;;  %v2180_v54 = vld [vmem:[%s3063_s1 + $0x2d0] sm:$0xf0] }
  0xe9   : > { %v1970_v14 = vld [vmem:[%s3063_s1 + $0x120] sm:$0xf]  ;;  %v2386_v16 = vld [vmem:[%s3063_s1 + $0x12c] sm:$0xf0]  ;;  %v1843_v21 = vor.u32 %v2354_v13, %v1842_v12  ;;  %1386 = vmatpush.bf16.msra.mxu2 %v2115_v11  ;;  %v2468_v55 = vld [vmem:[%s3063_s1 + $0x3c4] sm:$0xf]  ;;  %v2183_v59 = vor.u32 %v2436_v53, %v2180_v54 }
  0xea   : > { %v2098_v17 = vld [vmem:[%s3063_s1 + $0x220] sm:$0xf]  ;;  %v2418_v18 = vld [vmem:[%s3063_s1 + $0x22c] sm:$0xf0]  ;;  %v1971_v24 = vor.u32 %v2386_v16, %v1970_v14  ;;  %1400 = vmatpush.bf16.msra.mxu3 %v2243_v15  ;;  %v2308_v56 = vld [vmem:[%s3063_s1 + $0x3d0] sm:$0xf0] }
  0xeb   : > { %v2226_v19 = vld [vmem:[%s3063_s1 + $0x320] sm:$0xf]  ;;  %v2450_v20 = vld [vmem:[%s3063_s1 + $0x32c] sm:$0xf0]  ;;  %v2099_v25 = vor.u32 %v2418_v18, %v2098_v17  ;;  %1359 = vmatpush.bf16.msra.mxu0 %v1843_v21  ;;  %v2368_v60 = vld [vmem:[%s3063_s1 + $0xa4] sm:$0xf]  ;;  %v2311_v63 = vor.u32 %v2468_v55, %v2308_v56 }
  0xec   : > { %v1826_v22 = vld [vmem:[%s3063_s1] sm:$0xf]  ;;  %v2350_v23 = vld [vmem:[%s3063_s1 + $0xc] sm:$0xf0]  ;;  %v2227_v29 = vor.u32 %v2450_v20, %v2226_v19  ;;  %1373 = vmatpush.bf16.msra.mxu1 %v1971_v24  ;;  %v1908_v61 = vld [vmem:[%s3063_s1 + $0xb0] sm:$0xf0] }
  0xed   : > { %v1954_v26 = vld [vmem:[%s3063_s1 + $0x100] sm:$0xf]  ;;  %v2382_v27 = vld [vmem:[%s3063_s1 + $0x10c] sm:$0xf0]  ;;  %v1827_v36 = vor.u32 %v2350_v23, %v1826_v22  ;;  %1387 = vmatpush.bf16.msra.mxu2 %v2099_v25  ;;  %v2400_v62 = vld [vmem:[%s3063_s1 + $0x1a4] sm:$0xf]  ;;  %v1911_v6 = vor.u32 %v2368_v60, %v1908_v61 }
  0xee   : > { %v2082_v28 = vld [vmem:[%s3063_s1 + $0x200] sm:$0xf]  ;;  %v2414_v30 = vld [vmem:[%s3063_s1 + $0x20c] sm:$0xf0]  ;;  %v1955_v40 = vor.u32 %v2382_v27, %v1954_v26  ;;  %1401 = vmatpush.bf16.msra.mxu3 %v2227_v29  ;;  %v2036_v0 = vld [vmem:[%s3063_s1 + $0x1b0] sm:$0xf0] }
  0xef   : > { %v2210_v31 = vld [vmem:[%s3063_s1 + $0x300] sm:$0xf]  ;;  %v2446_v32 = vld [vmem:[%s3063_s1 + $0x30c] sm:$0xf0]  ;;  %v2083_v41 = vor.u32 %v2414_v30, %v2082_v28  ;;  %1360 = vmatpush.bf16.msra.mxu0 %v1827_v36  ;;  %v2432_v1 = vld [vmem:[%s3063_s1 + $0x2a4] sm:$0xf]  ;;  %v2039_v10 = vor.u32 %v2400_v62, %v2036_v0 }
  0xf0   : > { %v2211_v44 = vor.u32 %v2446_v32, %v2210_v31  ;;  %1374 = vmatpush.bf16.msra.mxu1 %v1955_v40  ;;  %v2164_v2 = vld [vmem:[%s3063_s1 + $0x2b0] sm:$0xf0]  ;;  %v2464_v3 = vld [vmem:[%s3063_s1 + $0x3a4] sm:$0xf]  ;;  %v1818_v8 = vld [vmem:[%s3061_s6 + $0x8] sm:$0xf] }
  0xf1   : > { %1388 = vmatpush.bf16.msra.mxu2 %v2083_v41  ;;  %v2292_v4 = vld [vmem:[%s3063_s1 + $0x3b0] sm:$0xf0]  ;;  %v2364_v5 = vld [vmem:[%s3063_s1 + $0x84] sm:$0xf]  ;;  %v2347_v9 = vld [vmem:[%s3061_s6 + $0x14] sm:$0xf0]  ;;  %v2167_v11 = vor.u32 %v2432_v1, %v2164_v2 }
  0xf2   : > { %1402 = vmatpush.bf16.msra.mxu3 %v2211_v44  ;;  %v1892_v7 = vld [vmem:[%s3063_s1 + $0x90] sm:$0xf0]  ;;  %v2396_v12 = vld [vmem:[%s3063_s1 + $0x184] sm:$0xf]  ;;  %v3161_v13 = vor.u32 %v2347_v9, %v1818_v8  ;;  %v2345_v14 = vld [vmem:[%s3061_s6 + $0xc] sm:$0xf]  ;;  %v2295_v16 = vor.u32 %v2464_v3, %v2292_v4 }
  0xf3   : > { %1409 = vmatpush.bf16.msrb.mxu0 %v1943_v45  ;;  %v1820_v15 = vld [vmem:[%s3061_s6 + $0x18] sm:$0xf0]  ;;  %v2020_v17 = vld [vmem:[%s3063_s1 + $0x190] sm:$0xf0]  ;;  %v2428_v18 = vld [vmem:[%s3063_s1 + $0x284] sm:$0xf]  ;;  %v1895_v24 = vor.u32 %v2364_v5, %v1892_v7 }
  0xf4   : > { %1423 = vmatpush.bf16.msrb.mxu1 %v2071_v46  ;;  %v2148_v19 = vld [vmem:[%s3063_s1 + $0x290] sm:$0xf0]  ;;  %v3168_v20 = vor.u32 %v2345_v14, %v1820_v15  ;;  %v2460_v21 = vld [vmem:[%s3063_s1 + $0x384] sm:$0xf]  ;;  %1389 = vmatmul.bf16.vlgmr.msra.gmra.mxu2 %v3161_v13  ;;  %v1810_v26 = vld [vmem:[%s3061_s6] sm:$0xf]  ;;  %v2023_v28 = vor.u32 %v2396_v12, %v2020_v17 }
  0xf5   : > { %1437 = vmatpush.bf16.msrb.mxu2 %v2199_v47  ;;  %v2276_v22 = vld [vmem:[%s3063_s1 + $0x390] sm:$0xf0]  ;;  %v2360_v23 = vld [vmem:[%s3063_s1 + $0x64] sm:$0xf]  ;;  %v2346_v27 = vld [vmem:[%s3061_s6 + $0xc] sm:$0xf0]  ;;  %v2151_v29 = vor.u32 %v2428_v18, %v2148_v19 }
  0xf6   : > { %1451 = vmatpush.bf16.msrb.mxu3 %v2327_v51  ;;  %v1876_v25 = vld [vmem:[%s3063_s1 + $0x70] sm:$0xf0]  ;;  %v2392_v30 = vld [vmem:[%s3063_s1 + $0x164] sm:$0xf]  ;;  %v3179_v31 = vor.u32 %v2346_v27, %v1810_v26  ;;  %v2279_v34 = vor.u32 %v2460_v21, %v2276_v22  ;;  %v1946_v14 = vld [vmem:[%s3063_s1 + $0xe8] sm:$0xf] }
  0xf7   : > { %1410 = vmatpush.bf16.msrb.mxu0 %v1927_v57  ;;  %1403 = vmatmul.bf16.vlgmr.msra.gmra.mxu3 %v3168_v20  ;;  %v2344_v32 = vld [vmem:[%s3061_s6 + $0x4] sm:$0xf]  ;;  %v1812_v33 = vld [vmem:[%s3061_s6 + $0x10] sm:$0xf0]  ;;  %v1879_v41 = vor.u32 %v2360_v23, %v1876_v25  ;;  %v2379_v15 = vld [vmem:[%s3063_s1 + $0xf4] sm:$0xf0] }
  0xf8   : > { %1424 = vmatpush.bf16.msrb.mxu1 %v2055_v58  ;;  %v2004_v35 = vld [vmem:[%s3063_s1 + $0x170] sm:$0xf0]  ;;  %v2424_v36 = vld [vmem:[%s3063_s1 + $0x264] sm:$0xf]  ;;  %v3186_v38 = vor.u32 %v2344_v32, %v1812_v33  ;;  %1361 = vmatmul.bf16.vlgmr.msra.gmra.mxu0 %v3179_v31  ;;  %v2411_v18 = vld [vmem:[%s3063_s1 + $0x1f4] sm:$0xf0]  ;;  %v1947_v27 = vor.u32 %v2379_v15, %v1946_v14 }
  0xf9   : > { %1438 = vmatpush.bf16.msrb.mxu2 %v2183_v59  ;;  %v2132_v37 = vld [vmem:[%s3063_s1 + $0x270] sm:$0xf0]  ;;  %v2456_v39 = vld [vmem:[%s3063_s1 + $0x364] sm:$0xf]  ;;  %v2007_v42 = vor.u32 %v2392_v30, %v2004_v35  ;;  %v2202_v19 = vld [vmem:[%s3063_s1 + $0x2e8] sm:$0xf] }
  0xfa   : > { %1452 = vmatpush.bf16.msrb.mxu3 %v2311_v63  ;;  %v2260_v40 = vld [vmem:[%s3063_s1 + $0x370] sm:$0xf0]  ;;  %1375 = vmatmul.bf16.vlgmr.msra.gmra.mxu1 %v3186_v38  ;;  %v2135_v43 = vor.u32 %v2424_v36, %v2132_v37  ;;  %v2356_v44 = vld [vmem:[%s3063_s1 + $0x44] sm:$0xf]  ;;  %v2443_v21 = vld [vmem:[%s3063_s1 + $0x2f4] sm:$0xf0] }
  0xfb   : > { %1411 = vmatpush.bf16.msrb.mxu0 %v1911_v6  ;;  %v1860_v45 = vld [vmem:[%s3063_s1 + $0x50] sm:$0xf0]  ;;  %v2388_v46 = vld [vmem:[%s3063_s1 + $0x144] sm:$0xf]  ;;  %v2263_v47 = vor.u32 %v2456_v39, %v2260_v40  ;;  %v2475_v25 = vld [vmem:[%s3063_s1 + $0x3f4] sm:$0xf0] }
  0xfc   : > { %1425 = vmatpush.bf16.msrb.mxu1 %v2039_v10  ;;  %v1988_v48 = vld [vmem:[%s3063_s1 + $0x150] sm:$0xf0]  ;;  %v2420_v49 = vld [vmem:[%s3063_s1 + $0x244] sm:$0xf]  ;;  %v1863_v53 = vor.u32 %v2356_v44, %v1860_v45  ;;  %v1930_v30 = vld [vmem:[%s3063_s1 + $0xc8] sm:$0xf] }
  0xfd   : > { %1439 = vmatpush.bf16.msrb.mxu2 %v2167_v11  ;;  %v2116_v50 = vld [vmem:[%s3063_s1 + $0x250] sm:$0xf0]  ;;  %v2452_v51 = vld [vmem:[%s3063_s1 + $0x344] sm:$0xf]  ;;  %v1991_v54 = vor.u32 %v2388_v46, %v1988_v48  ;;  %v2375_v32 = vld [vmem:[%s3063_s1 + $0xd4] sm:$0xf0] }
  0xfe   : > { %1453 = vmatpush.bf16.msrb.mxu3 %v2295_v16  ;;  %v2244_v52 = vld [vmem:[%s3063_s1 + $0x350] sm:$0xf0]  ;;  %v2119_v55 = vor.u32 %v2420_v49, %v2116_v50  ;;  %v2352_v56 = vld [vmem:[%s3063_s1 + $0x24] sm:$0xf]  ;;  %v2074_v16 = vld [vmem:[%s3063_s1 + $0x1e8] sm:$0xf] }
  0xff   : > { %1412 = vmatpush.bf16.msrb.mxu0 %v1895_v24  ;;  %v1844_v57 = vld [vmem:[%s3063_s1 + $0x30] sm:$0xf0]  ;;  %v2384_v58 = vld [vmem:[%s3063_s1 + $0x124] sm:$0xf]  ;;  %v2247_v59 = vor.u32 %v2452_v51, %v2244_v52  ;;  %v2330_v24 = vld [vmem:[%s3063_s1 + $0x3e8] sm:$0xf] }
 0x100   : > { %1426 = vmatpush.bf16.msrb.mxu1 %v2023_v28  ;;  %v1972_v60 = vld [vmem:[%s3063_s1 + $0x130] sm:$0xf0]  ;;  %v2416_v61 = vld [vmem:[%s3063_s1 + $0x224] sm:$0xf]  ;;  %v1847_v1 = vor.u32 %v2352_v56, %v1844_v57  ;;  %v2075_v28 = vor.u32 %v2411_v18, %v2074_v16  ;;  %v2058_v33 = vld [vmem:[%s3063_s1 + $0x1c8] sm:$0xf] }
 0x101   : > { %1440 = vmatpush.bf16.msrb.mxu2 %v2151_v29  ;;  %v2100_v62 = vld [vmem:[%s3063_s1 + $0x230] sm:$0xf0]  ;;  %v2448_v63 = vld [vmem:[%s3063_s1 + $0x324] sm:$0xf]  ;;  %v1975_v4 = vor.u32 %v2384_v58, %v1972_v60  ;;  %v2203_v29 = vor.u32 %v2443_v21, %v2202_v19  ;;  %v2407_v35 = vld [vmem:[%s3063_s1 + $0x1d4] sm:$0xf0] }
 0x102   : > { %1454 = vmatpush.bf16.msrb.mxu3 %v2279_v34  ;;  %v2228_v0 = vld [vmem:[%s3063_s1 + $0x330] sm:$0xf0]  ;;  %v2348_v2 = vld [vmem:[%s3063_s1 + $0x4] sm:$0xf]  ;;  %v2103_v5 = vor.u32 %v2416_v61, %v2100_v62  ;;  %v2331_v34 = vor.u32 %v2475_v25, %v2330_v24  ;;  %v2186_v36 = vld [vmem:[%s3063_s1 + $0x2c8] sm:$0xf] }
 0x103   : > { %1413 = vmatpush.bf16.msrb.mxu0 %v1879_v41  ;;  %v1828_v3 = vld [vmem:[%s3063_s1 + $0x10] sm:$0xf0]  ;;  %v2380_v6 = vld [vmem:[%s3063_s1 + $0x104] sm:$0xf]  ;;  %v2231_v9 = vor.u32 %v2448_v63, %v2228_v0  ;;  %v2439_v37 = vld [vmem:[%s3063_s1 + $0x2d4] sm:$0xf0]  ;;  %v1931_v41 = vor.u32 %v2375_v32, %v1930_v30 }
 0x104   : > { %1427 = vmatpush.bf16.msrb.mxu1 %v2007_v42  ;;  %v1956_v7 = vld [vmem:[%s3063_s1 + $0x110] sm:$0xf0]  ;;  %v2412_v8 = vld [vmem:[%s3063_s1 + $0x204] sm:$0xf]  ;;  %v1831_v17 = vor.u32 %v2348_v2, %v1828_v3  ;;  %v2314_v39 = vld [vmem:[%s3063_s1 + $0x3c8] sm:$0xf]  ;;  %v2059_v42 = vor.u32 %v2407_v35, %v2058_v33 }
 0x105   : > { %1441 = vmatpush.bf16.msrb.mxu2 %v2135_v43  ;;  %v2084_v10 = vld [vmem:[%s3063_s1 + $0x210] sm:$0xf0]  ;;  %v2444_v11 = vld [vmem:[%s3063_s1 + $0x304] sm:$0xf]  ;;  %v1959_v22 = vor.u32 %v2380_v6, %v1956_v7  ;;  %v2471_v40 = vld [vmem:[%s3063_s1 + $0x3d4] sm:$0xf0]  ;;  %v2187_v43 = vor.u32 %v2439_v37, %v2186_v36 }
 0x106   : > { %1455 = vmatpush.bf16.msrb.mxu3 %v2263_v47  ;;  %v2212_v12 = vld [vmem:[%s3063_s1 + $0x310] sm:$0xf0]  ;;  %v2087_v23 = vor.u32 %v2412_v8, %v2084_v10  ;;  %v1914_v44 = vld [vmem:[%s3063_s1 + $0xa8] sm:$0xf]  ;;  %v2371_v45 = vld [vmem:[%s3063_s1 + $0xb4] sm:$0xf0]  ;;  %v2315_v47 = vor.u32 %v2471_v40, %v2314_v39 }
 0x107   : > { %1414 = vmatpush.bf16.msrb.mxu0 %v1863_v53  ;;  %v2215_v26 = vor.u32 %v2444_v11, %v2212_v12  ;;  %v2042_v46 = vld [vmem:[%s3063_s1 + $0x1a8] sm:$0xf]  ;;  %v2403_v48 = vld [vmem:[%s3063_s1 + $0x1b4] sm:$0xf0]  ;;  %v1915_v53 = vor.u32 %v2371_v45, %v1914_v44 }
 0x108   : > { %1428 = vmatpush.bf16.msrb.mxu1 %v1991_v54  ;;  %v2170_v49 = vld [vmem:[%s3063_s1 + $0x2a8] sm:$0xf]  ;;  %v2435_v50 = vld [vmem:[%s3063_s1 + $0x2b4] sm:$0xf0]  ;;  %v2043_v54 = vor.u32 %v2403_v48, %v2042_v46 }
 0x109   : > { %1442 = vmatpush.bf16.msrb.mxu2 %v2119_v55  ;;  %v2298_v51 = vld [vmem:[%s3063_s1 + $0x3a8] sm:$0xf]  ;;  %v2467_v52 = vld [vmem:[%s3063_s1 + $0x3b4] sm:$0xf0]  ;;  %v2171_v55 = vor.u32 %v2435_v50, %v2170_v49 }
 0x10a   : > { %1456 = vmatpush.bf16.msrb.mxu3 %v2247_v59  ;;  %v1898_v56 = vld [vmem:[%s3063_s1 + $0x88] sm:$0xf]  ;;  %v2367_v57 = vld [vmem:[%s3063_s1 + $0x94] sm:$0xf0]  ;;  %v2299_v59 = vor.u32 %v2467_v52, %v2298_v51 }
 0x10b   : > { %1415 = vmatpush.bf16.msrb.mxu0 %v1847_v1  ;;  %v2026_v58 = vld [vmem:[%s3063_s1 + $0x188] sm:$0xf]  ;;  %v2399_v60 = vld [vmem:[%s3063_s1 + $0x194] sm:$0xf0]  ;;  %v1899_v1 = vor.u32 %v2367_v57, %v1898_v56  ;;  %v2076_v57 = vld [vmem:[%s3063_s1 + $0x1f8] sm:$0xf0] }
 0x10c   : > { %1429 = vmatpush.bf16.msrb.mxu1 %v1975_v4  ;;  %v2154_v61 = vld [vmem:[%s3063_s1 + $0x288] sm:$0xf]  ;;  %v2431_v62 = vld [vmem:[%s3063_s1 + $0x294] sm:$0xf0]  ;;  %v2027_v2 = vor.u32 %v2399_v60, %v2026_v58  ;;  %v2441_v58 = vld [vmem:[%s3063_s1 + $0x2ec] sm:$0xf] }
 0x10d   : > { %1443 = vmatpush.bf16.msrb.mxu2 %v2103_v5  ;;  %v2282_v63 = vld [vmem:[%s3063_s1 + $0x388] sm:$0xf]  ;;  %v2463_v0 = vld [vmem:[%s3063_s1 + $0x394] sm:$0xf0]  ;;  %v2155_v3 = vor.u32 %v2431_v62, %v2154_v61  ;;  %v2473_v62 = vld [vmem:[%s3063_s1 + $0x3ec] sm:$0xf] }
 0x10e   : > { %1457 = vmatpush.bf16.msrb.mxu3 %v2231_v9  ;;  %v1882_v4 = vld [vmem:[%s3063_s1 + $0x68] sm:$0xf]  ;;  %v2363_v5 = vld [vmem:[%s3063_s1 + $0x74] sm:$0xf0]  ;;  %v2283_v7 = vor.u32 %v2463_v0, %v2282_v63  ;;  %v2332_v63 = vld [vmem:[%s3063_s1 + $0x3f8] sm:$0xf0] }
 0x10f   : > { %1416 = vmatpush.bf16.msrb.mxu0 %v1831_v17  ;;  %v2010_v6 = vld [vmem:[%s3063_s1 + $0x168] sm:$0xf]  ;;  %v2395_v8 = vld [vmem:[%s3063_s1 + $0x174] sm:$0xf0]  ;;  %v1883_v14 = vor.u32 %v2363_v5, %v1882_v4  ;;  %v2373_v4 = vld [vmem:[%s3063_s1 + $0xcc] sm:$0xf] }
 0x110   : > { %1430 = vmatpush.bf16.msrb.mxu1 %v1959_v22  ;;  %v2138_v9 = vld [vmem:[%s3063_s1 + $0x268] sm:$0xf]  ;;  %v2427_v10 = vld [vmem:[%s3063_s1 + $0x274] sm:$0xf0]  ;;  %v2011_v15 = vor.u32 %v2395_v8, %v2010_v6  ;;  %v1932_v5 = vld [vmem:[%s3063_s1 + $0xd8] sm:$0xf0] }
 0x111   : > { %1444 = vmatpush.bf16.msrb.mxu2 %v2087_v23  ;;  %v2266_v11 = vld [vmem:[%s3063_s1 + $0x368] sm:$0xf]  ;;  %v2459_v12 = vld [vmem:[%s3063_s1 + $0x374] sm:$0xf0]  ;;  %v2139_v16 = vor.u32 %v2427_v10, %v2138_v9  ;;  %v2405_v6 = vld [vmem:[%s3063_s1 + $0x1cc] sm:$0xf] }
 0x112   : > { %1458 = vmatpush.bf16.msrb.mxu3 %v2215_v26  ;;  %1417 = vmatmul.bf16.vlgmr.msrb.gmra.mxu0 %v3179_v31  ;;  %v1866_v17 = vld [vmem:[%s3063_s1 + $0x48] sm:$0xf]  ;;  %v2359_v18 = vld [vmem:[%s3063_s1 + $0x54] sm:$0xf0]  ;;  %v2267_v21 = vor.u32 %v2459_v12, %v2266_v11  ;;  %v2060_v8 = vld [vmem:[%s3063_s1 + $0x1d8] sm:$0xf0] }
 0x113   : > { %1465 = vmatpush.bf16.msra.mxu0 %v1947_v27  ;;  %1431 = vmatmul.bf16.vlgmr.msrb.gmra.mxu1 %v3186_v38  ;;  %v1994_v19 = vld [vmem:[%s3063_s1 + $0x148] sm:$0xf]  ;;  %v2391_v22 = vld [vmem:[%s3063_s1 + $0x154] sm:$0xf0]  ;;  %v1867_v27 = vor.u32 %v2359_v18, %v1866_v17  ;;  %v2437_v9 = vld [vmem:[%s3063_s1 + $0x2cc] sm:$0xf] }
 0x114   : > { %1479 = vmatpush.bf16.msra.mxu1 %v2075_v28  ;;  %1445 = vmatmul.bf16.vlgmr.msrb.gmra.mxu2 %v3161_v13  ;;  %v2122_v23 = vld [vmem:[%s3063_s1 + $0x248] sm:$0xf]  ;;  %v2423_v24 = vld [vmem:[%s3063_s1 + $0x254] sm:$0xf0]  ;;  %v1995_v28 = vor.u32 %v2391_v22, %v1994_v19  ;;  %v2188_v10 = vld [vmem:[%s3063_s1 + $0x2d8] sm:$0xf0] }
 0x115   : > { %1493 = vmatpush.bf16.msra.mxu2 %v2203_v29  ;;  %1459 = vmatmul.bf16.vlgmr.msrb.gmra.mxu3 %v3168_v20  ;;  %v2250_v25 = vld [vmem:[%s3063_s1 + $0x348] sm:$0xf]  ;;  %v2455_v26 = vld [vmem:[%s3063_s1 + $0x354] sm:$0xf0]  ;;  %v2123_v29 = vor.u32 %v2423_v24, %v2122_v23  ;;  %v2469_v11 = vld [vmem:[%s3063_s1 + $0x3cc] sm:$0xf] }
 0x116   : > { %1507 = vmatpush.bf16.msra.mxu3 %v2331_v34  ;;  %v1850_v30 = vld [vmem:[%s3063_s1 + $0x28] sm:$0xf]  ;;  %v2355_v32 = vld [vmem:[%s3063_s1 + $0x34] sm:$0xf0]  ;;  %v2251_v34 = vor.u32 %v2455_v26, %v2250_v25  ;;  %v2316_v12 = vld [vmem:[%s3063_s1 + $0x3d8] sm:$0xf0] }
 0x117   : > { %1466 = vmatpush.bf16.msra.mxu0 %v1931_v41  ;;  %v1978_v33 = vld [vmem:[%s3063_s1 + $0x128] sm:$0xf]  ;;  %v2387_v35 = vld [vmem:[%s3063_s1 + $0x134] sm:$0xf0]  ;;  %v1851_v41 = vor.u32 %v2355_v32, %v1850_v30  ;;  %v2369_v17 = vld [vmem:[%s3063_s1 + $0xac] sm:$0xf] }
 0x118   : > { %1480 = vmatpush.bf16.msra.mxu1 %v2059_v42  ;;  %v2106_v36 = vld [vmem:[%s3063_s1 + $0x228] sm:$0xf]  ;;  %v2419_v37 = vld [vmem:[%s3063_s1 + $0x234] sm:$0xf0]  ;;  %v1979_v44 = vor.u32 %v2387_v35, %v1978_v33  ;;  %v1916_v18 = vld [vmem:[%s3063_s1 + $0xb8] sm:$0xf0] }
 0x119   : > { %1494 = vmatpush.bf16.msra.mxu2 %v2187_v43  ;;  %v2234_v39 = vld [vmem:[%s3063_s1 + $0x328] sm:$0xf]  ;;  %v2451_v40 = vld [vmem:[%s3063_s1 + $0x334] sm:$0xf0]  ;;  %v2107_v45 = vor.u32 %v2419_v37, %v2106_v36  ;;  %v2401_v19 = vld [vmem:[%s3063_s1 + $0x1ac] sm:$0xf] }
 0x11a   : > { %1508 = vmatpush.bf16.msra.mxu3 %v2315_v47  ;;  %v1834_v42 = vld [vmem:[%s3063_s1 + $0x8] sm:$0xf]  ;;  %v2351_v43 = vld [vmem:[%s3063_s1 + $0x14] sm:$0xf0]  ;;  %v2235_v49 = vor.u32 %v2451_v40, %v2234_v39  ;;  %v2044_v22 = vld [vmem:[%s3063_s1 + $0x1b8] sm:$0xf0] }
 0x11b   : > { %1467 = vmatpush.bf16.msra.mxu0 %v1915_v53  ;;  %v1962_v46 = vld [vmem:[%s3063_s1 + $0x108] sm:$0xf]  ;;  %v2383_v47 = vld [vmem:[%s3063_s1 + $0x114] sm:$0xf0]  ;;  %v2377_v53 = vld [vmem:[%s3063_s1 + $0xec] sm:$0xf]  ;;  %v1835_v56 = vor.u32 %v2351_v43, %v1834_v42 }
 0x11c   : > { %1481 = vmatpush.bf16.msra.mxu1 %v2043_v54  ;;  %v2090_v48 = vld [vmem:[%s3063_s1 + $0x208] sm:$0xf]  ;;  %v2415_v50 = vld [vmem:[%s3063_s1 + $0x214] sm:$0xf0]  ;;  %v1948_v54 = vld [vmem:[%s3063_s1 + $0xf8] sm:$0xf0]  ;;  %v1963_v60 = vor.u32 %v2383_v47, %v1962_v46 }
 0x11d   : > { %1495 = vmatpush.bf16.msra.mxu2 %v2171_v55  ;;  %v2218_v51 = vld [vmem:[%s3063_s1 + $0x308] sm:$0xf]  ;;  %v2447_v52 = vld [vmem:[%s3063_s1 + $0x314] sm:$0xf0]  ;;  %v2409_v55 = vld [vmem:[%s3063_s1 + $0x1ec] sm:$0xf]  ;;  %v2091_v61 = vor.u32 %v2415_v50, %v2090_v48 }
 0x11e   : > { %1509 = vmatpush.bf16.msra.mxu3 %v2299_v59  ;;  %v2204_v59 = vld [vmem:[%s3063_s1 + $0x2f8] sm:$0xf0]  ;;  %v2219_v0 = vor.u32 %v2447_v52, %v2218_v51  ;;  %v2433_v23 = vld [vmem:[%s3063_s1 + $0x2ac] sm:$0xf] }
 0x11f   : > { %1468 = vmatpush.bf16.msra.mxu0 %v1899_v1  ;;  %v1951_v1 = vor.u32 %v2377_v53, %v1948_v54  ;;  %v2172_v24 = vld [vmem:[%s3063_s1 + $0x2b8] sm:$0xf0]  ;;  %v2465_v25 = vld [vmem:[%s3063_s1 + $0x3ac] sm:$0xf] }
 0x120   : > { %1482 = vmatpush.bf16.msra.mxu1 %v2027_v2  ;;  %v2079_v2 = vor.u32 %v2409_v55, %v2076_v57  ;;  %v2300_v26 = vld [vmem:[%s3063_s1 + $0x3b8] sm:$0xf0]  ;;  %v2365_v30 = vld [vmem:[%s3063_s1 + $0x8c] sm:$0xf] }
 0x121   : > { %1496 = vmatpush.bf16.msra.mxu2 %v2155_v3  ;;  %v2207_v3 = vor.u32 %v2441_v58, %v2204_v59  ;;  %v1900_v32 = vld [vmem:[%s3063_s1 + $0x98] sm:$0xf0]  ;;  %v2397_v33 = vld [vmem:[%s3063_s1 + $0x18c] sm:$0xf] }
 0x122   : > { %1510 = vmatpush.bf16.msra.mxu3 %v2283_v7  ;;  %v2335_v7 = vor.u32 %v2473_v62, %v2332_v63  ;;  %v2028_v35 = vld [vmem:[%s3063_s1 + $0x198] sm:$0xf0]  ;;  %v2429_v36 = vld [vmem:[%s3063_s1 + $0x28c] sm:$0xf] }
 0x123   : > { %1469 = vmatpush.bf16.msra.mxu0 %v1883_v14  ;;  %v1935_v14 = vor.u32 %v2373_v4, %v1932_v5  ;;  %v2156_v37 = vld [vmem:[%s3063_s1 + $0x298] sm:$0xf0]  ;;  %v2461_v39 = vld [vmem:[%s3063_s1 + $0x38c] sm:$0xf]  ;;  %v2031_v42 = vor.u32 %v2397_v33, %v2028_v35 }
 0x124   : > { %1483 = vmatpush.bf16.msra.mxu1 %v2011_v15  ;;  %v2063_v15 = vor.u32 %v2405_v6, %v2060_v8  ;;  %v2284_v40 = vld [vmem:[%s3063_s1 + $0x398] sm:$0xf0]  ;;  %v2159_v43 = vor.u32 %v2429_v36, %v2156_v37  ;;  %v2393_v46 = vld [vmem:[%s3063_s1 + $0x16c] sm:$0xf] }
 0x125   : > { %1497 = vmatpush.bf16.msra.mxu2 %v2139_v16  ;;  %v2191_v16 = vor.u32 %v2437_v9, %v2188_v10  ;;  %v2287_v47 = vor.u32 %v2461_v39, %v2284_v40  ;;  %v2012_v48 = vld [vmem:[%s3063_s1 + $0x178] sm:$0xf0]  ;;  %v2457_v51 = vld [vmem:[%s3063_s1 + $0x36c] sm:$0xf]  ;;  %v553_v39 = vld [vmem:[#allocation2 + $0x30] sm:$0xff] }
 0x126   : > { %1511 = vmatpush.bf16.msra.mxu3 %v2267_v21  ;;  %v2319_v21 = vor.u32 %v2469_v11, %v2316_v12  ;;  %v2140_v50 = vld [vmem:[%s3063_s1 + $0x278] sm:$0xf0]  ;;  %v2015_v54 = vor.u32 %v2393_v46, %v2012_v48  ;;  %v2389_v58 = vld [vmem:[%s3063_s1 + $0x14c] sm:$0xf] }
 0x127   : > { %1470 = vmatpush.bf16.msra.mxu0 %v1867_v27  ;;  %v1919_v27 = vor.u32 %v2369_v17, %v1916_v18  ;;  %v2268_v52 = vld [vmem:[%s3063_s1 + $0x378] sm:$0xf0]  ;;  %v2453_v63 = vld [vmem:[%s3063_s1 + $0x34c] sm:$0xf] }
 0x128   : > { %1484 = vmatpush.bf16.msra.mxu1 %v1995_v28  ;;  %v2047_v28 = vor.u32 %v2401_v19, %v2044_v22  ;;  %v1868_v57 = vld [vmem:[%s3063_s1 + $0x58] sm:$0xf0]  ;;  %v2271_v59 = vor.u32 %v2457_v51, %v2268_v52  ;;  %v2353_v4 = vld [vmem:[%s3063_s1 + $0x2c] sm:$0xf] }
 0x129   : > { %1498 = vmatpush.bf16.msra.mxu2 %v2123_v29  ;;  %v2175_v29 = vor.u32 %v2433_v23, %v2172_v24  ;;  %v2124_v62 = vld [vmem:[%s3063_s1 + $0x258] sm:$0xf0]  ;;  %v2385_v6 = vld [vmem:[%s3063_s1 + $0x12c] sm:$0xf] }
 0x12a   : > { %1512 = vmatpush.bf16.msra.mxu3 %v2251_v34  ;;  %v2303_v34 = vor.u32 %v2465_v25, %v2300_v26  ;;  %v1852_v5 = vld [vmem:[%s3063_s1 + $0x38] sm:$0xf0]  ;;  %v2417_v9 = vld [vmem:[%s3063_s1 + $0x22c] sm:$0xf] }
 0x12b   : > { %1471 = vmatpush.bf16.msra.mxu0 %v1851_v41  ;;  %v1903_v41 = vor.u32 %v2365_v30, %v1900_v32  ;;  %v1980_v8 = vld [vmem:[%s3063_s1 + $0x138] sm:$0xf0]  ;;  %v2449_v11 = vld [vmem:[%s3063_s1 + $0x32c] sm:$0xf] }
 0x12c   : > { %1485 = vmatpush.bf16.msra.mxu1 %v1979_v44  ;;  %v2361_v44 = vld [vmem:[%s3063_s1 + $0x6c] sm:$0xf]  ;;  %v2108_v10 = vld [vmem:[%s3063_s1 + $0x238] sm:$0xf0] }
 0x12d   : > { %1499 = vmatpush.bf16.msra.mxu2 %v2107_v45  ;;  %v1884_v45 = vld [vmem:[%s3063_s1 + $0x78] sm:$0xf0]  ;;  %v2349_v17 = vld [vmem:[%s3063_s1 + $0xc] sm:$0xf] }
 0x12e   : > { %1513 = vmatpush.bf16.msra.mxu3 %v2235_v49  ;;  %v2425_v49 = vld [vmem:[%s3063_s1 + $0x26c] sm:$0xf]  ;;  %v1887_v53 = vor.u32 %v2361_v44, %v1884_v45  ;;  %v2236_v12 = vld [vmem:[%s3063_s1 + $0x338] sm:$0xf0] }
 0x12f   : > { %1472 = vmatpush.bf16.msra.mxu0 %v1835_v56  ;;  %v2143_v55 = vor.u32 %v2425_v49, %v2140_v50  ;;  %v2357_v56 = vld [vmem:[%s3063_s1 + $0x4c] sm:$0xf]  ;;  %v1836_v18 = vld [vmem:[%s3063_s1 + $0x18] sm:$0xf0] }
 0x130   : > { %1486 = vmatpush.bf16.msra.mxu1 %v1963_v60  ;;  %v1996_v60 = vld [vmem:[%s3063_s1 + $0x158] sm:$0xf0]  ;;  %v2381_v19 = vld [vmem:[%s3063_s1 + $0x10c] sm:$0xf] }
 0x131   : > { %1500 = vmatpush.bf16.msra.mxu2 %v2091_v61  ;;  %v2421_v61 = vld [vmem:[%s3063_s1 + $0x24c] sm:$0xf]  ;;  %v1964_v22 = vld [vmem:[%s3063_s1 + $0x118] sm:$0xf0] }
 0x132   : > { %1514 = vmatpush.bf16.msra.mxu3 %v2219_v0  ;;  %1473 = vmatmul.bf16.vlgmr.msra.gmra.mxu0 %v3179_v31  ;;  %v2252_v0 = vld [vmem:[%s3063_s1 + $0x358] sm:$0xf0]  ;;  %v2413_v23 = vld [vmem:[%s3063_s1 + $0x20c] sm:$0xf] }
 0x133   : > { %1521 = vmatpush.bf16.msrb.mxu0 %v1951_v1  ;;  %1487 = vmatmul.bf16.vlgmr.msra.gmra.mxu1 %v3186_v38  ;;  %v1871_v1 = vor.u32 %v2357_v56, %v1868_v57  ;;  %v2092_v24 = vld [vmem:[%s3063_s1 + $0x218] sm:$0xf0]  ;;  %v2445_v25 = vld [vmem:[%s3063_s1 + $0x30c] sm:$0xf] }
 0x134   : > { %1535 = vmatpush.bf16.msrb.mxu1 %v2079_v2  ;;  %1501 = vmatmul.bf16.vlgmr.msra.gmra.mxu2 %v3161_v13  ;;  %v1999_v2 = vor.u32 %v2389_v58, %v1996_v60  ;;  %v2220_v26 = vld [vmem:[%s3063_s1 + $0x318] sm:$0xf0]  ;;  %v557_v46 = vld [vmem:[#allocation2 + $0x8] sm:$0xff] }
 0x135   : > { %1549 = vmatpush.bf16.msrb.mxu2 %v2207_v3  ;;  %1515 = vmatmul.bf16.vlgmr.msra.gmra.mxu3 %v3168_v20  ;;  %v2127_v3 = vor.u32 %v2421_v61, %v2124_v62  ;;  %v2223_v30 = vor.u32 %v2445_v25, %v2220_v26  ;;  %v558_v62 = vld [vmem:[#allocation2 + $0x20] sm:$0xff] }
 0x136   : > { %1563 = vmatpush.bf16.msrb.mxu3 %v2335_v7  ;;  %v2255_v7 = vor.u32 %v2453_v63, %v2252_v0 }
 0x137   : > { %1522 = vmatpush.bf16.msrb.mxu0 %v1935_v14  ;;  %v1855_v14 = vor.u32 %v2353_v4, %v1852_v5 }
 0x138   : > { %1536 = vmatpush.bf16.msrb.mxu1 %v2063_v15  ;;  %v1983_v15 = vor.u32 %v2385_v6, %v1980_v8 }
 0x139   : > { %1550 = vmatpush.bf16.msrb.mxu2 %v2191_v16  ;;  %v2111_v16 = vor.u32 %v2417_v9, %v2108_v10 }
 0x13a   : > { %1564 = vmatpush.bf16.msrb.mxu3 %v2319_v21  ;;  %v2239_v21 = vor.u32 %v2449_v11, %v2236_v12 }
 0x13b   : > { %1523 = vmatpush.bf16.msrb.mxu0 %v1919_v27  ;;  %v1839_v27 = vor.u32 %v2349_v17, %v1836_v18  ;;  %v559_v17 = vld [vmem:[#allocation2 + $0x28] sm:$0xff] }
 0x13c   : > { %1537 = vmatpush.bf16.msrb.mxu1 %v2047_v28  ;;  %v1967_v28 = vor.u32 %v2381_v19, %v1964_v22 }
 0x13d   : > { %1551 = vmatpush.bf16.msrb.mxu2 %v2175_v29  ;;  %v2095_v29 = vor.u32 %v2413_v23, %v2092_v24 }
 0x13e   : > { %1565 = vmatpush.bf16.msrb.mxu3 %v2303_v34 }
 0x13f   : > { %1524 = vmatpush.bf16.msrb.mxu0 %v1903_v41 }
 0x140   : > { %1538 = vmatpush.bf16.msrb.mxu1 %v2031_v42 }
 0x141   : > { %1552 = vmatpush.bf16.msrb.mxu2 %v2159_v43 }
 0x142   : > { %1566 = vmatpush.bf16.msrb.mxu3 %v2287_v47 }
 0x143   : > { %1525 = vmatpush.bf16.msrb.mxu0 %v1887_v53  ;;  %v554_v53 = vld [vmem:[#allocation2] sm:$0xff] }
 0x144   : > { %1539 = vmatpush.bf16.msrb.mxu1 %v2015_v54 }
 0x145   : > { %1553 = vmatpush.bf16.msrb.mxu2 %v2143_v55 }
 0x146   : > { %1567 = vmatpush.bf16.msrb.mxu3 %v2271_v59 }
 0x147   : > { %1526 = vmatpush.bf16.msrb.mxu0 %v1871_v1 }
 0x148   : > { %1540 = vmatpush.bf16.msrb.mxu1 %v1999_v2 }
 0x149   : > { %1554 = vmatpush.bf16.msrb.mxu2 %v2127_v3 }
 0x14a   : > { %1568 = vmatpush.bf16.msrb.mxu3 %v2255_v7  ;;  %v555_v7 = vld [vmem:[#allocation2 + $0x18] sm:$0xff] }
 0x14b   : > { %1527 = vmatpush.bf16.msrb.mxu0 %v1855_v14 }
 0x14c   : > { %1541 = vmatpush.bf16.msrb.mxu1 %v1983_v15 }
 0x14d   : > { %1555 = vmatpush.bf16.msrb.mxu2 %v2111_v16 }
 0x14e   : > { %1569 = vmatpush.bf16.msrb.mxu3 %v2239_v21 }
 0x14f   : > { %1528 = vmatpush.bf16.msrb.mxu0 %v1839_v27  ;;  %v556_v27 = vld [vmem:[#allocation2 + $0x10] sm:$0xff] }
 0x150   : > { %1542 = vmatpush.bf16.msrb.mxu1 %v1967_v28 }
 0x151   : > { %1556 = vmatpush.bf16.msrb.mxu2 %v2095_v29 }
 0x152   : > { %1570 = vmatpush.bf16.msrb.mxu3 %v2223_v30  ;;  %1529 = vmatmul.bf16.vlgmr.msrb.gmra.mxu0 %v3179_v31 }
 0x153   : > { %1543 = vmatmul.bf16.vlgmr.msrb.gmra.mxu1 %v3186_v38 }
 0x154   : > { %1557 = vmatmul.bf16.vlgmr.msrb.gmra.mxu2 %v3161_v13 }
 0x155   : > { %1571 = vmatmul.bf16.vlgmr.msrb.gmra.mxu3 %v3168_v20 }
 0x175   : > { %v1362_v32 = vpop.f32.mrf.mxu0 }
 0x177   : > { %v1376_v33 = vpop.f32.mrf.mxu1  ;;  %v1390_v35 = vpop.f32.mrf.mxu2 }
 0x178   : > { %v1377_v34 = vadd.f32 %v1376_v33, %v1362_v32 }
 0x17a   : > { %v1404_v36 = vpop.f32.mrf.mxu3  ;;  %v1391_v37 = vadd.f32 %v1390_v35, %v1377_v34 }
 0x17c   : > { %v1405_v40 = vadd.f32 %v1404_v36, %v1391_v37  ;;  %v560_v36 = vld [vmem:[#allocation2 + $0x38] sm:$0xff] }
 0x17d   : > { %v1364_v42 = vpop.f32.mrf.mxu0 }
 0x17e   : > { %v1577_v41 = vadd.f32 %v1405_v40, %v553_v39 }
 0x17f   : > { %v1378_v43 = vpop.f32.mrf.mxu1  ;;  %v1392_v31 = vpop.f32.mrf.mxu2 }
 0x180   : > { %1585 = vst [vmem:[#allocation2 + $0x30] sm:$0xff] %v1577_v41  ;;  %v1379_v44 = vadd.f32 %v1378_v43, %v1364_v42 }
 0x182   : > { %v1406_v45 = vpop.f32.mrf.mxu3  ;;  %v1393_v38 = vadd.f32 %v1392_v31, %v1379_v44 }
 0x184   : > { %v1407_v13 = vadd.f32 %v1406_v45, %v1393_v38 }
 0x186   : > { %v1581_v47 = vadd.f32 %v1407_v13, %v557_v46 }
 0x188   : > { %1589 = vst [vmem:[#allocation2 + $0x8] sm:$0xff] %v1581_v47 }
 0x18f   : > { %v1418_v20 = vpop.f32.mrf.mxu0 }
 0x190   : > { %v1432_v48 = vpop.f32.mrf.mxu1 }
 0x191   : > { %v1433_v49 = vadd.f32 %v1432_v48, %v1418_v20 }
 0x197   : > { %v1446_v50 = vpop.f32.mrf.mxu2  ;;  %v1420_v55 = vpop.f32.mrf.mxu0 }
 0x198   : > { %v1447_v51 = vadd.f32 %v1446_v50, %v1433_v49  ;;  %v1460_v52 = vpop.f32.mrf.mxu3  ;;  %v1434_v56 = vpop.f32.mrf.mxu1 }
 0x199   : > { %v1435_v58 = vadd.f32 %v1434_v56, %v1420_v55 }
 0x19a   : > { %v1461_v54 = vadd.f32 %v1460_v52, %v1447_v51 }
 0x19c   : > { %v1578_v57 = vadd.f32 %v1461_v54, %v554_v53 }
 0x19e   : > { %1586 = vst [vmem:[#allocation2] sm:$0xff] %v1578_v57 }
 0x19f   : > { %v1448_v59 = vpop.f32.mrf.mxu2 }
 0x1a0   : > { %v1449_v60 = vadd.f32 %v1448_v59, %v1435_v58  ;;  %v1462_v61 = vpop.f32.mrf.mxu3 }
 0x1a2   : > { %v1463_v63 = vadd.f32 %v1462_v61, %v1449_v60 }
 0x1a4   : > { %v1582_v0 = vadd.f32 %v1463_v63, %v558_v62 }
 0x1a6   : > { %1590 = vst [vmem:[#allocation2 + $0x20] sm:$0xff] %v1582_v0 }
 0x1af   : > { %v1474_v1 = vpop.f32.mrf.mxu0 }
 0x1b0   : > { %v1488_v2 = vpop.f32.mrf.mxu1 }
 0x1b1   : > { %v1489_v3 = vadd.f32 %v1488_v2, %v1474_v1 }
 0x1b7   : > { %v1502_v4 = vpop.f32.mrf.mxu2  ;;  %v1476_v9 = vpop.f32.mrf.mxu0 }
 0x1b8   : > { %v1503_v5 = vadd.f32 %v1502_v4, %v1489_v3  ;;  %v1516_v6 = vpop.f32.mrf.mxu3  ;;  %v1490_v10 = vpop.f32.mrf.mxu1 }
 0x1b9   : > { %v1491_v12 = vadd.f32 %v1490_v10, %v1476_v9 }
 0x1ba   : > { %v1517_v8 = vadd.f32 %v1516_v6, %v1503_v5 }
 0x1bc   : > { %v1579_v11 = vadd.f32 %v1517_v8, %v555_v7 }
 0x1be   : > { %1587 = vst [vmem:[#allocation2 + $0x18] sm:$0xff] %v1579_v11 }
 0x1bf   : > { %v1504_v14 = vpop.f32.mrf.mxu2 }
 0x1c0   : > { %v1505_v15 = vadd.f32 %v1504_v14, %v1491_v12  ;;  %v1518_v16 = vpop.f32.mrf.mxu3 }
 0x1c2   : > { %v1519_v18 = vadd.f32 %v1518_v16, %v1505_v15 }
 0x1c4   : > { %v1583_v19 = vadd.f32 %v1519_v18, %v559_v17 }
 0x1c6   : > { %1591 = vst [vmem:[#allocation2 + $0x28] sm:$0xff] %v1583_v19 }
 0x1cf   : > { %v1530_v21 = vpop.f32.mrf.mxu0 }
 0x1d0   : > { %v1544_v22 = vpop.f32.mrf.mxu1 }
 0x1d1   : > { %v1545_v23 = vadd.f32 %v1544_v22, %v1530_v21 }
 0x1d7   : > { %v1558_v24 = vpop.f32.mrf.mxu2  ;;  %v1532_v29 = vpop.f32.mrf.mxu0 }
 0x1d8   : > { %v1559_v25 = vadd.f32 %v1558_v24, %v1545_v23  ;;  %v1572_v26 = vpop.f32.mrf.mxu3  ;;  %v1546_v30 = vpop.f32.mrf.mxu1 }
 0x1d9   : > { %v1547_v33 = vadd.f32 %v1546_v30, %v1532_v29 }
 0x1da   : > { %v1573_v28 = vadd.f32 %v1572_v26, %v1559_v25 }
 0x1dc   : > { %v1580_v32 = vadd.f32 %v1573_v28, %v556_v27 }
 0x1de   : > { %1588 = vst [vmem:[#allocation2 + $0x10] sm:$0xff] %v1580_v32 }
 0x1df   : > { %v1560_v34 = vpop.f32.mrf.mxu2 }
 0x1e0   : > { %v1561_v35 = vadd.f32 %v1560_v34, %v1547_v33  ;;  %v1574_v37 = vpop.f32.mrf.mxu3 }
 0x1e2   : > { %v1575_v39 = vadd.f32 %v1574_v37, %v1561_v35  ;;  %1596 = sbr.rel (%p2336_p5) target bundleno = 502 (0x1f6), region = 86 }
 0x1e4   : > { %v1584_v40 = vadd.f32 %v1575_v39, %v560_v36 }
 0x1e6   : > { %1592 = vst [vmem:[#allocation2 + $0x38] sm:$0xff] %v1584_v40 }
 0x1e7   : > { %v1597_v41 = vld [vmem:[#allocation2 + $0x30] sm:$0xff]  ;;  %v1605_v42 = vld [vmem:[%s537_s5] sm:$0xf]  ;;  %v1599_v45 = vld [vmem:[#allocation2 + $0x18] sm:$0xff] }
 0x1e8   : > { %v1598_v43 = vld [vmem:[#allocation2] sm:$0xff]  ;;  %v1607_v44 = vperm.slane %v1605_v42, 0  ;;  %v1608_v31 = vperm.slane %v1605_v42, 1  ;;  %v1609_v38 = vperm.slane %v1605_v42, 2  ;;  %v1600_v46 = vld [vmem:[#allocation2 + $0x10] sm:$0xff]  ;;  %v1610_v13 = vperm.slane %v1605_v42, 3 }
 0x1e9   : > { %v1601_v47 = vld [vmem:[#allocation2 + $0x8] sm:$0xff]  ;;  %v1602_v20 = vld [vmem:[#allocation2 + $0x20] sm:$0xff] }
 0x1ea   : > { %v1603_v48 = vld [vmem:[#allocation2 + $0x28] sm:$0xff]  ;;  %v1615_v49 = vadd.f32 %v1607_v44, %v1597_v41  ;;  %v1616_v50 = vadd.f32 %v1608_v31, %v1598_v43  ;;  %v1617_v51 = vadd.f32 %v1609_v38, %v1599_v45  ;;  %v1618_v52 = vadd.f32 %v1610_v13, %v1600_v46 }
 0x1eb   : > { %v1619_v54 = vadd.f32 %v1607_v44, %v1601_v47  ;;  %v1620_v55 = vadd.f32 %v1608_v31, %v1602_v20  ;;  %v1621_v59 = vadd.f32 %v1609_v38, %v1603_v48 }
 0x1ec   : > { %v1623_v56 = vmax.f32 %v1615_v49, 0.0  ;;  %v1624_v57 = vmax.f32 %v1616_v50, 0.0  ;;  %v1625_v58 = vmax.f32 %v1617_v51, 0.0  ;;  %v1626_v60 = vmax.f32 %v1618_v52, 0.0 }
 0x1ed   : > { %v1604_v53 = vld [vmem:[#allocation2 + $0x38] sm:$0xff]  ;;  %v1627_v62 = vmax.f32 %v1619_v54, 0.0  ;;  %v1628_v63 = vmax.f32 %v1620_v55, 0.0  ;;  %v1629_v0 = vmax.f32 %v1621_v59, 0.0 }
 0x1ee   : > { %v1622_v61 = vadd.f32 %v1610_v13, %v1604_v53  ;;  %1631 = vst [vmem:[%s3065_s25] sm:$0xff] %v1623_v56 }
 0x1ef   : > { %1632 = vst [vmem:[%s3065_s25 + $0x8] sm:$0xff] %v1624_v57 }
 0x1f0   : > { %1633 = vst [vmem:[%s3065_s25 + $0x10] sm:$0xff] %v1625_v58  ;;  %v1630_v1 = vmax.f32 %v1622_v61, 0.0 }
 0x1f1   : > { %1634 = vst [vmem:[%s3065_s25 + $0x18] sm:$0xff] %v1626_v60 }
 0x1f2   : > { %1635 = vst [vmem:[%s3065_s25 + $0x20] sm:$0xff] %v1627_v62 }
 0x1f3   : > { %1636 = vst [vmem:[%s3065_s25 + $0x28] sm:$0xff] %v1628_v63 }
 0x1f4   : > { %1637 = vst [vmem:[%s3065_s25 + $0x30] sm:$0xff] %v1629_v0 }
 0x1f5   : > { %1638 = vst [vmem:[%s3065_s25 + $0x38] sm:$0xff] %v1630_v1 }
 0x1f6 PF: > { %1645 = sbr.rel (!%p2769_p12) target bundleno = 512 (0x200), region = 90  ;;  %s2476_s14 = sshll.u32 (%p2769_p12), %s2640_s19, 5  ;;  %v1664_v2 = vld [vmem:[%s3065_s25] sm:$0xff] (%p2769_p12)  ;;  %v1666_v3 = vld [vmem:[%s3065_s25 + $0x8] sm:$0xff] (%p2769_p12) }
 0x1f7   : > { %s1651_s0 = scalar_lea.vmem (%p2769_p12), %s3420_s3, %s2476_s14  ;;  %v1668_v4 = vld [vmem:[%s3065_s25 + $0x10] sm:$0xff] (%p2769_p12) }
 0x1f8   : > { %1665 = vst [vmem:[%s1651_s0] sm:$0xff] (%p2769_p12), %v1664_v2  ;;  %v1670_v5 = vld [vmem:[%s3065_s25 + $0x18] sm:$0xff] (%p2769_p12) }
 0x1f9   : > { %1667 = vst [vmem:[%s1651_s0 + $0x8] sm:$0xff] (%p2769_p12), %v1666_v3  ;;  %v1672_v6 = vld [vmem:[%s3065_s25 + $0x20] sm:$0xff] (%p2769_p12) }
 0x1fa   : > { %1669 = vst [vmem:[%s1651_s0 + $0x10] sm:$0xff] (%p2769_p12), %v1668_v4  ;;  %v1674_v7 = vld [vmem:[%s3065_s25 + $0x28] sm:$0xff] (%p2769_p12) }
 0x1fb   : > { %1671 = vst [vmem:[%s1651_s0 + $0x18] sm:$0xff] %v1670_v5  ;;  %v1676_v8 = vld [vmem:[%s3065_s25 + $0x30] sm:$0xff] }
 0x1fc   : > { %1673 = vst [vmem:[%s1651_s0 + $0x100] sm:$0xff] %v1672_v6  ;;  %v1678_v9 = vld [vmem:[%s3065_s25 + $0x38] sm:$0xff] }
 0x1fd   : > { %1675 = vst [vmem:[%s1651_s0 + $0x108] sm:$0xff] %v1674_v7 }
 0x1fe   : > { %1677 = vst [vmem:[%s1651_s0 + $0x110] sm:$0xff] %v1676_v8 }
 0x1ff   : > { %1679 = vst [vmem:[%s1651_s0 + $0x118] sm:$0xff] %v1678_v9 }
 0x200 PF: > { %s13_s22 = sadd.s32 1, %s2652_s22   ;;  %s3430_s10 = sld [smem:[#allocation6_spill]] }
 0x201   : > { %p10_p6 = scmp.ge.s32.totalorder %s13_s22, 146   ;;  %s3431_s12 = smov %s2616_s13 }
 0x202   : > { %s3432_s13 = smov %s2767_s9  ;;  %s3433_s14 = smov %s2624_s15 }
 0x203   : > { %s3434_s15 = smov %s2764_s8  ;;  %s3435_s16 = smov %s2632_s17 }
 0x204   : > { %s3436_s17 = smov %s2750_s30  ;;  %s3437_s18 = smov %s2644_s20 }
 0x205   : > { %s3438_s19 = smov %s2648_s21  ;;  %s3439_s20 = smov %s3442_s24 }
 0x206   : > { %s3440_s21 = smov %s3430_s10  ;;  %12 = sbr.rel (!%p10_p6) target bundleno = 9 (0x9), region = 155 }

// kernel: mynet2_forward.14
= control target key start
LH: loop header
LB: loop body
LE: loop exit
PB: predicated region body
PF: predicated region fallthrough
CT: control target
= control target key end

     0   :  { %s3417_s0 = inlined_call_operand.vmem [shape: bf16[16,4096], index: 0, kind: input, shape index: {}]   ;;  %s3418_s1 = inlined_call_operand.vmem [shape: bf16[4096,4096], index: 1, kind: input, shape index: {}]   ;;  %s3419_s2 = inlined_call_operand.vmem [shape: f32[1,4096], index: 2, kind: input, shape index: {}]   ;;  %s3420_s3 = inlined_call_operand.vmem [shape: f32[16,4096], index: 3, kind: output, shape index: {}]  }
   0x1   :  { %3422 = sst [smem:[#allocation7_spill]] %s3417_s0 }
   0x2   :  { %3423 = sst [smem:[#allocation8_spill]] %s3418_s1 }
   0x3   :  { %s2675_s12 = smov 0   ;;  %s2677_s13 = smov 0  }
   0x4   :  { %s2679_s14 = smov 0   ;;  %s2681_s15 = smov 0  }
   0x5   :  { %s2683_s16 = smov 0   ;;  %s2685_s17 = smov 0  }
   0x6   :  { %s2687_s18 = smov 0   ;;  %s2689_s19 = smov 0  }
   0x7   :  { %s2691_s20 = smov 0   ;;  %s2693_s21 = smov 0  }
   0x8   :  { %s2695_s22 = smov 0  }
   0x9 LB: > { %s1790_s23 = sadd.s32 4294967295, %s2652_s22   ;;  %s25_s24 = sadd.s32 1, %s2644_s20  ;;  %s2652_s22 = sphi %s2695_s22, %s13_s22   ;;  %s2648_s21 = sphi %s2693_s21, %s3440_s21   ;;  %s2644_s20 = sphi %s2691_s20, %s3439_s20   ;;  %s2640_s19 = sphi %s2689_s19, %s3438_s19   ;;  %s2636_s18 = sphi %s2687_s18, %s3437_s18   ;;  %s2632_s17 = sphi %s2685_s17, %s3436_s17   ;;  %s2628_s16 = sphi %s2683_s16, %s3435_s16   ;;  %s2624_s15 = sphi %s2681_s15, %s3434_s15   ;;  %s2620_s14 = sphi %s2679_s14, %s3433_s14   ;;  %s2616_s13 = sphi %s2677_s13, %s3432_s13   ;;  %s2612_s12 = sphi %s2675_s12, %s3431_s12  }
   0xa   : > { %p26_p0 = scmp.ge.s32.totalorder %s25_s24, 8  ;;  %s28_s25 = sadd.s32 1, %s2648_s21 }
   0xb   : > { %s41_s26 = sadd.s32 1, %s2632_s17  ;;  %p48_p1 = scmp.ne.s32.totalorder %s2632_s17, %s2628_s16 }
   0xc   : > { %s3442_s24 = smov (%p26_p0, %s25_s24), 0  ;;  %s3444_s25 = smov (!%p26_p0, %s28_s25), %s2648_s21 }
   0xd   : > { %s37_s27 = ssub.s32 %s2644_s20, %s3442_s24  ;;  %p49_p2 = scmp.eq.s32.totalorder %s2652_s22, 0 }
   0xe   : > { %p30_p3 = scmp.ge.s32.totalorder %s3444_s25, 8  ;;  %p39_p4 = scmp.eq.s32.totalorder %s37_s27, 0 }
   0xf   : > { %p2742_p5 = por %p49_p2, %p48_p1  ;;  %s69_s29 = sadd.s32 1, %s2624_s15 }
  0x10   : > { %s3446_s25 = smov (%p30_p3, %s3444_s25), 0  ;;  %p76_p6 = scmp.ne.s32.totalorder %s2624_s15, %s2620_s14 }
  0x11   : > { %3425 = sst [smem:[#allocation6_spill]] %s3446_s25  ;;  %s65_s4 = ssub.s32 %s2648_s21, %s3446_s25 }
  0x12   : > { %s2750_s30 = scalar_select %p39_p4, %s2632_s17, %s41_s26  }
  0x13   : > { %s66_s5 = sor.u32 %s65_s4, %s37_s27  ;;  %p121_p7 = scmp.eq.s32.totalorder %s65_s4, 0 }
  0x14   : > { %p67_p8 = scmp.eq.s32.totalorder %s66_s5, 0  ;;  %p2756_p9 = por %p76_p6, %p49_p2 }
  0x15   : > { %s123_s7 = sadd.s32 1, %s2616_s13  ;;  %p133_p10 = scmp.ne.s32.totalorder %s2616_s13, %s2612_s12 }
  0x16   : > { %s2764_s8 = scalar_select %p67_p8, %s2624_s15, %s69_s29  }
  0x17   : > { %s2767_s9 = scalar_select %p121_p7, %s2616_s13, %s123_s7  }
  0x18   : > { %p134_p11 = scmp.eq.s32.totalorder %s1790_s23, 63  ;;  %p1793_p13 = scmp.ge.s32.totalorder %s2652_s22, 64 }
  0x1a   : > { %p2769_p12 = por %p134_p11, %p133_p10  ;;  %156 = sbr.rel (%p1793_p13) target bundleno = 183 (0xb7), region = 16 }
  0x1f   : > { %159 = sbr.rel (!%p2742_p5) target bundleno = 45 (0x2d), region = 20  ;;  %s161_s11 = sand.u32 (%p2742_p5), 1, %s2632_s17  }
  0x20   : > { %s2342_s26 = sshll.u32 (%p2742_p5), %s2644_s20, 4  ;;  %s1794_s27 = sshll.u32 (%p2742_p5), %s161_s11, 5 }
  0x21   : > { %s3428_s0 = sld [smem:[#allocation7_spill]] (%p2742_p5)  ;;  %s163_s23 = scalar_lea.vmem (%p2742_p5), [#allocation3], %s1794_s27 }
  0x27   : > { %s169_s5 = scalar_lea.vmem %s3428_s0, %s2342_s26 }
  0x28   : > { %v182_v0 = vld [vmem:[%s169_s5] sm:$0xff]  ;;  %v184_v1 = vld [vmem:[%s169_s5 + $0x8] sm:$0xff] }
  0x29   : > { %v186_v2 = vld [vmem:[%s169_s5 + $0x80] sm:$0xff]  ;;  %183 = vst [vmem:[%s163_s23] sm:$0xff] %v182_v0  ;;  %v188_v3 = vld [vmem:[%s169_s5 + $0x88] sm:$0xff] }
  0x2a   : > { %185 = vst [vmem:[%s163_s23 + $0x8] sm:$0xff] %v184_v1 }
  0x2b   : > { %187 = vst [vmem:[%s163_s23 + $0x10] sm:$0xff] %v186_v2 }
  0x2c   : > { %189 = vst [vmem:[%s163_s23 + $0x18] sm:$0xff] %v188_v3 }
  0x2d PF: > { %195 = sbr.rel (!%p2756_p9) target bundleno = 183 (0xb7), region = 43  ;;  %s197_s28 = sand.u32 (%p2756_p9), 1, %s2624_s15  }
  0x2e   : > { %s1799_s7 = sshll.u32 (%p2756_p9), %s2648_s21, 2  ;;  %s1797_s11 = sshll.u32 (%p2756_p9), %s197_s28, 10 }
  0x2f   : > { %s2343_s26 = sshll.u32 (%p2756_p9), %s2644_s20, 11  ;;  %s3429_s1 = sld [smem:[#allocation8_spill]] (%p2756_p9) }
  0x30   : > { %s203_s29 = sadd.s32 (%p2756_p9), %s2343_s26, %s1799_s7  ;;  %s2794_s6 = scalar_lea.vmem (%p2756_p9), [#allocation4], %s1797_s11 }
  0x31   : > { %s1801_s4 = sshll.u32 (%p2756_p9), %s203_s29, 2 }
  0x35   : > { %s2789_s5 = scalar_lea.vmem %s3429_s1, %s1801_s4 }
  0x36   : > { %v218_v4 = vld [vmem:[%s2789_s5] sm:$0xff]  ;;  %v220_v5 = vld [vmem:[%s2789_s5 + $0x8] sm:$0xff] }
  0x37   : > { %v222_v6 = vld [vmem:[%s2789_s5 + $0x80] sm:$0xff]  ;;  %219 = vst [vmem:[%s2794_s6] sm:$0xff] %v218_v4  ;;  %v224_v7 = vld [vmem:[%s2789_s5 + $0x88] sm:$0xff] }
  0x38   : > { %221 = vst [vmem:[%s2794_s6 + $0x8] sm:$0xff] %v220_v5  ;;  %v226_v8 = vld [vmem:[%s2789_s5 + $0x100] sm:$0xff]  ;;  %v228_v9 = vld [vmem:[%s2789_s5 + $0x108] sm:$0xff] }
  0x39   : > { %223 = vst [vmem:[%s2794_s6 + $0x10] sm:$0xff] %v222_v6  ;;  %v230_v10 = vld [vmem:[%s2789_s5 + $0x180] sm:$0xff]  ;;  %v232_v11 = vld [vmem:[%s2789_s5 + $0x188] sm:$0xff] }
  0x3a   : > { %225 = vst [vmem:[%s2794_s6 + $0x18] sm:$0xff] %v224_v7  ;;  %v234_v12 = vld [vmem:[%s2789_s5 + $0x200] sm:$0xff]  ;;  %v236_v13 = vld [vmem:[%s2789_s5 + $0x208] sm:$0xff] }
  0x3b   : > { %227 = vst [vmem:[%s2794_s6 + $0x20] sm:$0xff] %v226_v8  ;;  %v238_v14 = vld [vmem:[%s2789_s5 + $0x280] sm:$0xff]  ;;  %v240_v15 = vld [vmem:[%s2789_s5 + $0x288] sm:$0xff] }
  0x3c   : > { %229 = vst [vmem:[%s2794_s6 + $0x28] sm:$0xff] %v228_v9  ;;  %v242_v16 = vld [vmem:[%s2789_s5 + $0x300] sm:$0xff]  ;;  %v244_v17 = vld [vmem:[%s2789_s5 + $0x308] sm:$0xff] }
  0x3d   : > { %231 = vst [vmem:[%s2794_s6 + $0x30] sm:$0xff] %v230_v10  ;;  %v246_v18 = vld [vmem:[%s2789_s5 + $0x380] sm:$0xff]  ;;  %v248_v19 = vld [vmem:[%s2789_s5 + $0x388] sm:$0xff] }
  0x3e   : > { %233 = vst [vmem:[%s2794_s6 + $0x38] sm:$0xff] %v232_v11  ;;  %v250_v20 = vld [vmem:[%s2789_s5 + $0x400] sm:$0xff]  ;;  %v252_v21 = vld [vmem:[%s2789_s5 + $0x408] sm:$0xff] }
  0x3f   : > { %235 = vst [vmem:[%s2794_s6 + $0x40] sm:$0xff] %v234_v12  ;;  %v254_v22 = vld [vmem:[%s2789_s5 + $0x480] sm:$0xff]  ;;  %v256_v23 = vld [vmem:[%s2789_s5 + $0x488] sm:$0xff] }
  0x40   : > { %237 = vst [vmem:[%s2794_s6 + $0x48] sm:$0xff] %v236_v13  ;;  %v258_v24 = vld [vmem:[%s2789_s5 + $0x500] sm:$0xff]  ;;  %v260_v25 = vld [vmem:[%s2789_s5 + $0x508] sm:$0xff] }
  0x41   : > { %239 = vst [vmem:[%s2794_s6 + $0x50] sm:$0xff] %v238_v14  ;;  %v262_v26 = vld [vmem:[%s2789_s5 + $0x580] sm:$0xff]  ;;  %v264_v27 = vld [vmem:[%s2789_s5 + $0x588] sm:$0xff] }
  0x42   : > { %241 = vst [vmem:[%s2794_s6 + $0x58] sm:$0xff] %v240_v15  ;;  %v266_v28 = vld [vmem:[%s2789_s5 + $0x600] sm:$0xff]  ;;  %v268_v29 = vld [vmem:[%s2789_s5 + $0x608] sm:$0xff] }
  0x43   : > { %243 = vst [vmem:[%s2794_s6 + $0x60] sm:$0xff] %v242_v16  ;;  %v270_v30 = vld [vmem:[%s2789_s5 + $0x680] sm:$0xff]  ;;  %v272_v31 = vld [vmem:[%s2789_s5 + $0x688] sm:$0xff] }
  0x44   : > { %245 = vst [vmem:[%s2794_s6 + $0x68] sm:$0xff] %v244_v17  ;;  %v274_v32 = vld [vmem:[%s2789_s5 + $0x700] sm:$0xff]  ;;  %v276_v33 = vld [vmem:[%s2789_s5 + $0x708] sm:$0xff] }
  0x45   : > { %247 = vst [vmem:[%s2794_s6 + $0x70] sm:$0xff] %v246_v18  ;;  %v278_v34 = vld [vmem:[%s2789_s5 + $0x780] sm:$0xff]  ;;  %v280_v35 = vld [vmem:[%s2789_s5 + $0x788] sm:$0xff] }
  0x46   : > { %249 = vst [vmem:[%s2794_s6 + $0x78] sm:$0xff] %v248_v19  ;;  %v282_v36 = vld [vmem:[%s2789_s5 + $0x800] sm:$0xff]  ;;  %v284_v37 = vld [vmem:[%s2789_s5 + $0x808] sm:$0xff] }
  0x47   : > { %251 = vst [vmem:[%s2794_s6 + $0x80] sm:$0xff] %v250_v20  ;;  %v286_v38 = vld [vmem:[%s2789_s5 + $0x880] sm:$0xff]  ;;  %v288_v39 = vld [vmem:[%s2789_s5 + $0x888] sm:$0xff] }
  0x48   : > { %253 = vst [vmem:[%s2794_s6 + $0x88] sm:$0xff] %v252_v21  ;;  %v290_v40 = vld [vmem:[%s2789_s5 + $0x900] sm:$0xff]  ;;  %v292_v41 = vld [vmem:[%s2789_s5 + $0x908] sm:$0xff] }
  0x49   : > { %255 = vst [vmem:[%s2794_s6 + $0x90] sm:$0xff] %v254_v22  ;;  %v294_v42 = vld [vmem:[%s2789_s5 + $0x980] sm:$0xff]  ;;  %v296_v43 = vld [vmem:[%s2789_s5 + $0x988] sm:$0xff] }
  0x4a   : > { %257 = vst [vmem:[%s2794_s6 + $0x98] sm:$0xff] %v256_v23  ;;  %v298_v44 = vld [vmem:[%s2789_s5 + $0xa00] sm:$0xff]  ;;  %v300_v45 = vld [vmem:[%s2789_s5 + $0xa08] sm:$0xff] }
  0x4b   : > { %259 = vst [vmem:[%s2794_s6 + $0xa0] sm:$0xff] %v258_v24  ;;  %v302_v46 = vld [vmem:[%s2789_s5 + $0xa80] sm:$0xff]  ;;  %v304_v47 = vld [vmem:[%s2789_s5 + $0xa88] sm:$0xff] }
  0x4c   : > { %261 = vst [vmem:[%s2794_s6 + $0xa8] sm:$0xff] %v260_v25  ;;  %v306_v48 = vld [vmem:[%s2789_s5 + $0xb00] sm:$0xff]  ;;  %v308_v49 = vld [vmem:[%s2789_s5 + $0xb08] sm:$0xff] }
  0x4d   : > { %263 = vst [vmem:[%s2794_s6 + $0xb0] sm:$0xff] %v262_v26  ;;  %v310_v50 = vld [vmem:[%s2789_s5 + $0xb80] sm:$0xff]  ;;  %v312_v51 = vld [vmem:[%s2789_s5 + $0xb88] sm:$0xff] }
  0x4e   : > { %265 = vst [vmem:[%s2794_s6 + $0xb8] sm:$0xff] %v264_v27  ;;  %v314_v52 = vld [vmem:[%s2789_s5 + $0xc00] sm:$0xff]  ;;  %v316_v53 = vld [vmem:[%s2789_s5 + $0xc08] sm:$0xff] }
  0x4f   : > { %267 = vst [vmem:[%s2794_s6 + $0xc0] sm:$0xff] %v266_v28  ;;  %v318_v54 = vld [vmem:[%s2789_s5 + $0xc80] sm:$0xff]  ;;  %v320_v55 = vld [vmem:[%s2789_s5 + $0xc88] sm:$0xff] }
  0x50   : > { %269 = vst [vmem:[%s2794_s6 + $0xc8] sm:$0xff] %v268_v29  ;;  %v322_v56 = vld [vmem:[%s2789_s5 + $0xd00] sm:$0xff]  ;;  %v324_v57 = vld [vmem:[%s2789_s5 + $0xd08] sm:$0xff] }
  0x51   : > { %271 = vst [vmem:[%s2794_s6 + $0xd0] sm:$0xff] %v270_v30  ;;  %v326_v58 = vld [vmem:[%s2789_s5 + $0xd80] sm:$0xff]  ;;  %v328_v59 = vld [vmem:[%s2789_s5 + $0xd88] sm:$0xff] }
  0x52   : > { %273 = vst [vmem:[%s2794_s6 + $0xd8] sm:$0xff] %v272_v31  ;;  %v330_v60 = vld [vmem:[%s2789_s5 + $0xe00] sm:$0xff]  ;;  %v332_v61 = vld [vmem:[%s2789_s5 + $0xe08] sm:$0xff] }
  0x53   : > { %275 = vst [vmem:[%s2794_s6 + $0xe0] sm:$0xff] %v274_v32  ;;  %v334_v62 = vld [vmem:[%s2789_s5 + $0xe80] sm:$0xff]  ;;  %v336_v63 = vld [vmem:[%s2789_s5 + $0xe88] sm:$0xff] }
  0x54   : > { %277 = vst [vmem:[%s2794_s6 + $0xe8] sm:$0xff] %v276_v33  ;;  %v338_v0 = vld [vmem:[%s2789_s5 + $0xf00] sm:$0xff]  ;;  %v340_v1 = vld [vmem:[%s2789_s5 + $0xf08] sm:$0xff] }
  0x55   : > { %279 = vst [vmem:[%s2794_s6 + $0xf0] sm:$0xff] %v278_v34  ;;  %v342_v2 = vld [vmem:[%s2789_s5 + $0xf80] sm:$0xff]  ;;  %v344_v3 = vld [vmem:[%s2789_s5 + $0xf88] sm:$0xff] }
  0x56   : > { %281 = vst [vmem:[%s2794_s6 + $0xf8] sm:$0xff] %v280_v35  ;;  %v346_v4 = vld [vmem:[%s2789_s5 + $0x1000] sm:$0xff]  ;;  %v348_v5 = vld [vmem:[%s2789_s5 + $0x1008] sm:$0xff] }
  0x57   : > { %283 = vst [vmem:[%s2794_s6 + $0x100] sm:$0xff] %v282_v36  ;;  %v350_v6 = vld [vmem:[%s2789_s5 + $0x1080] sm:$0xff]  ;;  %v352_v7 = vld [vmem:[%s2789_s5 + $0x1088] sm:$0xff] }
  0x58   : > { %285 = vst [vmem:[%s2794_s6 + $0x108] sm:$0xff] %v284_v37  ;;  %v354_v8 = vld [vmem:[%s2789_s5 + $0x1100] sm:$0xff]  ;;  %v356_v9 = vld [vmem:[%s2789_s5 + $0x1108] sm:$0xff] }
  0x59   : > { %287 = vst [vmem:[%s2794_s6 + $0x110] sm:$0xff] %v286_v38  ;;  %v358_v10 = vld [vmem:[%s2789_s5 + $0x1180] sm:$0xff]  ;;  %v360_v11 = vld [vmem:[%s2789_s5 + $0x1188] sm:$0xff] }
  0x5a   : > { %289 = vst [vmem:[%s2794_s6 + $0x118] sm:$0xff] %v288_v39  ;;  %v362_v12 = vld [vmem:[%s2789_s5 + $0x1200] sm:$0xff]  ;;  %v364_v13 = vld [vmem:[%s2789_s5 + $0x1208] sm:$0xff] }
  0x5b   : > { %291 = vst [vmem:[%s2794_s6 + $0x120] sm:$0xff] %v290_v40  ;;  %v366_v14 = vld [vmem:[%s2789_s5 + $0x1280] sm:$0xff]  ;;  %v368_v15 = vld [vmem:[%s2789_s5 + $0x1288] sm:$0xff] }
  0x5c   : > { %293 = vst [vmem:[%s2794_s6 + $0x128] sm:$0xff] %v292_v41  ;;  %v370_v16 = vld [vmem:[%s2789_s5 + $0x1300] sm:$0xff]  ;;  %v372_v17 = vld [vmem:[%s2789_s5 + $0x1308] sm:$0xff] }
  0x5d   : > { %295 = vst [vmem:[%s2794_s6 + $0x130] sm:$0xff] %v294_v42  ;;  %v374_v18 = vld [vmem:[%s2789_s5 + $0x1380] sm:$0xff]  ;;  %v376_v19 = vld [vmem:[%s2789_s5 + $0x1388] sm:$0xff] }
  0x5e   : > { %297 = vst [vmem:[%s2794_s6 + $0x138] sm:$0xff] %v296_v43  ;;  %v378_v20 = vld [vmem:[%s2789_s5 + $0x1400] sm:$0xff]  ;;  %v380_v21 = vld [vmem:[%s2789_s5 + $0x1408] sm:$0xff] }
  0x5f   : > { %299 = vst [vmem:[%s2794_s6 + $0x140] sm:$0xff] %v298_v44  ;;  %v382_v22 = vld [vmem:[%s2789_s5 + $0x1480] sm:$0xff]  ;;  %v384_v23 = vld [vmem:[%s2789_s5 + $0x1488] sm:$0xff] }
  0x60   : > { %301 = vst [vmem:[%s2794_s6 + $0x148] sm:$0xff] %v300_v45  ;;  %v386_v24 = vld [vmem:[%s2789_s5 + $0x1500] sm:$0xff]  ;;  %v388_v25 = vld [vmem:[%s2789_s5 + $0x1508] sm:$0xff] }
  0x61   : > { %303 = vst [vmem:[%s2794_s6 + $0x150] sm:$0xff] %v302_v46  ;;  %v390_v26 = vld [vmem:[%s2789_s5 + $0x1580] sm:$0xff]  ;;  %v392_v27 = vld [vmem:[%s2789_s5 + $0x1588] sm:$0xff] }
  0x62   : > { %305 = vst [vmem:[%s2794_s6 + $0x158] sm:$0xff] %v304_v47  ;;  %v394_v28 = vld [vmem:[%s2789_s5 + $0x1600] sm:$0xff]  ;;  %v396_v29 = vld [vmem:[%s2789_s5 + $0x1608] sm:$0xff] }
  0x63   : > { %307 = vst [vmem:[%s2794_s6 + $0x160] sm:$0xff] %v306_v48  ;;  %v398_v30 = vld [vmem:[%s2789_s5 + $0x1680] sm:$0xff]  ;;  %v400_v31 = vld [vmem:[%s2789_s5 + $0x1688] sm:$0xff] }
  0x64   : > { %309 = vst [vmem:[%s2794_s6 + $0x168] sm:$0xff] %v308_v49  ;;  %v402_v32 = vld [vmem:[%s2789_s5 + $0x1700] sm:$0xff]  ;;  %v404_v33 = vld [vmem:[%s2789_s5 + $0x1708] sm:$0xff] }
  0x65   : > { %311 = vst [vmem:[%s2794_s6 + $0x170] sm:$0xff] %v310_v50  ;;  %v406_v34 = vld [vmem:[%s2789_s5 + $0x1780] sm:$0xff]  ;;  %v408_v35 = vld [vmem:[%s2789_s5 + $0x1788] sm:$0xff] }
  0x66   : > { %313 = vst [vmem:[%s2794_s6 + $0x178] sm:$0xff] %v312_v51  ;;  %v410_v36 = vld [vmem:[%s2789_s5 + $0x1800] sm:$0xff]  ;;  %v412_v37 = vld [vmem:[%s2789_s5 + $0x1808] sm:$0xff] }
  0x67   : > { %315 = vst [vmem:[%s2794_s6 + $0x180] sm:$0xff] %v314_v52  ;;  %v414_v38 = vld [vmem:[%s2789_s5 + $0x1880] sm:$0xff]  ;;  %v416_v39 = vld [vmem:[%s2789_s5 + $0x1888] sm:$0xff] }
  0x68   : > { %317 = vst [vmem:[%s2794_s6 + $0x188] sm:$0xff] %v316_v53  ;;  %v418_v40 = vld [vmem:[%s2789_s5 + $0x1900] sm:$0xff]  ;;  %v420_v41 = vld [vmem:[%s2789_s5 + $0x1908] sm:$0xff] }
  0x69   : > { %319 = vst [vmem:[%s2794_s6 + $0x190] sm:$0xff] %v318_v54  ;;  %v422_v42 = vld [vmem:[%s2789_s5 + $0x1980] sm:$0xff]  ;;  %v424_v43 = vld [vmem:[%s2789_s5 + $0x1988] sm:$0xff] }
  0x6a   : > { %321 = vst [vmem:[%s2794_s6 + $0x198] sm:$0xff] %v320_v55  ;;  %v426_v44 = vld [vmem:[%s2789_s5 + $0x1a00] sm:$0xff]  ;;  %v428_v45 = vld [vmem:[%s2789_s5 + $0x1a08] sm:$0xff] }
  0x6b   : > { %323 = vst [vmem:[%s2794_s6 + $0x1a0] sm:$0xff] %v322_v56  ;;  %v430_v46 = vld [vmem:[%s2789_s5 + $0x1a80] sm:$0xff]  ;;  %v432_v47 = vld [vmem:[%s2789_s5 + $0x1a88] sm:$0xff] }
  0x6c   : > { %325 = vst [vmem:[%s2794_s6 + $0x1a8] sm:$0xff] %v324_v57  ;;  %v434_v48 = vld [vmem:[%s2789_s5 + $0x1b00] sm:$0xff]  ;;  %v436_v49 = vld [vmem:[%s2789_s5 + $0x1b08] sm:$0xff] }
  0x6d   : > { %327 = vst [vmem:[%s2794_s6 + $0x1b0] sm:$0xff] %v326_v58  ;;  %v438_v50 = vld [vmem:[%s2789_s5 + $0x1b80] sm:$0xff]  ;;  %v440_v51 = vld [vmem:[%s2789_s5 + $0x1b88] sm:$0xff] }
  0x6e   : > { %329 = vst [vmem:[%s2794_s6 + $0x1b8] sm:$0xff] %v328_v59  ;;  %v442_v52 = vld [vmem:[%s2789_s5 + $0x1c00] sm:$0xff]  ;;  %v444_v53 = vld [vmem:[%s2789_s5 + $0x1c08] sm:$0xff] }
  0x6f   : > { %331 = vst [vmem:[%s2794_s6 + $0x1c0] sm:$0xff] %v330_v60  ;;  %v446_v54 = vld [vmem:[%s2789_s5 + $0x1c80] sm:$0xff]  ;;  %v448_v55 = vld [vmem:[%s2789_s5 + $0x1c88] sm:$0xff] }
  0x70   : > { %333 = vst [vmem:[%s2794_s6 + $0x1c8] sm:$0xff] %v332_v61  ;;  %v450_v56 = vld [vmem:[%s2789_s5 + $0x1d00] sm:$0xff]  ;;  %v452_v57 = vld [vmem:[%s2789_s5 + $0x1d08] sm:$0xff] }
  0x71   : > { %335 = vst [vmem:[%s2794_s6 + $0x1d0] sm:$0xff] %v334_v62  ;;  %v454_v58 = vld [vmem:[%s2789_s5 + $0x1d80] sm:$0xff]  ;;  %v456_v59 = vld [vmem:[%s2789_s5 + $0x1d88] sm:$0xff] }
  0x72   : > { %337 = vst [vmem:[%s2794_s6 + $0x1d8] sm:$0xff] %v336_v63  ;;  %v458_v60 = vld [vmem:[%s2789_s5 + $0x1e00] sm:$0xff]  ;;  %v460_v61 = vld [vmem:[%s2789_s5 + $0x1e08] sm:$0xff] }
  0x73   : > { %339 = vst [vmem:[%s2794_s6 + $0x1e0] sm:$0xff] %v338_v0  ;;  %v462_v62 = vld [vmem:[%s2789_s5 + $0x1e80] sm:$0xff]  ;;  %v464_v63 = vld [vmem:[%s2789_s5 + $0x1e88] sm:$0xff] }
  0x74   : > { %341 = vst [vmem:[%s2794_s6 + $0x1e8] sm:$0xff] %v340_v1  ;;  %v466_v0 = vld [vmem:[%s2789_s5 + $0x1f00] sm:$0xff]  ;;  %v468_v1 = vld [vmem:[%s2789_s5 + $0x1f08] sm:$0xff] }
  0x75   : > { %343 = vst [vmem:[%s2794_s6 + $0x1f0] sm:$0xff] %v342_v2  ;;  %v470_v2 = vld [vmem:[%s2789_s5 + $0x1f80] sm:$0xff] }
  0x76   : > { %345 = vst [vmem:[%s2794_s6 + $0x1f8] sm:$0xff] %v344_v3  ;;  %v472_v3 = vld [vmem:[%s2789_s5 + $0x1f88] sm:$0xff] }
  0x77   : > { %347 = vst [vmem:[%s2794_s6 + $0x200] sm:$0xff] %v346_v4 }
  0x78   : > { %349 = vst [vmem:[%s2794_s6 + $0x208] sm:$0xff] %v348_v5 }
  0x79   : > { %351 = vst [vmem:[%s2794_s6 + $0x210] sm:$0xff] %v350_v6 }
  0x7a   : > { %353 = vst [vmem:[%s2794_s6 + $0x218] sm:$0xff] %v352_v7 }
  0x7b   : > { %355 = vst [vmem:[%s2794_s6 + $0x220] sm:$0xff] %v354_v8 }
  0x7c   : > { %357 = vst [vmem:[%s2794_s6 + $0x228] sm:$0xff] %v356_v9 }
  0x7d   : > { %359 = vst [vmem:[%s2794_s6 + $0x230] sm:$0xff] %v358_v10 }
  0x7e   : > { %361 = vst [vmem:[%s2794_s6 + $0x238] sm:$0xff] %v360_v11 }
  0x7f   : > { %363 = vst [vmem:[%s2794_s6 + $0x240] sm:$0xff] %v362_v12 }
  0x80   : > { %365 = vst [vmem:[%s2794_s6 + $0x248] sm:$0xff] %v364_v13 }
  0x81   : > { %367 = vst [vmem:[%s2794_s6 + $0x250] sm:$0xff] %v366_v14 }
  0x82   : > { %369 = vst [vmem:[%s2794_s6 + $0x258] sm:$0xff] %v368_v15 }
  0x83   : > { %371 = vst [vmem:[%s2794_s6 + $0x260] sm:$0xff] %v370_v16 }
  0x84   : > { %373 = vst [vmem:[%s2794_s6 + $0x268] sm:$0xff] %v372_v17 }
  0x85   : > { %375 = vst [vmem:[%s2794_s6 + $0x270] sm:$0xff] %v374_v18 }
  0x86   : > { %377 = vst [vmem:[%s2794_s6 + $0x278] sm:$0xff] %v376_v19 }
  0x87   : > { %379 = vst [vmem:[%s2794_s6 + $0x280] sm:$0xff] %v378_v20 }
  0x88   : > { %381 = vst [vmem:[%s2794_s6 + $0x288] sm:$0xff] %v380_v21 }
  0x89   : > { %383 = vst [vmem:[%s2794_s6 + $0x290] sm:$0xff] %v382_v22 }
  0x8a   : > { %385 = vst [vmem:[%s2794_s6 + $0x298] sm:$0xff] %v384_v23 }
  0x8b   : > { %387 = vst [vmem:[%s2794_s6 + $0x2a0] sm:$0xff] %v386_v24 }
  0x8c   : > { %389 = vst [vmem:[%s2794_s6 + $0x2a8] sm:$0xff] %v388_v25 }
  0x8d   : > { %391 = vst [vmem:[%s2794_s6 + $0x2b0] sm:$0xff] %v390_v26 }
  0x8e   : > { %393 = vst [vmem:[%s2794_s6 + $0x2b8] sm:$0xff] %v392_v27 }
  0x8f   : > { %395 = vst [vmem:[%s2794_s6 + $0x2c0] sm:$0xff] %v394_v28 }
  0x90   : > { %397 = vst [vmem:[%s2794_s6 + $0x2c8] sm:$0xff] %v396_v29 }
  0x91   : > { %399 = vst [vmem:[%s2794_s6 + $0x2d0] sm:$0xff] %v398_v30 }
  0x92   : > { %401 = vst [vmem:[%s2794_s6 + $0x2d8] sm:$0xff] %v400_v31 }
  0x93   : > { %403 = vst [vmem:[%s2794_s6 + $0x2e0] sm:$0xff] %v402_v32 }
  0x94   : > { %405 = vst [vmem:[%s2794_s6 + $0x2e8] sm:$0xff] %v404_v33 }
  0x95   : > { %407 = vst [vmem:[%s2794_s6 + $0x2f0] sm:$0xff] %v406_v34 }
  0x96   : > { %409 = vst [vmem:[%s2794_s6 + $0x2f8] sm:$0xff] %v408_v35 }
  0x97   : > { %411 = vst [vmem:[%s2794_s6 + $0x300] sm:$0xff] %v410_v36 }
  0x98   : > { %413 = vst [vmem:[%s2794_s6 + $0x308] sm:$0xff] %v412_v37 }
  0x99   : > { %415 = vst [vmem:[%s2794_s6 + $0x310] sm:$0xff] %v414_v38 }
  0x9a   : > { %417 = vst [vmem:[%s2794_s6 + $0x318] sm:$0xff] %v416_v39 }
  0x9b   : > { %419 = vst [vmem:[%s2794_s6 + $0x320] sm:$0xff] %v418_v40 }
  0x9c   : > { %421 = vst [vmem:[%s2794_s6 + $0x328] sm:$0xff] %v420_v41 }
  0x9d   : > { %423 = vst [vmem:[%s2794_s6 + $0x330] sm:$0xff] %v422_v42 }
  0x9e   : > { %425 = vst [vmem:[%s2794_s6 + $0x338] sm:$0xff] %v424_v43 }
  0x9f   : > { %427 = vst [vmem:[%s2794_s6 + $0x340] sm:$0xff] %v426_v44 }
  0xa0   : > { %429 = vst [vmem:[%s2794_s6 + $0x348] sm:$0xff] %v428_v45 }
  0xa1   : > { %431 = vst [vmem:[%s2794_s6 + $0x350] sm:$0xff] %v430_v46 }
  0xa2   : > { %433 = vst [vmem:[%s2794_s6 + $0x358] sm:$0xff] %v432_v47 }
  0xa3   : > { %435 = vst [vmem:[%s2794_s6 + $0x360] sm:$0xff] %v434_v48 }
  0xa4   : > { %437 = vst [vmem:[%s2794_s6 + $0x368] sm:$0xff] %v436_v49 }
  0xa5   : > { %439 = vst [vmem:[%s2794_s6 + $0x370] sm:$0xff] %v438_v50 }
  0xa6   : > { %441 = vst [vmem:[%s2794_s6 + $0x378] sm:$0xff] %v440_v51 }
  0xa7   : > { %443 = vst [vmem:[%s2794_s6 + $0x380] sm:$0xff] %v442_v52 }
  0xa8   : > { %445 = vst [vmem:[%s2794_s6 + $0x388] sm:$0xff] %v444_v53 }
  0xa9   : > { %447 = vst [vmem:[%s2794_s6 + $0x390] sm:$0xff] %v446_v54 }
  0xaa   : > { %449 = vst [vmem:[%s2794_s6 + $0x398] sm:$0xff] %v448_v55 }
  0xab   : > { %451 = vst [vmem:[%s2794_s6 + $0x3a0] sm:$0xff] %v450_v56 }
  0xac   : > { %453 = vst [vmem:[%s2794_s6 + $0x3a8] sm:$0xff] %v452_v57 }
  0xad   : > { %455 = vst [vmem:[%s2794_s6 + $0x3b0] sm:$0xff] %v454_v58 }
  0xae   : > { %457 = vst [vmem:[%s2794_s6 + $0x3b8] sm:$0xff] %v456_v59 }
  0xaf   : > { %459 = vst [vmem:[%s2794_s6 + $0x3c0] sm:$0xff] %v458_v60 }
  0xb0   : > { %461 = vst [vmem:[%s2794_s6 + $0x3c8] sm:$0xff] %v460_v61 }
  0xb1   : > { %463 = vst [vmem:[%s2794_s6 + $0x3d0] sm:$0xff] %v462_v62 }
  0xb2   : > { %465 = vst [vmem:[%s2794_s6 + $0x3d8] sm:$0xff] %v464_v63 }
  0xb3   : > { %467 = vst [vmem:[%s2794_s6 + $0x3e0] sm:$0xff] %v466_v0 }
  0xb4   : > { %469 = vst [vmem:[%s2794_s6 + $0x3e8] sm:$0xff] %v468_v1 }
  0xb5   : > { %471 = vst [vmem:[%s2794_s6 + $0x3f0] sm:$0xff] %v470_v2 }
  0xb6   : > { %473 = vst [vmem:[%s2794_s6 + $0x3f8] sm:$0xff] %v472_v3 }
  0xb7 PF: > { %p1802_p0 = scmp.ge.s32.totalorder %s2652_s22, 1  ;;  %p486_p1 = scmp.lt.s32.totalorder %s2652_s22, 65 }
  0xb9   : > { %p487_p2 = pnand %p1802_p0, %p486_p1 }
  0xba   : > { %s493_s0 = sand.u32 (!%p487_p2), 1, %s2628_s16   ;;  %s500_s23 = sand.u32 (!%p487_p2), 1, %s2620_s14  }
  0xbb   : > { %490 = sbr.rel (%p487_p2) target bundleno = 512 (0x200), region = 70  ;;  %s1803_s28 = sshll.u32 (!%p487_p2), %s493_s0, 5 }
  0xbc   : > { %s1804_s7 = sshll.u32 (!%p487_p2), %s500_s23, 10  ;;  %s527_s11 = sand.u32 (!%p487_p2), 1, %s2612_s12  }
  0xbd   : > { %s1806_s26 = sshll.u32 (!%p487_p2), %s2640_s19, 2  ;;  %s1805_s29 = sshll.u32 (!%p487_p2), %s527_s11, 6 }
  0xbe   : > { %p535_p3 = scmp.lt.s32.totalorder (!%p487_p2), %s1806_s26, 31  ;;  %s3061_s6 = scalar_lea.vmem (!%p487_p2), [#allocation3], %s1803_s28 }
  0xbf   : > { %s3063_s1 = scalar_lea.vmem (!%p487_p2), [#allocation4], %s1804_s7  ;;  %s3065_s25 = scalar_lea.vmem (!%p487_p2), [#allocation5], %s1805_s29 }
  0xc0   : > { %s3448_s26 = smov (!%p535_p3, %s1806_s26), 31  ;;  %p1807_p4 = scmp.ne.s32.totalorder %s2636_s18, 0 }
  0xc1   : > { %s537_s5 = scalar_lea.vmem %s3419_s2, %s3448_s26 }
  0xc2   : > { %544 = sbr.rel (%p1807_p4) target bundleno = 208 (0xd0), region = 82 }
  0xc7   : > { %v2654_v4 = vmov 0.0  }
  0xc8   : > { %545 = vst [vmem:[#allocation2 + $0x30] sm:$0xff] %v2654_v4 }
  0xc9   : > { %546 = vst [vmem:[#allocation2] sm:$0xff] %v2654_v4 }
  0xca   : > { %547 = vst [vmem:[#allocation2 + $0x18] sm:$0xff] %v2654_v4 }
  0xcb   : > { %548 = vst [vmem:[#allocation2 + $0x10] sm:$0xff] %v2654_v4 }
  0xcc   : > { %549 = vst [vmem:[#allocation2 + $0x8] sm:$0xff] %v2654_v4 }
  0xcd   : > { %550 = vst [vmem:[#allocation2 + $0x20] sm:$0xff] %v2654_v4 }
  0xce   : > { %551 = vst [vmem:[#allocation2 + $0x28] sm:$0xff] %v2654_v4 }
  0xcf   : > { %552 = vst [vmem:[#allocation2 + $0x38] sm:$0xff] %v2654_v4 }
  0xd0 PF: > { %v1938_v5 = vld [vmem:[%s3063_s1 + $0xe0] sm:$0xf]  ;;  %v2378_v6 = vld [vmem:[%s3063_s1 + $0xec] sm:$0xf0]  ;;  %p2336_p5 = scmp.ne.s32.totalorder %s2636_s18, 7 }
  0xd1   : > { %v2066_v7 = vld [vmem:[%s3063_s1 + $0x1e0] sm:$0xf]  ;;  %v1939_v8 = vor.u32 %v2378_v6, %v1938_v5  ;;  %v2410_v9 = vld [vmem:[%s3063_s1 + $0x1ec] sm:$0xf0] }
  0xd2   : > { %v2194_v10 = vld [vmem:[%s3063_s1 + $0x2e0] sm:$0xf]  ;;  %v2442_v11 = vld [vmem:[%s3063_s1 + $0x2ec] sm:$0xf0]  ;;  %v2067_v12 = vor.u32 %v2410_v9, %v2066_v7 }
  0xd3   : > { %v2195_v13 = vor.u32 %v2442_v11, %v2194_v10  ;;  %v2322_v14 = vld [vmem:[%s3063_s1 + $0x3e0] sm:$0xf]  ;;  %v2474_v15 = vld [vmem:[%s3063_s1 + $0x3ec] sm:$0xf0]  ;;  %1353 = vmatpush.bf16.msra.mxu0 %v1939_v8 }
  0xd4   : > { %v1922_v16 = vld [vmem:[%s3063_s1 + $0xc0] sm:$0xf]  ;;  %v2323_v17 = vor.u32 %v2474_v15, %v2322_v14  ;;  %v2374_v18 = vld [vmem:[%s3063_s1 + $0xcc] sm:$0xf0]  ;;  %1367 = vmatpush.bf16.msra.mxu1 %v2067_v12 }
  0xd5   : > { %v2050_v19 = vld [vmem:[%s3063_s1 + $0x1c0] sm:$0xf]  ;;  %v2406_v20 = vld [vmem:[%s3063_s1 + $0x1cc] sm:$0xf0]  ;;  %1381 = vmatpush.bf16.msra.mxu2 %v2195_v13  ;;  %v1923_v21 = vor.u32 %v2374_v18, %v1922_v16 }
  0xd6   : > { %v2051_v22 = vor.u32 %v2406_v20, %v2050_v19  ;;  %v2178_v23 = vld [vmem:[%s3063_s1 + $0x2c0] sm:$0xf]  ;;  %v2438_v24 = vld [vmem:[%s3063_s1 + $0x2cc] sm:$0xf0]  ;;  %1395 = vmatpush.bf16.msra.mxu3 %v2323_v17 }
  0xd7   : > { %v2306_v25 = vld [vmem:[%s3063_s1 + $0x3c0] sm:$0xf]  ;;  %v2179_v26 = vor.u32 %v2438_v24, %v2178_v23  ;;  %v2470_v27 = vld [vmem:[%s3063_s1 + $0x3cc] sm:$0xf0]  ;;  %1354 = vmatpush.bf16.msra.mxu0 %v1923_v21 }
  0xd8   : > { %v1906_v28 = vld [vmem:[%s3063_s1 + $0xa0] sm:$0xf]  ;;  %v2370_v29 = vld [vmem:[%s3063_s1 + $0xac] sm:$0xf0]  ;;  %v2307_v30 = vor.u32 %v2470_v27, %v2306_v25  ;;  %1368 = vmatpush.bf16.msra.mxu1 %v2051_v22 }
  0xd9   : > { %v2034_v31 = vld [vmem:[%s3063_s1 + $0x1a0] sm:$0xf]  ;;  %v2402_v32 = vld [vmem:[%s3063_s1 + $0x1ac] sm:$0xf0]  ;;  %v1907_v34 = vor.u32 %v2370_v29, %v1906_v28  ;;  %1382 = vmatpush.bf16.msra.mxu2 %v2179_v26 }
  0xda   : > { %v2162_v33 = vld [vmem:[%s3063_s1 + $0x2a0] sm:$0xf]  ;;  %v2434_v35 = vld [vmem:[%s3063_s1 + $0x2ac] sm:$0xf0]  ;;  %v2035_v38 = vor.u32 %v2402_v32, %v2034_v31  ;;  %1396 = vmatpush.bf16.msra.mxu3 %v2307_v30 }
  0xdb   : > { %v2290_v36 = vld [vmem:[%s3063_s1 + $0x3a0] sm:$0xf]  ;;  %v2466_v37 = vld [vmem:[%s3063_s1 + $0x3ac] sm:$0xf0]  ;;  %v2163_v39 = vor.u32 %v2434_v35, %v2162_v33  ;;  %1355 = vmatpush.bf16.msra.mxu0 %v1907_v34  ;;  %v2376_v33 = vld [vmem:[%s3063_s1 + $0xe4] sm:$0xf] }
  0xdc   : > { %v1890_v40 = vld [vmem:[%s3063_s1 + $0x80] sm:$0xf]  ;;  %v2366_v41 = vld [vmem:[%s3063_s1 + $0x8c] sm:$0xf0]  ;;  %v2291_v43 = vor.u32 %v2466_v37, %v2290_v36  ;;  %1369 = vmatpush.bf16.msra.mxu1 %v2035_v38  ;;  %v1940_v34 = vld [vmem:[%s3063_s1 + $0xf0] sm:$0xf0] }
  0xdd   : > { %v2018_v42 = vld [vmem:[%s3063_s1 + $0x180] sm:$0xf]  ;;  %v2398_v44 = vld [vmem:[%s3063_s1 + $0x18c] sm:$0xf0]  ;;  %v1891_v49 = vor.u32 %v2366_v41, %v1890_v40  ;;  %1383 = vmatpush.bf16.msra.mxu2 %v2163_v39  ;;  %v2408_v35 = vld [vmem:[%s3063_s1 + $0x1e4] sm:$0xf] }
  0xde   : > { %v2146_v45 = vld [vmem:[%s3063_s1 + $0x280] sm:$0xf]  ;;  %v2430_v46 = vld [vmem:[%s3063_s1 + $0x28c] sm:$0xf0]  ;;  %v2019_v50 = vor.u32 %v2398_v44, %v2018_v42  ;;  %1397 = vmatpush.bf16.msra.mxu3 %v2291_v43  ;;  %v2068_v37 = vld [vmem:[%s3063_s1 + $0x1f0] sm:$0xf0] }
  0xdf   : > { %v2274_v47 = vld [vmem:[%s3063_s1 + $0x380] sm:$0xf]  ;;  %v2462_v48 = vld [vmem:[%s3063_s1 + $0x38c] sm:$0xf0]  ;;  %v2147_v51 = vor.u32 %v2430_v46, %v2146_v45  ;;  %1356 = vmatpush.bf16.msra.mxu0 %v1891_v49  ;;  %v2440_v38 = vld [vmem:[%s3063_s1 + $0x2e4] sm:$0xf]  ;;  %v1943_v45 = vor.u32 %v2376_v33, %v1940_v34  ;;  %v2071_v46 = vor.u32 %v2408_v35, %v2068_v37 }
  0xe0   : > { %v1874_v52 = vld [vmem:[%s3063_s1 + $0x60] sm:$0xf]  ;;  %v2362_v53 = vld [vmem:[%s3063_s1 + $0x6c] sm:$0xf0]  ;;  %v2275_v55 = vor.u32 %v2462_v48, %v2274_v47  ;;  %1370 = vmatpush.bf16.msra.mxu1 %v2019_v50  ;;  %v2196_v39 = vld [vmem:[%s3063_s1 + $0x2f0] sm:$0xf0] }
  0xe1   : > { %v2002_v54 = vld [vmem:[%s3063_s1 + $0x160] sm:$0xf]  ;;  %v2394_v56 = vld [vmem:[%s3063_s1 + $0x16c] sm:$0xf0]  ;;  %v1875_v61 = vor.u32 %v2362_v53, %v1874_v52  ;;  %1384 = vmatpush.bf16.msra.mxu2 %v2147_v51  ;;  %v2472_v42 = vld [vmem:[%s3063_s1 + $0x3e4] sm:$0xf]  ;;  %v2199_v47 = vor.u32 %v2440_v38, %v2196_v39 }
  0xe2   : > { %v2130_v57 = vld [vmem:[%s3063_s1 + $0x260] sm:$0xf]  ;;  %v2426_v58 = vld [vmem:[%s3063_s1 + $0x26c] sm:$0xf0]  ;;  %v2003_v62 = vor.u32 %v2394_v56, %v2002_v54  ;;  %1398 = vmatpush.bf16.msra.mxu3 %v2275_v55  ;;  %v2324_v43 = vld [vmem:[%s3063_s1 + $0x3f0] sm:$0xf0] }
  0xe3   : > { %v2258_v59 = vld [vmem:[%s3063_s1 + $0x360] sm:$0xf]  ;;  %v2458_v60 = vld [vmem:[%s3063_s1 + $0x36c] sm:$0xf0]  ;;  %v2131_v63 = vor.u32 %v2426_v58, %v2130_v57  ;;  %1357 = vmatpush.bf16.msra.mxu0 %v1875_v61  ;;  %v2372_v48 = vld [vmem:[%s3063_s1 + $0xc4] sm:$0xf]  ;;  %v2327_v51 = vor.u32 %v2472_v42, %v2324_v43 }
  0xe4   : > { %v1858_v0 = vld [vmem:[%s3063_s1 + $0x40] sm:$0xf]  ;;  %v2358_v1 = vld [vmem:[%s3063_s1 + $0x4c] sm:$0xf0]  ;;  %v2259_v3 = vor.u32 %v2458_v60, %v2258_v59  ;;  %1371 = vmatpush.bf16.msra.mxu1 %v2003_v62  ;;  %v1924_v49 = vld [vmem:[%s3063_s1 + $0xd0] sm:$0xf0] }
  0xe5   : > { %v1986_v2 = vld [vmem:[%s3063_s1 + $0x140] sm:$0xf]  ;;  %v2390_v4 = vld [vmem:[%s3063_s1 + $0x14c] sm:$0xf0]  ;;  %v1859_v9 = vor.u32 %v2358_v1, %v1858_v0  ;;  %1385 = vmatpush.bf16.msra.mxu2 %v2131_v63  ;;  %v2404_v50 = vld [vmem:[%s3063_s1 + $0x1c4] sm:$0xf]  ;;  %v1927_v57 = vor.u32 %v2372_v48, %v1924_v49 }
  0xe6   : > { %v2114_v5 = vld [vmem:[%s3063_s1 + $0x240] sm:$0xf]  ;;  %v2422_v6 = vld [vmem:[%s3063_s1 + $0x24c] sm:$0xf0]  ;;  %v1987_v10 = vor.u32 %v2390_v4, %v1986_v2  ;;  %1399 = vmatpush.bf16.msra.mxu3 %v2259_v3  ;;  %v2052_v52 = vld [vmem:[%s3063_s1 + $0x1d0] sm:$0xf0] }
  0xe7   : > { %v2242_v7 = vld [vmem:[%s3063_s1 + $0x340] sm:$0xf]  ;;  %v2454_v8 = vld [vmem:[%s3063_s1 + $0x34c] sm:$0xf0]  ;;  %v2115_v11 = vor.u32 %v2422_v6, %v2114_v5  ;;  %1358 = vmatpush.bf16.msra.mxu0 %v1859_v9  ;;  %v2436_v53 = vld [vmem:[%s3063_s1 + $0x2c4] sm:$0xf]  ;;  %v2055_v58 = vor.u32 %v2404_v50, %v2052_v52 }
  0xe8   : > { %v1842_v12 = vld [vmem:[%s3063_s1 + $0x20] sm:$0xf]  ;;  %v2354_v13 = vld [vmem:[%s3063_s1 + $0x2c] sm:$0xf0]  ;;  %v2243_v15 = vor.u32 %v2454_v8, %v2242_v7  ;;  %1372 = vmatpush.bf16.msra.mxu1 %v1987_v10  ;;  %v2180_v54 = vld [vmem:[%s3063_s1 + $0x2d0] sm:$0xf0] }
  0xe9   : > { %v1970_v14 = vld [vmem:[%s3063_s1 + $0x120] sm:$0xf]  ;;  %v2386_v16 = vld [vmem:[%s3063_s1 + $0x12c] sm:$0xf0]  ;;  %v1843_v21 = vor.u32 %v2354_v13, %v1842_v12  ;;  %1386 = vmatpush.bf16.msra.mxu2 %v2115_v11  ;;  %v2468_v55 = vld [vmem:[%s3063_s1 + $0x3c4] sm:$0xf]  ;;  %v2183_v59 = vor.u32 %v2436_v53, %v2180_v54 }
  0xea   : > { %v2098_v17 = vld [vmem:[%s3063_s1 + $0x220] sm:$0xf]  ;;  %v2418_v18 = vld [vmem:[%s3063_s1 + $0x22c] sm:$0xf0]  ;;  %v1971_v24 = vor.u32 %v2386_v16, %v1970_v14  ;;  %1400 = vmatpush.bf16.msra.mxu3 %v2243_v15  ;;  %v2308_v56 = vld [vmem:[%s3063_s1 + $0x3d0] sm:$0xf0] }
  0xeb   : > { %v2226_v19 = vld [vmem:[%s3063_s1 + $0x320] sm:$0xf]  ;;  %v2450_v20 = vld [vmem:[%s3063_s1 + $0x32c] sm:$0xf0]  ;;  %v2099_v25 = vor.u32 %v2418_v18, %v2098_v17  ;;  %1359 = vmatpush.bf16.msra.mxu0 %v1843_v21  ;;  %v2368_v60 = vld [vmem:[%s3063_s1 + $0xa4] sm:$0xf]  ;;  %v2311_v63 = vor.u32 %v2468_v55, %v2308_v56 }
  0xec   : > { %v1826_v22 = vld [vmem:[%s3063_s1] sm:$0xf]  ;;  %v2350_v23 = vld [vmem:[%s3063_s1 + $0xc] sm:$0xf0]  ;;  %v2227_v29 = vor.u32 %v2450_v20, %v2226_v19  ;;  %1373 = vmatpush.bf16.msra.mxu1 %v1971_v24  ;;  %v1908_v61 = vld [vmem:[%s3063_s1 + $0xb0] sm:$0xf0] }
  0xed   : > { %v1954_v26 = vld [vmem:[%s3063_s1 + $0x100] sm:$0xf]  ;;  %v2382_v27 = vld [vmem:[%s3063_s1 + $0x10c] sm:$0xf0]  ;;  %v1827_v36 = vor.u32 %v2350_v23, %v1826_v22  ;;  %1387 = vmatpush.bf16.msra.mxu2 %v2099_v25  ;;  %v2400_v62 = vld [vmem:[%s3063_s1 + $0x1a4] sm:$0xf]  ;;  %v1911_v6 = vor.u32 %v2368_v60, %v1908_v61 }
  0xee   : > { %v2082_v28 = vld [vmem:[%s3063_s1 + $0x200] sm:$0xf]  ;;  %v2414_v30 = vld [vmem:[%s3063_s1 + $0x20c] sm:$0xf0]  ;;  %v1955_v40 = vor.u32 %v2382_v27, %v1954_v26  ;;  %1401 = vmatpush.bf16.msra.mxu3 %v2227_v29  ;;  %v2036_v0 = vld [vmem:[%s3063_s1 + $0x1b0] sm:$0xf0] }
  0xef   : > { %v2210_v31 = vld [vmem:[%s3063_s1 + $0x300] sm:$0xf]  ;;  %v2446_v32 = vld [vmem:[%s3063_s1 + $0x30c] sm:$0xf0]  ;;  %v2083_v41 = vor.u32 %v2414_v30, %v2082_v28  ;;  %1360 = vmatpush.bf16.msra.mxu0 %v1827_v36  ;;  %v2432_v1 = vld [vmem:[%s3063_s1 + $0x2a4] sm:$0xf]  ;;  %v2039_v10 = vor.u32 %v2400_v62, %v2036_v0 }
  0xf0   : > { %v2211_v44 = vor.u32 %v2446_v32, %v2210_v31  ;;  %1374 = vmatpush.bf16.msra.mxu1 %v1955_v40  ;;  %v2164_v2 = vld [vmem:[%s3063_s1 + $0x2b0] sm:$0xf0]  ;;  %v2464_v3 = vld [vmem:[%s3063_s1 + $0x3a4] sm:$0xf]  ;;  %v1818_v8 = vld [vmem:[%s3061_s6 + $0x8] sm:$0xf] }
  0xf1   : > { %1388 = vmatpush.bf16.msra.mxu2 %v2083_v41  ;;  %v2292_v4 = vld [vmem:[%s3063_s1 + $0x3b0] sm:$0xf0]  ;;  %v2364_v5 = vld [vmem:[%s3063_s1 + $0x84] sm:$0xf]  ;;  %v2347_v9 = vld [vmem:[%s3061_s6 + $0x14] sm:$0xf0]  ;;  %v2167_v11 = vor.u32 %v2432_v1, %v2164_v2 }
  0xf2   : > { %1402 = vmatpush.bf16.msra.mxu3 %v2211_v44  ;;  %v1892_v7 = vld [vmem:[%s3063_s1 + $0x90] sm:$0xf0]  ;;  %v2396_v12 = vld [vmem:[%s3063_s1 + $0x184] sm:$0xf]  ;;  %v3161_v13 = vor.u32 %v2347_v9, %v1818_v8  ;;  %v2345_v14 = vld [vmem:[%s3061_s6 + $0xc] sm:$0xf]  ;;  %v2295_v16 = vor.u32 %v2464_v3, %v2292_v4 }
  0xf3   : > { %1409 = vmatpush.bf16.msrb.mxu0 %v1943_v45  ;;  %v1820_v15 = vld [vmem:[%s3061_s6 + $0x18] sm:$0xf0]  ;;  %v2020_v17 = vld [vmem:[%s3063_s1 + $0x190] sm:$0xf0]  ;;  %v2428_v18 = vld [vmem:[%s3063_s1 + $0x284] sm:$0xf]  ;;  %v1895_v24 = vor.u32 %v2364_v5, %v1892_v7 }
  0xf4   : > { %1423 = vmatpush.bf16.msrb.mxu1 %v2071_v46  ;;  %v2148_v19 = vld [vmem:[%s3063_s1 + $0x290] sm:$0xf0]  ;;  %v3168_v20 = vor.u32 %v2345_v14, %v1820_v15  ;;  %v2460_v21 = vld [vmem:[%s3063_s1 + $0x384] sm:$0xf]  ;;  %1389 = vmatmul.bf16.vlgmr.msra.gmra.mxu2 %v3161_v13  ;;  %v1810_v26 = vld [vmem:[%s3061_s6] sm:$0xf]  ;;  %v2023_v28 = vor.u32 %v2396_v12, %v2020_v17 }
  0xf5   : > { %1437 = vmatpush.bf16.msrb.mxu2 %v2199_v47  ;;  %v2276_v22 = vld [vmem:[%s3063_s1 + $0x390] sm:$0xf0]  ;;  %v2360_v23 = vld [vmem:[%s3063_s1 + $0x64] sm:$0xf]  ;;  %v2346_v27 = vld [vmem:[%s3061_s6 + $0xc] sm:$0xf0]  ;;  %v2151_v29 = vor.u32 %v2428_v18, %v2148_v19 }
  0xf6   : > { %1451 = vmatpush.bf16.msrb.mxu3 %v2327_v51  ;;  %v1876_v25 = vld [vmem:[%s3063_s1 + $0x70] sm:$0xf0]  ;;  %v2392_v30 = vld [vmem:[%s3063_s1 + $0x164] sm:$0xf]  ;;  %v3179_v31 = vor.u32 %v2346_v27, %v1810_v26  ;;  %v2279_v34 = vor.u32 %v2460_v21, %v2276_v22  ;;  %v1946_v14 = vld [vmem:[%s3063_s1 + $0xe8] sm:$0xf] }
  0xf7   : > { %1410 = vmatpush.bf16.msrb.mxu0 %v1927_v57  ;;  %1403 = vmatmul.bf16.vlgmr.msra.gmra.mxu3 %v3168_v20  ;;  %v2344_v32 = vld [vmem:[%s3061_s6 + $0x4] sm:$0xf]  ;;  %v1812_v33 = vld [vmem:[%s3061_s6 + $0x10] sm:$0xf0]  ;;  %v1879_v41 = vor.u32 %v2360_v23, %v1876_v25  ;;  %v2379_v15 = vld [vmem:[%s3063_s1 + $0xf4] sm:$0xf0] }
  0xf8   : > { %1424 = vmatpush.bf16.msrb.mxu1 %v2055_v58  ;;  %v2004_v35 = vld [vmem:[%s3063_s1 + $0x170] sm:$0xf0]  ;;  %v2424_v36 = vld [vmem:[%s3063_s1 + $0x264] sm:$0xf]  ;;  %v3186_v38 = vor.u32 %v2344_v32, %v1812_v33  ;;  %1361 = vmatmul.bf16.vlgmr.msra.gmra.mxu0 %v3179_v31  ;;  %v2411_v18 = vld [vmem:[%s3063_s1 + $0x1f4] sm:$0xf0]  ;;  %v1947_v27 = vor.u32 %v2379_v15, %v1946_v14 }
  0xf9   : > { %1438 = vmatpush.bf16.msrb.mxu2 %v2183_v59  ;;  %v2132_v37 = vld [vmem:[%s3063_s1 + $0x270] sm:$0xf0]  ;;  %v2456_v39 = vld [vmem:[%s3063_s1 + $0x364] sm:$0xf]  ;;  %v2007_v42 = vor.u32 %v2392_v30, %v2004_v35  ;;  %v2202_v19 = vld [vmem:[%s3063_s1 + $0x2e8] sm:$0xf] }
  0xfa   : > { %1452 = vmatpush.bf16.msrb.mxu3 %v2311_v63  ;;  %v2260_v40 = vld [vmem:[%s3063_s1 + $0x370] sm:$0xf0]  ;;  %1375 = vmatmul.bf16.vlgmr.msra.gmra.mxu1 %v3186_v38  ;;  %v2135_v43 = vor.u32 %v2424_v36, %v2132_v37  ;;  %v2356_v44 = vld [vmem:[%s3063_s1 + $0x44] sm:$0xf]  ;;  %v2443_v21 = vld [vmem:[%s3063_s1 + $0x2f4] sm:$0xf0] }
  0xfb   : > { %1411 = vmatpush.bf16.msrb.mxu0 %v1911_v6  ;;  %v1860_v45 = vld [vmem:[%s3063_s1 + $0x50] sm:$0xf0]  ;;  %v2388_v46 = vld [vmem:[%s3063_s1 + $0x144] sm:$0xf]  ;;  %v2263_v47 = vor.u32 %v2456_v39, %v2260_v40  ;;  %v2475_v25 = vld [vmem:[%s3063_s1 + $0x3f4] sm:$0xf0] }
  0xfc   : > { %1425 = vmatpush.bf16.msrb.mxu1 %v2039_v10  ;;  %v1988_v48 = vld [vmem:[%s3063_s1 + $0x150] sm:$0xf0]  ;;  %v2420_v49 = vld [vmem:[%s3063_s1 + $0x244] sm:$0xf]  ;;  %v1863_v53 = vor.u32 %v2356_v44, %v1860_v45  ;;  %v1930_v30 = vld [vmem:[%s3063_s1 + $0xc8] sm:$0xf] }
  0xfd   : > { %1439 = vmatpush.bf16.msrb.mxu2 %v2167_v11  ;;  %v2116_v50 = vld [vmem:[%s3063_s1 + $0x250] sm:$0xf0]  ;;  %v2452_v51 = vld [vmem:[%s3063_s1 + $0x344] sm:$0xf]  ;;  %v1991_v54 = vor.u32 %v2388_v46, %v1988_v48  ;;  %v2375_v32 = vld [vmem:[%s3063_s1 + $0xd4] sm:$0xf0] }
  0xfe   : > { %1453 = vmatpush.bf16.msrb.mxu3 %v2295_v16  ;;  %v2244_v52 = vld [vmem:[%s3063_s1 + $0x350] sm:$0xf0]  ;;  %v2119_v55 = vor.u32 %v2420_v49, %v2116_v50  ;;  %v2352_v56 = vld [vmem:[%s3063_s1 + $0x24] sm:$0xf]  ;;  %v2074_v16 = vld [vmem:[%s3063_s1 + $0x1e8] sm:$0xf] }
  0xff   : > { %1412 = vmatpush.bf16.msrb.mxu0 %v1895_v24  ;;  %v1844_v57 = vld [vmem:[%s3063_s1 + $0x30] sm:$0xf0]  ;;  %v2384_v58 = vld [vmem:[%s3063_s1 + $0x124] sm:$0xf]  ;;  %v2247_v59 = vor.u32 %v2452_v51, %v2244_v52  ;;  %v2330_v24 = vld [vmem:[%s3063_s1 + $0x3e8] sm:$0xf] }
 0x100   : > { %1426 = vmatpush.bf16.msrb.mxu1 %v2023_v28  ;;  %v1972_v60 = vld [vmem:[%s3063_s1 + $0x130] sm:$0xf0]  ;;  %v2416_v61 = vld [vmem:[%s3063_s1 + $0x224] sm:$0xf]  ;;  %v1847_v1 = vor.u32 %v2352_v56, %v1844_v57  ;;  %v2075_v28 = vor.u32 %v2411_v18, %v2074_v16  ;;  %v2058_v33 = vld [vmem:[%s3063_s1 + $0x1c8] sm:$0xf] }
 0x101   : > { %1440 = vmatpush.bf16.msrb.mxu2 %v2151_v29  ;;  %v2100_v62 = vld [vmem:[%s3063_s1 + $0x230] sm:$0xf0]  ;;  %v2448_v63 = vld [vmem:[%s3063_s1 + $0x324] sm:$0xf]  ;;  %v1975_v4 = vor.u32 %v2384_v58, %v1972_v60  ;;  %v2203_v29 = vor.u32 %v2443_v21, %v2202_v19  ;;  %v2407_v35 = vld [vmem:[%s3063_s1 + $0x1d4] sm:$0xf0] }
 0x102   : > { %1454 = vmatpush.bf16.msrb.mxu3 %v2279_v34  ;;  %v2228_v0 = vld [vmem:[%s3063_s1 + $0x330] sm:$0xf0]  ;;  %v2348_v2 = vld [vmem:[%s3063_s1 + $0x4] sm:$0xf]  ;;  %v2103_v5 = vor.u32 %v2416_v61, %v2100_v62  ;;  %v2331_v34 = vor.u32 %v2475_v25, %v2330_v24  ;;  %v2186_v36 = vld [vmem:[%s3063_s1 + $0x2c8] sm:$0xf] }
 0x103   : > { %1413 = vmatpush.bf16.msrb.mxu0 %v1879_v41  ;;  %v1828_v3 = vld [vmem:[%s3063_s1 + $0x10] sm:$0xf0]  ;;  %v2380_v6 = vld [vmem:[%s3063_s1 + $0x104] sm:$0xf]  ;;  %v2231_v9 = vor.u32 %v2448_v63, %v2228_v0  ;;  %v2439_v37 = vld [vmem:[%s3063_s1 + $0x2d4] sm:$0xf0]  ;;  %v1931_v41 = vor.u32 %v2375_v32, %v1930_v30 }
 0x104   : > { %1427 = vmatpush.bf16.msrb.mxu1 %v2007_v42  ;;  %v1956_v7 = vld [vmem:[%s3063_s1 + $0x110] sm:$0xf0]  ;;  %v2412_v8 = vld [vmem:[%s3063_s1 + $0x204] sm:$0xf]  ;;  %v1831_v17 = vor.u32 %v2348_v2, %v1828_v3  ;;  %v2314_v39 = vld [vmem:[%s3063_s1 + $0x3c8] sm:$0xf]  ;;  %v2059_v42 = vor.u32 %v2407_v35, %v2058_v33 }
 0x105   : > { %1441 = vmatpush.bf16.msrb.mxu2 %v2135_v43  ;;  %v2084_v10 = vld [vmem:[%s3063_s1 + $0x210] sm:$0xf0]  ;;  %v2444_v11 = vld [vmem:[%s3063_s1 + $0x304] sm:$0xf]  ;;  %v1959_v22 = vor.u32 %v2380_v6, %v1956_v7  ;;  %v2471_v40 = vld [vmem:[%s3063_s1 + $0x3d4] sm:$0xf0]  ;;  %v2187_v43 = vor.u32 %v2439_v37, %v2186_v36 }
 0x106   : > { %1455 = vmatpush.bf16.msrb.mxu3 %v2263_v47  ;;  %v2212_v12 = vld [vmem:[%s3063_s1 + $0x310] sm:$0xf0]  ;;  %v2087_v23 = vor.u32 %v2412_v8, %v2084_v10  ;;  %v1914_v44 = vld [vmem:[%s3063_s1 + $0xa8] sm:$0xf]  ;;  %v2371_v45 = vld [vmem:[%s3063_s1 + $0xb4] sm:$0xf0]  ;;  %v2315_v47 = vor.u32 %v2471_v40, %v2314_v39 }
 0x107   : > { %1414 = vmatpush.bf16.msrb.mxu0 %v1863_v53  ;;  %v2215_v26 = vor.u32 %v2444_v11, %v2212_v12  ;;  %v2042_v46 = vld [vmem:[%s3063_s1 + $0x1a8] sm:$0xf]  ;;  %v2403_v48 = vld [vmem:[%s3063_s1 + $0x1b4] sm:$0xf0]  ;;  %v1915_v53 = vor.u32 %v2371_v45, %v1914_v44 }
 0x108   : > { %1428 = vmatpush.bf16.msrb.mxu1 %v1991_v54  ;;  %v2170_v49 = vld [vmem:[%s3063_s1 + $0x2a8] sm:$0xf]  ;;  %v2435_v50 = vld [vmem:[%s3063_s1 + $0x2b4] sm:$0xf0]  ;;  %v2043_v54 = vor.u32 %v2403_v48, %v2042_v46 }
 0x109   : > { %1442 = vmatpush.bf16.msrb.mxu2 %v2119_v55  ;;  %v2298_v51 = vld [vmem:[%s3063_s1 + $0x3a8] sm:$0xf]  ;;  %v2467_v52 = vld [vmem:[%s3063_s1 + $0x3b4] sm:$0xf0]  ;;  %v2171_v55 = vor.u32 %v2435_v50, %v2170_v49 }
 0x10a   : > { %1456 = vmatpush.bf16.msrb.mxu3 %v2247_v59  ;;  %v1898_v56 = vld [vmem:[%s3063_s1 + $0x88] sm:$0xf]  ;;  %v2367_v57 = vld [vmem:[%s3063_s1 + $0x94] sm:$0xf0]  ;;  %v2299_v59 = vor.u32 %v2467_v52, %v2298_v51 }
 0x10b   : > { %1415 = vmatpush.bf16.msrb.mxu0 %v1847_v1  ;;  %v2026_v58 = vld [vmem:[%s3063_s1 + $0x188] sm:$0xf]  ;;  %v2399_v60 = vld [vmem:[%s3063_s1 + $0x194] sm:$0xf0]  ;;  %v1899_v1 = vor.u32 %v2367_v57, %v1898_v56  ;;  %v2076_v57 = vld [vmem:[%s3063_s1 + $0x1f8] sm:$0xf0] }
 0x10c   : > { %1429 = vmatpush.bf16.msrb.mxu1 %v1975_v4  ;;  %v2154_v61 = vld [vmem:[%s3063_s1 + $0x288] sm:$0xf]  ;;  %v2431_v62 = vld [vmem:[%s3063_s1 + $0x294] sm:$0xf0]  ;;  %v2027_v2 = vor.u32 %v2399_v60, %v2026_v58  ;;  %v2441_v58 = vld [vmem:[%s3063_s1 + $0x2ec] sm:$0xf] }
 0x10d   : > { %1443 = vmatpush.bf16.msrb.mxu2 %v2103_v5  ;;  %v2282_v63 = vld [vmem:[%s3063_s1 + $0x388] sm:$0xf]  ;;  %v2463_v0 = vld [vmem:[%s3063_s1 + $0x394] sm:$0xf0]  ;;  %v2155_v3 = vor.u32 %v2431_v62, %v2154_v61  ;;  %v2473_v62 = vld [vmem:[%s3063_s1 + $0x3ec] sm:$0xf] }
 0x10e   : > { %1457 = vmatpush.bf16.msrb.mxu3 %v2231_v9  ;;  %v1882_v4 = vld [vmem:[%s3063_s1 + $0x68] sm:$0xf]  ;;  %v2363_v5 = vld [vmem:[%s3063_s1 + $0x74] sm:$0xf0]  ;;  %v2283_v7 = vor.u32 %v2463_v0, %v2282_v63  ;;  %v2332_v63 = vld [vmem:[%s3063_s1 + $0x3f8] sm:$0xf0] }
 0x10f   : > { %1416 = vmatpush.bf16.msrb.mxu0 %v1831_v17  ;;  %v2010_v6 = vld [vmem:[%s3063_s1 + $0x168] sm:$0xf]  ;;  %v2395_v8 = vld [vmem:[%s3063_s1 + $0x174] sm:$0xf0]  ;;  %v1883_v14 = vor.u32 %v2363_v5, %v1882_v4  ;;  %v2373_v4 = vld [vmem:[%s3063_s1 + $0xcc] sm:$0xf] }
 0x110   : > { %1430 = vmatpush.bf16.msrb.mxu1 %v1959_v22  ;;  %v2138_v9 = vld [vmem:[%s3063_s1 + $0x268] sm:$0xf]  ;;  %v2427_v10 = vld [vmem:[%s3063_s1 + $0x274] sm:$0xf0]  ;;  %v2011_v15 = vor.u32 %v2395_v8, %v2010_v6  ;;  %v1932_v5 = vld [vmem:[%s3063_s1 + $0xd8] sm:$0xf0] }
 0x111   : > { %1444 = vmatpush.bf16.msrb.mxu2 %v2087_v23  ;;  %v2266_v11 = vld [vmem:[%s3063_s1 + $0x368] sm:$0xf]  ;;  %v2459_v12 = vld [vmem:[%s3063_s1 + $0x374] sm:$0xf0]  ;;  %v2139_v16 = vor.u32 %v2427_v10, %v2138_v9  ;;  %v2405_v6 = vld [vmem:[%s3063_s1 + $0x1cc] sm:$0xf] }
 0x112   : > { %1458 = vmatpush.bf16.msrb.mxu3 %v2215_v26  ;;  %1417 = vmatmul.bf16.vlgmr.msrb.gmra.mxu0 %v3179_v31  ;;  %v1866_v17 = vld [vmem:[%s3063_s1 + $0x48] sm:$0xf]  ;;  %v2359_v18 = vld [vmem:[%s3063_s1 + $0x54] sm:$0xf0]  ;;  %v2267_v21 = vor.u32 %v2459_v12, %v2266_v11  ;;  %v2060_v8 = vld [vmem:[%s3063_s1 + $0x1d8] sm:$0xf0] }
 0x113   : > { %1465 = vmatpush.bf16.msra.mxu0 %v1947_v27  ;;  %1431 = vmatmul.bf16.vlgmr.msrb.gmra.mxu1 %v3186_v38  ;;  %v1994_v19 = vld [vmem:[%s3063_s1 + $0x148] sm:$0xf]  ;;  %v2391_v22 = vld [vmem:[%s3063_s1 + $0x154] sm:$0xf0]  ;;  %v1867_v27 = vor.u32 %v2359_v18, %v1866_v17  ;;  %v2437_v9 = vld [vmem:[%s3063_s1 + $0x2cc] sm:$0xf] }
 0x114   : > { %1479 = vmatpush.bf16.msra.mxu1 %v2075_v28  ;;  %1445 = vmatmul.bf16.vlgmr.msrb.gmra.mxu2 %v3161_v13  ;;  %v2122_v23 = vld [vmem:[%s3063_s1 + $0x248] sm:$0xf]  ;;  %v2423_v24 = vld [vmem:[%s3063_s1 + $0x254] sm:$0xf0]  ;;  %v1995_v28 = vor.u32 %v2391_v22, %v1994_v19  ;;  %v2188_v10 = vld [vmem:[%s3063_s1 + $0x2d8] sm:$0xf0] }
 0x115   : > { %1493 = vmatpush.bf16.msra.mxu2 %v2203_v29  ;;  %1459 = vmatmul.bf16.vlgmr.msrb.gmra.mxu3 %v3168_v20  ;;  %v2250_v25 = vld [vmem:[%s3063_s1 + $0x348] sm:$0xf]  ;;  %v2455_v26 = vld [vmem:[%s3063_s1 + $0x354] sm:$0xf0]  ;;  %v2123_v29 = vor.u32 %v2423_v24, %v2122_v23  ;;  %v2469_v11 = vld [vmem:[%s3063_s1 + $0x3cc] sm:$0xf] }
 0x116   : > { %1507 = vmatpush.bf16.msra.mxu3 %v2331_v34  ;;  %v1850_v30 = vld [vmem:[%s3063_s1 + $0x28] sm:$0xf]  ;;  %v2355_v32 = vld [vmem:[%s3063_s1 + $0x34] sm:$0xf0]  ;;  %v2251_v34 = vor.u32 %v2455_v26, %v2250_v25  ;;  %v2316_v12 = vld [vmem:[%s3063_s1 + $0x3d8] sm:$0xf0] }
 0x117   : > { %1466 = vmatpush.bf16.msra.mxu0 %v1931_v41  ;;  %v1978_v33 = vld [vmem:[%s3063_s1 + $0x128] sm:$0xf]  ;;  %v2387_v35 = vld [vmem:[%s3063_s1 + $0x134] sm:$0xf0]  ;;  %v1851_v41 = vor.u32 %v2355_v32, %v1850_v30  ;;  %v2369_v17 = vld [vmem:[%s3063_s1 + $0xac] sm:$0xf] }
 0x118   : > { %1480 = vmatpush.bf16.msra.mxu1 %v2059_v42  ;;  %v2106_v36 = vld [vmem:[%s3063_s1 + $0x228] sm:$0xf]  ;;  %v2419_v37 = vld [vmem:[%s3063_s1 + $0x234] sm:$0xf0]  ;;  %v1979_v44 = vor.u32 %v2387_v35, %v1978_v33  ;;  %v1916_v18 = vld [vmem:[%s3063_s1 + $0xb8] sm:$0xf0] }
 0x119   : > { %1494 = vmatpush.bf16.msra.mxu2 %v2187_v43  ;;  %v2234_v39 = vld [vmem:[%s3063_s1 + $0x328] sm:$0xf]  ;;  %v2451_v40 = vld [vmem:[%s3063_s1 + $0x334] sm:$0xf0]  ;;  %v2107_v45 = vor.u32 %v2419_v37, %v2106_v36  ;;  %v2401_v19 = vld [vmem:[%s3063_s1 + $0x1ac] sm:$0xf] }
 0x11a   : > { %1508 = vmatpush.bf16.msra.mxu3 %v2315_v47  ;;  %v1834_v42 = vld [vmem:[%s3063_s1 + $0x8] sm:$0xf]  ;;  %v2351_v43 = vld [vmem:[%s3063_s1 + $0x14] sm:$0xf0]  ;;  %v2235_v49 = vor.u32 %v2451_v40, %v2234_v39  ;;  %v2044_v22 = vld [vmem:[%s3063_s1 + $0x1b8] sm:$0xf0] }
 0x11b   : > { %1467 = vmatpush.bf16.msra.mxu0 %v1915_v53  ;;  %v1962_v46 = vld [vmem:[%s3063_s1 + $0x108] sm:$0xf]  ;;  %v2383_v47 = vld [vmem:[%s3063_s1 + $0x114] sm:$0xf0]  ;;  %v2377_v53 = vld [vmem:[%s3063_s1 + $0xec] sm:$0xf]  ;;  %v1835_v56 = vor.u32 %v2351_v43, %v1834_v42 }
 0x11c   : > { %1481 = vmatpush.bf16.msra.mxu1 %v2043_v54  ;;  %v2090_v48 = vld [vmem:[%s3063_s1 + $0x208] sm:$0xf]  ;;  %v2415_v50 = vld [vmem:[%s3063_s1 + $0x214] sm:$0xf0]  ;;  %v1948_v54 = vld [vmem:[%s3063_s1 + $0xf8] sm:$0xf0]  ;;  %v1963_v60 = vor.u32 %v2383_v47, %v1962_v46 }
 0x11d   : > { %1495 = vmatpush.bf16.msra.mxu2 %v2171_v55  ;;  %v2218_v51 = vld [vmem:[%s3063_s1 + $0x308] sm:$0xf]  ;;  %v2447_v52 = vld [vmem:[%s3063_s1 + $0x314] sm:$0xf0]  ;;  %v2409_v55 = vld [vmem:[%s3063_s1 + $0x1ec] sm:$0xf]  ;;  %v2091_v61 = vor.u32 %v2415_v50, %v2090_v48 }
 0x11e   : > { %1509 = vmatpush.bf16.msra.mxu3 %v2299_v59  ;;  %v2204_v59 = vld [vmem:[%s3063_s1 + $0x2f8] sm:$0xf0]  ;;  %v2219_v0 = vor.u32 %v2447_v52, %v2218_v51  ;;  %v2433_v23 = vld [vmem:[%s3063_s1 + $0x2ac] sm:$0xf] }
 0x11f   : > { %1468 = vmatpush.bf16.msra.mxu0 %v1899_v1  ;;  %v1951_v1 = vor.u32 %v2377_v53, %v1948_v54  ;;  %v2172_v24 = vld [vmem:[%s3063_s1 + $0x2b8] sm:$0xf0]  ;;  %v2465_v25 = vld [vmem:[%s3063_s1 + $0x3ac] sm:$0xf] }
 0x120   : > { %1482 = vmatpush.bf16.msra.mxu1 %v2027_v2  ;;  %v2079_v2 = vor.u32 %v2409_v55, %v2076_v57  ;;  %v2300_v26 = vld [vmem:[%s3063_s1 + $0x3b8] sm:$0xf0]  ;;  %v2365_v30 = vld [vmem:[%s3063_s1 + $0x8c] sm:$0xf] }
 0x121   : > { %1496 = vmatpush.bf16.msra.mxu2 %v2155_v3  ;;  %v2207_v3 = vor.u32 %v2441_v58, %v2204_v59  ;;  %v1900_v32 = vld [vmem:[%s3063_s1 + $0x98] sm:$0xf0]  ;;  %v2397_v33 = vld [vmem:[%s3063_s1 + $0x18c] sm:$0xf] }
 0x122   : > { %1510 = vmatpush.bf16.msra.mxu3 %v2283_v7  ;;  %v2335_v7 = vor.u32 %v2473_v62, %v2332_v63  ;;  %v2028_v35 = vld [vmem:[%s3063_s1 + $0x198] sm:$0xf0]  ;;  %v2429_v36 = vld [vmem:[%s3063_s1 + $0x28c] sm:$0xf] }
 0x123   : > { %1469 = vmatpush.bf16.msra.mxu0 %v1883_v14  ;;  %v1935_v14 = vor.u32 %v2373_v4, %v1932_v5  ;;  %v2156_v37 = vld [vmem:[%s3063_s1 + $0x298] sm:$0xf0]  ;;  %v2461_v39 = vld [vmem:[%s3063_s1 + $0x38c] sm:$0xf]  ;;  %v2031_v42 = vor.u32 %v2397_v33, %v2028_v35 }
 0x124   : > { %1483 = vmatpush.bf16.msra.mxu1 %v2011_v15  ;;  %v2063_v15 = vor.u32 %v2405_v6, %v2060_v8  ;;  %v2284_v40 = vld [vmem:[%s3063_s1 + $0x398] sm:$0xf0]  ;;  %v2159_v43 = vor.u32 %v2429_v36, %v2156_v37  ;;  %v2393_v46 = vld [vmem:[%s3063_s1 + $0x16c] sm:$0xf] }
 0x125   : > { %1497 = vmatpush.bf16.msra.mxu2 %v2139_v16  ;;  %v2191_v16 = vor.u32 %v2437_v9, %v2188_v10  ;;  %v2287_v47 = vor.u32 %v2461_v39, %v2284_v40  ;;  %v2012_v48 = vld [vmem:[%s3063_s1 + $0x178] sm:$0xf0]  ;;  %v2457_v51 = vld [vmem:[%s3063_s1 + $0x36c] sm:$0xf]  ;;  %v553_v39 = vld [vmem:[#allocation2 + $0x30] sm:$0xff] }
 0x126   : > { %1511 = vmatpush.bf16.msra.mxu3 %v2267_v21  ;;  %v2319_v21 = vor.u32 %v2469_v11, %v2316_v12  ;;  %v2140_v50 = vld [vmem:[%s3063_s1 + $0x278] sm:$0xf0]  ;;  %v2015_v54 = vor.u32 %v2393_v46, %v2012_v48  ;;  %v2389_v58 = vld [vmem:[%s3063_s1 + $0x14c] sm:$0xf] }
 0x127   : > { %1470 = vmatpush.bf16.msra.mxu0 %v1867_v27  ;;  %v1919_v27 = vor.u32 %v2369_v17, %v1916_v18  ;;  %v2268_v52 = vld [vmem:[%s3063_s1 + $0x378] sm:$0xf0]  ;;  %v2453_v63 = vld [vmem:[%s3063_s1 + $0x34c] sm:$0xf] }
 0x128   : > { %1484 = vmatpush.bf16.msra.mxu1 %v1995_v28  ;;  %v2047_v28 = vor.u32 %v2401_v19, %v2044_v22  ;;  %v1868_v57 = vld [vmem:[%s3063_s1 + $0x58] sm:$0xf0]  ;;  %v2271_v59 = vor.u32 %v2457_v51, %v2268_v52  ;;  %v2353_v4 = vld [vmem:[%s3063_s1 + $0x2c] sm:$0xf] }
 0x129   : > { %1498 = vmatpush.bf16.msra.mxu2 %v2123_v29  ;;  %v2175_v29 = vor.u32 %v2433_v23, %v2172_v24  ;;  %v2124_v62 = vld [vmem:[%s3063_s1 + $0x258] sm:$0xf0]  ;;  %v2385_v6 = vld [vmem:[%s3063_s1 + $0x12c] sm:$0xf] }
 0x12a   : > { %1512 = vmatpush.bf16.msra.mxu3 %v2251_v34  ;;  %v2303_v34 = vor.u32 %v2465_v25, %v2300_v26  ;;  %v1852_v5 = vld [vmem:[%s3063_s1 + $0x38] sm:$0xf0]  ;;  %v2417_v9 = vld [vmem:[%s3063_s1 + $0x22c] sm:$0xf] }
 0x12b   : > { %1471 = vmatpush.bf16.msra.mxu0 %v1851_v41  ;;  %v1903_v41 = vor.u32 %v2365_v30, %v1900_v32  ;;  %v1980_v8 = vld [vmem:[%s3063_s1 + $0x138] sm:$0xf0]  ;;  %v2449_v11 = vld [vmem:[%s3063_s1 + $0x32c] sm:$0xf] }
 0x12c   : > { %1485 = vmatpush.bf16.msra.mxu1 %v1979_v44  ;;  %v2361_v44 = vld [vmem:[%s3063_s1 + $0x6c] sm:$0xf]  ;;  %v2108_v10 = vld [vmem:[%s3063_s1 + $0x238] sm:$0xf0] }
 0x12d   : > { %1499 = vmatpush.bf16.msra.mxu2 %v2107_v45  ;;  %v1884_v45 = vld [vmem:[%s3063_s1 + $0x78] sm:$0xf0]  ;;  %v2349_v17 = vld [vmem:[%s3063_s1 + $0xc] sm:$0xf] }
 0x12e   : > { %1513 = vmatpush.bf16.msra.mxu3 %v2235_v49  ;;  %v2425_v49 = vld [vmem:[%s3063_s1 + $0x26c] sm:$0xf]  ;;  %v1887_v53 = vor.u32 %v2361_v44, %v1884_v45  ;;  %v2236_v12 = vld [vmem:[%s3063_s1 + $0x338] sm:$0xf0] }
 0x12f   : > { %1472 = vmatpush.bf16.msra.mxu0 %v1835_v56  ;;  %v2143_v55 = vor.u32 %v2425_v49, %v2140_v50  ;;  %v2357_v56 = vld [vmem:[%s3063_s1 + $0x4c] sm:$0xf]  ;;  %v1836_v18 = vld [vmem:[%s3063_s1 + $0x18] sm:$0xf0] }
 0x130   : > { %1486 = vmatpush.bf16.msra.mxu1 %v1963_v60  ;;  %v1996_v60 = vld [vmem:[%s3063_s1 + $0x158] sm:$0xf0]  ;;  %v2381_v19 = vld [vmem:[%s3063_s1 + $0x10c] sm:$0xf] }
 0x131   : > { %1500 = vmatpush.bf16.msra.mxu2 %v2091_v61  ;;  %v2421_v61 = vld [vmem:[%s3063_s1 + $0x24c] sm:$0xf]  ;;  %v1964_v22 = vld [vmem:[%s3063_s1 + $0x118] sm:$0xf0] }
 0x132   : > { %1514 = vmatpush.bf16.msra.mxu3 %v2219_v0  ;;  %1473 = vmatmul.bf16.vlgmr.msra.gmra.mxu0 %v3179_v31  ;;  %v2252_v0 = vld [vmem:[%s3063_s1 + $0x358] sm:$0xf0]  ;;  %v2413_v23 = vld [vmem:[%s3063_s1 + $0x20c] sm:$0xf] }
 0x133   : > { %1521 = vmatpush.bf16.msrb.mxu0 %v1951_v1  ;;  %1487 = vmatmul.bf16.vlgmr.msra.gmra.mxu1 %v3186_v38  ;;  %v1871_v1 = vor.u32 %v2357_v56, %v1868_v57  ;;  %v2092_v24 = vld [vmem:[%s3063_s1 + $0x218] sm:$0xf0]  ;;  %v2445_v25 = vld [vmem:[%s3063_s1 + $0x30c] sm:$0xf] }
 0x134   : > { %1535 = vmatpush.bf16.msrb.mxu1 %v2079_v2  ;;  %1501 = vmatmul.bf16.vlgmr.msra.gmra.mxu2 %v3161_v13  ;;  %v1999_v2 = vor.u32 %v2389_v58, %v1996_v60  ;;  %v2220_v26 = vld [vmem:[%s3063_s1 + $0x318] sm:$0xf0]  ;;  %v557_v46 = vld [vmem:[#allocation2 + $0x8] sm:$0xff] }
 0x135   : > { %1549 = vmatpush.bf16.msrb.mxu2 %v2207_v3  ;;  %1515 = vmatmul.bf16.vlgmr.msra.gmra.mxu3 %v3168_v20  ;;  %v2127_v3 = vor.u32 %v2421_v61, %v2124_v62  ;;  %v2223_v30 = vor.u32 %v2445_v25, %v2220_v26  ;;  %v558_v62 = vld [vmem:[#allocation2 + $0x20] sm:$0xff] }
 0x136   : > { %1563 = vmatpush.bf16.msrb.mxu3 %v2335_v7  ;;  %v2255_v7 = vor.u32 %v2453_v63, %v2252_v0 }
 0x137   : > { %1522 = vmatpush.bf16.msrb.mxu0 %v1935_v14  ;;  %v1855_v14 = vor.u32 %v2353_v4, %v1852_v5 }
 0x138   : > { %1536 = vmatpush.bf16.msrb.mxu1 %v2063_v15  ;;  %v1983_v15 = vor.u32 %v2385_v6, %v1980_v8 }
 0x139   : > { %1550 = vmatpush.bf16.msrb.mxu2 %v2191_v16  ;;  %v2111_v16 = vor.u32 %v2417_v9, %v2108_v10 }
 0x13a   : > { %1564 = vmatpush.bf16.msrb.mxu3 %v2319_v21  ;;  %v2239_v21 = vor.u32 %v2449_v11, %v2236_v12 }
 0x13b   : > { %1523 = vmatpush.bf16.msrb.mxu0 %v1919_v27  ;;  %v1839_v27 = vor.u32 %v2349_v17, %v1836_v18  ;;  %v559_v17 = vld [vmem:[#allocation2 + $0x28] sm:$0xff] }
 0x13c   : > { %1537 = vmatpush.bf16.msrb.mxu1 %v2047_v28  ;;  %v1967_v28 = vor.u32 %v2381_v19, %v1964_v22 }
 0x13d   : > { %1551 = vmatpush.bf16.msrb.mxu2 %v2175_v29  ;;  %v2095_v29 = vor.u32 %v2413_v23, %v2092_v24 }
 0x13e   : > { %1565 = vmatpush.bf16.msrb.mxu3 %v2303_v34 }
 0x13f   : > { %1524 = vmatpush.bf16.msrb.mxu0 %v1903_v41 }
 0x140   : > { %1538 = vmatpush.bf16.msrb.mxu1 %v2031_v42 }
 0x141   : > { %1552 = vmatpush.bf16.msrb.mxu2 %v2159_v43 }
 0x142   : > { %1566 = vmatpush.bf16.msrb.mxu3 %v2287_v47 }
 0x143   : > { %1525 = vmatpush.bf16.msrb.mxu0 %v1887_v53  ;;  %v554_v53 = vld [vmem:[#allocation2] sm:$0xff] }
 0x144   : > { %1539 = vmatpush.bf16.msrb.mxu1 %v2015_v54 }
 0x145   : > { %1553 = vmatpush.bf16.msrb.mxu2 %v2143_v55 }
 0x146   : > { %1567 = vmatpush.bf16.msrb.mxu3 %v2271_v59 }
 0x147   : > { %1526 = vmatpush.bf16.msrb.mxu0 %v1871_v1 }
 0x148   : > { %1540 = vmatpush.bf16.msrb.mxu1 %v1999_v2 }
 0x149   : > { %1554 = vmatpush.bf16.msrb.mxu2 %v2127_v3 }
 0x14a   : > { %1568 = vmatpush.bf16.msrb.mxu3 %v2255_v7  ;;  %v555_v7 = vld [vmem:[#allocation2 + $0x18] sm:$0xff] }
 0x14b   : > { %1527 = vmatpush.bf16.msrb.mxu0 %v1855_v14 }
 0x14c   : > { %1541 = vmatpush.bf16.msrb.mxu1 %v1983_v15 }
 0x14d   : > { %1555 = vmatpush.bf16.msrb.mxu2 %v2111_v16 }
 0x14e   : > { %1569 = vmatpush.bf16.msrb.mxu3 %v2239_v21 }
 0x14f   : > { %1528 = vmatpush.bf16.msrb.mxu0 %v1839_v27  ;;  %v556_v27 = vld [vmem:[#allocation2 + $0x10] sm:$0xff] }
 0x150   : > { %1542 = vmatpush.bf16.msrb.mxu1 %v1967_v28 }
 0x151   : > { %1556 = vmatpush.bf16.msrb.mxu2 %v2095_v29 }
 0x152   : > { %1570 = vmatpush.bf16.msrb.mxu3 %v2223_v30  ;;  %1529 = vmatmul.bf16.vlgmr.msrb.gmra.mxu0 %v3179_v31 }
 0x153   : > { %1543 = vmatmul.bf16.vlgmr.msrb.gmra.mxu1 %v3186_v38 }
 0x154   : > { %1557 = vmatmul.bf16.vlgmr.msrb.gmra.mxu2 %v3161_v13 }
 0x155   : > { %1571 = vmatmul.bf16.vlgmr.msrb.gmra.mxu3 %v3168_v20 }
 0x175   : > { %v1362_v32 = vpop.f32.mrf.mxu0 }
 0x177   : > { %v1376_v33 = vpop.f32.mrf.mxu1  ;;  %v1390_v35 = vpop.f32.mrf.mxu2 }
 0x178   : > { %v1377_v34 = vadd.f32 %v1376_v33, %v1362_v32 }
 0x17a   : > { %v1404_v36 = vpop.f32.mrf.mxu3  ;;  %v1391_v37 = vadd.f32 %v1390_v35, %v1377_v34 }
 0x17c   : > { %v1405_v40 = vadd.f32 %v1404_v36, %v1391_v37  ;;  %v560_v36 = vld [vmem:[#allocation2 + $0x38] sm:$0xff] }
 0x17d   : > { %v1364_v42 = vpop.f32.mrf.mxu0 }
 0x17e   : > { %v1577_v41 = vadd.f32 %v1405_v40, %v553_v39 }
 0x17f   : > { %v1378_v43 = vpop.f32.mrf.mxu1  ;;  %v1392_v31 = vpop.f32.mrf.mxu2 }
 0x180   : > { %1585 = vst [vmem:[#allocation2 + $0x30] sm:$0xff] %v1577_v41  ;;  %v1379_v44 = vadd.f32 %v1378_v43, %v1364_v42 }
 0x182   : > { %v1406_v45 = vpop.f32.mrf.mxu3  ;;  %v1393_v38 = vadd.f32 %v1392_v31, %v1379_v44 }
 0x184   : > { %v1407_v13 = vadd.f32 %v1406_v45, %v1393_v38 }
 0x186   : > { %v1581_v47 = vadd.f32 %v1407_v13, %v557_v46 }
 0x188   : > { %1589 = vst [vmem:[#allocation2 + $0x8] sm:$0xff] %v1581_v47 }
 0x18f   : > { %v1418_v20 = vpop.f32.mrf.mxu0 }
 0x190   : > { %v1432_v48 = vpop.f32.mrf.mxu1 }
 0x191   : > { %v1433_v49 = vadd.f32 %v1432_v48, %v1418_v20 }
 0x197   : > { %v1446_v50 = vpop.f32.mrf.mxu2  ;;  %v1420_v55 = vpop.f32.mrf.mxu0 }
 0x198   : > { %v1447_v51 = vadd.f32 %v1446_v50, %v1433_v49  ;;  %v1460_v52 = vpop.f32.mrf.mxu3  ;;  %v1434_v56 = vpop.f32.mrf.mxu1 }
 0x199   : > { %v1435_v58 = vadd.f32 %v1434_v56, %v1420_v55 }
 0x19a   : > { %v1461_v54 = vadd.f32 %v1460_v52, %v1447_v51 }
 0x19c   : > { %v1578_v57 = vadd.f32 %v1461_v54, %v554_v53 }
 0x19e   : > { %1586 = vst [vmem:[#allocation2] sm:$0xff] %v1578_v57 }
 0x19f   : > { %v1448_v59 = vpop.f32.mrf.mxu2 }
 0x1a0   : > { %v1449_v60 = vadd.f32 %v1448_v59, %v1435_v58  ;;  %v1462_v61 = vpop.f32.mrf.mxu3 }
 0x1a2   : > { %v1463_v63 = vadd.f32 %v1462_v61, %v1449_v60 }
 0x1a4   : > { %v1582_v0 = vadd.f32 %v1463_v63, %v558_v62 }
 0x1a6   : > { %1590 = vst [vmem:[#allocation2 + $0x20] sm:$0xff] %v1582_v0 }
 0x1af   : > { %v1474_v1 = vpop.f32.mrf.mxu0 }
 0x1b0   : > { %v1488_v2 = vpop.f32.mrf.mxu1 }
 0x1b1   : > { %v1489_v3 = vadd.f32 %v1488_v2, %v1474_v1 }
 0x1b7   : > { %v1502_v4 = vpop.f32.mrf.mxu2  ;;  %v1476_v9 = vpop.f32.mrf.mxu0 }
 0x1b8   : > { %v1503_v5 = vadd.f32 %v1502_v4, %v1489_v3  ;;  %v1516_v6 = vpop.f32.mrf.mxu3  ;;  %v1490_v10 = vpop.f32.mrf.mxu1 }
 0x1b9   : > { %v1491_v12 = vadd.f32 %v1490_v10, %v1476_v9 }
 0x1ba   : > { %v1517_v8 = vadd.f32 %v1516_v6, %v1503_v5 }
 0x1bc   : > { %v1579_v11 = vadd.f32 %v1517_v8, %v555_v7 }
 0x1be   : > { %1587 = vst [vmem:[#allocation2 + $0x18] sm:$0xff] %v1579_v11 }
 0x1bf   : > { %v1504_v14 = vpop.f32.mrf.mxu2 }
 0x1c0   : > { %v1505_v15 = vadd.f32 %v1504_v14, %v1491_v12  ;;  %v1518_v16 = vpop.f32.mrf.mxu3 }
 0x1c2   : > { %v1519_v18 = vadd.f32 %v1518_v16, %v1505_v15 }
 0x1c4   : > { %v1583_v19 = vadd.f32 %v1519_v18, %v559_v17 }
 0x1c6   : > { %1591 = vst [vmem:[#allocation2 + $0x28] sm:$0xff] %v1583_v19 }
 0x1cf   : > { %v1530_v21 = vpop.f32.mrf.mxu0 }
 0x1d0   : > { %v1544_v22 = vpop.f32.mrf.mxu1 }
 0x1d1   : > { %v1545_v23 = vadd.f32 %v1544_v22, %v1530_v21 }
 0x1d7   : > { %v1558_v24 = vpop.f32.mrf.mxu2  ;;  %v1532_v29 = vpop.f32.mrf.mxu0 }
 0x1d8   : > { %v1559_v25 = vadd.f32 %v1558_v24, %v1545_v23  ;;  %v1572_v26 = vpop.f32.mrf.mxu3  ;;  %v1546_v30 = vpop.f32.mrf.mxu1 }
 0x1d9   : > { %v1547_v33 = vadd.f32 %v1546_v30, %v1532_v29 }
 0x1da   : > { %v1573_v28 = vadd.f32 %v1572_v26, %v1559_v25 }
 0x1dc   : > { %v1580_v32 = vadd.f32 %v1573_v28, %v556_v27 }
 0x1de   : > { %1588 = vst [vmem:[#allocation2 + $0x10] sm:$0xff] %v1580_v32 }
 0x1df   : > { %v1560_v34 = vpop.f32.mrf.mxu2 }
 0x1e0   : > { %v1561_v35 = vadd.f32 %v1560_v34, %v1547_v33  ;;  %v1574_v37 = vpop.f32.mrf.mxu3 }
 0x1e2   : > { %v1575_v39 = vadd.f32 %v1574_v37, %v1561_v35  ;;  %1596 = sbr.rel (%p2336_p5) target bundleno = 502 (0x1f6), region = 86 }
 0x1e4   : > { %v1584_v40 = vadd.f32 %v1575_v39, %v560_v36 }
 0x1e6   : > { %1592 = vst [vmem:[#allocation2 + $0x38] sm:$0xff] %v1584_v40 }
 0x1e7   : > { %v1597_v41 = vld [vmem:[#allocation2 + $0x30] sm:$0xff]  ;;  %v1605_v42 = vld [vmem:[%s537_s5] sm:$0xf]  ;;  %v1599_v45 = vld [vmem:[#allocation2 + $0x18] sm:$0xff] }
 0x1e8   : > { %v1598_v43 = vld [vmem:[#allocation2] sm:$0xff]  ;;  %v1607_v44 = vperm.slane %v1605_v42, 0  ;;  %v1608_v31 = vperm.slane %v1605_v42, 1  ;;  %v1609_v38 = vperm.slane %v1605_v42, 2  ;;  %v1600_v46 = vld [vmem:[#allocation2 + $0x10] sm:$0xff]  ;;  %v1610_v13 = vperm.slane %v1605_v42, 3 }
 0x1e9   : > { %v1601_v47 = vld [vmem:[#allocation2 + $0x8] sm:$0xff]  ;;  %v1602_v20 = vld [vmem:[#allocation2 + $0x20] sm:$0xff] }
 0x1ea   : > { %v1603_v48 = vld [vmem:[#allocation2 + $0x28] sm:$0xff]  ;;  %v1615_v49 = vadd.f32 %v1607_v44, %v1597_v41  ;;  %v1616_v50 = vadd.f32 %v1608_v31, %v1598_v43  ;;  %v1617_v51 = vadd.f32 %v1609_v38, %v1599_v45  ;;  %v1618_v52 = vadd.f32 %v1610_v13, %v1600_v46 }
 0x1eb   : > { %v1619_v54 = vadd.f32 %v1607_v44, %v1601_v47  ;;  %v1620_v55 = vadd.f32 %v1608_v31, %v1602_v20  ;;  %v1621_v59 = vadd.f32 %v1609_v38, %v1603_v48 }
 0x1ec   : > { %v1623_v56 = vmax.f32 %v1615_v49, 0.0  ;;  %v1624_v57 = vmax.f32 %v1616_v50, 0.0  ;;  %v1625_v58 = vmax.f32 %v1617_v51, 0.0  ;;  %v1626_v60 = vmax.f32 %v1618_v52, 0.0 }
 0x1ed   : > { %v1604_v53 = vld [vmem:[#allocation2 + $0x38] sm:$0xff]  ;;  %v1627_v62 = vmax.f32 %v1619_v54, 0.0  ;;  %v1628_v63 = vmax.f32 %v1620_v55, 0.0  ;;  %v1629_v0 = vmax.f32 %v1621_v59, 0.0 }
 0x1ee   : > { %v1622_v61 = vadd.f32 %v1610_v13, %v1604_v53  ;;  %1631 = vst [vmem:[%s3065_s25] sm:$0xff] %v1623_v56 }
 0x1ef   : > { %1632 = vst [vmem:[%s3065_s25 + $0x8] sm:$0xff] %v1624_v57 }
 0x1f0   : > { %1633 = vst [vmem:[%s3065_s25 + $0x10] sm:$0xff] %v1625_v58  ;;  %v1630_v1 = vmax.f32 %v1622_v61, 0.0 }
 0x1f1   : > { %1634 = vst [vmem:[%s3065_s25 + $0x18] sm:$0xff] %v1626_v60 }
 0x1f2   : > { %1635 = vst [vmem:[%s3065_s25 + $0x20] sm:$0xff] %v1627_v62 }
 0x1f3   : > { %1636 = vst [vmem:[%s3065_s25 + $0x28] sm:$0xff] %v1628_v63 }
 0x1f4   : > { %1637 = vst [vmem:[%s3065_s25 + $0x30] sm:$0xff] %v1629_v0 }
 0x1f5   : > { %1638 = vst [vmem:[%s3065_s25 + $0x38] sm:$0xff] %v1630_v1 }
 0x1f6 PF: > { %1645 = sbr.rel (!%p2769_p12) target bundleno = 512 (0x200), region = 90  ;;  %s2476_s14 = sshll.u32 (%p2769_p12), %s2640_s19, 5  ;;  %v1664_v2 = vld [vmem:[%s3065_s25] sm:$0xff] (%p2769_p12)  ;;  %v1666_v3 = vld [vmem:[%s3065_s25 + $0x8] sm:$0xff] (%p2769_p12) }
 0x1f7   : > { %s1651_s0 = scalar_lea.vmem (%p2769_p12), %s3420_s3, %s2476_s14  ;;  %v1668_v4 = vld [vmem:[%s3065_s25 + $0x10] sm:$0xff] (%p2769_p12) }
 0x1f8   : > { %1665 = vst [vmem:[%s1651_s0] sm:$0xff] (%p2769_p12), %v1664_v2  ;;  %v1670_v5 = vld [vmem:[%s3065_s25 + $0x18] sm:$0xff] (%p2769_p12) }
 0x1f9   : > { %1667 = vst [vmem:[%s1651_s0 + $0x8] sm:$0xff] (%p2769_p12), %v1666_v3  ;;  %v1672_v6 = vld [vmem:[%s3065_s25 + $0x20] sm:$0xff] (%p2769_p12) }
 0x1fa   : > { %1669 = vst [vmem:[%s1651_s0 + $0x10] sm:$0xff] (%p2769_p12), %v1668_v4  ;;  %v1674_v7 = vld [vmem:[%s3065_s25 + $0x28] sm:$0xff] (%p2769_p12) }
 0x1fb   : > { %1671 = vst [vmem:[%s1651_s0 + $0x18] sm:$0xff] %v1670_v5  ;;  %v1676_v8 = vld [vmem:[%s3065_s25 + $0x30] sm:$0xff] }
 0x1fc   : > { %1673 = vst [vmem:[%s1651_s0 + $0x100] sm:$0xff] %v1672_v6  ;;  %v1678_v9 = vld [vmem:[%s3065_s25 + $0x38] sm:$0xff] }
 0x1fd   : > { %1675 = vst [vmem:[%s1651_s0 + $0x108] sm:$0xff] %v1674_v7 }
 0x1fe   : > { %1677 = vst [vmem:[%s1651_s0 + $0x110] sm:$0xff] %v1676_v8 }
 0x1ff   : > { %1679 = vst [vmem:[%s1651_s0 + $0x118] sm:$0xff] %v1678_v9 }
 0x200 PF: > { %s13_s22 = sadd.s32 1, %s2652_s22   ;;  %s3430_s10 = sld [smem:[#allocation6_spill]] }
 0x201   : > { %p10_p6 = scmp.ge.s32.totalorder %s13_s22, 66   ;;  %s3431_s12 = smov %s2616_s13 }
 0x202   : > { %s3432_s13 = smov %s2767_s9  ;;  %s3433_s14 = smov %s2624_s15 }
 0x203   : > { %s3434_s15 = smov %s2764_s8  ;;  %s3435_s16 = smov %s2632_s17 }
 0x204   : > { %s3436_s17 = smov %s2750_s30  ;;  %s3437_s18 = smov %s2644_s20 }
 0x205   : > { %s3438_s19 = smov %s2648_s21  ;;  %s3439_s20 = smov %s3442_s24 }
 0x206   : > { %s3440_s21 = smov %s3430_s10  ;;  %12 = sbr.rel (!%p10_p6) target bundleno = 9 (0x9), region = 155 }

// kernel: mynet2_forward.15
= control target key start
LH: loop header
LB: loop body
LE: loop exit
PB: predicated region body
PF: predicated region fallthrough
CT: control target
= control target key end

     0   :  { %8 = vsyncpa [#allocation5], 0  ;;  %s1278_s0 = inlined_call_operand.vmem [shape: bf16[16,4096], index: 0, kind: input, shape index: {}]   ;;  %s1279_s1 = inlined_call_operand.hbm [shape: bf16[4096,128], index: 1, kind: input, shape index: {}]   ;;  %s1280_s2 = inlined_call_operand.vmem [shape: f32[1,128], index: 2, kind: input, shape index: {}]   ;;  %s1281_s3 = inlined_call_operand.vmem [shape: f32[16,128], index: 3, kind: output, shape index: {}]  }
   0x1   :  { %10 = vsyncpa [#allocation5 + $0x1], 0  ;;  %s1133_s12 = smov 0   ;;  %s1135_s13 = smov 0  }
   0x2   :  { %s1137_s14 = smov 0   ;;  %s1139_s15 = smov 0  }
   0x3   :  { %s1141_s16 = smov 0   ;;  %s1143_s17 = smov 0  }
   0x4 LB: > { %s775_s18 = sadd.s32 4294967295, %s1108_s17   ;;  %s28_s19 = sadd.s32 1, %s1104_s16  ;;  %s1108_s17 = sphi %s1143_s17, %s16_s17   ;;  %s1104_s16 = sphi %s1141_s16, %s1288_s16   ;;  %s1100_s15 = sphi %s1139_s15, %s1287_s15   ;;  %s1096_s14 = sphi %s1137_s14, %s1286_s14   ;;  %s1092_s13 = sphi %s1135_s13, %s1285_s13   ;;  %s1088_s12 = sphi %s1133_s12, %s1284_s12  }
   0x5   : > { %p29_p0 = scmp.ge.s32.totalorder %s28_s19, 8  ;;  %s44_s20 = sadd.s32 1, %s1096_s14 }
   0x6   : > { %p51_p1 = scmp.ne.s32.totalorder %s1096_s14, %s1092_s13  ;;  %p52_p2 = scmp.eq.s32.totalorder %s1108_s17, 0 }
   0x7   : > { %s1290_s19 = smov (%p29_p0, %s28_s19), 0  ;;  %p85_p4 = scmp.ne.s32.totalorder %s1092_s13, %s1088_s12 }
   0x8   : > { %p1169_p3 = por %p52_p2, %p51_p1  ;;  %s40_s22 = ssub.s32 %s1104_s16, %s1290_s19 }
   0x9   : > { %p86_p5 = scmp.eq.s32.totalorder %s775_s18, 0  ;;  %p42_p6 = scmp.eq.s32.totalorder %s40_s22, 0 }
   0xa   : > { %p778_p8 = scmp.ge.s32.totalorder %s1108_s17, 8 }
   0xb   : > { %p1176_p7 = por %p86_p5, %p85_p4 }
   0xc   : > { %s1181_s24 = scalar_select %p42_p6, %s1096_s14, %s44_s20  }
   0xd   : > { %165 = sbr.rel (%p778_p8) target bundleno = 32 (0x20), region = 20 }
  0x12   : > { %168 = sbr.rel (!%p1169_p3) target bundleno = 26 (0x1a), region = 24  ;;  %s170_s25 = sand.u32 (%p1169_p3), 1, %s1096_s14  }
  0x13   : > { %s938_s26 = sshll.u32 (%p1169_p3), %s1104_s16, 4  ;;  %s779_s27 = sshll.u32 (%p1169_p3), %s170_s25, 5 }
  0x14   : > { %s178_s30 = scalar_lea.vmem (%p1169_p3), %s1278_s0, %s938_s26  ;;  %s172_s4 = scalar_lea.vmem (%p1169_p3), [#allocation3], %s779_s27 }
  0x15   : > { %v191_v0 = vld [vmem:[%s178_s30] sm:$0xff] (%p1169_p3)  ;;  %v193_v1 = vld [vmem:[%s178_s30 + $0x8] sm:$0xff] (%p1169_p3) }
  0x16   : > { %v195_v2 = vld [vmem:[%s178_s30 + $0x80] sm:$0xff] (%p1169_p3)  ;;  %192 = vst [vmem:[%s172_s4] sm:$0xff] (%p1169_p3), %v191_v0  ;;  %v197_v3 = vld [vmem:[%s178_s30 + $0x88] sm:$0xff] (%p1169_p3) }
  0x17   : > { %194 = vst [vmem:[%s172_s4 + $0x8] sm:$0xff] %v193_v1 }
  0x18   : > { %196 = vst [vmem:[%s172_s4 + $0x10] sm:$0xff] %v195_v2 }
  0x19   : > { %198 = vst [vmem:[%s172_s4 + $0x18] sm:$0xff] %v197_v3 }
  0x1a PF: > { %s205_s5 = sand.u32 1, %s1096_s14   ;;  %s939_s6 = sshll.u32 %s1104_s16, 8 }
  0x1b   : > { %s782_s7 = sshll.u32 %s205_s5, 8  ;;  %s215_s10 = scalar_lea.hbm %s1279_s1, %s939_s6 }
  0x1c   : > { %s216_s11 = sshll.u32 %s215_s10, 4  ;;  %s209_s12 = scalar_lea.vmem [#allocation4], %s782_s7  ;;  %s217_s11 = int_to_ptr.hbm [resolvable:$true] %s216_s11 }
  0x1d   : > { %s218_s18 = sshll.u32 %s209_s12, 4  ;;  %s206_s20 = scalar_lea.sflag [#allocation5], %s205_s5  ;;  %s219_s18 = int_to_ptr.vmem [resolvable:$true] %s218_s18 }
  0x1e   : > { %s1110_s22 = smov 64   ;;  %s1111_s25 = smov 4  }
  0x1f   : > { %976 = dma.hbm_to_vmem [thread:$0]  (%p1169_p3), %s217_s11, 4096, %s219_s18, %s206_s20, %s1110_s22, %s1110_s22, %s1111_s25  }
  0x20 PF: > { %p785_p9 = scmp.ge.s32.totalorder %s1108_s17, 1  ;;  %p226_p10 = scmp.lt.s32.totalorder %s1108_s17, 9 }
  0x22   : > { %p227_p11 = pnand %p785_p9, %p226_p10 }
  0x23   : > { %s233_s26 = sand.u32 (!%p227_p11), 1, %s1092_s13  }
  0x24   : > { %230 = sbr.rel (%p227_p11) target bundleno = 243 (0xf3), region = 51  ;;  %s786_s27 = sshll.u32 (!%p227_p11), %s233_s26, 5 }
  0x25   : > { %s787_s28 = sshll.u32 (!%p227_p11), %s233_s26, 8  ;;  %s1201_s29 = scalar_lea.vmem (!%p227_p11), [#allocation3], %s786_s27 }
  0x26   : > { %s240_s30 = scalar_lea.sflag (!%p227_p11), [#allocation5], %s233_s26  ;;  %s1203_s4 = scalar_lea.vmem (!%p227_p11), [#allocation4], %s787_s28 }
  0x29   : > { %1083 = dma.done.wait (%p1176_p7), %s240_s30, 4096  }
  0x2a   : > { %1085 = vsyncadd (%p1176_p7), %s240_s30, 4294963200  ;;  %p788_p12 = scmp.ne.s32.totalorder %s1100_s15, 0 }
  0x2c   : > { %295 = sbr.rel (%p788_p12) target bundleno = 52 (0x34), region = 63 }
  0x31   : > { %v1112_v4 = vmov 0.0  }
  0x32   : > { %296 = vst [vmem:[#allocation2] sm:$0xff] %v1112_v4 }
  0x33   : > { %297 = vst [vmem:[#allocation2 + $0x8] sm:$0xff] %v1112_v4 }
  0x34 PF: > { %v951_v5 = vld [vmem:[%s1203_s4 + $0x38] sm:$0xff]  ;;  %v950_v9 = vld [vmem:[%s1203_s4 + $0x30] sm:$0xff]  ;;  %v949_v13 = vld [vmem:[%s1203_s4 + $0x28] sm:$0xff]  ;;  %p933_p13 = scmp.ne.s32.totalorder %s1100_s15, 7 }
  0x35   : > { %v959_v6 = vld [vmem:[%s1203_s4 + $0x78] sm:$0xff]  ;;  %580 = vmatpush.bf16.msra.mxu0 %v951_v5  ;;  %v958_v10 = vld [vmem:[%s1203_s4 + $0x70] sm:$0xff]  ;;  %v957_v14 = vld [vmem:[%s1203_s4 + $0x68] sm:$0xff] }
  0x36   : > { %v967_v7 = vld [vmem:[%s1203_s4 + $0xb8] sm:$0xff]  ;;  %594 = vmatpush.bf16.msra.mxu1 %v959_v6  ;;  %v966_v11 = vld [vmem:[%s1203_s4 + $0xb0] sm:$0xff]  ;;  %v965_v15 = vld [vmem:[%s1203_s4 + $0xa8] sm:$0xff] }
  0x37   : > { %v975_v8 = vld [vmem:[%s1203_s4 + $0xf8] sm:$0xff]  ;;  %608 = vmatpush.bf16.msra.mxu2 %v967_v7  ;;  %v974_v12 = vld [vmem:[%s1203_s4 + $0xf0] sm:$0xff]  ;;  %v973_v16 = vld [vmem:[%s1203_s4 + $0xe8] sm:$0xff] }
  0x38   : > { %622 = vmatpush.bf16.msra.mxu3 %v975_v8  ;;  %v948_v17 = vld [vmem:[%s1203_s4 + $0x20] sm:$0xff]  ;;  %v947_v21 = vld [vmem:[%s1203_s4 + $0x18] sm:$0xff]  ;;  %v946_v25 = vld [vmem:[%s1203_s4 + $0x10] sm:$0xff] }
  0x39   : > { %581 = vmatpush.bf16.msra.mxu0 %v950_v9  ;;  %v956_v18 = vld [vmem:[%s1203_s4 + $0x60] sm:$0xff]  ;;  %v955_v22 = vld [vmem:[%s1203_s4 + $0x58] sm:$0xff]  ;;  %v954_v26 = vld [vmem:[%s1203_s4 + $0x50] sm:$0xff] }
  0x3a   : > { %595 = vmatpush.bf16.msra.mxu1 %v958_v10  ;;  %v964_v19 = vld [vmem:[%s1203_s4 + $0xa0] sm:$0xff]  ;;  %v963_v23 = vld [vmem:[%s1203_s4 + $0x98] sm:$0xff]  ;;  %v962_v27 = vld [vmem:[%s1203_s4 + $0x90] sm:$0xff] }
  0x3b   : > { %609 = vmatpush.bf16.msra.mxu2 %v966_v11  ;;  %v972_v20 = vld [vmem:[%s1203_s4 + $0xe0] sm:$0xff]  ;;  %v971_v24 = vld [vmem:[%s1203_s4 + $0xd8] sm:$0xff]  ;;  %v970_v28 = vld [vmem:[%s1203_s4 + $0xd0] sm:$0xff] }
  0x3c   : > { %623 = vmatpush.bf16.msra.mxu3 %v974_v12  ;;  %v945_v29 = vld [vmem:[%s1203_s4 + $0x8] sm:$0xff]  ;;  %v944_v33 = vld [vmem:[%s1203_s4] sm:$0xff]  ;;  %v942_v38 = vld [vmem:[%s1201_s29 + $0xc] sm:$0xf0] }
  0x3d   : > { %582 = vmatpush.bf16.msra.mxu0 %v949_v13  ;;  %v953_v30 = vld [vmem:[%s1203_s4 + $0x48] sm:$0xff]  ;;  %v952_v34 = vld [vmem:[%s1203_s4 + $0x40] sm:$0xff]  ;;  %v793_v40 = vld [vmem:[%s1201_s29 + $0x10] sm:$0xf0] }
  0x3e   : > { %596 = vmatpush.bf16.msra.mxu1 %v957_v14  ;;  %v961_v31 = vld [vmem:[%s1203_s4 + $0x88] sm:$0xff]  ;;  %v960_v35 = vld [vmem:[%s1203_s4 + $0x80] sm:$0xff]  ;;  %v943_v42 = vld [vmem:[%s1201_s29 + $0x14] sm:$0xf0] }
  0x3f   : > { %610 = vmatpush.bf16.msra.mxu2 %v965_v15  ;;  %v969_v32 = vld [vmem:[%s1203_s4 + $0xc8] sm:$0xff]  ;;  %v968_v36 = vld [vmem:[%s1203_s4 + $0xc0] sm:$0xff]  ;;  %v801_v44 = vld [vmem:[%s1201_s29 + $0x18] sm:$0xf0] }
  0x40   : > { %624 = vmatpush.bf16.msra.mxu3 %v973_v16  ;;  %v791_v37 = vld [vmem:[%s1201_s29] sm:$0xf]  ;;  %v940_v39 = vld [vmem:[%s1201_s29 + $0x4] sm:$0xf]  ;;  %v799_v41 = vld [vmem:[%s1201_s29 + $0x8] sm:$0xf] }
  0x41   : > { %583 = vmatpush.bf16.msra.mxu0 %v948_v17  ;;  %v941_v43 = vld [vmem:[%s1201_s29 + $0xc] sm:$0xf]  ;;  %v792_v45 = vor.u32 %v942_v38, %v791_v37  ;;  %v796_v46 = vor.u32 %v940_v39, %v793_v40  ;;  %v800_v47 = vor.u32 %v943_v42, %v799_v41  ;;  %v298_v55 = vld [vmem:[#allocation2] sm:$0xff]  ;;  %v299_v63 = vld [vmem:[#allocation2 + $0x8] sm:$0xff] }
  0x42   : > { %597 = vmatpush.bf16.msra.mxu1 %v956_v18  ;;  %v804_v48 = vor.u32 %v941_v43, %v801_v44 }
  0x43   : > { %611 = vmatpush.bf16.msra.mxu2 %v964_v19 }
  0x44   : > { %625 = vmatpush.bf16.msra.mxu3 %v972_v20 }
  0x45   : > { %584 = vmatpush.bf16.msra.mxu0 %v947_v21 }
  0x46   : > { %598 = vmatpush.bf16.msra.mxu1 %v955_v22 }
  0x47   : > { %612 = vmatpush.bf16.msra.mxu2 %v963_v23 }
  0x48   : > { %626 = vmatpush.bf16.msra.mxu3 %v971_v24 }
  0x49   : > { %585 = vmatpush.bf16.msra.mxu0 %v946_v25 }
  0x4a   : > { %599 = vmatpush.bf16.msra.mxu1 %v954_v26 }
  0x4b   : > { %613 = vmatpush.bf16.msra.mxu2 %v962_v27 }
  0x4c   : > { %627 = vmatpush.bf16.msra.mxu3 %v970_v28 }
  0x4d   : > { %586 = vmatpush.bf16.msra.mxu0 %v945_v29 }
  0x4e   : > { %600 = vmatpush.bf16.msra.mxu1 %v953_v30 }
  0x4f   : > { %614 = vmatpush.bf16.msra.mxu2 %v961_v31 }
  0x50   : > { %628 = vmatpush.bf16.msra.mxu3 %v969_v32 }
  0x51   : > { %587 = vmatpush.bf16.msra.mxu0 %v944_v33 }
  0x52   : > { %601 = vmatpush.bf16.msra.mxu1 %v952_v34 }
  0x53   : > { %615 = vmatpush.bf16.msra.mxu2 %v960_v35 }
  0x54   : > { %629 = vmatpush.bf16.msra.mxu3 %v968_v36  ;;  %588 = vmatmul.bf16.vlgmr.msra.gmra.mxu0 %v792_v45 }
  0x55   : > { %602 = vmatmul.bf16.vlgmr.msra.gmra.mxu1 %v796_v46 }
  0x56   : > { %616 = vmatmul.bf16.vlgmr.msra.gmra.mxu2 %v800_v47 }
  0x57   : > { %630 = vmatmul.bf16.vlgmr.msra.gmra.mxu3 %v804_v48 }
  0xd1   : > { %v589_v49 = vpop.f32.mrf.mxu0 }
  0xd2   : > { %v603_v50 = vpop.f32.mrf.mxu1 }
  0xd3   : > { %v604_v51 = vadd.f32 %v603_v50, %v589_v49 }
  0xd9   : > { %v617_v52 = vpop.f32.mrf.mxu2  ;;  %v591_v57 = vpop.f32.mrf.mxu0 }
  0xda   : > { %v631_v53 = vpop.f32.mrf.mxu3  ;;  %v618_v54 = vadd.f32 %v617_v52, %v604_v51  ;;  %v605_v58 = vpop.f32.mrf.mxu1 }
  0xdb   : > { %v606_v60 = vadd.f32 %v605_v58, %v591_v57 }
  0xdc   : > { %v632_v56 = vadd.f32 %v631_v53, %v618_v54 }
  0xde   : > { %v636_v59 = vadd.f32 %v632_v56, %v298_v55 }
  0xe0   : > { %638 = vst [vmem:[#allocation2] sm:$0xff] %v636_v59 }
  0xe1   : > { %v619_v61 = vpop.f32.mrf.mxu2 }
  0xe2   : > { %v620_v62 = vadd.f32 %v619_v61, %v606_v60  ;;  %v633_v0 = vpop.f32.mrf.mxu3 }
  0xe4   : > { %v634_v1 = vadd.f32 %v633_v0, %v620_v62  ;;  %643 = sbr.rel (%p933_p13) target bundleno = 243 (0xf3), region = 67 }
  0xe6   : > { %v637_v2 = vadd.f32 %v634_v1, %v299_v63 }
  0xe8   : > { %639 = vst [vmem:[#allocation2 + $0x8] sm:$0xff] %v637_v2 }
  0xe9   : > { %v644_v3 = vld [vmem:[#allocation2] sm:$0xff] }
  0xea   : > { %v1029_v4 = vld [vmem:[%s1280_s2] ss:$0 sm:$0xff] }
  0xeb   : > { %v650_v6 = vadd.f32 %v1029_v4, %v644_v3 }
  0xed   : > { %652 = vst [vmem:[%s1281_s3] sm:$0xff] %v650_v6 }
  0xef   : > { %v645_v5 = vld [vmem:[#allocation2 + $0x8] sm:$0xff] }
  0xf0   : > { %v651_v7 = vadd.f32 %v1029_v4, %v645_v5 }
  0xf2   : > { %653 = vst [vmem:[%s1281_s3 + $0x8] sm:$0xff] %v651_v7 }
  0xf3 PF: > { %s16_s17 = sadd.s32 1, %s1108_s17   ;;  %s1284_s12 = smov %s1092_s13 }
  0xf4   : > { %p13_p0 = scmp.ge.s32.totalorder %s16_s17, 10   ;;  %s1285_s13 = smov %s1096_s14 }
  0xf5   : > { %s1286_s14 = smov %s1181_s24  ;;  %s1287_s15 = smov %s1104_s16 }
  0xf6   : > { %s1288_s16 = smov %s1290_s19  ;;  %15 = sbr.rel (!%p13_p0) target bundleno = 4 (0x4), region = 114 }
  0xfb   :  { %682 = vsyncpa [#allocation5], 1 }
  0xfc   :  { %684 = vsyncpa [#allocation5 + $0x1], 1 }

</bundles_post_ra>
